<compile_context>
chip_gen: v5e
topology: v5e:2x2
jax: 0.10.0
libtpu: 0.0.40
codegen_flags: <defaults>
</compile_context>

<pallas_src>
import jax
import jax.numpy as jnp
from jax.experimental import pallas as pl
from jax.experimental.pallas import tpu as pltpu
import numpy as np

# Small, TPU-friendly stand-ins for the module defaults (2500/300/300/2500).
INPUT_DIM = 128
HIDDEN1 = 128
HIDDEN2 = 128
OUTPUT_DIM = 128          # module semantics require output_dim == input_dim
BATCH = 2
SEQ = 8
DX = (1.0 - 0.0) / 100.0  # dx = (b - a) / Nx from train.py (a=0, b=1, Nx=100)


def _gates(z, c, H):
    """PyTorch LSTM gate order (i, f, g, o) -> (h_new, c_new).  f32 math."""
    i = jax.nn.sigmoid(z[:, 0 * H:1 * H])
    f = jax.nn.sigmoid(z[:, 1 * H:2 * H])
    g = jnp.tanh(z[:, 2 * H:3 * H])
    o = jax.nn.sigmoid(z[:, 3 * H:4 * H])
    c_new = f * c + i * g
    return o * jnp.tanh(c_new), c_new


def _bf16(v):
    return v.astype(jnp.bfloat16)


def lstm_poly_kernel(x_ref,
                     wih1_ref, whh1_ref, b1_ref,
                     wih2_ref, whh2_ref, b2_ref,
                     wih3_ref, whh3_ref, b3_ref,
                     wfc_ref, bfc_ref,
                     out_ref):
    # x_ref: (T*Bp, D) f32, time-major, rows [t*Bp:(t+1)*Bp] = timestep t.
    # All weight refs are bf16; all bias refs are f32.
    Bp = out_ref.shape[0]
    T = x_ref.shape[0] // Bp
    H1 = whh1_ref.shape[0]
    H2 = whh2_ref.shape[0]

    x2d = x_ref[...]                                           # f32 (T*Bp, D)

    # Hoisted input-only reduction for the CustomActivation penalty term:
    # depends only on x, so compute it before the recurrence (overlaps MXU).
    inputini = x2d[0:Bp, :]                                    # x[:, 0, :]
    inputini_sum = jnp.sum(inputini, axis=1, keepdims=True) * DX   # (Bp, 1)

    # Hoisted layer-1 input projection + bias: one large-M bf16 matmul,
    # f32 accumulation.
    z1x = jnp.dot(_bf16(x2d), wih1_ref[...],
                  preferred_element_type=jnp.float32) + b1_ref[...]   # (T*Bp, 4H1)

    whh1 = whh1_ref[...]
    wih2 = wih2_ref[...]
    whh2 = whh2_ref[...]
    wih3 = wih3_ref[...]
    whh3 = whh3_ref[...]
    # Hoisted bias broadcasts (broadcast_in_dim is not CSE'd per-iteration).
    b2b = jnp.broadcast_to(b2_ref[...], (Bp, 4 * H2))
    b3b = jnp.broadcast_to(b3_ref[...], (Bp, 4 * H2))

    h1 = c1 = jnp.zeros((Bp, H1), jnp.float32)
    h2 = c2 = jnp.zeros((Bp, H2), jnp.float32)
    h3 = c3 = jnp.zeros((Bp, H2), jnp.float32)

    # 3-stage layer wavefront, fully unrolled (T is static and small).
    # Macro-step s: layer1 processes timestep s, layer2 timestep s-1,
    # layer3 timestep s-2 -- the three cell updates are independent.
    for s in range(T + 2):
        h1_in, h2_in = h1, h2     # previous macro-step outputs for downstream layers
        if s < T:
            z1 = z1x[s * Bp:(s + 1) * Bp, :] + jnp.dot(
                _bf16(h1), whh1, preferred_element_type=jnp.float32)
            h1, c1 = _gates(z1, c1, H1)
        if 1 <= s <= T:
            # Two dots instead of concat + stacked weight (no per-step VMEM slab).
            z2 = (jnp.dot(_bf16(h1_in), wih2, preferred_element_type=jnp.float32)
                  + jnp.dot(_bf16(h2), whh2, preferred_element_type=jnp.float32)
                  + b2b)
            h2, c2 = _gates(z2, c2, H2)
        if 2 <= s <= T + 1:
            z3 = (jnp.dot(_bf16(h2_in), wih3, preferred_element_type=jnp.float32)
                  + jnp.dot(_bf16(h3), whh3, preferred_element_type=jnp.float32)
                  + b3b)
            h3, c3 = _gates(z3, c3, H2)

    # fc on the last timestep's hidden state: (Bp, H2) @ (H2, D_out) + bias.
    out = jnp.dot(_bf16(h3), wfc_ref[...],
                  preferred_element_type=jnp.float32) + bfc_ref[...]

    # polynomial_fit_and_correct: per-feature degree-1 least-squares fit of
    # x[:, -3:, :] at sample points [3, 4, 5], evaluated at 6.  Closed form:
    #   polyval(6) = (y3 + y4 + y5)/3 + (y5 - y3)      (f32, on raw x)
    y3 = x2d[(T - 3) * Bp:(T - 2) * Bp, :]
    y4 = x2d[(T - 2) * Bp:(T - 1) * Bp, :]
    y5 = x2d[(T - 1) * Bp:T * Bp, :]
    poly_bias = (y3 + y4 + y5) * (1.0 / 3.0) + (y5 - y3)

    out_b = out + poly_bias

    # CustomActivation(x, out_with_bias, dx).  Exact reciprocal: w_b_sum can be
    # near zero, which amplifies approx-reciprocal error; epilogue is off the
    # hot path anyway.
    w_b = 1.0 - out_b * out_b
    w_b_sum = jnp.sum(w_b, axis=1, keepdims=True) * DX                 # (Bp, 1)
    penalty = inputini_sum - jnp.sum(out_b, axis=1, keepdims=True) * DX
    out_ref[...] = out_b + w_b * (penalty / w_b_sum)


def lstm_model_forward(x_btd, params):
    """x_btd: (B, T, D) float32, batch-first (PyTorch convention)."""
    (wih1, whh1, b1, wih2, whh2, b2, wih3, whh3, b3, wfc, bfc) = params
    B, T, D = x_btd.shape
    H1 = whh1.shape[0]
    H2 = whh2.shape[0]

    # Pad batch to a multiple of 8 sublanes (full f32 vreg occupancy).  Padding
    # replicates the last real row (NOT zeros: zero rows would hit a near-zero
    # denominator in the epilogue; padded rows are sliced off regardless).
    Bp = ((B + 7) // 8) * 8
    if Bp != B:
        pad = jnp.broadcast_to(x_btd[-1:], (Bp - B, T, D))
        x_btd = jnp.concatenate([x_btd, pad], axis=0)

    # Time-major and flattened: rows [t*Bp:(t+1)*Bp] = timestep t.
    x_flat = jnp.transpose(x_btd, (1, 0, 2)).reshape(T * Bp, D)

    # bf16 weights (MXU-native operands, halved VMEM/DMA); biases stay f32.
    to_bf = lambda w: w.astype(jnp.bfloat16)
    args = (x_flat,
            to_bf(wih1), to_bf(whh1), b1,
            to_bf(wih2), to_bf(whh2), b2,
            to_bf(wih3), to_bf(whh3), b3,
            to_bf(wfc), bfc)

    # Advisory cost estimate for XLA's scheduler.
    flops = (2 * T * Bp * D * 4 * H1                       # hoisted x @ wih1
             + T * 2 * Bp * H1 * 4 * H1                    # layer-1 recurrent
             + T * 2 * Bp * (H1 + H2) * 4 * H2             # layer-2 (two dots)
             + T * 2 * Bp * (H2 + H2) * 4 * H2             # layer-3 (two dots)
             + 2 * Bp * H2 * OUTPUT_DIM)                   # fc
    transcendentals = T * Bp * (5 * H1 + 5 * H2 + 5 * H2)  # 3 sigmoid + 2 tanh / cell
    bytes_accessed = sum(int(np.prod(a.shape)) * a.dtype.itemsize for a in args) \
        + Bp * OUTPUT_DIM * 4

    vmem = pl.BlockSpec(memory_space=pltpu.MemorySpace.VMEM)
    out_p = pl.pallas_call(
        lstm_poly_kernel,
        out_shape=jax.ShapeDtypeStruct((Bp, OUTPUT_DIM), jnp.float32),
        in_specs=[vmem] * len(args),
        out_specs=vmem,
        cost_estimate=pl.CostEstimate(flops=flops,
                                      transcendentals=transcendentals,
                                      bytes_accessed=bytes_accessed),
        compiler_params=pltpu.CompilerParams(vmem_limit_bytes=32 * 1024 * 1024),
    )(*args)
    return out_p[:B]


def init_params(key):
    """Deterministic params mirroring PyTorch default init (uniform(-k, k))."""
    def u(key, shape, k):
        return jax.random.uniform(key, shape, jnp.float32, -k, k)

    keys = jax.random.split(key, 16)
    params = []
    layer_dims = [(INPUT_DIM, HIDDEN1), (HIDDEN1, HIDDEN2), (HIDDEN2, HIDDEN2)]
    ki = 0
    for d_in, h in layer_dims:
        k = 1.0 / np.sqrt(h)
        w_ih = u(keys[ki], (d_in, 4 * h), k); ki += 1      # (in, 4H)
        w_hh = u(keys[ki], (h, 4 * h), k); ki += 1         # (H, 4H)
        b_ih = u(keys[ki], (1, 4 * h), k); ki += 1
        b_hh = u(keys[ki], (1, 4 * h), k); ki += 1
        params += [w_ih, w_hh, b_ih + b_hh]                # PyTorch adds both biases
    k = 1.0 / np.sqrt(HIDDEN2)
    w_fc = u(keys[ki], (HIDDEN2, OUTPUT_DIM), k); ki += 1  # (H, D_out)
    b_fc = u(keys[ki], (1, OUTPUT_DIM), k); ki += 1
    params += [w_fc, b_fc]
    return tuple(params)


def reference_forward(x_btd, params):
    """Plain-JAX reference (layer-by-layer, sequential in time) for validation.

    Mirrors the kernel's precision policy (bf16 matmul operands, f32
    accumulation, f32 gate/state math) so the comparison isolates kernel
    implementation errors rather than bf16 rounding.
    """
    (wih1, whh1, b1, wih2, whh2, b2, wih3, whh3, b3, wfc, bfc) = params
    B, T, D = x_btd.shape

    def mm(a, w):
        return jnp.dot(a.astype(jnp.bfloat16), w.astype(jnp.bfloat16),
                       preferred_element_type=jnp.float32)

    def cell(xt, h, c, w_ih, w_hh, b, H):
        z = mm(xt, w_ih) + mm(h, w_hh) + b
        return _gates(z, c, H)

    def run(seq, wih, whh, b, H):
        h = jnp.zeros((B, H), jnp.float32)
        c = jnp.zeros((B, H), jnp.float32)
        outs = []
        for t in range(T):
            h, c = cell(seq[:, t, :], h, c, wih, whh, b, H)
            outs.append(h)
        return jnp.stack(outs, axis=1)

    o1 = run(x_btd, wih1, whh1, b1, HIDDEN1)
    o2 = run(o1, wih2, whh2, b2, HIDDEN2)
    o3 = run(o2, wih3, whh3, b3, HIDDEN2)
    out = mm(o3[:, -1, :], wfc) + bfc

    y3, y4, y5 = x_btd[:, -3, :], x_btd[:, -2, :], x_btd[:, -1, :]
    poly_bias = (y3 + y4 + y5) / 3.0 + (y5 - y3)
    out_b = out + poly_bias

    inputini = x_btd[:, 0, :]
    w_b = 1.0 - out_b ** 2
    w_b_sum = jnp.sum(w_b, axis=1, keepdims=True) * DX
    penalty = jnp.sum(inputini - out_b, axis=1, keepdims=True) * DX
    return out_b + w_b / w_b_sum * penalty


if __name__ == "__main__":
    key = jax.random.PRNGKey(0)
    k_x, k_p = jax.random.split(key)
    x = jax.random.normal(k_x, (BATCH, SEQ, INPUT_DIM), jnp.float32)
    params = init_params(k_p)

    out = jax.block_until_ready(lstm_model_forward(x, params))
    ref = jax.block_until_ready(reference_forward(x, params))

    assert out.shape == (BATCH, OUTPUT_DIM)
    np.testing.assert_allclose(np.asarray(out), np.asarray(ref),
                               rtol=5e-3, atol=5e-3)
    print("KERNEL_OK")
</pallas_src>

<mosaic_0001>
module attributes {stable_mosaic.version = 11 : i64} {
  func.func @lstm_poly_kernel(%arg0: memref<64x128xf32, #tpu.memory_space<vmem>>, %arg1: memref<128x512xbf16, #tpu.memory_space<vmem>>, %arg2: memref<128x512xbf16, #tpu.memory_space<vmem>>, %arg3: memref<1x512xf32, #tpu.memory_space<vmem>>, %arg4: memref<128x512xbf16, #tpu.memory_space<vmem>>, %arg5: memref<128x512xbf16, #tpu.memory_space<vmem>>, %arg6: memref<1x512xf32, #tpu.memory_space<vmem>>, %arg7: memref<128x512xbf16, #tpu.memory_space<vmem>>, %arg8: memref<128x512xbf16, #tpu.memory_space<vmem>>, %arg9: memref<1x512xf32, #tpu.memory_space<vmem>>, %arg10: memref<128x128xbf16, #tpu.memory_space<vmem>>, %arg11: memref<1x128xf32, #tpu.memory_space<vmem>>, %arg12: memref<8x128xf32, #tpu.memory_space<vmem>>) attributes {dimension_semantics = [], scalar_prefetch = 0 : i64, scratch_operands = 0 : i64, tpu.core_type = #tpu.core_type<tc>} {
    %c0 = arith.constant 0 : index
    %c0_0 = arith.constant 0 : index
    %0 = vector.load %arg0[%c0, %c0_0] : memref<64x128xf32, #tpu.memory_space<vmem>>, vector<64x128xf32>
    %1 = vector.extract_strided_slice %0 {offsets = [0, 0], sizes = [8, 128], strides = [1, 1]} : vector<64x128xf32> to vector<8x128xf32>
    %cst = arith.constant dense<0.000000e+00> : vector<8xf32>
    %2 = vector.multi_reduction <add>, %1, %cst [1] : vector<8x128xf32> to vector<8xf32>
    %3 = vector.shape_cast %2 : vector<8xf32> to vector<8x1xf32>
    %cst_1 = arith.constant 0.00999999977 : f32
    %4 = vector.broadcast %cst_1 : f32 to vector<8x1xf32>
    %5 = arith.mulf %3, %4 : vector<8x1xf32>
    %6 = arith.truncf %0 : vector<64x128xf32> to vector<64x128xbf16>
    %c0_2 = arith.constant 0 : index
    %c0_3 = arith.constant 0 : index
    %7 = vector.load %arg1[%c0_2, %c0_3] : memref<128x512xbf16, #tpu.memory_space<vmem>>, vector<128x512xbf16>
    %cst_4 = arith.constant dense<0.000000e+00> : vector<64x512xf32>
    %8 = tpu.matmul %6, %7, %cst_4 {dimension_numbers = #tpu.dot_dimension_numbers<[1], [0], [0], [1], [0, 0, 1, 1], [], []>} : vector<64x128xbf16>, vector<128x512xbf16>, vector<64x512xf32> -> vector<64x512xf32>
    %c0_5 = arith.constant 0 : index
    %c0_6 = arith.constant 0 : index
    %9 = vector.load %arg3[%c0_5, %c0_6] : memref<1x512xf32, #tpu.memory_space<vmem>>, vector<1x512xf32>
    %10 = vector.broadcast %9 : vector<1x512xf32> to vector<64x512xf32>
    %11 = arith.addf %8, %10 : vector<64x512xf32>
    %c0_7 = arith.constant 0 : index
    %c0_8 = arith.constant 0 : index
    %12 = vector.load %arg2[%c0_7, %c0_8] : memref<128x512xbf16, #tpu.memory_space<vmem>>, vector<128x512xbf16>
    %c0_9 = arith.constant 0 : index
    %c0_10 = arith.constant 0 : index
    %13 = vector.load %arg4[%c0_9, %c0_10] : memref<128x512xbf16, #tpu.memory_space<vmem>>, vector<128x512xbf16>
    %c0_11 = arith.constant 0 : index
    %c0_12 = arith.constant 0 : index
    %14 = vector.load %arg5[%c0_11, %c0_12] : memref<128x512xbf16, #tpu.memory_space<vmem>>, vector<128x512xbf16>
    %c0_13 = arith.constant 0 : index
    %c0_14 = arith.constant 0 : index
    %15 = vector.load %arg7[%c0_13, %c0_14] : memref<128x512xbf16, #tpu.memory_space<vmem>>, vector<128x512xbf16>
    %c0_15 = arith.constant 0 : index
    %c0_16 = arith.constant 0 : index
    %16 = vector.load %arg8[%c0_15, %c0_16] : memref<128x512xbf16, #tpu.memory_space<vmem>>, vector<128x512xbf16>
    %c0_17 = arith.constant 0 : index
    %c0_18 = arith.constant 0 : index
    %17 = vector.load %arg6[%c0_17, %c0_18] : memref<1x512xf32, #tpu.memory_space<vmem>>, vector<1x512xf32>
    %18 = vector.shape_cast %17 : vector<1x512xf32> to vector<1x512xf32>
    %19 = vector.broadcast %18 : vector<1x512xf32> to vector<8x512xf32>
    %c0_19 = arith.constant 0 : index
    %c0_20 = arith.constant 0 : index
    %20 = vector.load %arg9[%c0_19, %c0_20] : memref<1x512xf32, #tpu.memory_space<vmem>>, vector<1x512xf32>
    %21 = vector.shape_cast %20 : vector<1x512xf32> to vector<1x512xf32>
    %22 = vector.broadcast %21 : vector<1x512xf32> to vector<8x512xf32>
    %cst_21 = arith.constant 0.000000e+00 : f32
    %23 = vector.broadcast %cst_21 : f32 to vector<8x128xf32>
    %cst_22 = arith.constant 0.000000e+00 : f32
    %24 = vector.broadcast %cst_22 : f32 to vector<8x128xf32>
    %cst_23 = arith.constant 0.000000e+00 : f32
    %25 = vector.broadcast %cst_23 : f32 to vector<8x128xf32>
    %26 = vector.extract_strided_slice %11 {offsets = [0, 0], sizes = [8, 512], strides = [1, 1]} : vector<64x512xf32> to vector<8x512xf32>
    %27 = arith.truncf %23 : vector<8x128xf32> to vector<8x128xbf16>
    %cst_24 = arith.constant dense<0.000000e+00> : vector<8x512xf32>
    %28 = tpu.matmul %27, %12, %cst_24 {dimension_numbers = #tpu.dot_dimension_numbers<[1], [0], [0], [1], [0, 0, 1, 1], [], []>} : vector<8x128xbf16>, vector<128x512xbf16>, vector<8x512xf32> -> vector<8x512xf32>
    %29 = arith.addf %26, %28 : vector<8x512xf32>
    %30 = vector.extract_strided_slice %29 {offsets = [0, 0], sizes = [8, 128], strides = [1, 1]} : vector<8x512xf32> to vector<8x128xf32>
    %31 = arith.negf %30 : vector<8x128xf32>
    %32 = math.exp %31 : vector<8x128xf32>
    %cst_25 = arith.constant 1.000000e+00 : f32
    %33 = vector.broadcast %cst_25 : f32 to vector<8x128xf32>
    %34 = arith.addf %33, %32 : vector<8x128xf32>
    %35 = arith.divf %33, %34 : vector<8x128xf32>
    %36 = vector.extract_strided_slice %29 {offsets = [0, 128], sizes = [8, 128], strides = [1, 1]} : vector<8x512xf32> to vector<8x128xf32>
    %37 = arith.negf %36 : vector<8x128xf32>
    %38 = math.exp %37 : vector<8x128xf32>
    %cst_26 = arith.constant 1.000000e+00 : f32
    %39 = vector.broadcast %cst_26 : f32 to vector<8x128xf32>
    %40 = arith.addf %39, %38 : vector<8x128xf32>
    %41 = arith.divf %39, %40 : vector<8x128xf32>
    %42 = vector.extract_strided_slice %29 {offsets = [0, 256], sizes = [8, 128], strides = [1, 1]} : vector<8x512xf32> to vector<8x128xf32>
    %43 = math.tanh %42 : vector<8x128xf32>
    %44 = vector.extract_strided_slice %29 {offsets = [0, 384], sizes = [8, 128], strides = [1, 1]} : vector<8x512xf32> to vector<8x128xf32>
    %45 = arith.negf %44 : vector<8x128xf32>
    %46 = math.exp %45 : vector<8x128xf32>
    %cst_27 = arith.constant 1.000000e+00 : f32
    %47 = vector.broadcast %cst_27 : f32 to vector<8x128xf32>
    %48 = arith.addf %47, %46 : vector<8x128xf32>
    %49 = arith.divf %47, %48 : vector<8x128xf32>
    %50 = arith.mulf %41, %23 : vector<8x128xf32>
    %51 = arith.mulf %35, %43 : vector<8x128xf32>
    %52 = arith.addf %50, %51 : vector<8x128xf32>
    %53 = math.tanh %52 : vector<8x128xf32>
    %54 = arith.mulf %49, %53 : vector<8x128xf32>
    %55 = vector.extract_strided_slice %11 {offsets = [8, 0], sizes = [8, 512], strides = [1, 1]} : vector<64x512xf32> to vector<8x512xf32>
    %56 = arith.truncf %54 : vector<8x128xf32> to vector<8x128xbf16>
    %cst_28 = arith.constant dense<0.000000e+00> : vector<8x512xf32>
    %57 = tpu.matmul %56, %12, %cst_28 {dimension_numbers = #tpu.dot_dimension_numbers<[1], [0], [0], [1], [0, 0, 1, 1], [], []>} : vector<8x128xbf16>, vector<128x512xbf16>, vector<8x512xf32> -> vector<8x512xf32>
    %58 = arith.addf %55, %57 : vector<8x512xf32>
    %59 = vector.extract_strided_slice %58 {offsets = [0, 0], sizes = [8, 128], strides = [1, 1]} : vector<8x512xf32> to vector<8x128xf32>
    %60 = arith.negf %59 : vector<8x128xf32>
    %61 = math.exp %60 : vector<8x128xf32>
    %cst_29 = arith.constant 1.000000e+00 : f32
    %62 = vector.broadcast %cst_29 : f32 to vector<8x128xf32>
    %63 = arith.addf %62, %61 : vector<8x128xf32>
    %64 = arith.divf %62, %63 : vector<8x128xf32>
    %65 = vector.extract_strided_slice %58 {offsets = [0, 128], sizes = [8, 128], strides = [1, 1]} : vector<8x512xf32> to vector<8x128xf32>
    %66 = arith.negf %65 : vector<8x128xf32>
    %67 = math.exp %66 : vector<8x128xf32>
    %cst_30 = arith.constant 1.000000e+00 : f32
    %68 = vector.broadcast %cst_30 : f32 to vector<8x128xf32>
    %69 = arith.addf %68, %67 : vector<8x128xf32>
    %70 = arith.divf %68, %69 : vector<8x128xf32>
    %71 = vector.extract_strided_slice %58 {offsets = [0, 256], sizes = [8, 128], strides = [1, 1]} : vector<8x512xf32> to vector<8x128xf32>
    %72 = math.tanh %71 : vector<8x128xf32>
    %73 = vector.extract_strided_slice %58 {offsets = [0, 384], sizes = [8, 128], strides = [1, 1]} : vector<8x512xf32> to vector<8x128xf32>
    %74 = arith.negf %73 : vector<8x128xf32>
    %75 = math.exp %74 : vector<8x128xf32>
    %cst_31 = arith.constant 1.000000e+00 : f32
    %76 = vector.broadcast %cst_31 : f32 to vector<8x128xf32>
    %77 = arith.addf %76, %75 : vector<8x128xf32>
    %78 = arith.divf %76, %77 : vector<8x128xf32>
    %79 = arith.mulf %70, %52 : vector<8x128xf32>
    %80 = arith.mulf %64, %72 : vector<8x128xf32>
    %81 = arith.addf %79, %80 : vector<8x128xf32>
    %82 = math.tanh %81 : vector<8x128xf32>
    %83 = arith.mulf %78, %82 : vector<8x128xf32>
    %84 = arith.truncf %54 : vector<8x128xf32> to vector<8x128xbf16>
    %cst_32 = arith.constant dense<0.000000e+00> : vector<8x512xf32>
    %85 = tpu.matmul %84, %13, %cst_32 {dimension_numbers = #tpu.dot_dimension_numbers<[1], [0], [0], [1], [0, 0, 1, 1], [], []>} : vector<8x128xbf16>, vector<128x512xbf16>, vector<8x512xf32> -> vector<8x512xf32>
    %86 = arith.truncf %24 : vector<8x128xf32> to vector<8x128xbf16>
    %cst_33 = arith.constant dense<0.000000e+00> : vector<8x512xf32>
    %87 = tpu.matmul %86, %14, %cst_33 {dimension_numbers = #tpu.dot_dimension_numbers<[1], [0], [0], [1], [0, 0, 1, 1], [], []>} : vector<8x128xbf16>, vector<128x512xbf16>, vector<8x512xf32> -> vector<8x512xf32>
    %88 = arith.addf %85, %87 : vector<8x512xf32>
    %89 = arith.addf %88, %19 : vector<8x512xf32>
    %90 = vector.extract_strided_slice %89 {offsets = [0, 0], sizes = [8, 128], strides = [1, 1]} : vector<8x512xf32> to vector<8x128xf32>
    %91 = arith.negf %90 : vector<8x128xf32>
    %92 = math.exp %91 : vector<8x128xf32>
    %cst_34 = arith.constant 1.000000e+00 : f32
    %93 = vector.broadcast %cst_34 : f32 to vector<8x128xf32>
    %94 = arith.addf %93, %92 : vector<8x128xf32>
    %95 = arith.divf %93, %94 : vector<8x128xf32>
    %96 = vector.extract_strided_slice %89 {offsets = [0, 128], sizes = [8, 128], strides = [1, 1]} : vector<8x512xf32> to vector<8x128xf32>
    %97 = arith.negf %96 : vector<8x128xf32>
    %98 = math.exp %97 : vector<8x128xf32>
    %cst_35 = arith.constant 1.000000e+00 : f32
    %99 = vector.broadcast %cst_35 : f32 to vector<8x128xf32>
    %100 = arith.addf %99, %98 : vector<8x128xf32>
    %101 = arith.divf %99, %100 : vector<8x128xf32>
    %102 = vector.extract_strided_slice %89 {offsets = [0, 256], sizes = [8, 128], strides = [1, 1]} : vector<8x512xf32> to vector<8x128xf32>
    %103 = math.tanh %102 : vector<8x128xf32>
    %104 = vector.extract_strided_slice %89 {offsets = [0, 384], sizes = [8, 128], strides = [1, 1]} : vector<8x512xf32> to vector<8x128xf32>
    %105 = arith.negf %104 : vector<8x128xf32>
    %106 = math.exp %105 : vector<8x128xf32>
    %cst_36 = arith.constant 1.000000e+00 : f32
    %107 = vector.broadcast %cst_36 : f32 to vector<8x128xf32>
    %108 = arith.addf %107, %106 : vector<8x128xf32>
    %109 = arith.divf %107, %108 : vector<8x128xf32>
    %110 = arith.mulf %101, %24 : vector<8x128xf32>
    %111 = arith.mulf %95, %103 : vector<8x128xf32>
    %112 = arith.addf %110, %111 : vector<8x128xf32>
    %113 = math.tanh %112 : vector<8x128xf32>
    %114 = arith.mulf %109, %113 : vector<8x128xf32>
    %115 = vector.extract_strided_slice %11 {offsets = [16, 0], sizes = [8, 512], strides = [1, 1]} : vector<64x512xf32> to vector<8x512xf32>
    %116 = arith.truncf %83 : vector<8x128xf32> to vector<8x128xbf16>
    %cst_37 = arith.constant dense<0.000000e+00> : vector<8x512xf32>
    %117 = tpu.matmul %116, %12, %cst_37 {dimension_numbers = #tpu.dot_dimension_numbers<[1], [0], [0], [1], [0, 0, 1, 1], [], []>} : vector<8x128xbf16>, vector<128x512xbf16>, vector<8x512xf32> -> vector<8x512xf32>
    %118 = arith.addf %115, %117 : vector<8x512xf32>
    %119 = vector.extract_strided_slice %118 {offsets = [0, 0], sizes = [8, 128], strides = [1, 1]} : vector<8x512xf32> to vector<8x128xf32>
    %120 = arith.negf %119 : vector<8x128xf32>
    %121 = math.exp %120 : vector<8x128xf32>
    %cst_38 = arith.constant 1.000000e+00 : f32
    %122 = vector.broadcast %cst_38 : f32 to vector<8x128xf32>
    %123 = arith.addf %122, %121 : vector<8x128xf32>
    %124 = arith.divf %122, %123 : vector<8x128xf32>
    %125 = vector.extract_strided_slice %118 {offsets = [0, 128], sizes = [8, 128], strides = [1, 1]} : vector<8x512xf32> to vector<8x128xf32>
    %126 = arith.negf %125 : vector<8x128xf32>
    %127 = math.exp %126 : vector<8x128xf32>
    %cst_39 = arith.constant 1.000000e+00 : f32
    %128 = vector.broadcast %cst_39 : f32 to vector<8x128xf32>
    %129 = arith.addf %128, %127 : vector<8x128xf32>
    %130 = arith.divf %128, %129 : vector<8x128xf32>
    %131 = vector.extract_strided_slice %118 {offsets = [0, 256], sizes = [8, 128], strides = [1, 1]} : vector<8x512xf32> to vector<8x128xf32>
    %132 = math.tanh %131 : vector<8x128xf32>
    %133 = vector.extract_strided_slice %118 {offsets = [0, 384], sizes = [8, 128], strides = [1, 1]} : vector<8x512xf32> to vector<8x128xf32>
    %134 = arith.negf %133 : vector<8x128xf32>
    %135 = math.exp %134 : vector<8x128xf32>
    %cst_40 = arith.constant 1.000000e+00 : f32
    %136 = vector.broadcast %cst_40 : f32 to vector<8x128xf32>
    %137 = arith.addf %136, %135 : vector<8x128xf32>
    %138 = arith.divf %136, %137 : vector<8x128xf32>
    %139 = arith.mulf %130, %81 : vector<8x128xf32>
    %140 = arith.mulf %124, %132 : vector<8x128xf32>
    %141 = arith.addf %139, %140 : vector<8x128xf32>
    %142 = math.tanh %141 : vector<8x128xf32>
    %143 = arith.mulf %138, %142 : vector<8x128xf32>
    %144 = arith.truncf %83 : vector<8x128xf32> to vector<8x128xbf16>
    %cst_41 = arith.constant dense<0.000000e+00> : vector<8x512xf32>
    %145 = tpu.matmul %144, %13, %cst_41 {dimension_numbers = #tpu.dot_dimension_numbers<[1], [0], [0], [1], [0, 0, 1, 1], [], []>} : vector<8x128xbf16>, vector<128x512xbf16>, vector<8x512xf32> -> vector<8x512xf32>
    %146 = arith.truncf %114 : vector<8x128xf32> to vector<8x128xbf16>
    %cst_42 = arith.constant dense<0.000000e+00> : vector<8x512xf32>
    %147 = tpu.matmul %146, %14, %cst_42 {dimension_numbers = #tpu.dot_dimension_numbers<[1], [0], [0], [1], [0, 0, 1, 1], [], []>} : vector<8x128xbf16>, vector<128x512xbf16>, vector<8x512xf32> -> vector<8x512xf32>
    %148 = arith.addf %145, %147 : vector<8x512xf32>
    %149 = arith.addf %148, %19 : vector<8x512xf32>
    %150 = vector.extract_strided_slice %149 {offsets = [0, 0], sizes = [8, 128], strides = [1, 1]} : vector<8x512xf32> to vector<8x128xf32>
    %151 = arith.negf %150 : vector<8x128xf32>
    %152 = math.exp %151 : vector<8x128xf32>
    %cst_43 = arith.constant 1.000000e+00 : f32
    %153 = vector.broadcast %cst_43 : f32 to vector<8x128xf32>
    %154 = arith.addf %153, %152 : vector<8x128xf32>
    %155 = arith.divf %153, %154 : vector<8x128xf32>
    %156 = vector.extract_strided_slice %149 {offsets = [0, 128], sizes = [8, 128], strides = [1, 1]} : vector<8x512xf32> to vector<8x128xf32>
    %157 = arith.negf %156 : vector<8x128xf32>
    %158 = math.exp %157 : vector<8x128xf32>
    %cst_44 = arith.constant 1.000000e+00 : f32
    %159 = vector.broadcast %cst_44 : f32 to vector<8x128xf32>
    %160 = arith.addf %159, %158 : vector<8x128xf32>
    %161 = arith.divf %159, %160 : vector<8x128xf32>
    %162 = vector.extract_strided_slice %149 {offsets = [0, 256], sizes = [8, 128], strides = [1, 1]} : vector<8x512xf32> to vector<8x128xf32>
    %163 = math.tanh %162 : vector<8x128xf32>
    %164 = vector.extract_strided_slice %149 {offsets = [0, 384], sizes = [8, 128], strides = [1, 1]} : vector<8x512xf32> to vector<8x128xf32>
    %165 = arith.negf %164 : vector<8x128xf32>
    %166 = math.exp %165 : vector<8x128xf32>
    %cst_45 = arith.constant 1.000000e+00 : f32
    %167 = vector.broadcast %cst_45 : f32 to vector<8x128xf32>
    %168 = arith.addf %167, %166 : vector<8x128xf32>
    %169 = arith.divf %167, %168 : vector<8x128xf32>
    %170 = arith.mulf %161, %112 : vector<8x128xf32>
    %171 = arith.mulf %155, %163 : vector<8x128xf32>
    %172 = arith.addf %170, %171 : vector<8x128xf32>
    %173 = math.tanh %172 : vector<8x128xf32>
    %174 = arith.mulf %169, %173 : vector<8x128xf32>
    %175 = arith.truncf %114 : vector<8x128xf32> to vector<8x128xbf16>
    %cst_46 = arith.constant dense<0.000000e+00> : vector<8x512xf32>
    %176 = tpu.matmul %175, %15, %cst_46 {dimension_numbers = #tpu.dot_dimension_numbers<[1], [0], [0], [1], [0, 0, 1, 1], [], []>} : vector<8x128xbf16>, vector<128x512xbf16>, vector<8x512xf32> -> vector<8x512xf32>
    %177 = arith.truncf %25 : vector<8x128xf32> to vector<8x128xbf16>
    %cst_47 = arith.constant dense<0.000000e+00> : vector<8x512xf32>
    %178 = tpu.matmul %177, %16, %cst_47 {dimension_numbers = #tpu.dot_dimension_numbers<[1], [0], [0], [1], [0, 0, 1, 1], [], []>} : vector<8x128xbf16>, vector<128x512xbf16>, vector<8x512xf32> -> vector<8x512xf32>
    %179 = arith.addf %176, %178 : vector<8x512xf32>
    %180 = arith.addf %179, %22 : vector<8x512xf32>
    %181 = vector.extract_strided_slice %180 {offsets = [0, 0], sizes = [8, 128], strides = [1, 1]} : vector<8x512xf32> to vector<8x128xf32>
    %182 = arith.negf %181 : vector<8x128xf32>
    %183 = math.exp %182 : vector<8x128xf32>
    %cst_48 = arith.constant 1.000000e+00 : f32
    %184 = vector.broadcast %cst_48 : f32 to vector<8x128xf32>
    %185 = arith.addf %184, %183 : vector<8x128xf32>
    %186 = arith.divf %184, %185 : vector<8x128xf32>
    %187 = vector.extract_strided_slice %180 {offsets = [0, 128], sizes = [8, 128], strides = [1, 1]} : vector<8x512xf32> to vector<8x128xf32>
    %188 = arith.negf %187 : vector<8x128xf32>
    %189 = math.exp %188 : vector<8x128xf32>
    %cst_49 = arith.constant 1.000000e+00 : f32
    %190 = vector.broadcast %cst_49 : f32 to vector<8x128xf32>
    %191 = arith.addf %190, %189 : vector<8x128xf32>
    %192 = arith.divf %190, %191 : vector<8x128xf32>
    %193 = vector.extract_strided_slice %180 {offsets = [0, 256], sizes = [8, 128], strides = [1, 1]} : vector<8x512xf32> to vector<8x128xf32>
    %194 = math.tanh %193 : vector<8x128xf32>
    %195 = vector.extract_strided_slice %180 {offsets = [0, 384], sizes = [8, 128], strides = [1, 1]} : vector<8x512xf32> to vector<8x128xf32>
    %196 = arith.negf %195 : vector<8x128xf32>
    %197 = math.exp %196 : vector<8x128xf32>
    %cst_50 = arith.constant 1.000000e+00 : f32
    %198 = vector.broadcast %cst_50 : f32 to vector<8x128xf32>
    %199 = arith.addf %198, %197 : vector<8x128xf32>
    %200 = arith.divf %198, %199 : vector<8x128xf32>
    %201 = arith.mulf %192, %25 : vector<8x128xf32>
    %202 = arith.mulf %186, %194 : vector<8x128xf32>
    %203 = arith.addf %201, %202 : vector<8x128xf32>
    %204 = math.tanh %203 : vector<8x128xf32>
    %205 = arith.mulf %200, %204 : vector<8x128xf32>
    %206 = vector.extract_strided_slice %11 {offsets = [24, 0], sizes = [8, 512], strides = [1, 1]} : vector<64x512xf32> to vector<8x512xf32>
    %207 = arith.truncf %143 : vector<8x128xf32> to vector<8x128xbf16>
    %cst_51 = arith.constant dense<0.000000e+00> : vector<8x512xf32>
    %208 = tpu.matmul %207, %12, %cst_51 {dimension_numbers = #tpu.dot_dimension_numbers<[1], [0], [0], [1], [0, 0, 1, 1], [], []>} : vector<8x128xbf16>, vector<128x512xbf16>, vector<8x512xf32> -> vector<8x512xf32>
    %209 = arith.addf %206, %208 : vector<8x512xf32>
    %210 = vector.extract_strided_slice %209 {offsets = [0, 0], sizes = [8, 128], strides = [1, 1]} : vector<8x512xf32> to vector<8x128xf32>
    %211 = arith.negf %210 : vector<8x128xf32>
    %212 = math.exp %211 : vector<8x128xf32>
    %cst_52 = arith.constant 1.000000e+00 : f32
    %213 = vector.broadcast %cst_52 : f32 to vector<8x128xf32>
    %214 = arith.addf %213, %212 : vector<8x128xf32>
    %215 = arith.divf %213, %214 : vector<8x128xf32>
    %216 = vector.extract_strided_slice %209 {offsets = [0, 128], sizes = [8, 128], strides = [1, 1]} : vector<8x512xf32> to vector<8x128xf32>
    %217 = arith.negf %216 : vector<8x128xf32>
    %218 = math.exp %217 : vector<8x128xf32>
    %cst_53 = arith.constant 1.000000e+00 : f32
    %219 = vector.broadcast %cst_53 : f32 to vector<8x128xf32>
    %220 = arith.addf %219, %218 : vector<8x128xf32>
    %221 = arith.divf %219, %220 : vector<8x128xf32>
    %222 = vector.extract_strided_slice %209 {offsets = [0, 256], sizes = [8, 128], strides = [1, 1]} : vector<8x512xf32> to vector<8x128xf32>
    %223 = math.tanh %222 : vector<8x128xf32>
    %224 = vector.extract_strided_slice %209 {offsets = [0, 384], sizes = [8, 128], strides = [1, 1]} : vector<8x512xf32> to vector<8x128xf32>
    %225 = arith.negf %224 : vector<8x128xf32>
    %226 = math.exp %225 : vector<8x128xf32>
    %cst_54 = arith.constant 1.000000e+00 : f32
    %227 = vector.broadcast %cst_54 : f32 to vector<8x128xf32>
    %228 = arith.addf %227, %226 : vector<8x128xf32>
    %229 = arith.divf %227, %228 : vector<8x128xf32>
    %230 = arith.mulf %221, %141 : vector<8x128xf32>
    %231 = arith.mulf %215, %223 : vector<8x128xf32>
    %232 = arith.addf %230, %231 : vector<8x128xf32>
    %233 = math.tanh %232 : vector<8x128xf32>
    %234 = arith.mulf %229, %233 : vector<8x128xf32>
    %235 = arith.truncf %143 : vector<8x128xf32> to vector<8x128xbf16>
    %cst_55 = arith.constant dense<0.000000e+00> : vector<8x512xf32>
    %236 = tpu.matmul %235, %13, %cst_55 {dimension_numbers = #tpu.dot_dimension_numbers<[1], [0], [0], [1], [0, 0, 1, 1], [], []>} : vector<8x128xbf16>, vector<128x512xbf16>, vector<8x512xf32> -> vector<8x512xf32>
    %237 = arith.truncf %174 : vector<8x128xf32> to vector<8x128xbf16>
    %cst_56 = arith.constant dense<0.000000e+00> : vector<8x512xf32>
    %238 = tpu.matmul %237, %14, %cst_56 {dimension_numbers = #tpu.dot_dimension_numbers<[1], [0], [0], [1], [0, 0, 1, 1], [], []>} : vector<8x128xbf16>, vector<128x512xbf16>, vector<8x512xf32> -> vector<8x512xf32>
    %239 = arith.addf %236, %238 : vector<8x512xf32>
    %240 = arith.addf %239, %19 : vector<8x512xf32>
    %241 = vector.extract_strided_slice %240 {offsets = [0, 0], sizes = [8, 128], strides = [1, 1]} : vector<8x512xf32> to vector<8x128xf32>
    %242 = arith.negf %241 : vector<8x128xf32>
    %243 = math.exp %242 : vector<8x128xf32>
    %cst_57 = arith.constant 1.000000e+00 : f32
    %244 = vector.broadcast %cst_57 : f32 to vector<8x128xf32>
    %245 = arith.addf %244, %243 : vector<8x128xf32>
    %246 = arith.divf %244, %245 : vector<8x128xf32>
    %247 = vector.extract_strided_slice %240 {offsets = [0, 128], sizes = [8, 128], strides = [1, 1]} : vector<8x512xf32> to vector<8x128xf32>
    %248 = arith.negf %247 : vector<8x128xf32>
    %249 = math.exp %248 : vector<8x128xf32>
    %cst_58 = arith.constant 1.000000e+00 : f32
    %250 = vector.broadcast %cst_58 : f32 to vector<8x128xf32>
    %251 = arith.addf %250, %249 : vector<8x128xf32>
    %252 = arith.divf %250, %251 : vector<8x128xf32>
    %253 = vector.extract_strided_slice %240 {offsets = [0, 256], sizes = [8, 128], strides = [1, 1]} : vector<8x512xf32> to vector<8x128xf32>
    %254 = math.tanh %253 : vector<8x128xf32>
    %255 = vector.extract_strided_slice %240 {offsets = [0, 384], sizes = [8, 128], strides = [1, 1]} : vector<8x512xf32> to vector<8x128xf32>
    %256 = arith.negf %255 : vector<8x128xf32>
    %257 = math.exp %256 : vector<8x128xf32>
    %cst_59 = arith.constant 1.000000e+00 : f32
    %258 = vector.broadcast %cst_59 : f32 to vector<8x128xf32>
    %259 = arith.addf %258, %257 : vector<8x128xf32>
    %260 = arith.divf %258, %259 : vector<8x128xf32>
    %261 = arith.mulf %252, %172 : vector<8x128xf32>
    %262 = arith.mulf %246, %254 : vector<8x128xf32>
    %263 = arith.addf %261, %262 : vector<8x128xf32>
    %264 = math.tanh %263 : vector<8x128xf32>
    %265 = arith.mulf %260, %264 : vector<8x128xf32>
    %266 = arith.truncf %174 : vector<8x128xf32> to vector<8x128xbf16>
    %cst_60 = arith.constant dense<0.000000e+00> : vector<8x512xf32>
    %267 = tpu.matmul %266, %15, %cst_60 {dimension_numbers = #tpu.dot_dimension_numbers<[1], [0], [0], [1], [0, 0, 1, 1], [], []>} : vector<8x128xbf16>, vector<128x512xbf16>, vector<8x512xf32> -> vector<8x512xf32>
    %268 = arith.truncf %205 : vector<8x128xf32> to vector<8x128xbf16>
    %cst_61 = arith.constant dense<0.000000e+00> : vector<8x512xf32>
    %269 = tpu.matmul %268, %16, %cst_61 {dimension_numbers = #tpu.dot_dimension_numbers<[1], [0], [0], [1], [0, 0, 1, 1], [], []>} : vector<8x128xbf16>, vector<128x512xbf16>, vector<8x512xf32> -> vector<8x512xf32>
    %270 = arith.addf %267, %269 : vector<8x512xf32>
    %271 = arith.addf %270, %22 : vector<8x512xf32>
    %272 = vector.extract_strided_slice %271 {offsets = [0, 0], sizes = [8, 128], strides = [1, 1]} : vector<8x512xf32> to vector<8x128xf32>
    %273 = arith.negf %272 : vector<8x128xf32>
    %274 = math.exp %273 : vector<8x128xf32>
    %cst_62 = arith.constant 1.000000e+00 : f32
    %275 = vector.broadcast %cst_62 : f32 to vector<8x128xf32>
    %276 = arith.addf %275, %274 : vector<8x128xf32>
    %277 = arith.divf %275, %276 : vector<8x128xf32>
    %278 = vector.extract_strided_slice %271 {offsets = [0, 128], sizes = [8, 128], strides = [1, 1]} : vector<8x512xf32> to vector<8x128xf32>
    %279 = arith.negf %278 : vector<8x128xf32>
    %280 = math.exp %279 : vector<8x128xf32>
    %cst_63 = arith.constant 1.000000e+00 : f32
    %281 = vector.broadcast %cst_63 : f32 to vector<8x128xf32>
    %282 = arith.addf %281, %280 : vector<8x128xf32>
    %283 = arith.divf %281, %282 : vector<8x128xf32>
    %284 = vector.extract_strided_slice %271 {offsets = [0, 256], sizes = [8, 128], strides = [1, 1]} : vector<8x512xf32> to vector<8x128xf32>
    %285 = math.tanh %284 : vector<8x128xf32>
    %286 = vector.extract_strided_slice %271 {offsets = [0, 384], sizes = [8, 128], strides = [1, 1]} : vector<8x512xf32> to vector<8x128xf32>
    %287 = arith.negf %286 : vector<8x128xf32>
    %288 = math.exp %287 : vector<8x128xf32>
    %cst_64 = arith.constant 1.000000e+00 : f32
    %289 = vector.broadcast %cst_64 : f32 to vector<8x128xf32>
    %290 = arith.addf %289, %288 : vector<8x128xf32>
    %291 = arith.divf %289, %290 : vector<8x128xf32>
    %292 = arith.mulf %283, %203 : vector<8x128xf32>
    %293 = arith.mulf %277, %285 : vector<8x128xf32>
    %294 = arith.addf %292, %293 : vector<8x128xf32>
    %295 = math.tanh %294 : vector<8x128xf32>
    %296 = arith.mulf %291, %295 : vector<8x128xf32>
    %297 = vector.extract_strided_slice %11 {offsets = [32, 0], sizes = [8, 512], strides = [1, 1]} : vector<64x512xf32> to vector<8x512xf32>
    %298 = arith.truncf %234 : vector<8x128xf32> to vector<8x128xbf16>
    %cst_65 = arith.constant dense<0.000000e+00> : vector<8x512xf32>
    %299 = tpu.matmul %298, %12, %cst_65 {dimension_numbers = #tpu.dot_dimension_numbers<[1], [0], [0], [1], [0, 0, 1, 1], [], []>} : vector<8x128xbf16>, vector<128x512xbf16>, vector<8x512xf32> -> vector<8x512xf32>
    %300 = arith.addf %297, %299 : vector<8x512xf32>
    %301 = vector.extract_strided_slice %300 {offsets = [0, 0], sizes = [8, 128], strides = [1, 1]} : vector<8x512xf32> to vector<8x128xf32>
    %302 = arith.negf %301 : vector<8x128xf32>
    %303 = math.exp %302 : vector<8x128xf32>
    %cst_66 = arith.constant 1.000000e+00 : f32
    %304 = vector.broadcast %cst_66 : f32 to vector<8x128xf32>
    %305 = arith.addf %304, %303 : vector<8x128xf32>
    %306 = arith.divf %304, %305 : vector<8x128xf32>
    %307 = vector.extract_strided_slice %300 {offsets = [0, 128], sizes = [8, 128], strides = [1, 1]} : vector<8x512xf32> to vector<8x128xf32>
    %308 = arith.negf %307 : vector<8x128xf32>
    %309 = math.exp %308 : vector<8x128xf32>
    %cst_67 = arith.constant 1.000000e+00 : f32
    %310 = vector.broadcast %cst_67 : f32 to vector<8x128xf32>
    %311 = arith.addf %310, %309 : vector<8x128xf32>
    %312 = arith.divf %310, %311 : vector<8x128xf32>
    %313 = vector.extract_strided_slice %300 {offsets = [0, 256], sizes = [8, 128], strides = [1, 1]} : vector<8x512xf32> to vector<8x128xf32>
    %314 = math.tanh %313 : vector<8x128xf32>
    %315 = vector.extract_strided_slice %300 {offsets = [0, 384], sizes = [8, 128], strides = [1, 1]} : vector<8x512xf32> to vector<8x128xf32>
    %316 = arith.negf %315 : vector<8x128xf32>
    %317 = math.exp %316 : vector<8x128xf32>
    %cst_68 = arith.constant 1.000000e+00 : f32
    %318 = vector.broadcast %cst_68 : f32 to vector<8x128xf32>
    %319 = arith.addf %318, %317 : vector<8x128xf32>
    %320 = arith.divf %318, %319 : vector<8x128xf32>
    %321 = arith.mulf %312, %232 : vector<8x128xf32>
    %322 = arith.mulf %306, %314 : vector<8x128xf32>
    %323 = arith.addf %321, %322 : vector<8x128xf32>
    %324 = math.tanh %323 : vector<8x128xf32>
    %325 = arith.mulf %320, %324 : vector<8x128xf32>
    %326 = arith.truncf %234 : vector<8x128xf32> to vector<8x128xbf16>
    %cst_69 = arith.constant dense<0.000000e+00> : vector<8x512xf32>
    %327 = tpu.matmul %326, %13, %cst_69 {dimension_numbers = #tpu.dot_dimension_numbers<[1], [0], [0], [1], [0, 0, 1, 1], [], []>} : vector<8x128xbf16>, vector<128x512xbf16>, vector<8x512xf32> -> vector<8x512xf32>
    %328 = arith.truncf %265 : vector<8x128xf32> to vector<8x128xbf16>
    %cst_70 = arith.constant dense<0.000000e+00> : vector<8x512xf32>
    %329 = tpu.matmul %328, %14, %cst_70 {dimension_numbers = #tpu.dot_dimension_numbers<[1], [0], [0], [1], [0, 0, 1, 1], [], []>} : vector<8x128xbf16>, vector<128x512xbf16>, vector<8x512xf32> -> vector<8x512xf32>
    %330 = arith.addf %327, %329 : vector<8x512xf32>
    %331 = arith.addf %330, %19 : vector<8x512xf32>
    %332 = vector.extract_strided_slice %331 {offsets = [0, 0], sizes = [8, 128], strides = [1, 1]} : vector<8x512xf32> to vector<8x128xf32>
    %333 = arith.negf %332 : vector<8x128xf32>
    %334 = math.exp %333 : vector<8x128xf32>
    %cst_71 = arith.constant 1.000000e+00 : f32
    %335 = vector.broadcast %cst_71 : f32 to vector<8x128xf32>
    %336 = arith.addf %335, %334 : vector<8x128xf32>
    %337 = arith.divf %335, %336 : vector<8x128xf32>
    %338 = vector.extract_strided_slice %331 {offsets = [0, 128], sizes = [8, 128], strides = [1, 1]} : vector<8x512xf32> to vector<8x128xf32>
    %339 = arith.negf %338 : vector<8x128xf32>
    %340 = math.exp %339 : vector<8x128xf32>
    %cst_72 = arith.constant 1.000000e+00 : f32
    %341 = vector.broadcast %cst_72 : f32 to vector<8x128xf32>
    %342 = arith.addf %341, %340 : vector<8x128xf32>
    %343 = arith.divf %341, %342 : vector<8x128xf32>
    %344 = vector.extract_strided_slice %331 {offsets = [0, 256], sizes = [8, 128], strides = [1, 1]} : vector<8x512xf32> to vector<8x128xf32>
    %345 = math.tanh %344 : vector<8x128xf32>
    %346 = vector.extract_strided_slice %331 {offsets = [0, 384], sizes = [8, 128], strides = [1, 1]} : vector<8x512xf32> to vector<8x128xf32>
    %347 = arith.negf %346 : vector<8x128xf32>
    %348 = math.exp %347 : vector<8x128xf32>
    %cst_73 = arith.constant 1.000000e+00 : f32
    %349 = vector.broadcast %cst_73 : f32 to vector<8x128xf32>
    %350 = arith.addf %349, %348 : vector<8x128xf32>
    %351 = arith.divf %349, %350 : vector<8x128xf32>
    %352 = arith.mulf %343, %263 : vector<8x128xf32>
    %353 = arith.mulf %337, %345 : vector<8x128xf32>
    %354 = arith.addf %352, %353 : vector<8x128xf32>
    %355 = math.tanh %354 : vector<8x128xf32>
    %356 = arith.mulf %351, %355 : vector<8x128xf32>
    %357 = arith.truncf %265 : vector<8x128xf32> to vector<8x128xbf16>
    %cst_74 = arith.constant dense<0.000000e+00> : vector<8x512xf32>
    %358 = tpu.matmul %357, %15, %cst_74 {dimension_numbers = #tpu.dot_dimension_numbers<[1], [0], [0], [1], [0, 0, 1, 1], [], []>} : vector<8x128xbf16>, vector<128x512xbf16>, vector<8x512xf32> -> vector<8x512xf32>
    %359 = arith.truncf %296 : vector<8x128xf32> to vector<8x128xbf16>
    %cst_75 = arith.constant dense<0.000000e+00> : vector<8x512xf32>
    %360 = tpu.matmul %359, %16, %cst_75 {dimension_numbers = #tpu.dot_dimension_numbers<[1], [0], [0], [1], [0, 0, 1, 1], [], []>} : vector<8x128xbf16>, vector<128x512xbf16>, vector<8x512xf32> -> vector<8x512xf32>
    %361 = arith.addf %358, %360 : vector<8x512xf32>
    %362 = arith.addf %361, %22 : vector<8x512xf32>
    %363 = vector.extract_strided_slice %362 {offsets = [0, 0], sizes = [8, 128], strides = [1, 1]} : vector<8x512xf32> to vector<8x128xf32>
    %364 = arith.negf %363 : vector<8x128xf32>
    %365 = math.exp %364 : vector<8x128xf32>
    %cst_76 = arith.constant 1.000000e+00 : f32
    %366 = vector.broadcast %cst_76 : f32 to vector<8x128xf32>
    %367 = arith.addf %366, %365 : vector<8x128xf32>
    %368 = arith.divf %366, %367 : vector<8x128xf32>
    %369 = vector.extract_strided_slice %362 {offsets = [0, 128], sizes = [8, 128], strides = [1, 1]} : vector<8x512xf32> to vector<8x128xf32>
    %370 = arith.negf %369 : vector<8x128xf32>
    %371 = math.exp %370 : vector<8x128xf32>
    %cst_77 = arith.constant 1.000000e+00 : f32
    %372 = vector.broadcast %cst_77 : f32 to vector<8x128xf32>
    %373 = arith.addf %372, %371 : vector<8x128xf32>
    %374 = arith.divf %372, %373 : vector<8x128xf32>
    %375 = vector.extract_strided_slice %362 {offsets = [0, 256], sizes = [8, 128], strides = [1, 1]} : vector<8x512xf32> to vector<8x128xf32>
    %376 = math.tanh %375 : vector<8x128xf32>
    %377 = vector.extract_strided_slice %362 {offsets = [0, 384], sizes = [8, 128], strides = [1, 1]} : vector<8x512xf32> to vector<8x128xf32>
    %378 = arith.negf %377 : vector<8x128xf32>
    %379 = math.exp %378 : vector<8x128xf32>
    %cst_78 = arith.constant 1.000000e+00 : f32
    %380 = vector.broadcast %cst_78 : f32 to vector<8x128xf32>
    %381 = arith.addf %380, %379 : vector<8x128xf32>
    %382 = arith.divf %380, %381 : vector<8x128xf32>
    %383 = arith.mulf %374, %294 : vector<8x128xf32>
    %384 = arith.mulf %368, %376 : vector<8x128xf32>
    %385 = arith.addf %383, %384 : vector<8x128xf32>
    %386 = math.tanh %385 : vector<8x128xf32>
    %387 = arith.mulf %382, %386 : vector<8x128xf32>
    %388 = vector.extract_strided_slice %11 {offsets = [40, 0], sizes = [8, 512], strides = [1, 1]} : vector<64x512xf32> to vector<8x512xf32>
    %389 = arith.truncf %325 : vector<8x128xf32> to vector<8x128xbf16>
    %cst_79 = arith.constant dense<0.000000e+00> : vector<8x512xf32>
    %390 = tpu.matmul %389, %12, %cst_79 {dimension_numbers = #tpu.dot_dimension_numbers<[1], [0], [0], [1], [0, 0, 1, 1], [], []>} : vector<8x128xbf16>, vector<128x512xbf16>, vector<8x512xf32> -> vector<8x512xf32>
    %391 = arith.addf %388, %390 : vector<8x512xf32>
    %392 = vector.extract_strided_slice %391 {offsets = [0, 0], sizes = [8, 128], strides = [1, 1]} : vector<8x512xf32> to vector<8x128xf32>
    %393 = arith.negf %392 : vector<8x128xf32>
    %394 = math.exp %393 : vector<8x128xf32>
    %cst_80 = arith.constant 1.000000e+00 : f32
    %395 = vector.broadcast %cst_80 : f32 to vector<8x128xf32>
    %396 = arith.addf %395, %394 : vector<8x128xf32>
    %397 = arith.divf %395, %396 : vector<8x128xf32>
    %398 = vector.extract_strided_slice %391 {offsets = [0, 128], sizes = [8, 128], strides = [1, 1]} : vector<8x512xf32> to vector<8x128xf32>
    %399 = arith.negf %398 : vector<8x128xf32>
    %400 = math.exp %399 : vector<8x128xf32>
    %cst_81 = arith.constant 1.000000e+00 : f32
    %401 = vector.broadcast %cst_81 : f32 to vector<8x128xf32>
    %402 = arith.addf %401, %400 : vector<8x128xf32>
    %403 = arith.divf %401, %402 : vector<8x128xf32>
    %404 = vector.extract_strided_slice %391 {offsets = [0, 256], sizes = [8, 128], strides = [1, 1]} : vector<8x512xf32> to vector<8x128xf32>
    %405 = math.tanh %404 : vector<8x128xf32>
    %406 = vector.extract_strided_slice %391 {offsets = [0, 384], sizes = [8, 128], strides = [1, 1]} : vector<8x512xf32> to vector<8x128xf32>
    %407 = arith.negf %406 : vector<8x128xf32>
    %408 = math.exp %407 : vector<8x128xf32>
    %cst_82 = arith.constant 1.000000e+00 : f32
    %409 = vector.broadcast %cst_82 : f32 to vector<8x128xf32>
    %410 = arith.addf %409, %408 : vector<8x128xf32>
    %411 = arith.divf %409, %410 : vector<8x128xf32>
    %412 = arith.mulf %403, %323 : vector<8x128xf32>
    %413 = arith.mulf %397, %405 : vector<8x128xf32>
    %414 = arith.addf %412, %413 : vector<8x128xf32>
    %415 = math.tanh %414 : vector<8x128xf32>
    %416 = arith.mulf %411, %415 : vector<8x128xf32>
    %417 = arith.truncf %325 : vector<8x128xf32> to vector<8x128xbf16>
    %cst_83 = arith.constant dense<0.000000e+00> : vector<8x512xf32>
    %418 = tpu.matmul %417, %13, %cst_83 {dimension_numbers = #tpu.dot_dimension_numbers<[1], [0], [0], [1], [0, 0, 1, 1], [], []>} : vector<8x128xbf16>, vector<128x512xbf16>, vector<8x512xf32> -> vector<8x512xf32>
    %419 = arith.truncf %356 : vector<8x128xf32> to vector<8x128xbf16>
    %cst_84 = arith.constant dense<0.000000e+00> : vector<8x512xf32>
    %420 = tpu.matmul %419, %14, %cst_84 {dimension_numbers = #tpu.dot_dimension_numbers<[1], [0], [0], [1], [0, 0, 1, 1], [], []>} : vector<8x128xbf16>, vector<128x512xbf16>, vector<8x512xf32> -> vector<8x512xf32>
    %421 = arith.addf %418, %420 : vector<8x512xf32>
    %422 = arith.addf %421, %19 : vector<8x512xf32>
    %423 = vector.extract_strided_slice %422 {offsets = [0, 0], sizes = [8, 128], strides = [1, 1]} : vector<8x512xf32> to vector<8x128xf32>
    %424 = arith.negf %423 : vector<8x128xf32>
    %425 = math.exp %424 : vector<8x128xf32>
    %cst_85 = arith.constant 1.000000e+00 : f32
    %426 = vector.broadcast %cst_85 : f32 to vector<8x128xf32>
    %427 = arith.addf %426, %425 : vector<8x128xf32>
    %428 = arith.divf %426, %427 : vector<8x128xf32>
    %429 = vector.extract_strided_slice %422 {offsets = [0, 128], sizes = [8, 128], strides = [1, 1]} : vector<8x512xf32> to vector<8x128xf32>
    %430 = arith.negf %429 : vector<8x128xf32>
    %431 = math.exp %430 : vector<8x128xf32>
    %cst_86 = arith.constant 1.000000e+00 : f32
    %432 = vector.broadcast %cst_86 : f32 to vector<8x128xf32>
    %433 = arith.addf %432, %431 : vector<8x128xf32>
    %434 = arith.divf %432, %433 : vector<8x128xf32>
    %435 = vector.extract_strided_slice %422 {offsets = [0, 256], sizes = [8, 128], strides = [1, 1]} : vector<8x512xf32> to vector<8x128xf32>
    %436 = math.tanh %435 : vector<8x128xf32>
    %437 = vector.extract_strided_slice %422 {offsets = [0, 384], sizes = [8, 128], strides = [1, 1]} : vector<8x512xf32> to vector<8x128xf32>
    %438 = arith.negf %437 : vector<8x128xf32>
    %439 = math.exp %438 : vector<8x128xf32>
    %cst_87 = arith.constant 1.000000e+00 : f32
    %440 = vector.broadcast %cst_87 : f32 to vector<8x128xf32>
    %441 = arith.addf %440, %439 : vector<8x128xf32>
    %442 = arith.divf %440, %441 : vector<8x128xf32>
    %443 = arith.mulf %434, %354 : vector<8x128xf32>
    %444 = arith.mulf %428, %436 : vector<8x128xf32>
    %445 = arith.addf %443, %444 : vector<8x128xf32>
    %446 = math.tanh %445 : vector<8x128xf32>
    %447 = arith.mulf %442, %446 : vector<8x128xf32>
    %448 = arith.truncf %356 : vector<8x128xf32> to vector<8x128xbf16>
    %cst_88 = arith.constant dense<0.000000e+00> : vector<8x512xf32>
    %449 = tpu.matmul %448, %15, %cst_88 {dimension_numbers = #tpu.dot_dimension_numbers<[1], [0], [0], [1], [0, 0, 1, 1], [], []>} : vector<8x128xbf16>, vector<128x512xbf16>, vector<8x512xf32> -> vector<8x512xf32>
    %450 = arith.truncf %387 : vector<8x128xf32> to vector<8x128xbf16>
    %cst_89 = arith.constant dense<0.000000e+00> : vector<8x512xf32>
    %451 = tpu.matmul %450, %16, %cst_89 {dimension_numbers = #tpu.dot_dimension_numbers<[1], [0], [0], [1], [0, 0, 1, 1], [], []>} : vector<8x128xbf16>, vector<128x512xbf16>, vector<8x512xf32> -> vector<8x512xf32>
    %452 = arith.addf %449, %451 : vector<8x512xf32>
    %453 = arith.addf %452, %22 : vector<8x512xf32>
    %454 = vector.extract_strided_slice %453 {offsets = [0, 0], sizes = [8, 128], strides = [1, 1]} : vector<8x512xf32> to vector<8x128xf32>
    %455 = arith.negf %454 : vector<8x128xf32>
    %456 = math.exp %455 : vector<8x128xf32>
    %cst_90 = arith.constant 1.000000e+00 : f32
    %457 = vector.broadcast %cst_90 : f32 to vector<8x128xf32>
    %458 = arith.addf %457, %456 : vector<8x128xf32>
    %459 = arith.divf %457, %458 : vector<8x128xf32>
    %460 = vector.extract_strided_slice %453 {offsets = [0, 128], sizes = [8, 128], strides = [1, 1]} : vector<8x512xf32> to vector<8x128xf32>
    %461 = arith.negf %460 : vector<8x128xf32>
    %462 = math.exp %461 : vector<8x128xf32>
    %cst_91 = arith.constant 1.000000e+00 : f32
    %463 = vector.broadcast %cst_91 : f32 to vector<8x128xf32>
    %464 = arith.addf %463, %462 : vector<8x128xf32>
    %465 = arith.divf %463, %464 : vector<8x128xf32>
    %466 = vector.extract_strided_slice %453 {offsets = [0, 256], sizes = [8, 128], strides = [1, 1]} : vector<8x512xf32> to vector<8x128xf32>
    %467 = math.tanh %466 : vector<8x128xf32>
    %468 = vector.extract_strided_slice %453 {offsets = [0, 384], sizes = [8, 128], strides = [1, 1]} : vector<8x512xf32> to vector<8x128xf32>
    %469 = arith.negf %468 : vector<8x128xf32>
    %470 = math.exp %469 : vector<8x128xf32>
    %cst_92 = arith.constant 1.000000e+00 : f32
    %471 = vector.broadcast %cst_92 : f32 to vector<8x128xf32>
    %472 = arith.addf %471, %470 : vector<8x128xf32>
    %473 = arith.divf %471, %472 : vector<8x128xf32>
    %474 = arith.mulf %465, %385 : vector<8x128xf32>
    %475 = arith.mulf %459, %467 : vector<8x128xf32>
    %476 = arith.addf %474, %475 : vector<8x128xf32>
    %477 = math.tanh %476 : vector<8x128xf32>
    %478 = arith.mulf %473, %477 : vector<8x128xf32>
    %479 = vector.extract_strided_slice %11 {offsets = [48, 0], sizes = [8, 512], strides = [1, 1]} : vector<64x512xf32> to vector<8x512xf32>
    %480 = arith.truncf %416 : vector<8x128xf32> to vector<8x128xbf16>
    %cst_93 = arith.constant dense<0.000000e+00> : vector<8x512xf32>
    %481 = tpu.matmul %480, %12, %cst_93 {dimension_numbers = #tpu.dot_dimension_numbers<[1], [0], [0], [1], [0, 0, 1, 1], [], []>} : vector<8x128xbf16>, vector<128x512xbf16>, vector<8x512xf32> -> vector<8x512xf32>
    %482 = arith.addf %479, %481 : vector<8x512xf32>
    %483 = vector.extract_strided_slice %482 {offsets = [0, 0], sizes = [8, 128], strides = [1, 1]} : vector<8x512xf32> to vector<8x128xf32>
    %484 = arith.negf %483 : vector<8x128xf32>
    %485 = math.exp %484 : vector<8x128xf32>
    %cst_94 = arith.constant 1.000000e+00 : f32
    %486 = vector.broadcast %cst_94 : f32 to vector<8x128xf32>
    %487 = arith.addf %486, %485 : vector<8x128xf32>
    %488 = arith.divf %486, %487 : vector<8x128xf32>
    %489 = vector.extract_strided_slice %482 {offsets = [0, 128], sizes = [8, 128], strides = [1, 1]} : vector<8x512xf32> to vector<8x128xf32>
    %490 = arith.negf %489 : vector<8x128xf32>
    %491 = math.exp %490 : vector<8x128xf32>
    %cst_95 = arith.constant 1.000000e+00 : f32
    %492 = vector.broadcast %cst_95 : f32 to vector<8x128xf32>
    %493 = arith.addf %492, %491 : vector<8x128xf32>
    %494 = arith.divf %492, %493 : vector<8x128xf32>
    %495 = vector.extract_strided_slice %482 {offsets = [0, 256], sizes = [8, 128], strides = [1, 1]} : vector<8x512xf32> to vector<8x128xf32>
    %496 = math.tanh %495 : vector<8x128xf32>
    %497 = vector.extract_strided_slice %482 {offsets = [0, 384], sizes = [8, 128], strides = [1, 1]} : vector<8x512xf32> to vector<8x128xf32>
    %498 = arith.negf %497 : vector<8x128xf32>
    %499 = math.exp %498 : vector<8x128xf32>
    %cst_96 = arith.constant 1.000000e+00 : f32
    %500 = vector.broadcast %cst_96 : f32 to vector<8x128xf32>
    %501 = arith.addf %500, %499 : vector<8x128xf32>
    %502 = arith.divf %500, %501 : vector<8x128xf32>
    %503 = arith.mulf %494, %414 : vector<8x128xf32>
    %504 = arith.mulf %488, %496 : vector<8x128xf32>
    %505 = arith.addf %503, %504 : vector<8x128xf32>
    %506 = math.tanh %505 : vector<8x128xf32>
    %507 = arith.mulf %502, %506 : vector<8x128xf32>
    %508 = arith.truncf %416 : vector<8x128xf32> to vector<8x128xbf16>
    %cst_97 = arith.constant dense<0.000000e+00> : vector<8x512xf32>
    %509 = tpu.matmul %508, %13, %cst_97 {dimension_numbers = #tpu.dot_dimension_numbers<[1], [0], [0], [1], [0, 0, 1, 1], [], []>} : vector<8x128xbf16>, vector<128x512xbf16>, vector<8x512xf32> -> vector<8x512xf32>
    %510 = arith.truncf %447 : vector<8x128xf32> to vector<8x128xbf16>
    %cst_98 = arith.constant dense<0.000000e+00> : vector<8x512xf32>
    %511 = tpu.matmul %510, %14, %cst_98 {dimension_numbers = #tpu.dot_dimension_numbers<[1], [0], [0], [1], [0, 0, 1, 1], [], []>} : vector<8x128xbf16>, vector<128x512xbf16>, vector<8x512xf32> -> vector<8x512xf32>
    %512 = arith.addf %509, %511 : vector<8x512xf32>
    %513 = arith.addf %512, %19 : vector<8x512xf32>
    %514 = vector.extract_strided_slice %513 {offsets = [0, 0], sizes = [8, 128], strides = [1, 1]} : vector<8x512xf32> to vector<8x128xf32>
    %515 = arith.negf %514 : vector<8x128xf32>
    %516 = math.exp %515 : vector<8x128xf32>
    %cst_99 = arith.constant 1.000000e+00 : f32
    %517 = vector.broadcast %cst_99 : f32 to vector<8x128xf32>
    %518 = arith.addf %517, %516 : vector<8x128xf32>
    %519 = arith.divf %517, %518 : vector<8x128xf32>
    %520 = vector.extract_strided_slice %513 {offsets = [0, 128], sizes = [8, 128], strides = [1, 1]} : vector<8x512xf32> to vector<8x128xf32>
    %521 = arith.negf %520 : vector<8x128xf32>
    %522 = math.exp %521 : vector<8x128xf32>
    %cst_100 = arith.constant 1.000000e+00 : f32
    %523 = vector.broadcast %cst_100 : f32 to vector<8x128xf32>
    %524 = arith.addf %523, %522 : vector<8x128xf32>
    %525 = arith.divf %523, %524 : vector<8x128xf32>
    %526 = vector.extract_strided_slice %513 {offsets = [0, 256], sizes = [8, 128], strides = [1, 1]} : vector<8x512xf32> to vector<8x128xf32>
    %527 = math.tanh %526 : vector<8x128xf32>
    %528 = vector.extract_strided_slice %513 {offsets = [0, 384], sizes = [8, 128], strides = [1, 1]} : vector<8x512xf32> to vector<8x128xf32>
    %529 = arith.negf %528 : vector<8x128xf32>
    %530 = math.exp %529 : vector<8x128xf32>
    %cst_101 = arith.constant 1.000000e+00 : f32
    %531 = vector.broadcast %cst_101 : f32 to vector<8x128xf32>
    %532 = arith.addf %531, %530 : vector<8x128xf32>
    %533 = arith.divf %531, %532 : vector<8x128xf32>
    %534 = arith.mulf %525, %445 : vector<8x128xf32>
    %535 = arith.mulf %519, %527 : vector<8x128xf32>
    %536 = arith.addf %534, %535 : vector<8x128xf32>
    %537 = math.tanh %536 : vector<8x128xf32>
    %538 = arith.mulf %533, %537 : vector<8x128xf32>
    %539 = arith.truncf %447 : vector<8x128xf32> to vector<8x128xbf16>
    %cst_102 = arith.constant dense<0.000000e+00> : vector<8x512xf32>
    %540 = tpu.matmul %539, %15, %cst_102 {dimension_numbers = #tpu.dot_dimension_numbers<[1], [0], [0], [1], [0, 0, 1, 1], [], []>} : vector<8x128xbf16>, vector<128x512xbf16>, vector<8x512xf32> -> vector<8x512xf32>
    %541 = arith.truncf %478 : vector<8x128xf32> to vector<8x128xbf16>
    %cst_103 = arith.constant dense<0.000000e+00> : vector<8x512xf32>
    %542 = tpu.matmul %541, %16, %cst_103 {dimension_numbers = #tpu.dot_dimension_numbers<[1], [0], [0], [1], [0, 0, 1, 1], [], []>} : vector<8x128xbf16>, vector<128x512xbf16>, vector<8x512xf32> -> vector<8x512xf32>
    %543 = arith.addf %540, %542 : vector<8x512xf32>
    %544 = arith.addf %543, %22 : vector<8x512xf32>
    %545 = vector.extract_strided_slice %544 {offsets = [0, 0], sizes = [8, 128], strides = [1, 1]} : vector<8x512xf32> to vector<8x128xf32>
    %546 = arith.negf %545 : vector<8x128xf32>
    %547 = math.exp %546 : vector<8x128xf32>
    %cst_104 = arith.constant 1.000000e+00 : f32
    %548 = vector.broadcast %cst_104 : f32 to vector<8x128xf32>
    %549 = arith.addf %548, %547 : vector<8x128xf32>
    %550 = arith.divf %548, %549 : vector<8x128xf32>
    %551 = vector.extract_strided_slice %544 {offsets = [0, 128], sizes = [8, 128], strides = [1, 1]} : vector<8x512xf32> to vector<8x128xf32>
    %552 = arith.negf %551 : vector<8x128xf32>
    %553 = math.exp %552 : vector<8x128xf32>
    %cst_105 = arith.constant 1.000000e+00 : f32
    %554 = vector.broadcast %cst_105 : f32 to vector<8x128xf32>
    %555 = arith.addf %554, %553 : vector<8x128xf32>
    %556 = arith.divf %554, %555 : vector<8x128xf32>
    %557 = vector.extract_strided_slice %544 {offsets = [0, 256], sizes = [8, 128], strides = [1, 1]} : vector<8x512xf32> to vector<8x128xf32>
    %558 = math.tanh %557 : vector<8x128xf32>
    %559 = vector.extract_strided_slice %544 {offsets = [0, 384], sizes = [8, 128], strides = [1, 1]} : vector<8x512xf32> to vector<8x128xf32>
    %560 = arith.negf %559 : vector<8x128xf32>
    %561 = math.exp %560 : vector<8x128xf32>
    %cst_106 = arith.constant 1.000000e+00 : f32
    %562 = vector.broadcast %cst_106 : f32 to vector<8x128xf32>
    %563 = arith.addf %562, %561 : vector<8x128xf32>
    %564 = arith.divf %562, %563 : vector<8x128xf32>
    %565 = arith.mulf %556, %476 : vector<8x128xf32>
    %566 = arith.mulf %550, %558 : vector<8x128xf32>
    %567 = arith.addf %565, %566 : vector<8x128xf32>
    %568 = math.tanh %567 : vector<8x128xf32>
    %569 = arith.mulf %564, %568 : vector<8x128xf32>
    %570 = vector.extract_strided_slice %11 {offsets = [56, 0], sizes = [8, 512], strides = [1, 1]} : vector<64x512xf32> to vector<8x512xf32>
    %571 = arith.truncf %507 : vector<8x128xf32> to vector<8x128xbf16>
    %cst_107 = arith.constant dense<0.000000e+00> : vector<8x512xf32>
    %572 = tpu.matmul %571, %12, %cst_107 {dimension_numbers = #tpu.dot_dimension_numbers<[1], [0], [0], [1], [0, 0, 1, 1], [], []>} : vector<8x128xbf16>, vector<128x512xbf16>, vector<8x512xf32> -> vector<8x512xf32>
    %573 = arith.addf %570, %572 : vector<8x512xf32>
    %574 = vector.extract_strided_slice %573 {offsets = [0, 0], sizes = [8, 128], strides = [1, 1]} : vector<8x512xf32> to vector<8x128xf32>
    %575 = arith.negf %574 : vector<8x128xf32>
    %576 = math.exp %575 : vector<8x128xf32>
    %cst_108 = arith.constant 1.000000e+00 : f32
    %577 = vector.broadcast %cst_108 : f32 to vector<8x128xf32>
    %578 = arith.addf %577, %576 : vector<8x128xf32>
    %579 = arith.divf %577, %578 : vector<8x128xf32>
    %580 = vector.extract_strided_slice %573 {offsets = [0, 128], sizes = [8, 128], strides = [1, 1]} : vector<8x512xf32> to vector<8x128xf32>
    %581 = arith.negf %580 : vector<8x128xf32>
    %582 = math.exp %581 : vector<8x128xf32>
    %cst_109 = arith.constant 1.000000e+00 : f32
    %583 = vector.broadcast %cst_109 : f32 to vector<8x128xf32>
    %584 = arith.addf %583, %582 : vector<8x128xf32>
    %585 = arith.divf %583, %584 : vector<8x128xf32>
    %586 = vector.extract_strided_slice %573 {offsets = [0, 256], sizes = [8, 128], strides = [1, 1]} : vector<8x512xf32> to vector<8x128xf32>
    %587 = math.tanh %586 : vector<8x128xf32>
    %588 = vector.extract_strided_slice %573 {offsets = [0, 384], sizes = [8, 128], strides = [1, 1]} : vector<8x512xf32> to vector<8x128xf32>
    %589 = arith.negf %588 : vector<8x128xf32>
    %590 = math.exp %589 : vector<8x128xf32>
    %cst_110 = arith.constant 1.000000e+00 : f32
    %591 = vector.broadcast %cst_110 : f32 to vector<8x128xf32>
    %592 = arith.addf %591, %590 : vector<8x128xf32>
    %593 = arith.divf %591, %592 : vector<8x128xf32>
    %594 = arith.mulf %585, %505 : vector<8x128xf32>
    %595 = arith.mulf %579, %587 : vector<8x128xf32>
    %596 = arith.addf %594, %595 : vector<8x128xf32>
    %597 = math.tanh %596 : vector<8x128xf32>
    %598 = arith.mulf %593, %597 : vector<8x128xf32>
    %599 = arith.truncf %507 : vector<8x128xf32> to vector<8x128xbf16>
    %cst_111 = arith.constant dense<0.000000e+00> : vector<8x512xf32>
    %600 = tpu.matmul %599, %13, %cst_111 {dimension_numbers = #tpu.dot_dimension_numbers<[1], [0], [0], [1], [0, 0, 1, 1], [], []>} : vector<8x128xbf16>, vector<128x512xbf16>, vector<8x512xf32> -> vector<8x512xf32>
    %601 = arith.truncf %538 : vector<8x128xf32> to vector<8x128xbf16>
    %cst_112 = arith.constant dense<0.000000e+00> : vector<8x512xf32>
    %602 = tpu.matmul %601, %14, %cst_112 {dimension_numbers = #tpu.dot_dimension_numbers<[1], [0], [0], [1], [0, 0, 1, 1], [], []>} : vector<8x128xbf16>, vector<128x512xbf16>, vector<8x512xf32> -> vector<8x512xf32>
    %603 = arith.addf %600, %602 : vector<8x512xf32>
    %604 = arith.addf %603, %19 : vector<8x512xf32>
    %605 = vector.extract_strided_slice %604 {offsets = [0, 0], sizes = [8, 128], strides = [1, 1]} : vector<8x512xf32> to vector<8x128xf32>
    %606 = arith.negf %605 : vector<8x128xf32>
    %607 = math.exp %606 : vector<8x128xf32>
    %cst_113 = arith.constant 1.000000e+00 : f32
    %608 = vector.broadcast %cst_113 : f32 to vector<8x128xf32>
    %609 = arith.addf %608, %607 : vector<8x128xf32>
    %610 = arith.divf %608, %609 : vector<8x128xf32>
    %611 = vector.extract_strided_slice %604 {offsets = [0, 128], sizes = [8, 128], strides = [1, 1]} : vector<8x512xf32> to vector<8x128xf32>
    %612 = arith.negf %611 : vector<8x128xf32>
    %613 = math.exp %612 : vector<8x128xf32>
    %cst_114 = arith.constant 1.000000e+00 : f32
    %614 = vector.broadcast %cst_114 : f32 to vector<8x128xf32>
    %615 = arith.addf %614, %613 : vector<8x128xf32>
    %616 = arith.divf %614, %615 : vector<8x128xf32>
    %617 = vector.extract_strided_slice %604 {offsets = [0, 256], sizes = [8, 128], strides = [1, 1]} : vector<8x512xf32> to vector<8x128xf32>
    %618 = math.tanh %617 : vector<8x128xf32>
    %619 = vector.extract_strided_slice %604 {offsets = [0, 384], sizes = [8, 128], strides = [1, 1]} : vector<8x512xf32> to vector<8x128xf32>
    %620 = arith.negf %619 : vector<8x128xf32>
    %621 = math.exp %620 : vector<8x128xf32>
    %cst_115 = arith.constant 1.000000e+00 : f32
    %622 = vector.broadcast %cst_115 : f32 to vector<8x128xf32>
    %623 = arith.addf %622, %621 : vector<8x128xf32>
    %624 = arith.divf %622, %623 : vector<8x128xf32>
    %625 = arith.mulf %616, %536 : vector<8x128xf32>
    %626 = arith.mulf %610, %618 : vector<8x128xf32>
    %627 = arith.addf %625, %626 : vector<8x128xf32>
    %628 = math.tanh %627 : vector<8x128xf32>
    %629 = arith.mulf %624, %628 : vector<8x128xf32>
    %630 = arith.truncf %538 : vector<8x128xf32> to vector<8x128xbf16>
    %cst_116 = arith.constant dense<0.000000e+00> : vector<8x512xf32>
    %631 = tpu.matmul %630, %15, %cst_116 {dimension_numbers = #tpu.dot_dimension_numbers<[1], [0], [0], [1], [0, 0, 1, 1], [], []>} : vector<8x128xbf16>, vector<128x512xbf16>, vector<8x512xf32> -> vector<8x512xf32>
    %632 = arith.truncf %569 : vector<8x128xf32> to vector<8x128xbf16>
    %cst_117 = arith.constant dense<0.000000e+00> : vector<8x512xf32>
    %633 = tpu.matmul %632, %16, %cst_117 {dimension_numbers = #tpu.dot_dimension_numbers<[1], [0], [0], [1], [0, 0, 1, 1], [], []>} : vector<8x128xbf16>, vector<128x512xbf16>, vector<8x512xf32> -> vector<8x512xf32>
    %634 = arith.addf %631, %633 : vector<8x512xf32>
    %635 = arith.addf %634, %22 : vector<8x512xf32>
    %636 = vector.extract_strided_slice %635 {offsets = [0, 0], sizes = [8, 128], strides = [1, 1]} : vector<8x512xf32> to vector<8x128xf32>
    %637 = arith.negf %636 : vector<8x128xf32>
    %638 = math.exp %637 : vector<8x128xf32>
    %cst_118 = arith.constant 1.000000e+00 : f32
    %639 = vector.broadcast %cst_118 : f32 to vector<8x128xf32>
    %640 = arith.addf %639, %638 : vector<8x128xf32>
    %641 = arith.divf %639, %640 : vector<8x128xf32>
    %642 = vector.extract_strided_slice %635 {offsets = [0, 128], sizes = [8, 128], strides = [1, 1]} : vector<8x512xf32> to vector<8x128xf32>
    %643 = arith.negf %642 : vector<8x128xf32>
    %644 = math.exp %643 : vector<8x128xf32>
    %cst_119 = arith.constant 1.000000e+00 : f32
    %645 = vector.broadcast %cst_119 : f32 to vector<8x128xf32>
    %646 = arith.addf %645, %644 : vector<8x128xf32>
    %647 = arith.divf %645, %646 : vector<8x128xf32>
    %648 = vector.extract_strided_slice %635 {offsets = [0, 256], sizes = [8, 128], strides = [1, 1]} : vector<8x512xf32> to vector<8x128xf32>
    %649 = math.tanh %648 : vector<8x128xf32>
    %650 = vector.extract_strided_slice %635 {offsets = [0, 384], sizes = [8, 128], strides = [1, 1]} : vector<8x512xf32> to vector<8x128xf32>
    %651 = arith.negf %650 : vector<8x128xf32>
    %652 = math.exp %651 : vector<8x128xf32>
    %cst_120 = arith.constant 1.000000e+00 : f32
    %653 = vector.broadcast %cst_120 : f32 to vector<8x128xf32>
    %654 = arith.addf %653, %652 : vector<8x128xf32>
    %655 = arith.divf %653, %654 : vector<8x128xf32>
    %656 = arith.mulf %647, %567 : vector<8x128xf32>
    %657 = arith.mulf %641, %649 : vector<8x128xf32>
    %658 = arith.addf %656, %657 : vector<8x128xf32>
    %659 = math.tanh %658 : vector<8x128xf32>
    %660 = arith.mulf %655, %659 : vector<8x128xf32>
    %661 = arith.truncf %598 : vector<8x128xf32> to vector<8x128xbf16>
    %cst_121 = arith.constant dense<0.000000e+00> : vector<8x512xf32>
    %662 = tpu.matmul %661, %13, %cst_121 {dimension_numbers = #tpu.dot_dimension_numbers<[1], [0], [0], [1], [0, 0, 1, 1], [], []>} : vector<8x128xbf16>, vector<128x512xbf16>, vector<8x512xf32> -> vector<8x512xf32>
    %663 = arith.truncf %629 : vector<8x128xf32> to vector<8x128xbf16>
    %cst_122 = arith.constant dense<0.000000e+00> : vector<8x512xf32>
    %664 = tpu.matmul %663, %14, %cst_122 {dimension_numbers = #tpu.dot_dimension_numbers<[1], [0], [0], [1], [0, 0, 1, 1], [], []>} : vector<8x128xbf16>, vector<128x512xbf16>, vector<8x512xf32> -> vector<8x512xf32>
    %665 = arith.addf %662, %664 : vector<8x512xf32>
    %666 = arith.addf %665, %19 : vector<8x512xf32>
    %667 = vector.extract_strided_slice %666 {offsets = [0, 0], sizes = [8, 128], strides = [1, 1]} : vector<8x512xf32> to vector<8x128xf32>
    %668 = arith.negf %667 : vector<8x128xf32>
    %669 = math.exp %668 : vector<8x128xf32>
    %cst_123 = arith.constant 1.000000e+00 : f32
    %670 = vector.broadcast %cst_123 : f32 to vector<8x128xf32>
    %671 = arith.addf %670, %669 : vector<8x128xf32>
    %672 = arith.divf %670, %671 : vector<8x128xf32>
    %673 = vector.extract_strided_slice %666 {offsets = [0, 128], sizes = [8, 128], strides = [1, 1]} : vector<8x512xf32> to vector<8x128xf32>
    %674 = arith.negf %673 : vector<8x128xf32>
    %675 = math.exp %674 : vector<8x128xf32>
    %cst_124 = arith.constant 1.000000e+00 : f32
    %676 = vector.broadcast %cst_124 : f32 to vector<8x128xf32>
    %677 = arith.addf %676, %675 : vector<8x128xf32>
    %678 = arith.divf %676, %677 : vector<8x128xf32>
    %679 = vector.extract_strided_slice %666 {offsets = [0, 256], sizes = [8, 128], strides = [1, 1]} : vector<8x512xf32> to vector<8x128xf32>
    %680 = math.tanh %679 : vector<8x128xf32>
    %681 = vector.extract_strided_slice %666 {offsets = [0, 384], sizes = [8, 128], strides = [1, 1]} : vector<8x512xf32> to vector<8x128xf32>
    %682 = arith.negf %681 : vector<8x128xf32>
    %683 = math.exp %682 : vector<8x128xf32>
    %cst_125 = arith.constant 1.000000e+00 : f32
    %684 = vector.broadcast %cst_125 : f32 to vector<8x128xf32>
    %685 = arith.addf %684, %683 : vector<8x128xf32>
    %686 = arith.divf %684, %685 : vector<8x128xf32>
    %687 = arith.mulf %678, %627 : vector<8x128xf32>
    %688 = arith.mulf %672, %680 : vector<8x128xf32>
    %689 = arith.addf %687, %688 : vector<8x128xf32>
    %690 = math.tanh %689 : vector<8x128xf32>
    %691 = arith.mulf %686, %690 : vector<8x128xf32>
    %692 = arith.truncf %629 : vector<8x128xf32> to vector<8x128xbf16>
    %cst_126 = arith.constant dense<0.000000e+00> : vector<8x512xf32>
    %693 = tpu.matmul %692, %15, %cst_126 {dimension_numbers = #tpu.dot_dimension_numbers<[1], [0], [0], [1], [0, 0, 1, 1], [], []>} : vector<8x128xbf16>, vector<128x512xbf16>, vector<8x512xf32> -> vector<8x512xf32>
    %694 = arith.truncf %660 : vector<8x128xf32> to vector<8x128xbf16>
    %cst_127 = arith.constant dense<0.000000e+00> : vector<8x512xf32>
    %695 = tpu.matmul %694, %16, %cst_127 {dimension_numbers = #tpu.dot_dimension_numbers<[1], [0], [0], [1], [0, 0, 1, 1], [], []>} : vector<8x128xbf16>, vector<128x512xbf16>, vector<8x512xf32> -> vector<8x512xf32>
    %696 = arith.addf %693, %695 : vector<8x512xf32>
    %697 = arith.addf %696, %22 : vector<8x512xf32>
    %698 = vector.extract_strided_slice %697 {offsets = [0, 0], sizes = [8, 128], strides = [1, 1]} : vector<8x512xf32> to vector<8x128xf32>
    %699 = arith.negf %698 : vector<8x128xf32>
    %700 = math.exp %699 : vector<8x128xf32>
    %cst_128 = arith.constant 1.000000e+00 : f32
    %701 = vector.broadcast %cst_128 : f32 to vector<8x128xf32>
    %702 = arith.addf %701, %700 : vector<8x128xf32>
    %703 = arith.divf %701, %702 : vector<8x128xf32>
    %704 = vector.extract_strided_slice %697 {offsets = [0, 128], sizes = [8, 128], strides = [1, 1]} : vector<8x512xf32> to vector<8x128xf32>
    %705 = arith.negf %704 : vector<8x128xf32>
    %706 = math.exp %705 : vector<8x128xf32>
    %cst_129 = arith.constant 1.000000e+00 : f32
    %707 = vector.broadcast %cst_129 : f32 to vector<8x128xf32>
    %708 = arith.addf %707, %706 : vector<8x128xf32>
    %709 = arith.divf %707, %708 : vector<8x128xf32>
    %710 = vector.extract_strided_slice %697 {offsets = [0, 256], sizes = [8, 128], strides = [1, 1]} : vector<8x512xf32> to vector<8x128xf32>
    %711 = math.tanh %710 : vector<8x128xf32>
    %712 = vector.extract_strided_slice %697 {offsets = [0, 384], sizes = [8, 128], strides = [1, 1]} : vector<8x512xf32> to vector<8x128xf32>
    %713 = arith.negf %712 : vector<8x128xf32>
    %714 = math.exp %713 : vector<8x128xf32>
    %cst_130 = arith.constant 1.000000e+00 : f32
    %715 = vector.broadcast %cst_130 : f32 to vector<8x128xf32>
    %716 = arith.addf %715, %714 : vector<8x128xf32>
    %717 = arith.divf %715, %716 : vector<8x128xf32>
    %718 = arith.mulf %709, %658 : vector<8x128xf32>
    %719 = arith.mulf %703, %711 : vector<8x128xf32>
    %720 = arith.addf %718, %719 : vector<8x128xf32>
    %721 = math.tanh %720 : vector<8x128xf32>
    %722 = arith.mulf %717, %721 : vector<8x128xf32>
    %723 = arith.truncf %691 : vector<8x128xf32> to vector<8x128xbf16>
    %cst_131 = arith.constant dense<0.000000e+00> : vector<8x512xf32>
    %724 = tpu.matmul %723, %15, %cst_131 {dimension_numbers = #tpu.dot_dimension_numbers<[1], [0], [0], [1], [0, 0, 1, 1], [], []>} : vector<8x128xbf16>, vector<128x512xbf16>, vector<8x512xf32> -> vector<8x512xf32>
    %725 = arith.truncf %722 : vector<8x128xf32> to vector<8x128xbf16>
    %cst_132 = arith.constant dense<0.000000e+00> : vector<8x512xf32>
    %726 = tpu.matmul %725, %16, %cst_132 {dimension_numbers = #tpu.dot_dimension_numbers<[1], [0], [0], [1], [0, 0, 1, 1], [], []>} : vector<8x128xbf16>, vector<128x512xbf16>, vector<8x512xf32> -> vector<8x512xf32>
    %727 = arith.addf %724, %726 : vector<8x512xf32>
    %728 = arith.addf %727, %22 : vector<8x512xf32>
    %729 = vector.extract_strided_slice %728 {offsets = [0, 0], sizes = [8, 128], strides = [1, 1]} : vector<8x512xf32> to vector<8x128xf32>
    %730 = arith.negf %729 : vector<8x128xf32>
    %731 = math.exp %730 : vector<8x128xf32>
    %cst_133 = arith.constant 1.000000e+00 : f32
    %732 = vector.broadcast %cst_133 : f32 to vector<8x128xf32>
    %733 = arith.addf %732, %731 : vector<8x128xf32>
    %734 = arith.divf %732, %733 : vector<8x128xf32>
    %735 = vector.extract_strided_slice %728 {offsets = [0, 128], sizes = [8, 128], strides = [1, 1]} : vector<8x512xf32> to vector<8x128xf32>
    %736 = arith.negf %735 : vector<8x128xf32>
    %737 = math.exp %736 : vector<8x128xf32>
    %cst_134 = arith.constant 1.000000e+00 : f32
    %738 = vector.broadcast %cst_134 : f32 to vector<8x128xf32>
    %739 = arith.addf %738, %737 : vector<8x128xf32>
    %740 = arith.divf %738, %739 : vector<8x128xf32>
    %741 = vector.extract_strided_slice %728 {offsets = [0, 256], sizes = [8, 128], strides = [1, 1]} : vector<8x512xf32> to vector<8x128xf32>
    %742 = math.tanh %741 : vector<8x128xf32>
    %743 = vector.extract_strided_slice %728 {offsets = [0, 384], sizes = [8, 128], strides = [1, 1]} : vector<8x512xf32> to vector<8x128xf32>
    %744 = arith.negf %743 : vector<8x128xf32>
    %745 = math.exp %744 : vector<8x128xf32>
    %cst_135 = arith.constant 1.000000e+00 : f32
    %746 = vector.broadcast %cst_135 : f32 to vector<8x128xf32>
    %747 = arith.addf %746, %745 : vector<8x128xf32>
    %748 = arith.divf %746, %747 : vector<8x128xf32>
    %749 = arith.mulf %740, %720 : vector<8x128xf32>
    %750 = arith.mulf %734, %742 : vector<8x128xf32>
    %751 = arith.addf %749, %750 : vector<8x128xf32>
    %752 = math.tanh %751 : vector<8x128xf32>
    %753 = arith.mulf %748, %752 : vector<8x128xf32>
    %754 = arith.truncf %753 : vector<8x128xf32> to vector<8x128xbf16>
    %c0_136 = arith.constant 0 : index
    %c0_137 = arith.constant 0 : index
    %755 = vector.load %arg10[%c0_136, %c0_137] : memref<128x128xbf16, #tpu.memory_space<vmem>>, vector<128x128xbf16>
    %cst_138 = arith.constant dense<0.000000e+00> : vector<8x128xf32>
    %756 = tpu.matmul %754, %755, %cst_138 {dimension_numbers = #tpu.dot_dimension_numbers<[1], [0], [0], [1], [0, 0, 1, 1], [], []>} : vector<8x128xbf16>, vector<128x128xbf16>, vector<8x128xf32> -> vector<8x128xf32>
    %c0_139 = arith.constant 0 : index
    %c0_140 = arith.constant 0 : index
    %757 = vector.load %arg11[%c0_139, %c0_140] : memref<1x128xf32, #tpu.memory_space<vmem>>, vector<1x128xf32>
    %758 = vector.broadcast %757 : vector<1x128xf32> to vector<8x128xf32>
    %759 = arith.addf %756, %758 : vector<8x128xf32>
    %760 = vector.extract_strided_slice %0 {offsets = [40, 0], sizes = [8, 128], strides = [1, 1]} : vector<64x128xf32> to vector<8x128xf32>
    %761 = vector.extract_strided_slice %0 {offsets = [48, 0], sizes = [8, 128], strides = [1, 1]} : vector<64x128xf32> to vector<8x128xf32>
    %762 = vector.extract_strided_slice %0 {offsets = [56, 0], sizes = [8, 128], strides = [1, 1]} : vector<64x128xf32> to vector<8x128xf32>
    %763 = arith.addf %760, %761 : vector<8x128xf32>
    %764 = arith.addf %763, %762 : vector<8x128xf32>
    %cst_141 = arith.constant 0.333333343 : f32
    %765 = vector.broadcast %cst_141 : f32 to vector<8x128xf32>
    %766 = arith.mulf %764, %765 : vector<8x128xf32>
    %767 = arith.subf %762, %760 : vector<8x128xf32>
    %768 = arith.addf %766, %767 : vector<8x128xf32>
    %769 = arith.addf %759, %768 : vector<8x128xf32>
    %770 = arith.mulf %769, %769 : vector<8x128xf32>
    %cst_142 = arith.constant 1.000000e+00 : f32
    %771 = vector.broadcast %cst_142 : f32 to vector<8x128xf32>
    %772 = arith.subf %771, %770 : vector<8x128xf32>
    %cst_143 = arith.constant dense<0.000000e+00> : vector<8xf32>
    %773 = vector.multi_reduction <add>, %772, %cst_143 [1] : vector<8x128xf32> to vector<8xf32>
    %774 = vector.shape_cast %773 : vector<8xf32> to vector<8x1xf32>
    %cst_144 = arith.constant 0.00999999977 : f32
    %775 = vector.broadcast %cst_144 : f32 to vector<8x1xf32>
    %776 = arith.mulf %774, %775 : vector<8x1xf32>
    %cst_145 = arith.constant dense<0.000000e+00> : vector<8xf32>
    %777 = vector.multi_reduction <add>, %769, %cst_145 [1] : vector<8x128xf32> to vector<8xf32>
    %778 = vector.shape_cast %777 : vector<8xf32> to vector<8x1xf32>
    %cst_146 = arith.constant 0.00999999977 : f32
    %779 = vector.broadcast %cst_146 : f32 to vector<8x1xf32>
    %780 = arith.mulf %778, %779 : vector<8x1xf32>
    %781 = arith.subf %5, %780 : vector<8x1xf32>
    %782 = arith.divf %781, %776 : vector<8x1xf32>
    %783 = vector.broadcast %782 : vector<8x1xf32> to vector<8x128xf32>
    %784 = arith.mulf %772, %783 : vector<8x128xf32>
    %785 = arith.addf %769, %784 : vector<8x128xf32>
    %c0_147 = arith.constant 0 : index
    %c0_148 = arith.constant 0 : index
    %786 = vector.load %arg12[%c0_147, %c0_148] : memref<8x128xf32, #tpu.memory_space<vmem>>, vector<8x128xf32>
    tpu.vector_store %arg12[%c0_147, %c0_148], %785 {strides = array<i32>} : memref<8x128xf32, #tpu.memory_space<vmem>>, vector<8x128xf32>,
    return
  }
}

</mosaic_0001>

<bundles_post_ra>
// kernel: tpu_custom_call.1
= control target key start
LH: loop header
LB: loop body
LE: loop exit
PB: predicated region body
PF: predicated region fallthrough
CT: control target
= control target key end

     0   :  { %17 = vsyncpa [#allocation3], 0  ;;  %s9552_s0 = inlined_call_operand.hbm [shape: f32[64,128], index: 0, kind: input, shape index: {}]   ;;  %s9553_s1 = inlined_call_operand.hbm [shape: bf16[128,512], index: 1, kind: input, shape index: {}]   ;;  %s9554_s2 = inlined_call_operand.hbm [shape: bf16[128,512], index: 2, kind: input, shape index: {}]   ;;  %s9555_s3 = inlined_call_operand.hbm [shape: f32[1,512], index: 3, kind: input, shape index: {}]   ;;  %s9556_s4 = inlined_call_operand.hbm [shape: bf16[128,512], index: 4, kind: input, shape index: {}]   ;;  %s9557_s5 = inlined_call_operand.hbm [shape: bf16[128,512], index: 5, kind: input, shape index: {}]   ;;  %s9558_s6 = inlined_call_operand.vmem [shape: f32[1,512], index: 6, kind: input, shape index: {}]   ;;  %s9559_s7 = inlined_call_operand.hbm [shape: bf16[128,512], index: 7, kind: input, shape index: {}]   ;;  %s9560_s8 = inlined_call_operand.hbm [shape: bf16[128,512], index: 8, kind: input, shape index: {}]   ;;  %s9561_s9 = inlined_call_operand.vmem [shape: f32[1,512], index: 9, kind: input, shape index: {}]   ;;  %s9562_s10 = inlined_call_operand.hbm [shape: bf16[128,128], index: 10, kind: input, shape index: {}]   ;;  %s9563_s11 = inlined_call_operand.vmem [shape: f32[1,128], index: 11, kind: input, shape index: {}]   ;;  %s9564_s12 = inlined_call_operand.hbm [shape: f32[8,128], index: 12, kind: output, shape index: {}]  }
   0x1   :  { %18 = vsyncpa [#allocation6], 0 }
   0x2   :  { %19 = vsyncpa [#allocation9], 0 }
   0x3   :  { %20 = vsyncpa [#allocation12], 0 }
   0x4   :  { %21 = vsyncpa [#allocation15], 0  ;;  %s40_s23 = sshll.u32 %s9553_s1, 4  ;;  %s41_s23 = int_to_ptr.hbm [resolvable:$true] %s40_s23 }
   0x5   :  { %22 = vsyncpa [#allocation4], 0  ;;  %s7073_s24 = smov [#allocation5]   ;;  %s67_s28 = sshll.u32 %s9555_s3, 4  ;;  %s68_s28 = int_to_ptr.hbm [resolvable:$true] %s67_s28 }
   0x6   :  { %s42_s25 = sshll.u32 %s7073_s24, 4  ;;  %s7074_s29 = smov 256   ;;  %s43_s25 = int_to_ptr.vmem [resolvable:$true] %s42_s25 }
   0x7   :  { %s7075_s30 = smov 16   ;;  %s7076_s13 = smov [#allocation8]  }
   0x8   :  { %48 = dma.hbm_to_vmem [thread:$0]  %s41_s23, 4096, %s43_s25, [#allocation6], %s7074_s29, %s7074_s29, %s7075_s30  }
   0x9   :  { %s69_s14 = sshll.u32 %s7076_s13, 4  ;;  %s90_s16 = sshll.u32 %s9557_s5, 4  ;;  %s70_s14 = int_to_ptr.vmem [resolvable:$true] %s69_s14  ;;  %s91_s16 = int_to_ptr.hbm [resolvable:$true] %s90_s16 }
   0xa   :  { %72 = dma.hbm_to_vmem [thread:$0]  %s68_s28, 64, %s70_s14, [#allocation9]  }
   0xb   :  { %s118_s3 = sshll.u32 %s9560_s8, 4  ;;  %s7077_s19 = smov [#allocation11]   ;;  %s119_s3 = int_to_ptr.hbm [resolvable:$true] %s118_s3 }
   0xc   :  { %s92_s20 = sshll.u32 %s7077_s19, 4  ;;  %s7078_s21 = smov [#allocation14]   ;;  %s93_s20 = int_to_ptr.vmem [resolvable:$true] %s92_s20 }
   0xd   :  { %98 = dma.hbm_to_vmem [thread:$0]  %s91_s16, 4096, %s93_s20, [#allocation12], %s7074_s29, %s7074_s29, %s7075_s30  }
   0xe   :  { %s120_s22 = sshll.u32 %s7078_s21, 4  ;;  %s27_s5 = sshll.u32 %s9552_s0, 4  ;;  %s121_s22 = int_to_ptr.vmem [resolvable:$true] %s120_s22  ;;  %s28_s5 = int_to_ptr.hbm [resolvable:$true] %s27_s5 }
   0xf   :  { %126 = dma.hbm_to_vmem [thread:$0]  %s119_s3, 4096, %s121_s22, [#allocation15], %s7074_s29, %s7074_s29, %s7075_s30  }
  0x10   :  { %s7079_s8 = smov [#allocation2]   ;;  %s53_s28 = sshll.u32 %s9554_s2, 4  ;;  %s54_s28 = int_to_ptr.hbm [resolvable:$true] %s53_s28 }
  0x11   :  { %s29_s25 = sshll.u32 %s7079_s8, 4  ;;  %s7080_s13 = smov 128   ;;  %s30_s25 = int_to_ptr.vmem [resolvable:$true] %s29_s25 }
  0x12   :  { %s7081_s14 = smov 8   ;;  %s7082_s15 = smov [#allocation7]  }
  0x13   :  { %35 = dma.hbm_to_vmem [thread:$0]  %s28_s5, 1024, %s30_s25, [#allocation3], %s7080_s13, %s7080_s13, %s7081_s14  }
  0x14   :  { %s55_s1 = sshll.u32 %s7082_s15, 4  ;;  %s77_s17 = sshll.u32 %s9556_s4, 4  ;;  %s56_s1 = int_to_ptr.vmem [resolvable:$true] %s55_s1  ;;  %s78_s17 = int_to_ptr.hbm [resolvable:$true] %s77_s17 }
  0x15   :  { %61 = dma.hbm_to_vmem [thread:$0]  %s54_s28, 4096, %s56_s1, [#allocation6], %s7074_s29, %s7074_s29, %s7075_s30  }
  0x16   :  { %s105_s2 = sshll.u32 %s9559_s7, 4  ;;  %s7083_s19 = smov [#allocation10]   ;;  %s106_s2 = int_to_ptr.hbm [resolvable:$true] %s105_s2 }
  0x17   :  { %s79_s20 = sshll.u32 %s7083_s19, 4  ;;  %s7084_s21 = smov [#allocation13]   ;;  %s80_s20 = int_to_ptr.vmem [resolvable:$true] %s79_s20 }
  0x18   :  { %85 = dma.hbm_to_vmem [thread:$0]  %s78_s17, 4096, %s80_s20, [#allocation9], %s7074_s29, %s7074_s29, %s7075_s30  }
  0x19   :  { %s107_s4 = sshll.u32 %s7084_s21, 4  ;;  %s133_s24 = sshll.u32 %s9562_s10, 4  ;;  %s108_s4 = int_to_ptr.vmem [resolvable:$true] %s107_s4  ;;  %s134_s24 = int_to_ptr.hbm [resolvable:$true] %s133_s24 }
  0x1a   :  { %113 = dma.hbm_to_vmem [thread:$0]  %s106_s2, 4096, %s108_s4, [#allocation12], %s7074_s29, %s7074_s29, %s7075_s30  }
  0x1b   :  { %s7085_s7 = smov [#allocation16]   ;;  %s7086_s8 = smov 64  }
  0x1c   :  { %s135_s5 = sshll.u32 %s7085_s7, 4  ;;  %s7087_s25 = smov 4   ;;  %s136_s5 = int_to_ptr.vmem [resolvable:$true] %s135_s5 }
  0x1d   :  { %141 = dma.hbm_to_vmem [thread:$0]  %s134_s24, 1024, %s136_s5, [#allocation15], %s7086_s8, %s7086_s8, %s7087_s25  }
  0x1e   :  { %7061 = dma.done.wait [#allocation3], 1024  }
  0x1f   :  { %7062 = vsyncadd [#allocation3], 4294966272 }
  0x20   :  { %7063 = dma.done.wait [#allocation6], 8192  }
  0x21   :  { %7064 = vsyncadd [#allocation6], 4294959104 }
  0x22   :  { %7065 = dma.done.wait [#allocation9], 4160  }
  0x23   :  { %7066 = vsyncadd [#allocation9], 4294963136 }
  0x24   :  { %7067 = dma.done.wait [#allocation12], 8192  }
  0x25   :  { %7068 = vsyncadd [#allocation12], 4294959104 }
  0x26   :  { %7069 = dma.done.wait [#allocation15], 5120  }
  0x27   :  { %7070 = vsyncadd [#allocation15], 4294962176  ;;  %v5455_v0 = vld [vmem:[#allocation5 + $0xe0] sm:$0xf]  ;;  %v6243_v1 = vld [vmem:[#allocation5 + $0xec] sm:$0xf0] }
  0x28   :  { %v6241_v2 = vld [vmem:[#allocation5 + $0xe4] sm:$0xf]  ;;  %v5456_v3 = vor.u32 %v6243_v1, %v5455_v0  ;;  %v5457_v4 = vld [vmem:[#allocation5 + $0xf0] sm:$0xf0]  ;;  %v5463_v5 = vld [vmem:[#allocation5 + $0xe8] sm:$0xf] }
  0x29   :  { %v6244_v6 = vld [vmem:[#allocation5 + $0xf4] sm:$0xf0]  ;;  %v5460_v7 = vor.u32 %v6241_v2, %v5457_v4  ;;  %v6242_v9 = vld [vmem:[#allocation5 + $0xec] sm:$0xf]  ;;  %v5465_v10 = vld [vmem:[#allocation5 + $0xf8] sm:$0xf0] }
  0x2a   :  { %v5464_v8 = vor.u32 %v6244_v6, %v5463_v5  ;;  %v5439_v11 = vld [vmem:[#allocation5 + $0xc0] sm:$0xf]  ;;  %398 = vmatpush.bf16.msra.mxu0 %v5456_v3  ;;  %v5468_v12 = vor.u32 %v6242_v9, %v5465_v10  ;;  %v6239_v13 = vld [vmem:[#allocation5 + $0xcc] sm:$0xf0]  ;;  %v6237_v14 = vld [vmem:[#allocation5 + $0xc4] sm:$0xf] }
  0x2b   :  { %v5441_v15 = vld [vmem:[#allocation5 + $0xd0] sm:$0xf0]  ;;  %427 = vmatpush.bf16.msra.mxu1 %v5460_v7  ;;  %v5440_v16 = vor.u32 %v6239_v13, %v5439_v11  ;;  %v5447_v18 = vld [vmem:[#allocation5 + $0xc8] sm:$0xf]  ;;  %v6240_v19 = vld [vmem:[#allocation5 + $0xd4] sm:$0xf0] }
  0x2c   :  { %456 = vmatpush.bf16.msra.mxu2 %v5464_v8  ;;  %v5444_v17 = vor.u32 %v6237_v14, %v5441_v15  ;;  %v6238_v20 = vld [vmem:[#allocation5 + $0xcc] sm:$0xf]  ;;  %485 = vmatpush.bf16.msra.mxu3 %v5468_v12  ;;  %v5448_v21 = vor.u32 %v6240_v19, %v5447_v18  ;;  %v5449_v22 = vld [vmem:[#allocation5 + $0xd8] sm:$0xf0]  ;;  %v5423_v23 = vld [vmem:[#allocation5 + $0xa0] sm:$0xf] }
  0x2d   :  { %v6235_v24 = vld [vmem:[#allocation5 + $0xac] sm:$0xf0]  ;;  %v5452_v25 = vor.u32 %v6238_v20, %v5449_v22  ;;  %v6233_v26 = vld [vmem:[#allocation5 + $0xa4] sm:$0xf]  ;;  %v5425_v27 = vld [vmem:[#allocation5 + $0xb0] sm:$0xf0] }
  0x2e   :  { %v5431_v28 = vld [vmem:[#allocation5 + $0xa8] sm:$0xf]  ;;  %399 = vmatpush.bf16.msra.mxu0 %v5440_v16  ;;  %v5424_v29 = vor.u32 %v6235_v24, %v5423_v23  ;;  %v6236_v30 = vld [vmem:[#allocation5 + $0xb4] sm:$0xf0]  ;;  %v6234_v31 = vld [vmem:[#allocation5 + $0xac] sm:$0xf]  ;;  %v5428_v33 = vor.u32 %v6233_v26, %v5425_v27 }
  0x2f   :  { %v5433_v32 = vld [vmem:[#allocation5 + $0xb8] sm:$0xf0]  ;;  %428 = vmatpush.bf16.msra.mxu1 %v5444_v17  ;;  %v5432_v34 = vor.u32 %v6236_v30, %v5431_v28  ;;  %v5407_v35 = vld [vmem:[#allocation5 + $0x80] sm:$0xf]  ;;  %v6231_v36 = vld [vmem:[#allocation5 + $0x8c] sm:$0xf0] }
  0x30   :  { %457 = vmatpush.bf16.msra.mxu2 %v5448_v21  ;;  %v6229_v37 = vld [vmem:[#allocation5 + $0x84] sm:$0xf]  ;;  %486 = vmatpush.bf16.msra.mxu3 %v5452_v25  ;;  %v5436_v38 = vor.u32 %v6234_v31, %v5433_v32  ;;  %v5409_v39 = vld [vmem:[#allocation5 + $0x90] sm:$0xf0]  ;;  %v5415_v40 = vld [vmem:[#allocation5 + $0x88] sm:$0xf]  ;;  %v5408_v44 = vor.u32 %v6231_v36, %v5407_v35 }
  0x31   :  { %v6232_v41 = vld [vmem:[#allocation5 + $0x94] sm:$0xf0]  ;;  %v6230_v42 = vld [vmem:[#allocation5 + $0x8c] sm:$0xf]  ;;  %v5417_v43 = vld [vmem:[#allocation5 + $0x98] sm:$0xf0]  ;;  %v5412_v45 = vor.u32 %v6229_v37, %v5409_v39 }
  0x32   :  { %400 = vmatpush.bf16.msra.mxu0 %v5424_v29  ;;  %v5416_v46 = vor.u32 %v6232_v41, %v5415_v40  ;;  %v5391_v47 = vld [vmem:[#allocation5 + $0x60] sm:$0xf]  ;;  %v6227_v48 = vld [vmem:[#allocation5 + $0x6c] sm:$0xf0]  ;;  %v6225_v49 = vld [vmem:[#allocation5 + $0x64] sm:$0xf]  ;;  %v5420_v50 = vor.u32 %v6230_v42, %v5417_v43 }
  0x33   :  { %429 = vmatpush.bf16.msra.mxu1 %v5428_v33  ;;  %v5393_v51 = vld [vmem:[#allocation5 + $0x70] sm:$0xf0]  ;;  %v5399_v52 = vld [vmem:[#allocation5 + $0x68] sm:$0xf]  ;;  %v6228_v53 = vld [vmem:[#allocation5 + $0x74] sm:$0xf0]  ;;  %v5392_v56 = vor.u32 %v6227_v48, %v5391_v47 }
  0x34   :  { %458 = vmatpush.bf16.msra.mxu2 %v5432_v34  ;;  %487 = vmatpush.bf16.msra.mxu3 %v5436_v38  ;;  %v6226_v54 = vld [vmem:[#allocation5 + $0x6c] sm:$0xf]  ;;  %v5401_v55 = vld [vmem:[#allocation5 + $0x78] sm:$0xf0]  ;;  %v5396_v57 = vor.u32 %v6225_v49, %v5393_v51  ;;  %v5400_v58 = vor.u32 %v6228_v53, %v5399_v52  ;;  %v5375_v59 = vld [vmem:[#allocation5 + $0x40] sm:$0xf] }
  0x35   :  { %v6223_v60 = vld [vmem:[#allocation5 + $0x4c] sm:$0xf0]  ;;  %v6221_v61 = vld [vmem:[#allocation5 + $0x44] sm:$0xf]  ;;  %v5404_v62 = vor.u32 %v6226_v54, %v5401_v55  ;;  %v5377_v63 = vld [vmem:[#allocation5 + $0x50] sm:$0xf0] }
  0x36   :  { %401 = vmatpush.bf16.msra.mxu0 %v5408_v44  ;;  %v5383_v0 = vld [vmem:[#allocation5 + $0x48] sm:$0xf]  ;;  %v6224_v1 = vld [vmem:[#allocation5 + $0x54] sm:$0xf0]  ;;  %v6222_v2 = vld [vmem:[#allocation5 + $0x4c] sm:$0xf]  ;;  %v5376_v4 = vor.u32 %v6223_v60, %v5375_v59  ;;  %v5380_v5 = vor.u32 %v6221_v61, %v5377_v63 }
  0x37   :  { %430 = vmatpush.bf16.msra.mxu1 %v5412_v45  ;;  %v5385_v3 = vld [vmem:[#allocation5 + $0x58] sm:$0xf0]  ;;  %v5384_v6 = vor.u32 %v6224_v1, %v5383_v0  ;;  %v5359_v7 = vld [vmem:[#allocation5 + $0x20] sm:$0xf]  ;;  %v6219_v8 = vld [vmem:[#allocation5 + $0x2c] sm:$0xf0] }
  0x38   :  { %459 = vmatpush.bf16.msra.mxu2 %v5416_v46  ;;  %488 = vmatpush.bf16.msra.mxu3 %v5420_v50  ;;  %v6217_v9 = vld [vmem:[#allocation5 + $0x24] sm:$0xf]  ;;  %v5388_v10 = vor.u32 %v6222_v2, %v5385_v3  ;;  %v5361_v11 = vld [vmem:[#allocation5 + $0x30] sm:$0xf0]  ;;  %v5367_v12 = vld [vmem:[#allocation5 + $0x28] sm:$0xf]  ;;  %v5360_v16 = vor.u32 %v6219_v8, %v5359_v7 }
  0x39   :  { %v6220_v13 = vld [vmem:[#allocation5 + $0x34] sm:$0xf0]  ;;  %v6218_v14 = vld [vmem:[#allocation5 + $0x2c] sm:$0xf]  ;;  %v5369_v15 = vld [vmem:[#allocation5 + $0x38] sm:$0xf0]  ;;  %v5364_v19 = vor.u32 %v6217_v9, %v5361_v11 }
  0x3a   :  { %402 = vmatpush.bf16.msra.mxu0 %v5392_v56  ;;  %v5343_v17 = vld [vmem:[#allocation5] sm:$0xf]  ;;  %v6215_v18 = vld [vmem:[#allocation5 + $0xc] sm:$0xf0]  ;;  %v5368_v20 = vor.u32 %v6220_v13, %v5367_v12  ;;  %v6213_v21 = vld [vmem:[#allocation5 + $0x4] sm:$0xf]  ;;  %v5372_v24 = vor.u32 %v6218_v14, %v5369_v15 }
  0x3b   :  { %431 = vmatpush.bf16.msra.mxu1 %v5396_v57  ;;  %v5345_v22 = vld [vmem:[#allocation5 + $0x10] sm:$0xf0]  ;;  %v5351_v23 = vld [vmem:[#allocation5 + $0x8] sm:$0xf]  ;;  %v6216_v25 = vld [vmem:[#allocation5 + $0x14] sm:$0xf0]  ;;  %v5344_v31 = vor.u32 %v6215_v18, %v5343_v17 }
  0x3c   :  { %460 = vmatpush.bf16.msra.mxu2 %v5400_v58  ;;  %489 = vmatpush.bf16.msra.mxu3 %v5404_v62  ;;  %v6214_v26 = vld [vmem:[#allocation5 + $0xc] sm:$0xf]  ;;  %v5353_v27 = vld [vmem:[#allocation5 + $0x18] sm:$0xf0]  ;;  %v181_v28 = vld [vmem:[#allocation2] sm:$0xff]  ;;  %v5348_v35 = vor.u32 %v6213_v21, %v5345_v22  ;;  %v5352_v36 = vor.u32 %v6216_v25, %v5351_v23  ;;  %s5327_s14 = sshll.u32 %s9564_s12, 4  ;;  %s5328_s14 = int_to_ptr.hbm [resolvable:$true] %s5327_s14 }
  0x3d   :  { %v5583_v29 = vld [vmem:[#allocation7 + $0xe0] sm:$0xf]  ;;  %v6275_v30 = vld [vmem:[#allocation7 + $0xec] sm:$0xf0]  ;;  %v182_v32 = vld [vmem:[#allocation2 + $0x8] sm:$0xff]  ;;  %v5356_v38 = vor.u32 %v6214_v26, %v5353_v27 }
  0x3e   :  { %403 = vmatpush.bf16.msra.mxu0 %v5376_v4  ;;  %v6273_v33 = vld [vmem:[#allocation7 + $0xe4] sm:$0xf]  ;;  %v5585_v34 = vld [vmem:[#allocation7 + $0xf0] sm:$0xf0]  ;;  %v6274_v37 = vld [vmem:[#allocation7 + $0xec] sm:$0xf]  ;;  %v7200_v39 = vor.u32 %v6275_v30, %v5583_v29  ;;  %v192_v42 = vpack.c.bf16 %v182_v32, %v181_v28 }
  0x3f   :  { %432 = vmatpush.bf16.msra.mxu1 %v5380_v5  ;;  %v5591_v40 = vld [vmem:[#allocation7 + $0xe8] sm:$0xf]  ;;  %v6276_v41 = vld [vmem:[#allocation7 + $0xf4] sm:$0xf0]  ;;  %v7202_v43 = vor.u32 %v6273_v33, %v5585_v34  ;;  %v5593_v44 = vld [vmem:[#allocation7 + $0xf8] sm:$0xf0] }
  0x40   :  { %461 = vmatpush.bf16.msra.mxu2 %v5384_v6  ;;  %490 = vmatpush.bf16.msra.mxu3 %v5388_v10  ;;  %9954 = vst [vmem:[#allocation24_spill] sm:$0xff] %v7200_v39  ;;  %v5567_v45 = vld [vmem:[#allocation7 + $0xc0] sm:$0xf]  ;;  %v6271_v46 = vld [vmem:[#allocation7 + $0xcc] sm:$0xf0]  ;;  %v7204_v49 = vor.u32 %v6276_v41, %v5591_v40  ;;  %v7207_v50 = vor.u32 %v6274_v37, %v5593_v44 }
  0x41   :  { %9955 = vst [vmem:[#allocation25_spill] sm:$0xff] %v7202_v43  ;;  %v6269_v47 = vld [vmem:[#allocation7 + $0xc4] sm:$0xf]  ;;  %v5569_v48 = vld [vmem:[#allocation7 + $0xd0] sm:$0xf0]  ;;  %v7209_v51 = vor.u32 %v6271_v46, %v5567_v45 }
  0x42   :  { %404 = vmatpush.bf16.msra.mxu0 %v5360_v16  ;;  %9956 = vst [vmem:[#allocation26_spill] sm:$0xff] %v7204_v49  ;;  %v6270_v52 = vld [vmem:[#allocation7 + $0xcc] sm:$0xf]  ;;  %v7212_v53 = vor.u32 %v6269_v47, %v5569_v48  ;;  %v5577_v54 = vld [vmem:[#allocation7 + $0xd8] sm:$0xf0]  ;;  %v183_v10 = vld [vmem:[#allocation2 + $0x10] sm:$0xff] }
  0x43   :  { %433 = vmatpush.bf16.msra.mxu1 %v5364_v19  ;;  %9957 = vst [vmem:[#allocation27_spill] sm:$0xff] %v7207_v50  ;;  %v5551_v55 = vld [vmem:[#allocation7 + $0xa0] sm:$0xf]  ;;  %v6267_v56 = vld [vmem:[#allocation7 + $0xac] sm:$0xf0]  ;;  %v7217_v60 = vor.u32 %v6270_v52, %v5577_v54 }
  0x44   :  { %462 = vmatpush.bf16.msra.mxu2 %v5368_v20  ;;  %491 = vmatpush.bf16.msra.mxu3 %v5372_v24  ;;  %9958 = vst [vmem:[#allocation28_spill] sm:$0xff] %v7209_v51  ;;  %v6265_v57 = vld [vmem:[#allocation7 + $0xa4] sm:$0xf]  ;;  %v5553_v58 = vld [vmem:[#allocation7 + $0xb0] sm:$0xf0]  ;;  %v7219_v61 = vor.u32 %v6267_v56, %v5551_v55  ;;  %v184_v20 = vld [vmem:[#allocation2 + $0x18] sm:$0xff] }
  0x45   :  { %9959 = vst [vmem:[#allocation29_spill] sm:$0xff] %v7212_v53  ;;  %v5575_v59 = vld [vmem:[#allocation7 + $0xc8] sm:$0xf]  ;;  %v6266_v62 = vld [vmem:[#allocation7 + $0xac] sm:$0xf]  ;;  %v7222_v1 = vor.u32 %v6265_v57, %v5553_v58  ;;  %v193_v26 = vpack.c.bf16 %v184_v20, %v183_v10 }
  0x46   :  { %405 = vmatpush.bf16.msra.mxu0 %v5344_v31  ;;  %9960 = vst [vmem:[#allocation30_spill] sm:$0xff] %v7217_v60  ;;  %v5561_v63 = vld [vmem:[#allocation7 + $0xb8] sm:$0xf0]  ;;  %v6272_v0 = vld [vmem:[#allocation7 + $0xd4] sm:$0xf0] }
  0x47   :  { %434 = vmatpush.bf16.msra.mxu1 %v5348_v35  ;;  %9961 = vst [vmem:[#allocation31_spill] sm:$0xff] %v7219_v61  ;;  %v7224_v2 = vor.u32 %v6272_v0, %v5575_v59  ;;  %v5535_v3 = vld [vmem:[#allocation7 + $0x80] sm:$0xf]  ;;  %v6263_v4 = vld [vmem:[#allocation7 + $0x8c] sm:$0xf0]  ;;  %v7231_v11 = vor.u32 %v6266_v62, %v5561_v63  ;;  %v186_v0 = vld [vmem:[#allocation2 + $0x28] sm:$0xff] }
  0x48   :  { %463 = vmatpush.bf16.msra.mxu2 %v5352_v36  ;;  %492 = vmatpush.bf16.msra.mxu3 %v5356_v38  ;;  %9962 = vst [vmem:[#allocation32_spill] sm:$0xff] %v7222_v1  ;;  %v5559_v5 = vld [vmem:[#allocation7 + $0xa8] sm:$0xf]  ;;  %v6261_v6 = vld [vmem:[#allocation7 + $0x84] sm:$0xf]  ;;  %v7233_v12 = vor.u32 %v6263_v4, %v5535_v3 }
  0x49   :  { %406 = vmatmul.bf16.vlgmr.msra.gmra.mxu0 %v192_v42  ;;  %9963 = vst [vmem:[#allocation33_spill] sm:$0xff] %v7224_v2  ;;  %v5537_v7 = vld [vmem:[#allocation7 + $0x90] sm:$0xf0]  ;;  %v6268_v8 = vld [vmem:[#allocation7 + $0xb4] sm:$0xf0]  ;;  %v185_v63 = vld [vmem:[#allocation2 + $0x20] sm:$0xff] }
  0x4a   :  { %854 = vmatpush.bf16.msrb.mxu0 %v7200_v39  ;;  %435 = vmatmul.bf16.vlgmr.msra.gmra.mxu1 %v192_v42  ;;  %v7227_v9 = vor.u32 %v6268_v8, %v5559_v5  ;;  %9965 = vst [vmem:[#allocation35_spill] sm:$0xff] %v7231_v11  ;;  %v6262_v13 = vld [vmem:[#allocation7 + $0x8c] sm:$0xf]  ;;  %v5543_v14 = vld [vmem:[#allocation7 + $0x88] sm:$0xf]  ;;  %v7236_v16 = vor.u32 %v6261_v6, %v5537_v7 }
  0x4b   :  { %867 = vmatpush.bf16.msrb.mxu1 %v7202_v43  ;;  %464 = vmatmul.bf16.vlgmr.msra.gmra.mxu2 %v192_v42  ;;  %9966 = vst [vmem:[#allocation36_spill] sm:$0xff] %v7233_v12  ;;  %v6264_v15 = vld [vmem:[#allocation7 + $0x94] sm:$0xf0]  ;;  %v5545_v17 = vld [vmem:[#allocation7 + $0x98] sm:$0xf0] }
  0x4c   :  { %493 = vmatmul.bf16.vlgmr.msra.gmra.mxu3 %v192_v42  ;;  %880 = vmatpush.bf16.msrb.mxu2 %v7204_v49  ;;  %9964 = vst [vmem:[#allocation34_spill] sm:$0xff] %v7227_v9  ;;  %v5519_v18 = vld [vmem:[#allocation7 + $0x60] sm:$0xf]  ;;  %v6259_v19 = vld [vmem:[#allocation7 + $0x6c] sm:$0xf0]  ;;  %v7239_v23 = vor.u32 %v6264_v15, %v5543_v14  ;;  %v7243_v24 = vor.u32 %v6262_v13, %v5545_v17 }
  0x4d   :  { %893 = vmatpush.bf16.msrb.mxu3 %v7207_v50  ;;  %9967 = vst [vmem:[#allocation37_spill] sm:$0xff] %v7236_v16  ;;  %v6257_v21 = vld [vmem:[#allocation7 + $0x64] sm:$0xf]  ;;  %v5521_v22 = vld [vmem:[#allocation7 + $0x70] sm:$0xf0]  ;;  %v7245_v25 = vor.u32 %v6259_v19, %v5519_v18 }
  0x4e   :  { %855 = vmatpush.bf16.msrb.mxu0 %v7209_v51  ;;  %9968 = vst [vmem:[#allocation38_spill] sm:$0xff] %v7239_v23  ;;  %v7248_v27 = vor.u32 %v6257_v21, %v5521_v22  ;;  %v5527_v28 = vld [vmem:[#allocation7 + $0x68] sm:$0xf]  ;;  %v6260_v29 = vld [vmem:[#allocation7 + $0x74] sm:$0xf0]  ;;  %v194_v21 = vpack.c.bf16 %v186_v0, %v185_v63 }
  0x4f   :  { %868 = vmatpush.bf16.msrb.mxu1 %v7212_v53  ;;  %9969 = vst [vmem:[#allocation39_spill] sm:$0xff] %v7243_v24  ;;  %v6258_v30 = vld [vmem:[#allocation7 + $0x6c] sm:$0xf]  ;;  %v7254_v31 = vor.u32 %v6260_v29, %v5527_v28  ;;  %v5529_v32 = vld [vmem:[#allocation7 + $0x78] sm:$0xf0] }
  0x50   :  { %881 = vmatpush.bf16.msrb.mxu2 %v7224_v2  ;;  %9970 = vst [vmem:[#allocation40_spill] sm:$0xff] %v7245_v25  ;;  %v7256_v33 = vor.u32 %v6258_v30, %v5529_v32  ;;  %v5503_v34 = vld [vmem:[#allocation7 + $0x40] sm:$0xf]  ;;  %v6255_v35 = vld [vmem:[#allocation7 + $0x4c] sm:$0xf0]  ;;  %v188_v28 = vld [vmem:[#allocation2 + $0x38] sm:$0xff] }
  0x51   :  { %894 = vmatpush.bf16.msrb.mxu3 %v7217_v60  ;;  %9971 = vst [vmem:[#allocation41_spill] sm:$0xff] %v7248_v27  ;;  %v6253_v36 = vld [vmem:[#allocation7 + $0x44] sm:$0xf]  ;;  %v7259_v37 = vor.u32 %v6255_v35, %v5503_v34  ;;  %v5505_v38 = vld [vmem:[#allocation7 + $0x50] sm:$0xf0]  ;;  %v9565_v30 = vmov 0  }
  0x52   :  { %856 = vmatpush.bf16.msrb.mxu0 %v7219_v61  ;;  %9972 = vst [vmem:[#allocation42_spill] sm:$0xff] %v7254_v31  ;;  %v5511_v40 = vld [vmem:[#allocation7 + $0x48] sm:$0xf]  ;;  %v6256_v41 = vld [vmem:[#allocation7 + $0x54] sm:$0xf0]  ;;  %v7262_v42 = vor.u32 %v6253_v36, %v5505_v38 }
  0x53   :  { %869 = vmatpush.bf16.msrb.mxu1 %v7222_v1  ;;  %9973 = vst [vmem:[#allocation43_spill] sm:$0xff] %v7256_v33  ;;  %v7264_v44 = vor.u32 %v6256_v41, %v5511_v40  ;;  %v6254_v45 = vld [vmem:[#allocation7 + $0x4c] sm:$0xf]  ;;  %v5513_v46 = vld [vmem:[#allocation7 + $0x58] sm:$0xf0] }
  0x54   :  { %882 = vmatpush.bf16.msrb.mxu2 %v7227_v9  ;;  %9974 = vst [vmem:[#allocation44_spill] sm:$0xff] %v7259_v37  ;;  %v5487_v47 = vld [vmem:[#allocation7 + $0x20] sm:$0xf]  ;;  %v7267_v48 = vor.u32 %v6254_v45, %v5513_v46  ;;  %v6251_v52 = vld [vmem:[#allocation7 + $0x2c] sm:$0xf0] }
  0x55   :  { %895 = vmatpush.bf16.msrb.mxu3 %v7231_v11  ;;  %9975 = vst [vmem:[#allocation45_spill] sm:$0xff] %v7262_v42  ;;  %v6249_v54 = vld [vmem:[#allocation7 + $0x24] sm:$0xf]  ;;  %v5489_v55 = vld [vmem:[#allocation7 + $0x30] sm:$0xf0]  ;;  %v7270_v56 = vor.u32 %v6251_v52, %v5487_v47 }
  0x56   :  { %857 = vmatpush.bf16.msrb.mxu0 %v7233_v12  ;;  %9976 = vst [vmem:[#allocation46_spill] sm:$0xff] %v7264_v44  ;;  %v7272_v57 = vor.u32 %v6249_v54, %v5489_v55  ;;  %v5495_v58 = vld [vmem:[#allocation7 + $0x28] sm:$0xf]  ;;  %v6252_v59 = vld [vmem:[#allocation7 + $0x34] sm:$0xf0] }
  0x57   :  { %870 = vmatpush.bf16.msrb.mxu1 %v7236_v16  ;;  %9977 = vst [vmem:[#allocation47_spill] sm:$0xff] %v7267_v48  ;;  %v6250_v62 = vld [vmem:[#allocation7 + $0x2c] sm:$0xf]  ;;  %v7275_v3 = vor.u32 %v6252_v59, %v5495_v58  ;;  %v5497_v4 = vld [vmem:[#allocation7 + $0x38] sm:$0xf0] }
  0x58   :  { %883 = vmatpush.bf16.msrb.mxu2 %v7239_v23  ;;  %9978 = vst [vmem:[#allocation48_spill] sm:$0xff] %v7270_v56  ;;  %v5471_v5 = vld [vmem:[#allocation7] sm:$0xf]  ;;  %v6247_v6 = vld [vmem:[#allocation7 + $0xc] sm:$0xf0]  ;;  %v7278_v7 = vor.u32 %v6250_v62, %v5497_v4 }
  0x59   :  { %896 = vmatpush.bf16.msrb.mxu3 %v7243_v24  ;;  %411 = vmatmul.bf16.gmra.mxu0 %v193_v26  ;;  %9979 = vst [vmem:[#allocation49_spill] sm:$0xff] %v7272_v57  ;;  %v6245_v8 = vld [vmem:[#allocation7 + $0x4] sm:$0xf]  ;;  %v5473_v10 = vld [vmem:[#allocation7 + $0x10] sm:$0xf0]  ;;  %v7281_v14 = vor.u32 %v6247_v6, %v5471_v5 }
  0x5a   :  { %858 = vmatpush.bf16.msrb.mxu0 %v7245_v25  ;;  %440 = vmatmul.bf16.gmra.mxu1 %v193_v26  ;;  %9980 = vst [vmem:[#allocation50_spill] sm:$0xff] %v7275_v3  ;;  %v5479_v13 = vld [vmem:[#allocation7 + $0x8] sm:$0xf]  ;;  %v6248_v15 = vld [vmem:[#allocation7 + $0x14] sm:$0xf0]  ;;  %v7284_v19 = vor.u32 %v6245_v8, %v5473_v10 }
  0x5b   :  { %871 = vmatpush.bf16.msrb.mxu1 %v7248_v27  ;;  %469 = vmatmul.bf16.gmra.mxu2 %v193_v26  ;;  %9981 = vst [vmem:[#allocation51_spill] sm:$0xff] %v7278_v7  ;;  %v6246_v17 = vld [vmem:[#allocation7 + $0xc] sm:$0xf]  ;;  %v5481_v18 = vld [vmem:[#allocation7 + $0x18] sm:$0xf0]  ;;  %v7287_v20 = vor.u32 %v6248_v15, %v5479_v13 }
  0x5c   :  { %498 = vmatmul.bf16.gmra.mxu3 %v193_v26  ;;  %884 = vmatpush.bf16.msrb.mxu2 %v7254_v31  ;;  %9982 = vst [vmem:[#allocation52_spill] sm:$0xff] %v7281_v14  ;;  %v7290_v22 = vor.u32 %v6246_v17, %v5481_v18  ;;  %v187_v26 = vld [vmem:[#allocation2 + $0x30] sm:$0xff]  ;;  %v228_v41 = vld [vmem:[#allocation8] sm:$0xf] }
  0x5d   :  { %897 = vmatpush.bf16.msrb.mxu3 %v7256_v33  ;;  %9983 = vst [vmem:[#allocation53_spill] sm:$0xff] %v7284_v19  ;;  %v195_v29 = vpack.c.bf16 %v188_v28, %v187_v26  ;;  %v7344_v45 = vperm.slane %v228_v41, 0  ;;  %v7348_v47 = vperm.slane %v228_v41, 1  ;;  %v7358_v62 = vperm.slane %v228_v41, 2 }
  0x5e   :  { %859 = vmatpush.bf16.msrb.mxu0 %v7259_v37  ;;  %9984 = vst [vmem:[#allocation54_spill] sm:$0xff] %v7287_v20  ;;  %v7360_v63 = vperm.slane %v228_v41, 3 }
  0x5f   :  { %872 = vmatpush.bf16.msrb.mxu1 %v7262_v42  ;;  %9985 = vst [vmem:[#allocation55_spill] sm:$0xff] %v7290_v22 }
  0x60   :  { %885 = vmatpush.bf16.msrb.mxu2 %v7264_v44  ;;  %9988 = vst [vmem:[#allocation58_spill] sm:$0xff] %v7344_v45 }
  0x61   :  { %898 = vmatpush.bf16.msrb.mxu3 %v7267_v48  ;;  %9990 = vst [vmem:[#allocation60_spill] sm:$0xff] %v7348_v47 }
  0x62   :  { %860 = vmatpush.bf16.msrb.mxu0 %v7270_v56  ;;  %9994 = vst [vmem:[#allocation64_spill] sm:$0xff] %v7358_v62 }
  0x63   :  { %873 = vmatpush.bf16.msrb.mxu1 %v7272_v57  ;;  %9995 = vst [vmem:[#allocation65_spill] sm:$0xff] %v7360_v63 }
  0x64   :  { %886 = vmatpush.bf16.msrb.mxu2 %v7275_v3 }
  0x65   :  { %899 = vmatpush.bf16.msrb.mxu3 %v7278_v7 }
  0x66   :  { %861 = vmatpush.bf16.msrb.mxu0 %v7281_v14 }
  0x67   :  { %874 = vmatpush.bf16.msrb.mxu1 %v7284_v19 }
  0x68   :  { %887 = vmatpush.bf16.msrb.mxu2 %v7287_v20 }
  0x69   :  { %416 = vmatmul.bf16.gmra.mxu0 %v194_v21  ;;  %900 = vmatpush.bf16.msrb.mxu3 %v7290_v22 }
  0x6a   :  { %974 = vmatpush.bf16.msra.mxu0 %v7200_v39  ;;  %445 = vmatmul.bf16.gmra.mxu1 %v194_v21 }
  0x6b   :  { %987 = vmatpush.bf16.msra.mxu1 %v7202_v43  ;;  %474 = vmatmul.bf16.gmra.mxu2 %v194_v21 }
  0x6c   :  { %503 = vmatmul.bf16.gmra.mxu3 %v194_v21  ;;  %1000 = vmatpush.bf16.msra.mxu2 %v7204_v49 }
  0x6d   :  { %1013 = vmatpush.bf16.msra.mxu3 %v7207_v50 }
  0x6e   :  { %975 = vmatpush.bf16.msra.mxu0 %v7209_v51 }
  0x6f   :  { %988 = vmatpush.bf16.msra.mxu1 %v7212_v53 }
  0x70   :  { %1001 = vmatpush.bf16.msra.mxu2 %v7224_v2 }
  0x71   :  { %1014 = vmatpush.bf16.msra.mxu3 %v7217_v60 }
  0x72   :  { %976 = vmatpush.bf16.msra.mxu0 %v7219_v61 }
  0x73   :  { %989 = vmatpush.bf16.msra.mxu1 %v7222_v1 }
  0x74   :  { %1002 = vmatpush.bf16.msra.mxu2 %v7227_v9 }
  0x75   :  { %1015 = vmatpush.bf16.msra.mxu3 %v7231_v11 }
  0x76   :  { %977 = vmatpush.bf16.msra.mxu0 %v7233_v12 }
  0x77   :  { %990 = vmatpush.bf16.msra.mxu1 %v7236_v16 }
  0x78   :  { %1003 = vmatpush.bf16.msra.mxu2 %v7239_v23 }
  0x79   :  { %1016 = vmatpush.bf16.msra.mxu3 %v7243_v24  ;;  %421 = vmatmul.bf16.gmra.mxu0 %v195_v29 }
  0x7a   :  { %978 = vmatpush.bf16.msra.mxu0 %v7245_v25  ;;  %450 = vmatmul.bf16.gmra.mxu1 %v195_v29 }
  0x7b   :  { %991 = vmatpush.bf16.msra.mxu1 %v7248_v27  ;;  %479 = vmatmul.bf16.gmra.mxu2 %v195_v29 }
  0x7c   :  { %508 = vmatmul.bf16.gmra.mxu3 %v195_v29  ;;  %1004 = vmatpush.bf16.msra.mxu2 %v7254_v31 }
  0x7d   :  { %1017 = vmatpush.bf16.msra.mxu3 %v7256_v33 }
  0x7e   :  { %979 = vmatpush.bf16.msra.mxu0 %v7259_v37 }
  0x7f   :  { %992 = vmatpush.bf16.msra.mxu1 %v7262_v42 }
  0x80   :  { %1005 = vmatpush.bf16.msra.mxu2 %v7264_v44 }
  0x81   :  { %1018 = vmatpush.bf16.msra.mxu3 %v7267_v48 }
  0x82   :  { %980 = vmatpush.bf16.msra.mxu0 %v7270_v56 }
  0x83   :  { %993 = vmatpush.bf16.msra.mxu1 %v7272_v57 }
  0x84   :  { %1006 = vmatpush.bf16.msra.mxu2 %v7275_v3 }
  0x85   :  { %1019 = vmatpush.bf16.msra.mxu3 %v7278_v7 }
  0x86   :  { %981 = vmatpush.bf16.msra.mxu0 %v7281_v14 }
  0x87   :  { %994 = vmatpush.bf16.msra.mxu1 %v7284_v19 }
  0x88   :  { %1007 = vmatpush.bf16.msra.mxu2 %v7287_v20 }
  0x89   :  { %1020 = vmatpush.bf16.msra.mxu3 %v7290_v22  ;;  %862 = vmatmul.bf16.vlgmr.msrb.gmra.mxu0 %v9565_v30 }
  0x8a   :  { %875 = vmatmul.bf16.vlgmr.msrb.gmra.mxu1 %v9565_v30 }
  0x8b   :  { %888 = vmatmul.bf16.vlgmr.msrb.gmra.mxu2 %v9565_v30 }
  0x8c   :  { %901 = vmatmul.bf16.vlgmr.msrb.gmra.mxu3 %v9565_v30 }
  0xc6   :  { %v7332_v32 = vpop.f32.mrf.mxu0 }
  0xc7   :  { %v7334_v34 = vpop.f32.mrf.mxu1 }
  0xce   :  { %v7336_v35 = vpop.f32.mrf.mxu2  ;;  %v7340_v38 = vpop.f32.mrf.mxu0 }
  0xcf   :  { %v7338_v36 = vpop.f32.mrf.mxu3  ;;  %9986 = vst [vmem:[#allocation56_spill] sm:$0xff] %v7340_v38  ;;  %v7342_v40 = vpop.f32.mrf.mxu1 }
  0xd0   :  { %9987 = vst [vmem:[#allocation57_spill] sm:$0xff] %v7342_v40 }
  0xd6   :  { %v7346_v46 = vpop.f32.mrf.mxu2  ;;  %v412_v54 = vpop.f32.mrf.mxu0 }
  0xd7   :  { %9989 = vst [vmem:[#allocation59_spill] sm:$0xff] %v7346_v46  ;;  %v7350_v52 = vpop.f32.mrf.mxu3  ;;  %v7353_v55 = vadd.f32 %v412_v54, %v7344_v45  ;;  %v441_v58 = vpop.f32.mrf.mxu1  ;;  %v5669_v46 = vld [vmem:[#allocation11 + $0x80] sm:$0xf] }
  0xd8   :  { %9991 = vst [vmem:[#allocation61_spill] sm:$0xff] %v7350_v52  ;;  %v7356_v59 = vadd.f32 %v441_v58, %v7348_v47  ;;  %v408_v52 = vadd.f32 %v7332_v32, %v7344_v45  ;;  %v6326_v32 = vld [vmem:[#allocation11 + $0x8c] sm:$0xf] }
  0xd9   :  { %9992 = vst [vmem:[#allocation62_spill] sm:$0xff] %v7353_v55 }
  0xda   :  { %9993 = vst [vmem:[#allocation63_spill] sm:$0xff] %v7356_v59  ;;  %v5711_v59 = vld [vmem:[#allocation11 + $0xd8] sm:$0xf0] }
  0xde   :  { %v470_v0 = vpop.f32.mrf.mxu2  ;;  %v7365_v6 = vpop.f32.mrf.mxu0 }
  0xdf   :  { %v7363_v4 = vadd.f32 %v470_v0, %v7358_v62  ;;  %v499_v5 = vpop.f32.mrf.mxu3  ;;  %9997 = vst [vmem:[#allocation67_spill] sm:$0xff] %v7365_v6  ;;  %v7370_v10 = vpop.f32.mrf.mxu1 }
  0xe0   :  { %v7368_v8 = vadd.f32 %v499_v5, %v7360_v63  ;;  %9999 = vst [vmem:[#allocation69_spill] sm:$0xff] %v7370_v10  ;;  %v5727_v10 = vld [vmem:[#allocation11 + $0xf8] sm:$0xf0] }
  0xe1   :  { %9996 = vst [vmem:[#allocation66_spill] sm:$0xff] %v7363_v4 }
  0xe2   :  { %9998 = vst [vmem:[#allocation68_spill] sm:$0xff] %v7368_v8  ;;  %v6334_v8 = vld [vmem:[#allocation11 + $0xcc] sm:$0xf] }
  0xe6   :  { %v7372_v13 = vpop.f32.mrf.mxu2  ;;  %v417_v17 = vpop.f32.mrf.mxu0 }
  0xe7   :  { %10000 = vst [vmem:[#allocation70_spill] sm:$0xff] %v7372_v13  ;;  %v7374_v15 = vpop.f32.mrf.mxu3  ;;  %v7377_v18 = vadd.f32 %v417_v17, %v7344_v45  ;;  %v446_v21 = vpop.f32.mrf.mxu1 }
  0xe8   :  { %10001 = vst [vmem:[#allocation71_spill] sm:$0xff] %v7374_v15  ;;  %v7380_v26 = vadd.f32 %v446_v21, %v7348_v47 }
  0xe9   :  { %10002 = vst [vmem:[#allocation72_spill] sm:$0xff] %v7377_v18  ;;  %v6339_v18 = vld [vmem:[#allocation11 + $0xec] sm:$0xf0] }
  0xea   :  { %10003 = vst [vmem:[#allocation73_spill] sm:$0xff] %v7380_v26 }
  0xee   :  { %v475_v28 = vpop.f32.mrf.mxu2  ;;  %v7385_v54 = vpop.f32.mrf.mxu0 }
  0xef   :  { %v7383_v29 = vadd.f32 %v475_v28, %v7358_v62  ;;  %v504_v41 = vpop.f32.mrf.mxu3  ;;  %10005 = vst [vmem:[#allocation75_spill] sm:$0xff] %v7385_v54  ;;  %v7390_v0 = vpop.f32.mrf.mxu1  ;;  %v6337_v54 = vld [vmem:[#allocation11 + $0xe4] sm:$0xf] }
  0xf0   :  { %v7388_v58 = vadd.f32 %v504_v41, %v7360_v63  ;;  %10007 = vst [vmem:[#allocation77_spill] sm:$0xff] %v7390_v0  ;;  %v5719_v41 = vld [vmem:[#allocation11 + $0xf0] sm:$0xf0]  ;;  %v6340_v0 = vld [vmem:[#allocation11 + $0xf4] sm:$0xf0] }
  0xf1   :  { %10004 = vst [vmem:[#allocation74_spill] sm:$0xff] %v7383_v29  ;;  %v5717_v29 = vld [vmem:[#allocation11 + $0xe0] sm:$0xf]  ;;  %v7404_v15 = vor.u32 %v6337_v54, %v5719_v41  ;;  %v6336_v41 = vld [vmem:[#allocation11 + $0xd4] sm:$0xf0] }
  0xf2   :  { %10006 = vst [vmem:[#allocation76_spill] sm:$0xff] %v7388_v58  ;;  %v7402_v13 = vor.u32 %v6339_v18, %v5717_v29  ;;  %v5725_v58 = vld [vmem:[#allocation11 + $0xe8] sm:$0xf]  ;;  %v6335_v18 = vld [vmem:[#allocation11 + $0xcc] sm:$0xf0] }
  0xf3   :  { %10013 = vst [vmem:[#allocation83_spill] sm:$0xff] %v7404_v15  ;;  %1266 = vmatpush.bf16.msrb.mxu1 %v7404_v15  ;;  %v6333_v29 = vld [vmem:[#allocation11 + $0xc4] sm:$0xf] }
  0xf4   :  { %10012 = vst [vmem:[#allocation82_spill] sm:$0xff] %v7402_v13  ;;  %1253 = vmatpush.bf16.msrb.mxu0 %v7402_v13 }
  0xf6   :  { %v7392_v5 = vpop.f32.mrf.mxu2  ;;  %v422_v30 = vpop.f32.mrf.mxu0 }
  0xf7   :  { %10008 = vst [vmem:[#allocation78_spill] sm:$0xff] %v7392_v5  ;;  %v7394_v17 = vpop.f32.mrf.mxu3  ;;  %v7397_v21 = vadd.f32 %v422_v30, %v7344_v45  ;;  %v451_v26 = vpop.f32.mrf.mxu1  ;;  %v7406_v5 = vor.u32 %v6340_v0, %v5725_v58  ;;  %v5703_v58 = vld [vmem:[#allocation11 + $0xd0] sm:$0xf0]  ;;  %v5709_v0 = vld [vmem:[#allocation11 + $0xc8] sm:$0xf] }
  0xf8   :  { %10009 = vst [vmem:[#allocation79_spill] sm:$0xff] %v7394_v17  ;;  %v7400_v28 = vadd.f32 %v451_v26, %v7348_v47  ;;  %v6338_v17 = vld [vmem:[#allocation11 + $0xec] sm:$0xf]  ;;  %v5701_v26 = vld [vmem:[#allocation11 + $0xc0] sm:$0xf]  ;;  %v7421_v6 = vor.u32 %v6333_v29, %v5703_v58  ;;  %v7423_v4 = vor.u32 %v6336_v41, %v5709_v0 }
  0xf9   :  { %10010 = vst [vmem:[#allocation80_spill] sm:$0xff] %v7397_v21  ;;  %v7409_v30 = vor.u32 %v6338_v17, %v5727_v10  ;;  %1279 = vmatpush.bf16.msrb.mxu2 %v7406_v5  ;;  %v7414_v54 = vor.u32 %v6335_v18, %v5701_v26  ;;  %v7431_v18 = vor.u32 %v6334_v8, %v5711_v59  ;;  %v6331_v29 = vld [vmem:[#allocation11 + $0xac] sm:$0xf0]  ;;  %v6329_v58 = vld [vmem:[#allocation11 + $0xa4] sm:$0xf] }
  0xfa   :  { %10011 = vst [vmem:[#allocation81_spill] sm:$0xff] %v7400_v28  ;;  %1267 = vmatpush.bf16.msrb.mxu1 %v7421_v6  ;;  %v5687_v41 = vld [vmem:[#allocation11 + $0xb0] sm:$0xf0]  ;;  %v6330_v59 = vld [vmem:[#allocation11 + $0xac] sm:$0xf] }
  0xfb   :  { %10014 = vst [vmem:[#allocation84_spill] sm:$0xff] %v7406_v5  ;;  %1292 = vmatpush.bf16.msrb.mxu3 %v7409_v30  ;;  %1254 = vmatpush.bf16.msrb.mxu0 %v7414_v54  ;;  %v5695_v8 = vld [vmem:[#allocation11 + $0xb8] sm:$0xf0] }
  0xfc   :  { %10015 = vst [vmem:[#allocation85_spill] sm:$0xff] %v7409_v30  ;;  %v5679_v45 = vld [vmem:[#allocation11 + $0x98] sm:$0xf0] }
  0xfd   :  { %10016 = vst [vmem:[#allocation86_spill] sm:$0xff] %v7414_v54  ;;  %1280 = vmatpush.bf16.msrb.mxu2 %v7423_v4 }
  0xfe   :  { %v480_v28 = vpop.f32.mrf.mxu2  ;;  %v7419_v17 = vpop.f32.mrf.mxu0  ;;  %10019 = vst [vmem:[#allocation89_spill] sm:$0xff] %v7421_v6 }
  0xff   :  { %v7417_v21 = vadd.f32 %v480_v28, %v7358_v62  ;;  %v509_v10 = vpop.f32.mrf.mxu3  ;;  %10018 = vst [vmem:[#allocation88_spill] sm:$0xff] %v7419_v17  ;;  %v7428_v26 = vpop.f32.mrf.mxu1  ;;  %v5685_v28 = vld [vmem:[#allocation11 + $0xa0] sm:$0xf]  ;;  %1293 = vmatpush.bf16.msrb.mxu3 %v7431_v18  ;;  %v6332_v17 = vld [vmem:[#allocation11 + $0xb4] sm:$0xf0] }
 0x100   :  { %10020 = vst [vmem:[#allocation90_spill] sm:$0xff] %v7423_v4  ;;  %v7426_v55 = vadd.f32 %v509_v10, %v7360_v63  ;;  %v7436_v0 = vor.u32 %v6331_v29, %v5685_v28  ;;  %v5693_v10 = vld [vmem:[#allocation11 + $0xa8] sm:$0xf]  ;;  %v6327_v28 = vld [vmem:[#allocation11 + $0x8c] sm:$0xf0] }
 0x101   :  { %10017 = vst [vmem:[#allocation87_spill] sm:$0xff] %v7417_v21  ;;  %v7438_v21 = vor.u32 %v6329_v58, %v5687_v41  ;;  %v6325_v29 = vld [vmem:[#allocation11 + $0x84] sm:$0xf]  ;;  %v5671_v41 = vld [vmem:[#allocation11 + $0x90] sm:$0xf0] }
 0x102   :  { %10021 = vst [vmem:[#allocation91_spill] sm:$0xff] %v7426_v55  ;;  %1255 = vmatpush.bf16.msrb.mxu0 %v7436_v0  ;;  %v7443_v55 = vor.u32 %v6330_v59, %v5695_v8  ;;  %v6328_v59 = vld [vmem:[#allocation11 + $0x94] sm:$0xf0]  ;;  %v437_v8 = vadd.f32 %v7334_v34, %v7348_v47  ;;  %v5653_v34 = vld [vmem:[#allocation11 + $0x60] sm:$0xf] }
 0x103   :  { %10022 = vst [vmem:[#allocation92_spill] sm:$0xff] %v7428_v26  ;;  %v7440_v26 = vor.u32 %v6332_v17, %v5693_v10  ;;  %1268 = vmatpush.bf16.msrb.mxu1 %v7438_v21  ;;  %v7452_v17 = vor.u32 %v6327_v28, %v5669_v46  ;;  %v5677_v10 = vld [vmem:[#allocation11 + $0x88] sm:$0xf]  ;;  %v7463_v46 = vor.u32 %v6326_v32, %v5679_v45  ;;  %v6321_v47 = vld [vmem:[#allocation11 + $0x64] sm:$0xf] }
 0x104   :  { %10023 = vst [vmem:[#allocation93_spill] sm:$0xff] %v7431_v18  ;;  %1294 = vmatpush.bf16.msrb.mxu3 %v7443_v55  ;;  %v6324_v45 = vld [vmem:[#allocation11 + $0x74] sm:$0xf0]  ;;  %v6322_v32 = vld [vmem:[#allocation11 + $0x6c] sm:$0xf] }
 0x105   :  { %10024 = vst [vmem:[#allocation94_spill] sm:$0xff] %v7436_v0  ;;  %1281 = vmatpush.bf16.msrb.mxu2 %v7440_v26 }
 0x106   :  { %10025 = vst [vmem:[#allocation95_spill] sm:$0xff] %v7438_v21  ;;  %v7449_v58 = vpop.f32.mrf.mxu2  ;;  %v863_v38 = vpop.f32.mrf.mxu0  ;;  %v7460_v21 = vor.u32 %v6328_v59, %v5677_v10  ;;  %1256 = vmatpush.bf16.msrb.mxu0 %v7452_v17  ;;  %v5655_v10 = vld [vmem:[#allocation11 + $0x70] sm:$0xf0] }
 0x107   :  { %10026 = vst [vmem:[#allocation96_spill] sm:$0xff] %v7440_v26  ;;  %v7456_v40 = vpop.f32.mrf.mxu3  ;;  %v7458_v26 = vor.u32 %v6325_v29, %v5671_v41  ;;  %v876_v0 = vpop.f32.mrf.mxu1  ;;  %v7470_v59 = vor.u32 %v6321_v47, %v5655_v10  ;;  %v495_v47 = vadd.f32 %v7338_v36, %v7360_v63  ;;  %v5639_v10 = vld [vmem:[#allocation11 + $0x50] sm:$0xf0] }
 0x108   :  { %10027 = vst [vmem:[#allocation97_spill] sm:$0xff] %v7443_v55  ;;  %v907_v28 = vadd.f32 %v876_v0, %v437_v8  ;;  %1295 = vmatpush.bf16.msrb.mxu3 %v7463_v46  ;;  %v5663_v8 = vld [vmem:[#allocation11 + $0x78] sm:$0xf0] }
 0x109   :  { %10028 = vst [vmem:[#allocation98_spill] sm:$0xff] %v7449_v58  ;;  %v906_v58 = vadd.f32 %v863_v38, %v408_v52  ;;  %1269 = vmatpush.bf16.msrb.mxu1 %v7458_v26  ;;  %1282 = vmatpush.bf16.msrb.mxu2 %v7460_v21  ;;  %v5661_v38 = vld [vmem:[#allocation11 + $0x68] sm:$0xf] }
 0x10a   :  { %10029 = vst [vmem:[#allocation99_spill] sm:$0xff] %v7452_v17  ;;  %v5598_v52 = vmul.f32 -1.442695, %v907_v28  ;;  %v7473_v0 = vor.u32 %v6324_v45, %v5661_v38  ;;  %v5645_v38 = vld [vmem:[#allocation11 + $0x48] sm:$0xf] }
 0x10b   :  { %10030 = vst [vmem:[#allocation100_spill] sm:$0xff] %v7456_v40  ;;  %v6323_v40 = vld [vmem:[#allocation11 + $0x6c] sm:$0xf0]  ;;  %v5597_v29 = vmul.f32 -1.442695, %v906_v58  ;;  %v7476_v58 = vor.u32 %v6322_v32, %v5663_v8 }
 0x10c   :  { %10031 = vst [vmem:[#allocation101_spill] sm:$0xff] %v7458_v26  ;;  %v7468_v41 = vor.u32 %v6323_v40, %v5653_v34  ;;  %v5637_v40 = vld [vmem:[#allocation11 + $0x40] sm:$0xf]  ;;  %v6319_v34 = vld [vmem:[#allocation11 + $0x4c] sm:$0xf0] }
 0x10d   :  { %10032 = vst [vmem:[#allocation102_spill] sm:$0xff] %v7460_v21  ;;  %6431 = vpow2.f32 %v5597_v29  ;;  %1270 = vmatpush.bf16.msrb.mxu1 %v7470_v59  ;;  %1283 = vmatpush.bf16.msrb.mxu2 %v7473_v0  ;;  %v7483_v29 = vor.u32 %v6319_v34, %v5637_v40  ;;  %v6320_v45 = vld [vmem:[#allocation11 + $0x54] sm:$0xf0]  ;;  %v5647_v21 = vld [vmem:[#allocation11 + $0x58] sm:$0xf0] }
 0x10e   :  { %10033 = vst [vmem:[#allocation103_spill] sm:$0xff] %v7463_v46  ;;  %1257 = vmatpush.bf16.msrb.mxu0 %v7468_v41  ;;  %6433 = vpow2.f32 %v5598_v52  ;;  %v6317_v46 = vld [vmem:[#allocation11 + $0x44] sm:$0xf]  ;;  %v7480_v28 = vpop.f32.mrf.mxu2  ;;  %1296 = vmatpush.bf16.msrb.mxu3 %v7476_v58  ;;  %v7488_v8 = vor.u32 %v6320_v45, %v5645_v38  ;;  %v5621_v40 = vld [vmem:[#allocation11 + $0x20] sm:$0xf] }
 0x10f   :  { %10034 = vst [vmem:[#allocation104_spill] sm:$0xff] %v7468_v41  ;;  %v902_v52 = vpop.f32.mrf.mxu3  ;;  %v865_v41 = vpop.f32.mrf.mxu0  ;;  %v7486_v32 = vor.u32 %v6317_v46, %v5639_v10  ;;  %v6315_v34 = vld [vmem:[#allocation11 + $0x2c] sm:$0xf0]  ;;  %v6313_v26 = vld [vmem:[#allocation11 + $0x24] sm:$0xf] }
 0x110   :  { %10035 = vst [vmem:[#allocation105_spill] sm:$0xff] %v7470_v59  ;;  %v6318_v59 = vld [vmem:[#allocation11 + $0x4c] sm:$0xf]  ;;  %v909_v36 = vadd.f32 %v902_v52, %v495_v47  ;;  %v878_v63 = vpop.f32.mrf.mxu1  ;;  %v7495_v46 = vor.u32 %v6315_v34, %v5621_v40  ;;  %v5623_v10 = vld [vmem:[#allocation11 + $0x30] sm:$0xf0] }
 0x111   :  { %10036 = vst [vmem:[#allocation106_spill] sm:$0xff] %v7473_v0  ;;  %v7491_v0 = vor.u32 %v6318_v59, %v5647_v21  ;;  %1271 = vmatpush.bf16.msrb.mxu1 %v7486_v32  ;;  %1284 = vmatpush.bf16.msrb.mxu2 %v7488_v8  ;;  %v5629_v38 = vld [vmem:[#allocation11 + $0x28] sm:$0xf]  ;;  %v7500_v63 = vor.u32 %v6313_v26, %v5623_v10  ;;  %v6316_v21 = vld [vmem:[#allocation11 + $0x34] sm:$0xf0] }
 0x112   :  { %10037 = vst [vmem:[#allocation107_spill] sm:$0xff] %v7476_v58  ;;  %1258 = vmatpush.bf16.msrb.mxu0 %v7483_v29  ;;  %v5599_v17 = vmul.f32 -1.442695, %v909_v36  ;;  %v7505_v52 = vor.u32 %v6316_v21, %v5629_v38  ;;  %v6314_v36 = vld [vmem:[#allocation11 + $0x2c] sm:$0xf] }
 0x113   :  { %10038 = vst [vmem:[#allocation108_spill] sm:$0xff] %v7483_v29  ;;  %v6432_v41 = vpop.eup %6431  ;;  %1297 = vmatpush.bf16.msrb.mxu3 %v7491_v0  ;;  %v5631_v40 = vld [vmem:[#allocation11 + $0x38] sm:$0xf0]  ;;  %v5605_v34 = vld [vmem:[#allocation11] sm:$0xf] }
 0x114   :  { %10039 = vst [vmem:[#allocation109_spill] sm:$0xff] %v7486_v32  ;;  %v6434_v45 = vpop.eup %6433  ;;  %v7497_v47 = vadd.f32 1.0, %v6432_v41  ;;  %6435 = vpow2.f32 %v5599_v17  ;;  %v6311_v26 = vld [vmem:[#allocation11 + $0xc] sm:$0xf0]  ;;  %v6309_v38 = vld [vmem:[#allocation11 + $0x4] sm:$0xf] }
 0x115   :  { %10040 = vst [vmem:[#allocation110_spill] sm:$0xff] %v7488_v8  ;;  %v7502_v59 = vadd.f32 1.0, %v6434_v45  ;;  %1272 = vmatpush.bf16.msrb.mxu1 %v7500_v63  ;;  %1285 = vmatpush.bf16.msrb.mxu2 %v7505_v52  ;;  %v7511_v45 = vor.u32 %v6314_v36, %v5631_v40  ;;  %v7513_v17 = vor.u32 %v6311_v26, %v5605_v34  ;;  %v5607_v21 = vld [vmem:[#allocation11 + $0x10] sm:$0xf0]  ;;  %v6312_v8 = vld [vmem:[#allocation11 + $0x14] sm:$0xf0] }
 0x116   :  { %10041 = vst [vmem:[#allocation111_spill] sm:$0xff] %v7491_v0  ;;  %1259 = vmatpush.bf16.msrb.mxu0 %v7495_v46  ;;  %6437 = vrcp.f32 %v7497_v47  ;;  %v891_v41 = vpop.f32.mrf.mxu2  ;;  %v5613_v0 = vld [vmem:[#allocation11 + $0x8] sm:$0xf]  ;;  %v5615_v36 = vld [vmem:[#allocation11 + $0x18] sm:$0xf0]  ;;  %vm919_vm2 = vweird.f32 %v7497_v47 }
 0x117   :  { %10042 = vst [vmem:[#allocation112_spill] sm:$0xff] %v7495_v46  ;;  %6439 = vrcp.f32 %v7502_v59  ;;  %v904_v10 = vpop.f32.mrf.mxu3  ;;  %v7515_v46 = vor.u32 %v6309_v38, %v5607_v21  ;;  %1298 = vmatpush.bf16.msrb.mxu3 %v7511_v45  ;;  %v7521_v41 = vor.u32 %v6312_v8, %v5613_v0  ;;  %vm938_vm3 = vweird.f32 %v7502_v59 }
 0x118   :  { %10043 = vst [vmem:[#allocation113_spill] sm:$0xff] %v7500_v63  ;;  %v466_v63 = vadd.f32 %v7336_v35, %v7358_v62  ;;  %v6310_v10 = vld [vmem:[#allocation11 + $0xc] sm:$0xf] }
 0x119   :  { %10044 = vst [vmem:[#allocation114_spill] sm:$0xff] %v7505_v52  ;;  %1273 = vmatpush.bf16.msrb.mxu1 %v7515_v46  ;;  %v7524_v34 = vor.u32 %v6310_v10, %v5615_v36  ;;  %1286 = vmatpush.bf16.msrb.mxu2 %v7521_v41  ;;  %v944_v10 = vand.u32 2147483648, %v7502_v59 }
 0x11a   :  { %10045 = vst [vmem:[#allocation115_spill] sm:$0xff] %v7511_v45  ;;  %1260 = vmatpush.bf16.msrb.mxu0 %v7513_v17  ;;  %v6436_v40 = vpop.eup %6435  ;;  %v908_v38 = vadd.f32 %v7480_v28, %v466_v63  ;;  %v923_v28 = vand.u32 2147483647, %v7497_v47 }
 0x11b   :  { %10046 = vst [vmem:[#allocation116_spill] sm:$0xff] %v7513_v17  ;;  %v952_v21 = vadd.f32 1.0, %v6436_v40  ;;  %1299 = vmatpush.bf16.msrb.mxu3 %v7524_v34  ;;  %v942_v40 = vand.u32 2147483647, %v7502_v59 }
 0x11c   :  { %10047 = vst [vmem:[#allocation117_spill] sm:$0xff] %v7515_v46  ;;  %v6438_v26 = vpop.eup %6437  ;;  %v925_v46 = vand.u32 2147483648, %v7497_v47  ;;  %vm924_vm5 = vcmp.eq.f32.partialorder %v923_v28, 8.507059e+37 }
 0x11d   :  { %10048 = vst [vmem:[#allocation118_spill] sm:$0xff] %v7521_v41  ;;  %v6440_v35 = vpop.eup %6439  ;;  %v915_v62 = vmul.f32 %v6438_v26, %v7497_v47  ;;  %6441 = vrcp.f32 %v952_v21  ;;  %vm920_vm0 = vweird.f32 %v6438_v26  ;;  %vm943_vm7 = vcmp.eq.f32.partialorder %v942_v40, 8.507059e+37  ;;  %v6306_v40 = vld [vmem:[#allocation10 + $0xec] sm:$0xf] }
 0x11e   :  { %10049 = vst [vmem:[#allocation119_spill] sm:$0xff] %v7524_v34  ;;  %v934_v17 = vmul.f32 %v6440_v35, %v7502_v59  ;;  %6443 = vtanh.f32 %v908_v38  ;;  %vm939_vm1 = vweird.f32 %v6440_v35  ;;  %vm921_vm4 = vmor %vm919_vm2, %vm920_vm0  ;;  %v945_v38 = vor.u32 1.1754944e-38, %v944_v10 }
 0x11f   :  { %v916_v0 = vsub.f32 1.0, %v915_v62  ;;  %v926_v62 = vor.u32 1.1754944e-38, %v925_v46  ;;  %vm940_vm6 = vmor %vm938_vm3, %vm939_vm1  ;;  %v964_v46 = vand.u32 2147483648, %v952_v21  ;;  %vm958_vm9 = vweird.f32 %v952_v21 }
 0x120   :  { %v935_v8 = vsub.f32 1.0, %v934_v17 }
 0x121   :  { %v917_v36 = vmul.f32 %v6438_v26, %v916_v0  ;;  %v965_v10 = vor.u32 1.1754944e-38, %v964_v46  ;;  %v5837_v46 = vld [vmem:[#allocation10 + $0xc8] sm:$0xf] }
 0x122   :  { %v936_v63 = vmul.f32 %v6440_v35, %v935_v8 }
 0x123   :  { %v918_v41 = vadd.f32 %v6438_v26, %v917_v36  ;;  %v6442_v45 = vpop.eup %6441 }
 0x124   :  { %v937_v17 = vadd.f32 %v6440_v35, %v936_v63  ;;  %v954_v0 = vmul.f32 %v6442_v45, %v952_v21  ;;  %v6444_v52 = vpop.eup %6443  ;;  %vm959_vm8 = vweird.f32 %v6442_v45  ;;  %v5853_v63 = vld [vmem:[#allocation10 + $0xe8] sm:$0xf] }
 0x125   :  { %v922_v34 = vsel %vm921_vm4, %v6438_v26, %v918_v41  ;;  %v962_v41 = vand.u32 2147483647, %v952_v21  ;;  %vm960_vm10 = vmor %vm958_vm9, %vm959_vm8 }
 0x126   :  { %v927_v32 = vsel %vm924_vm5, %v926_v62, %v922_v34  ;;  %v941_v8 = vsel %vm940_vm6, %v6440_v35, %v937_v17  ;;  %v955_v36 = vsub.f32 1.0, %v954_v0  ;;  %v5845_v34 = vld [vmem:[#allocation10 + $0xe0] sm:$0xf]  ;;  %v6307_v35 = vld [vmem:[#allocation10 + $0xec] sm:$0xf0] }
 0x127   :  { %v946_v29 = vsel %vm943_vm7, %v945_v38, %v941_v8  ;;  %v969_v58 = vmul.f32 %v6444_v52, %v927_v32  ;;  %vm963_vm11 = vcmp.eq.f32.partialorder %v962_v41, 8.507059e+37  ;;  %v6305_v52 = vld [vmem:[#allocation10 + $0xe4] sm:$0xf]  ;;  %v5855_v62 = vld [vmem:[#allocation10 + $0xf8] sm:$0xf0]  ;;  %v7542_v38 = vor.u32 %v6307_v35, %v5845_v34 }
 0x128   :  { %v968_v55 = vmul.f32 0.0, %v946_v29  ;;  %v956_v47 = vmul.f32 %v6442_v45, %v955_v36  ;;  %v5847_v29 = vld [vmem:[#allocation10 + $0xf0] sm:$0xf0]  ;;  %v6303_v0 = vld [vmem:[#allocation10 + $0xcc] sm:$0xf0]  ;;  %v7548_v36 = vor.u32 %v6306_v40, %v5855_v62 }
 0x129   :  { %10050 = vst [vmem:[#allocation120_spill] sm:$0xff] %v7542_v38  ;;  %v7544_v21 = vor.u32 %v6305_v52, %v5847_v29  ;;  %v6304_v41 = vld [vmem:[#allocation10 + $0xd4] sm:$0xf0]  ;;  %v6298_v62 = vld [vmem:[#allocation10 + $0xac] sm:$0xf] }
 0x12a   :  { %v7537_v18 = vadd.f32 %v969_v58, %v968_v55  ;;  %v957_v59 = vadd.f32 %v6442_v45, %v956_v47  ;;  %v6308_v58 = vld [vmem:[#allocation10 + $0xf4] sm:$0xf0]  ;;  %10053 = vst [vmem:[#allocation123_spill] sm:$0xff] %v7548_v36  ;;  %v6301_v47 = vld [vmem:[#allocation10 + $0xc4] sm:$0xf]  ;;  %v7562_v52 = vor.u32 %v6304_v41, %v5837_v46 }
 0x12b   :  { %10051 = vst [vmem:[#allocation121_spill] sm:$0xff] %v7544_v21  ;;  %v7546_v8 = vor.u32 %v6308_v58, %v5853_v63  ;;  %v6297_v63 = vld [vmem:[#allocation10 + $0xa4] sm:$0xf]  ;;  %v5821_v58 = vld [vmem:[#allocation10 + $0xa8] sm:$0xf] }
 0x12c   :  { %6445 = vtanh.f32 %v7537_v18  ;;  %v961_v26 = vsel %vm960_vm10, %v6442_v45, %v957_v59  ;;  %v5829_v45 = vld [vmem:[#allocation10 + $0xc0] sm:$0xf]  ;;  %v5831_v59 = vld [vmem:[#allocation10 + $0xd0] sm:$0xf0]  ;;  %10056 = vst [vmem:[#allocation126_spill] sm:$0xff] %v7562_v52 }
 0x12d   :  { %v966_v32 = vsel %vm963_vm11, %v965_v10, %v961_v26  ;;  %10052 = vst [vmem:[#allocation122_spill] sm:$0xff] %v7546_v8  ;;  %v6302_v26 = vld [vmem:[#allocation10 + $0xcc] sm:$0xf]  ;;  %v5839_v10 = vld [vmem:[#allocation10 + $0xd8] sm:$0xf0]  ;;  %v7556_v34 = vor.u32 %v6303_v0, %v5829_v45  ;;  %v7558_v35 = vor.u32 %v6301_v47, %v5831_v59 }
 0x12e   :  { %v7564_v29 = vor.u32 %v6302_v26, %v5839_v10  ;;  %v6300_v40 = vld [vmem:[#allocation10 + $0xb4] sm:$0xf0]  ;;  %v5797_v47 = vld [vmem:[#allocation10 + $0x80] sm:$0xf]  ;;  %v6295_v59 = vld [vmem:[#allocation10 + $0x8c] sm:$0xf0] }
 0x12f   :  { %10054 = vst [vmem:[#allocation124_spill] sm:$0xff] %v7556_v34  ;;  %v7574_v46 = vor.u32 %v6300_v40, %v5821_v58  ;;  %v6293_v26 = vld [vmem:[#allocation10 + $0x84] sm:$0xf]  ;;  %v5799_v10 = vld [vmem:[#allocation10 + $0x90] sm:$0xf0] }
 0x130   :  { %10055 = vst [vmem:[#allocation125_spill] sm:$0xff] %v7558_v35  ;;  %v6289_v40 = vld [vmem:[#allocation10 + $0x64] sm:$0xf] }
 0x131   :  { %10057 = vst [vmem:[#allocation127_spill] sm:$0xff] %v7564_v29 }
 0x132   :  { %v6446_v28 = vpop.eup %6445  ;;  %10060 = vst [vmem:[#allocation130_spill] sm:$0xff] %v7574_v46 }
 0x133   :  { %v972_v55 = vmul.f32 %v6446_v28, %v966_v32  ;;  %v5813_v28 = vld [vmem:[#allocation10 + $0xa0] sm:$0xf]  ;;  %v6299_v32 = vld [vmem:[#allocation10 + $0xac] sm:$0xf0] }
 0x134   :  { %v7568_v45 = vor.u32 %v6299_v32, %v5813_v28  ;;  %v7580_v28 = vor.u32 %v6295_v59, %v5797_v47  ;;  %v7582_v32 = vor.u32 %v6293_v26, %v5799_v10  ;;  %v5765_v26 = vld [vmem:[#allocation10 + $0x40] sm:$0xf]  ;;  %v6287_v10 = vld [vmem:[#allocation10 + $0x4c] sm:$0xf0] }
 0x135   :  { %v7540_v17 = vpack.c.bf16 %v972_v55, %v972_v55  ;;  %v5815_v55 = vld [vmem:[#allocation10 + $0xb0] sm:$0xf0] }
 0x136   :  { %10058 = vst [vmem:[#allocation128_spill] sm:$0xff] %v7568_v45  ;;  %v7570_v0 = vor.u32 %v6297_v63, %v5815_v55  ;;  %v5781_v63 = vld [vmem:[#allocation10 + $0x60] sm:$0xf]  ;;  %v6291_v55 = vld [vmem:[#allocation10 + $0x6c] sm:$0xf0] }
 0x137   :  { %982 = vmatmul.bf16.vlgmr.msra.gmra.mxu0 %v7540_v17  ;;  %995 = vmatmul.bf16.vlgmr.msra.gmra.mxu1 %v7540_v17  ;;  %10062 = vst [vmem:[#allocation132_spill] sm:$0xff] %v7580_v28  ;;  %v7592_v47 = vor.u32 %v6291_v55, %v5781_v63  ;;  %v6288_v63 = vld [vmem:[#allocation10 + $0x54] sm:$0xf0]  ;;  %v6286_v55 = vld [vmem:[#allocation10 + $0x4c] sm:$0xf] }
 0x138   :  { %1008 = vmatmul.bf16.vlgmr.msra.gmra.mxu2 %v7540_v17  ;;  %1021 = vmatmul.bf16.vlgmr.msra.gmra.mxu3 %v7540_v17  ;;  %10059 = vst [vmem:[#allocation129_spill] sm:$0xff] %v7570_v0 }
 0x139   :  { %1465 = vmatpush.bf16.msra.mxu0 %v7542_v38  ;;  %1478 = vmatpush.bf16.msra.mxu1 %v7544_v21  ;;  %v5823_v21 = vld [vmem:[#allocation10 + $0xb8] sm:$0xf0]  ;;  %10063 = vst [vmem:[#allocation133_spill] sm:$0xff] %v7582_v32 }
 0x13a   :  { %1491 = vmatpush.bf16.msra.mxu2 %v7546_v8  ;;  %1504 = vmatpush.bf16.msra.mxu3 %v7548_v36  ;;  %v7576_v41 = vor.u32 %v6298_v62, %v5823_v21  ;;  %v5805_v36 = vld [vmem:[#allocation10 + $0x88] sm:$0xf]  ;;  %v6294_v8 = vld [vmem:[#allocation10 + $0x8c] sm:$0xf]  ;;  %v5783_v62 = vld [vmem:[#allocation10 + $0x70] sm:$0xf0] }
 0x13b   :  { %10066 = vst [vmem:[#allocation136_spill] sm:$0xff] %v7592_v47  ;;  %v7594_v59 = vor.u32 %v6289_v40, %v5783_v62  ;;  %v5775_v40 = vld [vmem:[#allocation10 + $0x58] sm:$0xf0] }
 0x13c   :  { %10061 = vst [vmem:[#allocation131_spill] sm:$0xff] %v7576_v41 }
 0x13d   :  { %1466 = vmatpush.bf16.msra.mxu0 %v7556_v34  ;;  %1479 = vmatpush.bf16.msra.mxu1 %v7558_v35  ;;  %v6296_v34 = vld [vmem:[#allocation10 + $0x94] sm:$0xf0]  ;;  %v5807_v35 = vld [vmem:[#allocation10 + $0x98] sm:$0xf0]  ;;  %10067 = vst [vmem:[#allocation137_spill] sm:$0xff] %v7594_v59 }
 0x13e   :  { %1492 = vmatpush.bf16.msra.mxu2 %v7562_v52  ;;  %1505 = vmatpush.bf16.msra.mxu3 %v7564_v29  ;;  %v7586_v21 = vor.u32 %v6296_v34, %v5805_v36  ;;  %v7588_v58 = vor.u32 %v6294_v8, %v5807_v35  ;;  %v5789_v29 = vld [vmem:[#allocation10 + $0x68] sm:$0xf]  ;;  %v6290_v52 = vld [vmem:[#allocation10 + $0x6c] sm:$0xf]  ;;  %v6285_v34 = vld [vmem:[#allocation10 + $0x44] sm:$0xf] }
 0x13f   :  { %v5767_v35 = vld [vmem:[#allocation10 + $0x50] sm:$0xf0] }
 0x140   :  { %10064 = vst [vmem:[#allocation134_spill] sm:$0xff] %v7586_v21 }
 0x141   :  { %1467 = vmatpush.bf16.msra.mxu0 %v7568_v45  ;;  %1480 = vmatpush.bf16.msra.mxu1 %v7570_v0  ;;  %10065 = vst [vmem:[#allocation135_spill] sm:$0xff] %v7588_v58  ;;  %v6292_v45 = vld [vmem:[#allocation10 + $0x74] sm:$0xf0]  ;;  %v5791_v0 = vld [vmem:[#allocation10 + $0x78] sm:$0xf0] }
 0x142   :  { %1493 = vmatpush.bf16.msra.mxu2 %v7574_v46  ;;  %1506 = vmatpush.bf16.msra.mxu3 %v7576_v41  ;;  %v7598_v8 = vor.u32 %v6292_v45, %v5789_v29  ;;  %v7600_v36 = vor.u32 %v6290_v52, %v5791_v0  ;;  %v5773_v41 = vld [vmem:[#allocation10 + $0x48] sm:$0xf]  ;;  %v7608_v52 = vor.u32 %v6287_v10, %v5765_v26  ;;  %v5749_v45 = vld [vmem:[#allocation10 + $0x20] sm:$0xf]  ;;  %v6283_v0 = vld [vmem:[#allocation10 + $0x2c] sm:$0xf0] }
 0x143   :  { %v7610_v29 = vor.u32 %v6285_v34, %v5767_v35  ;;  %v7614_v62 = vor.u32 %v6288_v63, %v5773_v41  ;;  %v6282_v46 = vld [vmem:[#allocation10 + $0x2c] sm:$0xf]  ;;  %v7620_v26 = vor.u32 %v6283_v0, %v5749_v45  ;;  %v5733_v34 = vld [vmem:[#allocation10] sm:$0xf]  ;;  %v6279_v35 = vld [vmem:[#allocation10 + $0xc] sm:$0xf0] }
 0x144   :  { %10068 = vst [vmem:[#allocation138_spill] sm:$0xff] %v7598_v8  ;;  %v10090_v45 = vld [vmem:[#allocation102_spill] sm:$0xff]  ;;  %v10091_v0 = vld [vmem:[#allocation103_spill] sm:$0xff] }
 0x145   :  { %1468 = vmatpush.bf16.msra.mxu0 %v7580_v28  ;;  %1481 = vmatpush.bf16.msra.mxu1 %v7582_v32  ;;  %10069 = vst [vmem:[#allocation139_spill] sm:$0xff] %v7600_v36  ;;  %v10070_v28 = vmov 0   ;;  %v5757_v32 = vld [vmem:[#allocation10 + $0x28] sm:$0xf] }
 0x146   :  { %1494 = vmatpush.bf16.msra.mxu2 %v7586_v21  ;;  %1507 = vmatpush.bf16.msra.mxu3 %v7588_v58  ;;  %10071 = vst [vmem:[#allocation140_spill] sm:$0xff] %v7608_v52  ;;  %v7616_v58 = vor.u32 %v6286_v55, %v5775_v40  ;;  %v6281_v21 = vld [vmem:[#allocation10 + $0x24] sm:$0xf]  ;;  %v5735_v40 = vld [vmem:[#allocation10 + $0x10] sm:$0xf0] }
 0x147   :  { %1261 = vmatmul.bf16.vlgmr.msrb.gmra.mxu0 %v10070_v28  ;;  %1274 = vmatmul.bf16.vlgmr.msrb.gmra.mxu1 %v10070_v28  ;;  %10072 = vst [vmem:[#allocation141_spill] sm:$0xff] %v7610_v29  ;;  %v6277_v55 = vld [vmem:[#allocation10 + $0x4] sm:$0xf] }
 0x148   :  { %1287 = vmatmul.bf16.vlgmr.msrb.gmra.mxu2 %v10070_v28  ;;  %1300 = vmatmul.bf16.vlgmr.msrb.gmra.mxu3 %v10070_v28  ;;  %10073 = vst [vmem:[#allocation142_spill] sm:$0xff] %v7614_v62  ;;  %v5751_v28 = vld [vmem:[#allocation10 + $0x30] sm:$0xf0] }
 0x149   :  { %1469 = vmatpush.bf16.msra.mxu0 %v7592_v47  ;;  %1482 = vmatpush.bf16.msra.mxu1 %v7594_v59  ;;  %10074 = vst [vmem:[#allocation143_spill] sm:$0xff] %v7616_v58  ;;  %v6284_v47 = vld [vmem:[#allocation10 + $0x34] sm:$0xf0]  ;;  %v5759_v59 = vld [vmem:[#allocation10 + $0x38] sm:$0xf0]  ;;  %v7622_v10 = vor.u32 %v6281_v21, %v5751_v28  ;;  %v7632_v28 = vor.u32 %v6279_v35, %v5733_v34  ;;  %v10092_v34 = vld [vmem:[#allocation104_spill] sm:$0xff] }
 0x14a   :  { %1495 = vmatpush.bf16.msra.mxu2 %v7598_v8  ;;  %1508 = vmatpush.bf16.msra.mxu3 %v7600_v36  ;;  %10075 = vst [vmem:[#allocation144_spill] sm:$0xff] %v7620_v26  ;;  %v7626_v41 = vor.u32 %v6284_v47, %v5757_v32  ;;  %v7628_v63 = vor.u32 %v6282_v46, %v5759_v59  ;;  %v5741_v36 = vld [vmem:[#allocation10 + $0x8] sm:$0xf]  ;;  %v6278_v8 = vld [vmem:[#allocation10 + $0xc] sm:$0xf]  ;;  %v10084_v47 = vld [vmem:[#allocation94_spill] sm:$0xff] }
 0x14b   :  { %10076 = vst [vmem:[#allocation145_spill] sm:$0xff] %v7622_v10  ;;  %v7634_v21 = vor.u32 %v6277_v55, %v5735_v40  ;;  %v10085_v59 = vld [vmem:[#allocation95_spill] sm:$0xff]  ;;  %v10093_v35 = vld [vmem:[#allocation105_spill] sm:$0xff]  ;;  %v10094_v55 = vld [vmem:[#allocation106_spill] sm:$0xff] }
 0x14c   :  { %10077 = vst [vmem:[#allocation146_spill] sm:$0xff] %v7626_v41  ;;  %v10095_v40 = vld [vmem:[#allocation107_spill] sm:$0xff] }
 0x14d   :  { %1470 = vmatpush.bf16.msra.mxu0 %v7608_v52  ;;  %1483 = vmatpush.bf16.msra.mxu1 %v7610_v29  ;;  %10078 = vst [vmem:[#allocation147_spill] sm:$0xff] %v7628_v63  ;;  %v6280_v52 = vld [vmem:[#allocation10 + $0x14] sm:$0xf0]  ;;  %v5743_v29 = vld [vmem:[#allocation10 + $0x18] sm:$0xf0] }
 0x14e   :  { %1496 = vmatpush.bf16.msra.mxu2 %v7614_v62  ;;  %1509 = vmatpush.bf16.msra.mxu3 %v7616_v58  ;;  %10079 = vst [vmem:[#allocation148_spill] sm:$0xff] %v7632_v28  ;;  %v7638_v46 = vor.u32 %v6280_v52, %v5741_v36  ;;  %v7640_v32 = vor.u32 %v6278_v8, %v5743_v29  ;;  %v10086_v8 = vld [vmem:[#allocation96_spill] sm:$0xff]  ;;  %v10087_v36 = vld [vmem:[#allocation97_spill] sm:$0xff]  ;;  %v10088_v52 = vld [vmem:[#allocation99_spill] sm:$0xff] }
 0x14f   :  { %10080 = vst [vmem:[#allocation149_spill] sm:$0xff] %v7634_v21  ;;  %v10089_v29 = vld [vmem:[#allocation101_spill] sm:$0xff] }
 0x150   :  { %10081 = vst [vmem:[#allocation150_spill] sm:$0xff] %v7638_v46 }
 0x151   :  { %1471 = vmatpush.bf16.msra.mxu0 %v7620_v26  ;;  %1484 = vmatpush.bf16.msra.mxu1 %v7622_v10  ;;  %10082 = vst [vmem:[#allocation151_spill] sm:$0xff] %v7640_v32 }
 0x152   :  { %1497 = vmatpush.bf16.msra.mxu2 %v7626_v41  ;;  %1510 = vmatpush.bf16.msra.mxu3 %v7628_v63 }
 0x155   :  { %1472 = vmatpush.bf16.msra.mxu0 %v7632_v28  ;;  %1485 = vmatpush.bf16.msra.mxu1 %v7634_v21 }
 0x156   :  { %1498 = vmatpush.bf16.msra.mxu2 %v7638_v46  ;;  %1511 = vmatpush.bf16.msra.mxu3 %v7640_v32 }
 0x158   :  { %1473 = vmatmul.bf16.vlgmr.msra.gmra.mxu0 %v7540_v17  ;;  %1486 = vmatmul.bf16.vlgmr.msra.gmra.mxu1 %v7540_v17 }
 0x159   :  { %1585 = vmatpush.bf16.msrb.mxu0 %v7200_v39  ;;  %1598 = vmatpush.bf16.msrb.mxu1 %v7202_v43 }
 0x15a   :  { %1499 = vmatmul.bf16.vlgmr.msra.gmra.mxu2 %v7540_v17  ;;  %1512 = vmatmul.bf16.vlgmr.msra.gmra.mxu3 %v7540_v17  ;;  %v10083_v17 = vld [vmem:[#allocation93_spill] sm:$0xff] }
 0x15b   :  { %1611 = vmatpush.bf16.msrb.mxu2 %v7204_v49  ;;  %1624 = vmatpush.bf16.msrb.mxu3 %v7207_v50 }
 0x15d   :  { %1586 = vmatpush.bf16.msrb.mxu0 %v7209_v51  ;;  %1599 = vmatpush.bf16.msrb.mxu1 %v7212_v53 }
 0x15f   :  { %1612 = vmatpush.bf16.msrb.mxu2 %v7224_v2  ;;  %1625 = vmatpush.bf16.msrb.mxu3 %v7217_v60 }
 0x161   :  { %1587 = vmatpush.bf16.msrb.mxu0 %v7219_v61  ;;  %1600 = vmatpush.bf16.msrb.mxu1 %v7222_v1 }
 0x163   :  { %1613 = vmatpush.bf16.msrb.mxu2 %v7227_v9  ;;  %1626 = vmatpush.bf16.msrb.mxu3 %v7231_v11 }
 0x165   :  { %1588 = vmatpush.bf16.msrb.mxu0 %v7233_v12  ;;  %1601 = vmatpush.bf16.msrb.mxu1 %v7236_v16 }
 0x167   :  { %1614 = vmatpush.bf16.msrb.mxu2 %v7239_v23  ;;  %1627 = vmatpush.bf16.msrb.mxu3 %v7243_v24 }
 0x169   :  { %1589 = vmatpush.bf16.msrb.mxu0 %v7245_v25  ;;  %1602 = vmatpush.bf16.msrb.mxu1 %v7248_v27 }
 0x16b   :  { %1615 = vmatpush.bf16.msrb.mxu2 %v7254_v31  ;;  %1628 = vmatpush.bf16.msrb.mxu3 %v7256_v33 }
 0x16d   :  { %1590 = vmatpush.bf16.msrb.mxu0 %v7259_v37  ;;  %1603 = vmatpush.bf16.msrb.mxu1 %v7262_v42 }
 0x16f   :  { %1616 = vmatpush.bf16.msrb.mxu2 %v7264_v44  ;;  %1629 = vmatpush.bf16.msrb.mxu3 %v7267_v48 }
 0x171   :  { %1591 = vmatpush.bf16.msrb.mxu0 %v7270_v56  ;;  %1604 = vmatpush.bf16.msrb.mxu1 %v7272_v57 }
 0x173   :  { %1617 = vmatpush.bf16.msrb.mxu2 %v7275_v3  ;;  %1630 = vmatpush.bf16.msrb.mxu3 %v7278_v7 }
 0x175   :  { %1592 = vmatpush.bf16.msrb.mxu0 %v7281_v14  ;;  %1605 = vmatpush.bf16.msrb.mxu1 %v7284_v19 }
 0x177   :  { %1618 = vmatpush.bf16.msrb.mxu2 %v7287_v20  ;;  %1631 = vmatpush.bf16.msrb.mxu3 %v7290_v22 }
 0x179   :  { %1705 = vmatpush.bf16.msra.mxu0 %v7402_v13  ;;  %1718 = vmatpush.bf16.msra.mxu1 %v7404_v15 }
 0x17b   :  { %1731 = vmatpush.bf16.msra.mxu2 %v7406_v5  ;;  %1744 = vmatpush.bf16.msra.mxu3 %v7409_v30  ;;  %v10113_v30 = vld [vmem:[#allocation61_spill] sm:$0xff] }
 0x17d   :  { %1706 = vmatpush.bf16.msra.mxu0 %v7414_v54  ;;  %1719 = vmatpush.bf16.msra.mxu1 %v7421_v6 }
 0x17f   :  { %1732 = vmatpush.bf16.msra.mxu2 %v7423_v4  ;;  %1745 = vmatpush.bf16.msra.mxu3 %v10083_v17  ;;  %v10111_v17 = vld [vmem:[#allocation57_spill] sm:$0xff] }
 0x181   :  { %1707 = vmatpush.bf16.msra.mxu0 %v10084_v47  ;;  %1720 = vmatpush.bf16.msra.mxu1 %v10085_v59  ;;  %v10096_v59 = vld [vmem:[#allocation108_spill] sm:$0xff] }
 0x183   :  { %1733 = vmatpush.bf16.msra.mxu2 %v10086_v8  ;;  %1746 = vmatpush.bf16.msra.mxu3 %v10087_v36  ;;  %v10097_v8 = vld [vmem:[#allocation109_spill] sm:$0xff]  ;;  %v10098_v36 = vld [vmem:[#allocation110_spill] sm:$0xff] }
 0x185   :  { %1708 = vmatpush.bf16.msra.mxu0 %v10088_v52  ;;  %1721 = vmatpush.bf16.msra.mxu1 %v10089_v29  ;;  %v10099_v52 = vld [vmem:[#allocation111_spill] sm:$0xff]  ;;  %v10100_v29 = vld [vmem:[#allocation112_spill] sm:$0xff] }
 0x187   :  { %1734 = vmatpush.bf16.msra.mxu2 %v10090_v45  ;;  %1747 = vmatpush.bf16.msra.mxu3 %v10091_v0  ;;  %v10101_v45 = vld [vmem:[#allocation113_spill] sm:$0xff]  ;;  %v10102_v0 = vld [vmem:[#allocation114_spill] sm:$0xff] }
 0x189   :  { %1709 = vmatpush.bf16.msra.mxu0 %v10092_v34  ;;  %1722 = vmatpush.bf16.msra.mxu1 %v10093_v35  ;;  %v10103_v34 = vld [vmem:[#allocation115_spill] sm:$0xff]  ;;  %v10104_v35 = vld [vmem:[#allocation116_spill] sm:$0xff] }
 0x18b   :  { %1735 = vmatpush.bf16.msra.mxu2 %v10094_v55  ;;  %1748 = vmatpush.bf16.msra.mxu3 %v10095_v40  ;;  %v10105_v55 = vld [vmem:[#allocation117_spill] sm:$0xff]  ;;  %v10106_v40 = vld [vmem:[#allocation118_spill] sm:$0xff] }
 0x18d   :  { %1710 = vmatpush.bf16.msra.mxu0 %v10096_v59  ;;  %1723 = vmatpush.bf16.msra.mxu1 %v10097_v8  ;;  %v10107_v59 = vld [vmem:[#allocation119_spill] sm:$0xff]  ;;  %v10108_v8 = vld [vmem:[#allocation58_spill] sm:$0xff] }
 0x18f   :  { %1736 = vmatpush.bf16.msra.mxu2 %v10098_v36  ;;  %1749 = vmatpush.bf16.msra.mxu3 %v10099_v52  ;;  %v10109_v36 = vld [vmem:[#allocation56_spill] sm:$0xff] }
 0x190   :  { %v410_v47 = vadd.f32 %v10109_v36, %v10108_v8  ;;  %v10110_v52 = vld [vmem:[#allocation60_spill] sm:$0xff] }
 0x191   :  { %1711 = vmatpush.bf16.msra.mxu0 %v10100_v29  ;;  %1724 = vmatpush.bf16.msra.mxu1 %v10101_v45  ;;  %v439_v29 = vadd.f32 %v10111_v17, %v10110_v52 }
 0x193   :  { %1737 = vmatpush.bf16.msra.mxu2 %v10102_v0  ;;  %1750 = vmatpush.bf16.msra.mxu3 %v10103_v34 }
 0x195   :  { %1712 = vmatpush.bf16.msra.mxu0 %v10104_v35  ;;  %1725 = vmatpush.bf16.msra.mxu1 %v10105_v55  ;;  %v10112_v35 = vld [vmem:[#allocation65_spill] sm:$0xff] }
 0x196   :  { %v497_v55 = vadd.f32 %v10113_v30, %v10112_v35  ;;  %v10114_v30 = vld [vmem:[#allocation64_spill] sm:$0xff] }
 0x197   :  { %1738 = vmatpush.bf16.msra.mxu2 %v10106_v40  ;;  %1751 = vmatpush.bf16.msra.mxu3 %v10107_v59 }
 0x1b4   :  { %v983_v4 = vpop.f32.mrf.mxu0  ;;  %v996_v45 = vpop.f32.mrf.mxu1 }
 0x1b5   :  { %v1026_v6 = vadd.f32 %v983_v4, %v410_v47  ;;  %v1027_v0 = vadd.f32 %v996_v45, %v439_v29  ;;  %v10115_v45 = vld [vmem:[#allocation59_spill] sm:$0xff] }
 0x1b7   :  { %v5600_v54 = vmul.f32 -1.442695, %v1026_v6  ;;  %v5601_v34 = vmul.f32 -1.442695, %v1027_v0  ;;  %v468_v0 = vadd.f32 %v10115_v45, %v10114_v30 }
 0x1b9   :  { %6447 = vpow2.f32 %v5600_v54 }
 0x1ba   :  { %6449 = vpow2.f32 %v5601_v34 }
 0x1bb   :  { %v1009_v40 = vpop.f32.mrf.mxu2  ;;  %v1022_v5 = vpop.f32.mrf.mxu3 }
 0x1bc   :  { %v1029_v59 = vadd.f32 %v1022_v5, %v497_v55  ;;  %v985_v22 = vpop.f32.mrf.mxu0  ;;  %v998_v20 = vpop.f32.mrf.mxu1 }
 0x1bd   :  { %v1028_v20 = vadd.f32 %v1009_v40, %v468_v0 }
 0x1be   :  { %v5602_v36 = vmul.f32 -1.442695, %v1029_v59 }
 0x1bf   :  { %v6448_v8 = vpop.eup %6447 }
 0x1c0   :  { %v6450_v15 = vpop.eup %6449  ;;  %v1033_v17 = vadd.f32 1.0, %v6448_v8  ;;  %6451 = vpow2.f32 %v5602_v36 }
 0x1c1   :  { %v1052_v52 = vadd.f32 1.0, %v6450_v15 }
 0x1c2   :  { %6453 = vrcp.f32 %v1033_v17  ;;  %v1043_v30 = vand.u32 2147483647, %v1033_v17  ;;  %vm1039_vm14 = vweird.f32 %v1033_v17 }
 0x1c3   :  { %6455 = vrcp.f32 %v1052_v52  ;;  %v1011_v4 = vpop.f32.mrf.mxu2  ;;  %v1024_v6 = vpop.f32.mrf.mxu3  ;;  %v1064_v45 = vand.u32 2147483648, %v1052_v52  ;;  %v1062_v0 = vand.u32 2147483647, %v1052_v52  ;;  %vm1058_vm15 = vweird.f32 %v1052_v52 }
 0x1c4   :  { %v1262_v54 = vpop.f32.mrf.mxu0  ;;  %v1275_v47 = vpop.f32.mrf.mxu1  ;;  %v1045_v6 = vand.u32 2147483648, %v1033_v17  ;;  %vm1044_vm2 = vcmp.eq.f32.partialorder %v1043_v30, 8.507059e+37 }
 0x1c5   :  { %vm1063_vm3 = vcmp.eq.f32.partialorder %v1062_v0, 8.507059e+37 }
 0x1c6   :  { %v6452_v29 = vpop.eup %6451 }
 0x1c7   :  { %v7722_v34 = vadd.f32 1.0, %v6452_v29 }
 0x1c8   :  { %v6454_v22 = vpop.eup %6453 }
 0x1c9   :  { %v6456_v5 = vpop.eup %6455  ;;  %v1035_v59 = vmul.f32 %v6454_v22, %v1033_v17  ;;  %6457 = vrcp.f32 %v7722_v34  ;;  %vm1040_vm12 = vweird.f32 %v6454_v22  ;;  %vm1078_vm5 = vweird.f32 %v7722_v34 }
 0x1ca   :  { %v1054_v8 = vmul.f32 %v6456_v5, %v1052_v52  ;;  %6459 = vtanh.f32 %v1028_v20  ;;  %vm1059_vm13 = vweird.f32 %v6456_v5  ;;  %vm1041_vm0 = vmor %vm1039_vm14, %vm1040_vm12  ;;  %v1065_v20 = vor.u32 1.1754944e-38, %v1064_v45 }
 0x1cb   :  { %v1036_v15 = vsub.f32 1.0, %v1035_v59  ;;  %v7725_v55 = vpop.f32.mrf.mxu2  ;;  %v7727_v36 = vpop.f32.mrf.mxu3  ;;  %v1046_v59 = vor.u32 1.1754944e-38, %v1045_v6  ;;  %vm1060_vm1 = vmor %vm1058_vm15, %vm1059_vm13 }
 0x1cc   :  { %v1055_v4 = vsub.f32 1.0, %v1054_v8  ;;  %v1264_v35 = vpop.f32.mrf.mxu0  ;;  %v1277_v13 = vpop.f32.mrf.mxu1 }
 0x1cd   :  { %v1037_v29 = vmul.f32 %v6454_v22, %v1036_v15  ;;  %v7733_v13 = vld [vmem:[%s9558_s6] sm:$0xf] }
 0x1ce   :  { %v1056_v40 = vmul.f32 %v6456_v5, %v1055_v4  ;;  %v7740_v30 = vperm.slane %v7733_v13, 1 }
 0x1cf   :  { %v6458_v19 = vpop.eup %6457  ;;  %v1038_v14 = vadd.f32 %v6454_v22, %v1037_v29 }
 0x1d0   :  { %v1057_v7 = vadd.f32 %v6456_v5, %v1056_v40  ;;  %v1074_v8 = vmul.f32 %v6458_v19, %v7722_v34  ;;  %v6460_v15 = vpop.eup %6459  ;;  %10117 = vst [vmem:[#allocation57_spill] sm:$0xff] %v7740_v30  ;;  %vm1079_vm4 = vweird.f32 %v6458_v19 }
 0x1d1   :  { %v1042_v35 = vsel %vm1041_vm0, %v6454_v22, %v1038_v14  ;;  %v7737_v14 = vperm.slane %v7733_v13, 0  ;;  %vm7750_vm6 = vmor %vm1078_vm5, %vm1079_vm4 }
 0x1d2   :  { %v1047_v4 = vsel %vm1044_vm2, %v1046_v59, %v1042_v35  ;;  %v1061_v3 = vsel %vm1060_vm1, %v6456_v5, %v1057_v7  ;;  %v1075_v17 = vsub.f32 1.0, %v1074_v8  ;;  %v1082_v8 = vand.u32 2147483647, %v7722_v34 }
 0x1d3   :  { %v1066_v52 = vsel %vm1063_vm3, %v1065_v20, %v1061_v3  ;;  %v1089_v29 = vmul.f32 %v6460_v15, %v1047_v4  ;;  %v1290_v6 = vpop.f32.mrf.mxu2  ;;  %v1303_v40 = vpop.f32.mrf.mxu3  ;;  %10116 = vst [vmem:[#allocation56_spill] sm:$0xff] %v7737_v14  ;;  %v1084_v3 = vand.u32 2147483648, %v7722_v34  ;;  %v10123_v20 = vld [vmem:[#allocation123_spill] sm:$0xff] }
 0x1d4   :  { %v1088_v57 = vmul.f32 %v1066_v52, %v7537_v18  ;;  %v1076_v56 = vmul.f32 %v6458_v19, %v1075_v17  ;;  %vm1083_vm7 = vcmp.eq.f32.partialorder %v1082_v8, 8.507059e+37  ;;  %v10122_v8 = vld [vmem:[#allocation122_spill] sm:$0xff] }
 0x1d5   :  { %v1474_v22 = vpop.f32.mrf.mxu0  ;;  %v1487_v45 = vpop.f32.mrf.mxu1  ;;  %v1085_v35 = vor.u32 1.1754944e-38, %v1084_v3 }
 0x1d6   :  { %v7742_v48 = vadd.f32 %v1089_v29, %v1088_v57  ;;  %v1475_v7 = vadd.f32 %v1474_v22, %v1262_v54  ;;  %v1488_v5 = vadd.f32 %v1487_v45, %v1275_v47  ;;  %v1077_v0 = vadd.f32 %v6458_v19, %v1076_v56 }
 0x1d7   :  { %v7757_v47 = vperm.slane %v7733_v13, 3 }
 0x1d8   :  { %6461 = vtanh.f32 %v7742_v48  ;;  %v1517_v18 = vadd.f32 %v1475_v7, %v7737_v14  ;;  %v1518_v59 = vadd.f32 %v1488_v5, %v7740_v30  ;;  %v1081_v56 = vsel %vm7750_vm6, %v6458_v19, %v1077_v0 }
 0x1d9   :  { %10120 = vst [vmem:[#allocation61_spill] sm:$0xff] %v7757_v47  ;;  %v1086_v6 = vsel %vm1083_vm7, %v1085_v35, %v1081_v56  ;;  %v10125_v35 = vld [vmem:[#allocation124_spill] sm:$0xff] }
 0x1da   :  { %v5859_v57 = vmul.f32 -1.442695, %v1517_v18  ;;  %v5860_v54 = vmul.f32 -1.442695, %v1518_v59  ;;  %v10121_v59 = vld [vmem:[#allocation121_spill] sm:$0xff] }
 0x1dc   :  { %6463 = vpow2.f32 %v5859_v57  ;;  %v7772_v57 = vperm.slane %v7733_v13, 2 }
 0x1dd   :  { %v1500_v15 = vpop.f32.mrf.mxu2  ;;  %v1513_v4 = vpop.f32.mrf.mxu3  ;;  %6465 = vpow2.f32 %v5860_v54 }
 0x1de   :  { %v1514_v34 = vadd.f32 %v1513_v4, %v7727_v36  ;;  %v1476_v17 = vpop.f32.mrf.mxu0  ;;  %v1489_v52 = vpop.f32.mrf.mxu1  ;;  %10124 = vst [vmem:[#allocation59_spill] sm:$0xff] %v7772_v57  ;;  %v1501_v54 = vadd.f32 %v1500_v15, %v7725_v55  ;;  %v10126_v4 = vld [vmem:[#allocation125_spill] sm:$0xff]  ;;  %v10129_v55 = vld [vmem:[#allocation128_spill] sm:$0xff] }
 0x1df   :  { %v6462_v29 = vpop.eup %6461  ;;  %v10127_v17 = vld [vmem:[#allocation126_spill] sm:$0xff]  ;;  %v10128_v52 = vld [vmem:[#allocation127_spill] sm:$0xff]  ;;  %v10130_v15 = vld [vmem:[#allocation129_spill] sm:$0xff] }
 0x1e0   :  { %v1092_v40 = vmul.f32 %v6462_v29, %v1086_v6  ;;  %v1520_v22 = vadd.f32 %v1514_v34, %v7757_v47  ;;  %v1519_v6 = vadd.f32 %v1501_v54, %v7772_v57 }
 0x1e2   :  { %v7761_v45 = vpack.c.bf16 %v1092_v40, %v1092_v40  ;;  %v5861_v19 = vmul.f32 -1.442695, %v1520_v22  ;;  %v6464_v7 = vpop.eup %6463 }
 0x1e3   :  { %v6466_v5 = vpop.eup %6465  ;;  %v1524_v0 = vadd.f32 1.0, %v6464_v7  ;;  %v10131_v7 = vld [vmem:[#allocation130_spill] sm:$0xff] }
 0x1e4   :  { %6467 = vpow2.f32 %v5861_v19  ;;  %1593 = vmatmul.bf16.vlgmr.msrb.gmra.mxu0 %v7761_v45  ;;  %1606 = vmatmul.bf16.vlgmr.msrb.gmra.mxu1 %v7761_v45  ;;  %v1543_v3 = vadd.f32 1.0, %v6466_v5  ;;  %v10132_v5 = vld [vmem:[#allocation131_spill] sm:$0xff] }
 0x1e5   :  { %v1502_v36 = vpop.f32.mrf.mxu2  ;;  %v1515_v18 = vpop.f32.mrf.mxu3  ;;  %1619 = vmatmul.bf16.vlgmr.msrb.gmra.mxu2 %v7761_v45  ;;  %1632 = vmatmul.bf16.vlgmr.msrb.gmra.mxu3 %v7761_v45  ;;  %6469 = vrcp.f32 %v1524_v0  ;;  %v1534_v54 = vand.u32 2147483647, %v1524_v0  ;;  %vm1530_vm10 = vweird.f32 %v1524_v0 }
 0x1e6   :  { %1757 = vmatpush.bf16.msrb.mxu0 %v7542_v38  ;;  %1770 = vmatpush.bf16.msrb.mxu1 %v10121_v59  ;;  %6471 = vrcp.f32 %v1543_v3  ;;  %v1536_v18 = vand.u32 2147483648, %v1524_v0  ;;  %vm1549_vm11 = vweird.f32 %v1543_v3 }
 0x1e7   :  { %1783 = vmatpush.bf16.msrb.mxu2 %v10122_v8  ;;  %1796 = vmatpush.bf16.msrb.mxu3 %v10123_v20  ;;  %vm1535_vm13 = vcmp.eq.f32.partialorder %v1534_v54, 8.507059e+37 }
 0x1ea   :  { %v6468_v56 = vpop.eup %6467  ;;  %1758 = vmatpush.bf16.msrb.mxu0 %v10125_v35  ;;  %1771 = vmatpush.bf16.msrb.mxu1 %v10126_v4 }
 0x1eb   :  { %v7777_v34 = vadd.f32 1.0, %v6468_v56  ;;  %1784 = vmatpush.bf16.msrb.mxu2 %v10127_v17  ;;  %1797 = vmatpush.bf16.msrb.mxu3 %v10128_v52  ;;  %v6470_v29 = vpop.eup %6469  ;;  %v1555_v56 = vand.u32 2147483648, %v1543_v3  ;;  %v1553_v52 = vand.u32 2147483647, %v1543_v3  ;;  %v10133_v17 = vld [vmem:[#allocation132_spill] sm:$0xff] }
 0x1ec   :  { %v6472_v40 = vpop.eup %6471  ;;  %v1526_v22 = vmul.f32 %v6470_v29, %v1524_v0  ;;  %vm1531_vm8 = vweird.f32 %v6470_v29  ;;  %v10137_v0 = vld [vmem:[#allocation136_spill] sm:$0xff] }
 0x1ed   :  { %6473 = vrcp.f32 %v7777_v34  ;;  %v1545_v13 = vmul.f32 %v6472_v40, %v1543_v3  ;;  %vm1550_vm9 = vweird.f32 %v6472_v40  ;;  %vm1532_vm12 = vmor %vm1530_vm10, %vm1531_vm8  ;;  %vm1554_vm15 = vcmp.eq.f32.partialorder %v1553_v52, 8.507059e+37 }
 0x1ee   :  { %1759 = vmatpush.bf16.msrb.mxu0 %v10129_v55  ;;  %1772 = vmatpush.bf16.msrb.mxu1 %v10130_v15  ;;  %v1527_v19 = vsub.f32 1.0, %v1526_v22  ;;  %6475 = vtanh.f32 %v1519_v6  ;;  %v10134_v55 = vld [vmem:[#allocation133_spill] sm:$0xff]  ;;  %v1537_v6 = vor.u32 1.1754944e-38, %v1536_v18  ;;  %vm1551_vm14 = vmor %vm1549_vm11, %vm1550_vm9  ;;  %v10139_v18 = vld [vmem:[#allocation138_spill] sm:$0xff]  ;;  %vm1569_vm1 = vweird.f32 %v7777_v34 }
 0x1ef   :  { %1785 = vmatpush.bf16.msrb.mxu2 %v10131_v7  ;;  %1798 = vmatpush.bf16.msrb.mxu3 %v10132_v5  ;;  %v1546_v36 = vsub.f32 1.0, %v1545_v13  ;;  %v10135_v7 = vld [vmem:[#allocation134_spill] sm:$0xff]  ;;  %v10136_v5 = vld [vmem:[#allocation135_spill] sm:$0xff] }
 0x1f0   :  { %v1528_v47 = vmul.f32 %v6470_v29, %v1527_v19 }
 0x1f1   :  { %v1547_v57 = vmul.f32 %v6472_v40, %v1546_v36  ;;  %v1556_v36 = vor.u32 1.1754944e-38, %v1555_v56 }
 0x1f2   :  { %1760 = vmatpush.bf16.msrb.mxu0 %v10133_v17  ;;  %1773 = vmatpush.bf16.msrb.mxu1 %v10134_v55  ;;  %v1529_v22 = vadd.f32 %v6470_v29, %v1528_v47 }
 0x1f3   :  { %v6474_v15 = vpop.eup %6473  ;;  %1786 = vmatpush.bf16.msrb.mxu2 %v10135_v7  ;;  %1799 = vmatpush.bf16.msrb.mxu3 %v10136_v5  ;;  %v1548_v13 = vadd.f32 %v6472_v40, %v1547_v57  ;;  %v10138_v7 = vld [vmem:[#allocation137_spill] sm:$0xff]  ;;  %v10140_v57 = vld [vmem:[#allocation139_spill] sm:$0xff] }
 0x1f4   :  { %v1565_v19 = vmul.f32 %v6474_v15, %v7777_v34  ;;  %v1533_v30 = vsel %vm1532_vm12, %v6470_v29, %v1529_v22  ;;  %v6476_v17 = vpop.eup %6475  ;;  %v10142_v22 = vld [vmem:[#allocation140_spill] sm:$0xff]  ;;  %vm1570_vm0 = vweird.f32 %v6474_v15 }
 0x1f5   :  { %v1538_v55 = vsel %vm1535_vm13, %v1537_v6, %v1533_v30  ;;  %v1552_v14 = vsel %vm1551_vm14, %v6472_v40, %v1548_v13  ;;  %v10143_v30 = vld [vmem:[#allocation141_spill] sm:$0xff]  ;;  %vm1571_vm2 = vmor %vm1569_vm1, %vm1570_vm0 }
 0x1f6   :  { %v1566_v47 = vsub.f32 1.0, %v1565_v19  ;;  %1761 = vmatpush.bf16.msrb.mxu0 %v10137_v0  ;;  %1774 = vmatpush.bf16.msrb.mxu1 %v10138_v7  ;;  %v1557_v3 = vsel %vm1554_vm15, %v1556_v36, %v1552_v14  ;;  %v1580_v5 = vmul.f32 %v6476_v17, %v1538_v55  ;;  %v1575_v14 = vand.u32 2147483648, %v7777_v34  ;;  %v6403_v6 = vld [vmem:[#allocation14 + $0xec] sm:$0xf0]  ;;  %v5984_v36 = vld [vmem:[#allocation14 + $0xf0] sm:$0xf0] }
 0x1f7   :  { %1787 = vmatpush.bf16.msrb.mxu2 %v10139_v18  ;;  %1800 = vmatpush.bf16.msrb.mxu3 %v10140_v57  ;;  %v1579_v56 = vmul.f32 0.0, %v1557_v3  ;;  %v1573_v17 = vand.u32 2147483647, %v7777_v34  ;;  %v6401_v34 = vld [vmem:[#allocation14 + $0xe4] sm:$0xf] }
 0x1f8   :  { %v1567_v29 = vmul.f32 %v6474_v15, %v1566_v47  ;;  %v1576_v55 = vor.u32 1.1754944e-38, %v1575_v14  ;;  %v5990_v47 = vld [vmem:[#allocation14 + $0xe8] sm:$0xf] }
 0x1f9   :  { %v7797_v54 = vadd.f32 %v1580_v5, %v1579_v56  ;;  %vm1574_vm3 = vcmp.eq.f32.partialorder %v1573_v17, 8.507059e+37  ;;  %v5982_v5 = vld [vmem:[#allocation14 + $0xe0] sm:$0xf]  ;;  %v6402_v56 = vld [vmem:[#allocation14 + $0xec] sm:$0xf]  ;;  %v7819_v17 = vor.u32 %v6401_v34, %v5984_v36 }
 0x1fa   :  { %1762 = vmatpush.bf16.msrb.mxu0 %v10142_v22  ;;  %1775 = vmatpush.bf16.msrb.mxu1 %v10143_v30  ;;  %v1568_v52 = vadd.f32 %v6474_v15, %v1567_v29  ;;  %v5992_v29 = vld [vmem:[#allocation14 + $0xf8] sm:$0xf0]  ;;  %v7817_v14 = vor.u32 %v6403_v6, %v5982_v5  ;;  %v5950_v34 = vld [vmem:[#allocation14 + $0xa0] sm:$0xf]  ;;  %v6395_v36 = vld [vmem:[#allocation14 + $0xac] sm:$0xf0] }
 0x1fb   :  { %10141 = vst [vmem:[#allocation152_spill] sm:$0xff] %v7797_v54  ;;  %1788 = vmatpush.bf16.msrb.mxu2 %v7614_v62  ;;  %1801 = vmatpush.bf16.msrb.mxu3 %v7616_v58  ;;  %6477 = vtanh.f32 %v7797_v54  ;;  %v6096_v58 = vld [vmem:[#allocation13 + $0xd0] sm:$0xf0]  ;;  %v6102_v62 = vld [vmem:[#allocation13 + $0xc8] sm:$0xf] }
 0x1fc   :  { %v1572_v40 = vsel %vm1571_vm2, %v6474_v15, %v1568_v52  ;;  %v6404_v15 = vld [vmem:[#allocation14 + $0xf4] sm:$0xf0]  ;;  %10144 = vst [vmem:[#allocation153_spill] sm:$0xff] %v7817_v14 }
 0x1fd   :  { %v1577_v19 = vsel %vm1574_vm3, %v1576_v55, %v1572_v40  ;;  %10145 = vst [vmem:[#allocation154_spill] sm:$0xff] %v7819_v17  ;;  %v5966_v40 = vld [vmem:[#allocation14 + $0xc0] sm:$0xf]  ;;  %v6399_v55 = vld [vmem:[#allocation14 + $0xcc] sm:$0xf0]  ;;  %v7821_v54 = vor.u32 %v6404_v15, %v5990_v47 }
 0x1fe   :  { %1763 = vmatpush.bf16.msrb.mxu0 %v7620_v26  ;;  %1776 = vmatpush.bf16.msrb.mxu1 %v7622_v10  ;;  %v7831_v5 = vor.u32 %v6399_v55, %v5966_v40  ;;  %v7843_v40 = vor.u32 %v6395_v36, %v5950_v34 }
 0x1ff   :  { %1789 = vmatpush.bf16.msrb.mxu2 %v7626_v41  ;;  %1802 = vmatpush.bf16.msrb.mxu3 %v7628_v63  ;;  %10146 = vst [vmem:[#allocation155_spill] sm:$0xff] %v7821_v54  ;;  %v5958_v63 = vld [vmem:[#allocation14 + $0xa8] sm:$0xf]  ;;  %v6394_v41 = vld [vmem:[#allocation14 + $0xac] sm:$0xf] }
 0x200   :  { %10148 = vst [vmem:[#allocation157_spill] sm:$0xff] %v7831_v5 }
 0x201   :  { %v6478_v13 = vpop.eup %6477  ;;  %10152 = vst [vmem:[#allocation161_spill] sm:$0xff] %v7843_v40 }
 0x202   :  { %1764 = vmatpush.bf16.msrb.mxu0 %v7632_v28  ;;  %1777 = vmatpush.bf16.msrb.mxu1 %v7634_v21  ;;  %v1583_v3 = vmul.f32 %v6478_v13, %v1577_v19  ;;  %v7823_v21 = vor.u32 %v6402_v56, %v5992_v29  ;;  %v6397_v13 = vld [vmem:[#allocation14 + $0xc4] sm:$0xf]  ;;  %v5968_v19 = vld [vmem:[#allocation14 + $0xd0] sm:$0xf0]  ;;  %v5976_v28 = vld [vmem:[#allocation14 + $0xd8] sm:$0xf0] }
 0x203   :  { %1790 = vmatpush.bf16.msrb.mxu2 %v7638_v46  ;;  %1803 = vmatpush.bf16.msrb.mxu3 %v7640_v32  ;;  %v5974_v46 = vld [vmem:[#allocation14 + $0xc8] sm:$0xf]  ;;  %v6400_v32 = vld [vmem:[#allocation14 + $0xd4] sm:$0xf0]  ;;  %v7833_v6 = vor.u32 %v6397_v13, %v5968_v19  ;;  %v6393_v56 = vld [vmem:[#allocation14 + $0xa4] sm:$0xf] }
 0x204   :  { %v7815_v52 = vpack.c.bf16 %v1583_v3, %v1583_v3  ;;  %10147 = vst [vmem:[#allocation156_spill] sm:$0xff] %v7823_v21  ;;  %v6398_v3 = vld [vmem:[#allocation14 + $0xcc] sm:$0xf]  ;;  %v7837_v47 = vor.u32 %v6400_v32, %v5974_v46  ;;  %v5952_v29 = vld [vmem:[#allocation14 + $0xb0] sm:$0xf0] }
 0x205   :  { %10149 = vst [vmem:[#allocation158_spill] sm:$0xff] %v7833_v6  ;;  %v7839_v15 = vor.u32 %v6398_v3, %v5976_v28  ;;  %v7845_v55 = vor.u32 %v6393_v56, %v5952_v29  ;;  %v5934_v13 = vld [vmem:[#allocation14 + $0x80] sm:$0xf]  ;;  %v6391_v19 = vld [vmem:[#allocation14 + $0x8c] sm:$0xf0] }
 0x206   :  { %1713 = vmatmul.bf16.vlgmr.msra.gmra.mxu0 %v7815_v52  ;;  %1726 = vmatmul.bf16.vlgmr.msra.gmra.mxu1 %v7815_v52  ;;  %10150 = vst [vmem:[#allocation159_spill] sm:$0xff] %v7837_v47  ;;  %v6389_v32 = vld [vmem:[#allocation14 + $0x84] sm:$0xf]  ;;  %v5936_v3 = vld [vmem:[#allocation14 + $0x90] sm:$0xf0]  ;;  %v7855_v34 = vor.u32 %v6391_v19, %v5934_v13 }
 0x207   :  { %1739 = vmatmul.bf16.vlgmr.msra.gmra.mxu2 %v7815_v52  ;;  %1752 = vmatmul.bf16.vlgmr.msra.gmra.mxu3 %v7815_v52  ;;  %10151 = vst [vmem:[#allocation160_spill] sm:$0xff] %v7839_v15  ;;  %v7857_v36 = vor.u32 %v6389_v32, %v5936_v3  ;;  %v5918_v56 = vld [vmem:[#allocation14 + $0x60] sm:$0xf]  ;;  %v6387_v29 = vld [vmem:[#allocation14 + $0x6c] sm:$0xf0] }
 0x208   :  { %2036 = vmatpush.bf16.msra.mxu0 %v7817_v14  ;;  %2049 = vmatpush.bf16.msra.mxu1 %v7819_v17  ;;  %v6396_v14 = vld [vmem:[#allocation14 + $0xb4] sm:$0xf0]  ;;  %v5960_v17 = vld [vmem:[#allocation14 + $0xb8] sm:$0xf0]  ;;  %10153 = vst [vmem:[#allocation162_spill] sm:$0xff] %v7845_v55  ;;  %v7867_v13 = vor.u32 %v6387_v29, %v5918_v56 }
 0x209   :  { %2062 = vmatpush.bf16.msra.mxu2 %v7821_v54  ;;  %2075 = vmatpush.bf16.msra.mxu3 %v7823_v21  ;;  %v7849_v28 = vor.u32 %v6396_v14, %v5958_v63  ;;  %v7851_v46 = vor.u32 %v6394_v41, %v5960_v17  ;;  %v5942_v21 = vld [vmem:[#allocation14 + $0x88] sm:$0xf]  ;;  %v6390_v54 = vld [vmem:[#allocation14 + $0x8c] sm:$0xf]  ;;  %10156 = vst [vmem:[#allocation165_spill] sm:$0xff] %v7855_v34 }
 0x20a   :  { %10157 = vst [vmem:[#allocation166_spill] sm:$0xff] %v7857_v36  ;;  %v6385_v14 = vld [vmem:[#allocation14 + $0x64] sm:$0xf]  ;;  %v5920_v17 = vld [vmem:[#allocation14 + $0x70] sm:$0xf0] }
 0x20b   :  { %10154 = vst [vmem:[#allocation163_spill] sm:$0xff] %v7849_v28  ;;  %v7869_v19 = vor.u32 %v6385_v14, %v5920_v17  ;;  %v5902_v32 = vld [vmem:[#allocation14 + $0x40] sm:$0xf]  ;;  %v6383_v3 = vld [vmem:[#allocation14 + $0x4c] sm:$0xf0] }
 0x20c   :  { %2037 = vmatpush.bf16.msra.mxu0 %v7831_v5  ;;  %2050 = vmatpush.bf16.msra.mxu1 %v7833_v6  ;;  %10155 = vst [vmem:[#allocation164_spill] sm:$0xff] %v7851_v46  ;;  %v6392_v5 = vld [vmem:[#allocation14 + $0x94] sm:$0xf0]  ;;  %v5944_v6 = vld [vmem:[#allocation14 + $0x98] sm:$0xf0] }
 0x20d   :  { %2063 = vmatpush.bf16.msra.mxu2 %v7837_v47  ;;  %2076 = vmatpush.bf16.msra.mxu3 %v7839_v15  ;;  %v7861_v41 = vor.u32 %v6392_v5, %v5942_v21  ;;  %v7863_v63 = vor.u32 %v6390_v54, %v5944_v6  ;;  %v5926_v15 = vld [vmem:[#allocation14 + $0x68] sm:$0xf]  ;;  %v6386_v47 = vld [vmem:[#allocation14 + $0x6c] sm:$0xf]  ;;  %10160 = vst [vmem:[#allocation169_spill] sm:$0xff] %v7867_v13 }
 0x20e   :  { %10161 = vst [vmem:[#allocation170_spill] sm:$0xff] %v7869_v19  ;;  %v6381_v5 = vld [vmem:[#allocation14 + $0x44] sm:$0xf]  ;;  %v5904_v6 = vld [vmem:[#allocation14 + $0x50] sm:$0xf0] }
 0x20f   :  { %10158 = vst [vmem:[#allocation167_spill] sm:$0xff] %v7861_v41  ;;  %v6384_v56 = vld [vmem:[#allocation14 + $0x54] sm:$0xf0]  ;;  %v6382_v29 = vld [vmem:[#allocation14 + $0x4c] sm:$0xf] }
 0x210   :  { %2038 = vmatpush.bf16.msra.mxu0 %v7843_v40  ;;  %2051 = vmatpush.bf16.msra.mxu1 %v7845_v55  ;;  %10159 = vst [vmem:[#allocation168_spill] sm:$0xff] %v7863_v63  ;;  %v6388_v40 = vld [vmem:[#allocation14 + $0x74] sm:$0xf0]  ;;  %v5928_v55 = vld [vmem:[#allocation14 + $0x78] sm:$0xf0] }
 0x211   :  { %2064 = vmatpush.bf16.msra.mxu2 %v7849_v28  ;;  %2077 = vmatpush.bf16.msra.mxu3 %v7851_v46  ;;  %v7873_v21 = vor.u32 %v6388_v40, %v5926_v15  ;;  %v7875_v54 = vor.u32 %v6386_v47, %v5928_v55  ;;  %v5910_v46 = vld [vmem:[#allocation14 + $0x48] sm:$0xf]  ;;  %v5912_v14 = vld [vmem:[#allocation14 + $0x58] sm:$0xf0]  ;;  %v7883_v47 = vor.u32 %v6383_v3, %v5902_v32  ;;  %v5886_v40 = vld [vmem:[#allocation14 + $0x20] sm:$0xf] }
 0x212   :  { %v7885_v15 = vor.u32 %v6381_v5, %v5904_v6  ;;  %v6379_v55 = vld [vmem:[#allocation14 + $0x2c] sm:$0xf0]  ;;  %v7889_v17 = vor.u32 %v6384_v56, %v5910_v46  ;;  %v5870_v32 = vld [vmem:[#allocation14] sm:$0xf]  ;;  %v6373_v46 = vld [vmem:[#allocation14 + $0x4] sm:$0xf] }
 0x213   :  { %10162 = vst [vmem:[#allocation171_spill] sm:$0xff] %v7873_v21  ;;  %v7895_v3 = vor.u32 %v6379_v55, %v5886_v40  ;;  %v6375_v6 = vld [vmem:[#allocation14 + $0xc] sm:$0xf0]  ;;  %v5872_v56 = vld [vmem:[#allocation14 + $0x10] sm:$0xf0] }
 0x214   :  { %2039 = vmatpush.bf16.msra.mxu0 %v7855_v34  ;;  %2052 = vmatpush.bf16.msra.mxu1 %v7857_v36  ;;  %10163 = vst [vmem:[#allocation172_spill] sm:$0xff] %v7875_v54  ;;  %v5894_v36 = vld [vmem:[#allocation14 + $0x28] sm:$0xf]  ;;  %v6378_v34 = vld [vmem:[#allocation14 + $0x2c] sm:$0xf] }
 0x215   :  { %2065 = vmatpush.bf16.msra.mxu2 %v7861_v41  ;;  %2078 = vmatpush.bf16.msra.mxu3 %v7863_v63  ;;  %10164 = vst [vmem:[#allocation173_spill] sm:$0xff] %v7883_v47  ;;  %v7891_v63 = vor.u32 %v6382_v29, %v5912_v14  ;;  %v6377_v41 = vld [vmem:[#allocation14 + $0x24] sm:$0xf]  ;;  %v5880_v28 = vld [vmem:[#allocation14 + $0x18] sm:$0xf0] }
 0x216   :  { %1765 = vmatmul.bf16.vlgmr.msrb.gmra.mxu0 %v7761_v45  ;;  %1778 = vmatmul.bf16.vlgmr.msrb.gmra.mxu1 %v7761_v45  ;;  %10165 = vst [vmem:[#allocation174_spill] sm:$0xff] %v7885_v15  ;;  %v6371_v40 = vld [vmem:[#allocation13 + $0xec] sm:$0xf0]  ;;  %v6369_v55 = vld [vmem:[#allocation13 + $0xe4] sm:$0xf] }
 0x217   :  { %1791 = vmatmul.bf16.vlgmr.msrb.gmra.mxu2 %v7761_v45  ;;  %1804 = vmatmul.bf16.vlgmr.msrb.gmra.mxu3 %v7761_v45  ;;  %10166 = vst [vmem:[#allocation175_spill] sm:$0xff] %v7889_v17  ;;  %v5888_v45 = vld [vmem:[#allocation14 + $0x30] sm:$0xf0] }
 0x218   :  { %2040 = vmatpush.bf16.msra.mxu0 %v7867_v13  ;;  %2053 = vmatpush.bf16.msra.mxu1 %v7869_v19  ;;  %10167 = vst [vmem:[#allocation176_spill] sm:$0xff] %v7891_v63  ;;  %v6380_v13 = vld [vmem:[#allocation14 + $0x34] sm:$0xf0]  ;;  %v5896_v19 = vld [vmem:[#allocation14 + $0x38] sm:$0xf0]  ;;  %v7897_v5 = vor.u32 %v6377_v41, %v5888_v45 }
 0x219   :  { %2066 = vmatpush.bf16.msra.mxu2 %v7873_v21  ;;  %2079 = vmatpush.bf16.msra.mxu3 %v7875_v54  ;;  %10168 = vst [vmem:[#allocation177_spill] sm:$0xff] %v7895_v3  ;;  %v7901_v29 = vor.u32 %v6380_v13, %v5894_v36  ;;  %v7903_v14 = vor.u32 %v6378_v34, %v5896_v19  ;;  %v5878_v54 = vld [vmem:[#allocation14 + $0x8] sm:$0xf]  ;;  %v6376_v21 = vld [vmem:[#allocation14 + $0x14] sm:$0xf0] }
 0x21a   :  { %10169 = vst [vmem:[#allocation178_spill] sm:$0xff] %v7897_v5  ;;  %v6112_v41 = vld [vmem:[#allocation13 + $0xf0] sm:$0xf0]  ;;  %v6118_v45 = vld [vmem:[#allocation13 + $0xe8] sm:$0xf]  ;;  %v7913_v19 = vor.u32 %v6376_v21, %v5878_v54 }
 0x21b   :  { %10170 = vst [vmem:[#allocation179_spill] sm:$0xff] %v7901_v29  ;;  %v6372_v36 = vld [vmem:[#allocation13 + $0xf4] sm:$0xf0]  ;;  %v6370_v34 = vld [vmem:[#allocation13 + $0xec] sm:$0xf] }
 0x21c   :  { %2041 = vmatpush.bf16.msra.mxu0 %v7883_v47  ;;  %2054 = vmatpush.bf16.msra.mxu1 %v7885_v15  ;;  %10171 = vst [vmem:[#allocation180_spill] sm:$0xff] %v7903_v14  ;;  %v6374_v47 = vld [vmem:[#allocation14 + $0xc] sm:$0xf]  ;;  %v6110_v15 = vld [vmem:[#allocation13 + $0xe0] sm:$0xf] }
 0x21d   :  { %2067 = vmatpush.bf16.msra.mxu2 %v7889_v17  ;;  %2080 = vmatpush.bf16.msra.mxu3 %v7891_v63  ;;  %v7907_v17 = vor.u32 %v6375_v6, %v5870_v32  ;;  %v7909_v63 = vor.u32 %v6373_v46, %v5872_v56  ;;  %v6120_v13 = vld [vmem:[#allocation13 + $0xf8] sm:$0xf0]  ;;  %v7915_v10 = vor.u32 %v6374_v47, %v5880_v28  ;;  %v6367_v32 = vld [vmem:[#allocation13 + $0xcc] sm:$0xf0]  ;;  %v6365_v56 = vld [vmem:[#allocation13 + $0xc4] sm:$0xf] }
 0x21e   :  { %v7917_v26 = vor.u32 %v6371_v40, %v6110_v15  ;;  %v7921_v6 = vor.u32 %v6372_v36, %v6118_v45  ;;  %v7923_v46 = vor.u32 %v6370_v34, %v6120_v13  ;;  %v6368_v21 = vld [vmem:[#allocation13 + $0xd4] sm:$0xf0]  ;;  %v6366_v28 = vld [vmem:[#allocation13 + $0xcc] sm:$0xf]  ;;  %v6104_v54 = vld [vmem:[#allocation13 + $0xd8] sm:$0xf0]  ;;  %v7933_v15 = vor.u32 %v6365_v56, %v6096_v58 }
 0x21f   :  { %10172 = vst [vmem:[#allocation181_spill] sm:$0xff] %v7907_v17  ;;  %v6078_v40 = vld [vmem:[#allocation13 + $0xa0] sm:$0xf]  ;;  %v7939_v45 = vor.u32 %v6366_v28, %v6104_v54  ;;  %v6361_v36 = vld [vmem:[#allocation13 + $0xa4] sm:$0xf] }
 0x220   :  { %2042 = vmatpush.bf16.msra.mxu0 %v7895_v3  ;;  %2055 = vmatpush.bf16.msra.mxu1 %v7897_v5  ;;  %10173 = vst [vmem:[#allocation182_spill] sm:$0xff] %v7915_v10  ;;  %v7919_v3 = vor.u32 %v6369_v55, %v6112_v41  ;;  %v6094_v5 = vld [vmem:[#allocation13 + $0xc0] sm:$0xf]  ;;  %v6363_v55 = vld [vmem:[#allocation13 + $0xac] sm:$0xf0]  ;;  %v7937_v41 = vor.u32 %v6368_v21, %v6102_v62 }
 0x221   :  { %2068 = vmatpush.bf16.msra.mxu2 %v7901_v29  ;;  %2081 = vmatpush.bf16.msra.mxu3 %v7903_v14  ;;  %10174 = vst [vmem:[#allocation183_spill] sm:$0xff] %v7917_v26  ;;  %v7931_v47 = vor.u32 %v6367_v32, %v6094_v5  ;;  %v6080_v34 = vld [vmem:[#allocation13 + $0xb0] sm:$0xf0]  ;;  %v6086_v13 = vld [vmem:[#allocation13 + $0xa8] sm:$0xf]  ;;  %v7947_v62 = vor.u32 %v6363_v55, %v6078_v40 }
 0x222   :  { %10175 = vst [vmem:[#allocation184_spill] sm:$0xff] %v7919_v3  ;;  %v6364_v5 = vld [vmem:[#allocation13 + $0xb4] sm:$0xf0]  ;;  %v6362_v58 = vld [vmem:[#allocation13 + $0xac] sm:$0xf]  ;;  %v7949_v56 = vor.u32 %v6361_v36, %v6080_v34 }
 0x223   :  { %10176 = vst [vmem:[#allocation185_spill] sm:$0xff] %v7921_v6  ;;  %v6088_v32 = vld [vmem:[#allocation13 + $0xb8] sm:$0xf0]  ;;  %v6062_v21 = vld [vmem:[#allocation13 + $0x80] sm:$0xf]  ;;  %v7953_v54 = vor.u32 %v6364_v5, %v6086_v13 }
 0x224   :  { %10177 = vst [vmem:[#allocation186_spill] sm:$0xff] %v7923_v46  ;;  %2043 = vmatpush.bf16.msra.mxu0 %v7907_v17  ;;  %2056 = vmatpush.bf16.msra.mxu1 %v7909_v63  ;;  %v6359_v28 = vld [vmem:[#allocation13 + $0x8c] sm:$0xf0]  ;;  %v6046_v36 = vld [vmem:[#allocation13 + $0x60] sm:$0xf] }
 0x225   :  { %2069 = vmatpush.bf16.msra.mxu2 %v7913_v19  ;;  %2082 = vmatpush.bf16.msra.mxu3 %v7915_v10  ;;  %10178 = vst [vmem:[#allocation187_spill] sm:$0xff] %v7931_v47  ;;  %v6358_v10 = vld [vmem:[#allocation13 + $0x8c] sm:$0xf]  ;;  %v7959_v40 = vor.u32 %v6359_v28, %v6062_v21  ;;  %v6355_v34 = vld [vmem:[#allocation13 + $0x6c] sm:$0xf0] }
 0x226   :  { %10179 = vst [vmem:[#allocation188_spill] sm:$0xff] %v7933_v15  ;;  %v6030_v28 = vld [vmem:[#allocation13 + $0x40] sm:$0xf] }
 0x227   :  { %10180 = vst [vmem:[#allocation189_spill] sm:$0xff] %v7937_v41 }
 0x228   :  { %2248 = vmatpush.bf16.msrb.mxu0 %v7917_v26  ;;  %2261 = vmatpush.bf16.msrb.mxu1 %v7919_v3  ;;  %10181 = vst [vmem:[#allocation190_spill] sm:$0xff] %v7939_v45  ;;  %v10182_v26 = vmov 0   ;;  %v6070_v3 = vld [vmem:[#allocation13 + $0x88] sm:$0xf] }
 0x229   :  { %2274 = vmatpush.bf16.msrb.mxu2 %v7921_v6  ;;  %2287 = vmatpush.bf16.msrb.mxu3 %v7923_v46  ;;  %10183 = vst [vmem:[#allocation191_spill] sm:$0xff] %v7947_v62  ;;  %v7955_v46 = vor.u32 %v6362_v58, %v6088_v32  ;;  %v6357_v6 = vld [vmem:[#allocation13 + $0x84] sm:$0xf]  ;;  %v6048_v32 = vld [vmem:[#allocation13 + $0x70] sm:$0xf0] }
 0x22a   :  { %2044 = vmatmul.bf16.vlgmr.msra.gmra.mxu0 %v10182_v26  ;;  %2057 = vmatmul.bf16.vlgmr.msra.gmra.mxu1 %v10182_v26  ;;  %10184 = vst [vmem:[#allocation192_spill] sm:$0xff] %v7949_v56  ;;  %v6353_v58 = vld [vmem:[#allocation13 + $0x64] sm:$0xf] }
 0x22b   :  { %2083 = vmatmul.bf16.vlgmr.msra.gmra.mxu3 %v10182_v26  ;;  %2070 = vmatmul.bf16.vlgmr.msra.gmra.mxu2 %v10182_v26  ;;  %10185 = vst [vmem:[#allocation193_spill] sm:$0xff] %v7953_v54  ;;  %v6064_v26 = vld [vmem:[#allocation13 + $0x90] sm:$0xf0]  ;;  %v7973_v21 = vor.u32 %v6353_v58, %v6048_v32  ;;  %v6014_v58 = vld [vmem:[#allocation13 + $0x20] sm:$0xf] }
 0x22c   :  { %2249 = vmatpush.bf16.msrb.mxu0 %v7931_v47  ;;  %2262 = vmatpush.bf16.msrb.mxu1 %v7933_v15  ;;  %10186 = vst [vmem:[#allocation194_spill] sm:$0xff] %v7955_v46  ;;  %v6360_v47 = vld [vmem:[#allocation13 + $0x94] sm:$0xf0]  ;;  %v6072_v15 = vld [vmem:[#allocation13 + $0x98] sm:$0xf0]  ;;  %v7961_v55 = vor.u32 %v6357_v6, %v6064_v26  ;;  %v7971_v6 = vor.u32 %v6355_v34, %v6046_v36 }
 0x22d   :  { %2275 = vmatpush.bf16.msrb.mxu2 %v7937_v41  ;;  %2288 = vmatpush.bf16.msrb.mxu3 %v7939_v45  ;;  %10187 = vst [vmem:[#allocation195_spill] sm:$0xff] %v7959_v40  ;;  %v7965_v13 = vor.u32 %v6360_v47, %v6070_v3  ;;  %v7967_v5 = vor.u32 %v6358_v10, %v6072_v15  ;;  %v6054_v45 = vld [vmem:[#allocation13 + $0x68] sm:$0xf]  ;;  %v6354_v41 = vld [vmem:[#allocation13 + $0x6c] sm:$0xf] }
 0x22e   :  { %10188 = vst [vmem:[#allocation196_spill] sm:$0xff] %v7961_v55  ;;  %v6351_v26 = vld [vmem:[#allocation13 + $0x4c] sm:$0xf0]  ;;  %v6349_v47 = vld [vmem:[#allocation13 + $0x44] sm:$0xf] }
 0x22f   :  { %10189 = vst [vmem:[#allocation197_spill] sm:$0xff] %v7965_v13  ;;  %v6032_v15 = vld [vmem:[#allocation13 + $0x50] sm:$0xf0]  ;;  %v7983_v36 = vor.u32 %v6351_v26, %v6030_v28  ;;  %v6347_v32 = vld [vmem:[#allocation13 + $0x2c] sm:$0xf0] }
 0x230   :  { %2250 = vmatpush.bf16.msrb.mxu0 %v7947_v62  ;;  %2263 = vmatpush.bf16.msrb.mxu1 %v7949_v56  ;;  %10190 = vst [vmem:[#allocation198_spill] sm:$0xff] %v7967_v5  ;;  %v6356_v62 = vld [vmem:[#allocation13 + $0x74] sm:$0xf0]  ;;  %v6056_v56 = vld [vmem:[#allocation13 + $0x78] sm:$0xf0]  ;;  %v7985_v34 = vor.u32 %v6349_v47, %v6032_v15  ;;  %v7995_v28 = vor.u32 %v6347_v32, %v6014_v58 }
 0x231   :  { %2276 = vmatpush.bf16.msrb.mxu2 %v7953_v54  ;;  %2289 = vmatpush.bf16.msrb.mxu3 %v7955_v46  ;;  %10191 = vst [vmem:[#allocation199_spill] sm:$0xff] %v7971_v6  ;;  %v7977_v10 = vor.u32 %v6356_v62, %v6054_v45  ;;  %v7979_v3 = vor.u32 %v6354_v41, %v6056_v56  ;;  %v6038_v46 = vld [vmem:[#allocation13 + $0x48] sm:$0xf]  ;;  %v6350_v54 = vld [vmem:[#allocation13 + $0x4c] sm:$0xf] }
 0x232   :  { %10192 = vst [vmem:[#allocation200_spill] sm:$0xff] %v7973_v21  ;;  %v6345_v62 = vld [vmem:[#allocation13 + $0x24] sm:$0xf]  ;;  %v6016_v56 = vld [vmem:[#allocation13 + $0x30] sm:$0xf0] }
 0x233   :  { %10193 = vst [vmem:[#allocation201_spill] sm:$0xff] %v7977_v10  ;;  %v7997_v26 = vor.u32 %v6345_v62, %v6016_v56  ;;  %v5998_v47 = vld [vmem:[#allocation13] sm:$0xf]  ;;  %v6343_v15 = vld [vmem:[#allocation13 + $0xc] sm:$0xf0]  ;;  %v10212_v62 = vld [vmem:[#allocation52_spill] sm:$0xff] }
 0x234   :  { %2251 = vmatpush.bf16.msrb.mxu0 %v7959_v40  ;;  %2264 = vmatpush.bf16.msrb.mxu1 %v7961_v55  ;;  %10194 = vst [vmem:[#allocation202_spill] sm:$0xff] %v7979_v3  ;;  %v6352_v40 = vld [vmem:[#allocation13 + $0x54] sm:$0xf0]  ;;  %v6040_v55 = vld [vmem:[#allocation13 + $0x58] sm:$0xf0]  ;;  %v8007_v58 = vor.u32 %v6343_v15, %v5998_v47  ;;  %v10213_v56 = vld [vmem:[#allocation53_spill] sm:$0xff] }
 0x235   :  { %2277 = vmatpush.bf16.msrb.mxu2 %v7965_v13  ;;  %2290 = vmatpush.bf16.msrb.mxu3 %v7967_v5  ;;  %10195 = vst [vmem:[#allocation203_spill] sm:$0xff] %v7983_v36  ;;  %v7989_v41 = vor.u32 %v6352_v40, %v6038_v46  ;;  %v7991_v45 = vor.u32 %v6350_v54, %v6040_v55  ;;  %v6022_v5 = vld [vmem:[#allocation13 + $0x28] sm:$0xf]  ;;  %v6346_v13 = vld [vmem:[#allocation13 + $0x2c] sm:$0xf]  ;;  %v10214_v47 = vld [vmem:[#allocation62_spill] sm:$0xff] }
 0x236   :  { %10196 = vst [vmem:[#allocation204_spill] sm:$0xff] %v7985_v34  ;;  %v6341_v40 = vld [vmem:[#allocation13 + $0x4] sm:$0xf]  ;;  %v6000_v55 = vld [vmem:[#allocation13 + $0x10] sm:$0xf0] }
 0x237   :  { %10197 = vst [vmem:[#allocation205_spill] sm:$0xff] %v7989_v41  ;;  %v8009_v32 = vor.u32 %v6341_v40, %v6000_v55  ;;  %v10215_v40 = vld [vmem:[#allocation63_spill] sm:$0xff] }
 0x238   :  { %2252 = vmatpush.bf16.msrb.mxu0 %v7971_v6  ;;  %2265 = vmatpush.bf16.msrb.mxu1 %v7973_v21  ;;  %10198 = vst [vmem:[#allocation206_spill] sm:$0xff] %v7991_v45  ;;  %v6348_v6 = vld [vmem:[#allocation13 + $0x34] sm:$0xf0]  ;;  %v6024_v21 = vld [vmem:[#allocation13 + $0x38] sm:$0xf0] }
 0x239   :  { %2278 = vmatpush.bf16.msrb.mxu2 %v7977_v10  ;;  %2291 = vmatpush.bf16.msrb.mxu3 %v7979_v3  ;;  %10199 = vst [vmem:[#allocation207_spill] sm:$0xff] %v7995_v28  ;;  %v8001_v46 = vor.u32 %v6348_v6, %v6022_v5  ;;  %v8003_v54 = vor.u32 %v6346_v13, %v6024_v21  ;;  %v6006_v3 = vld [vmem:[#allocation13 + $0x8] sm:$0xf]  ;;  %v6342_v10 = vld [vmem:[#allocation13 + $0xc] sm:$0xf]  ;;  %v10209_v21 = vld [vmem:[#allocation49_spill] sm:$0xff] }
 0x23a   :  { %10200 = vst [vmem:[#allocation208_spill] sm:$0xff] %v7997_v26  ;;  %v10208_v6 = vld [vmem:[#allocation48_spill] sm:$0xff] }
 0x23b   :  { %10201 = vst [vmem:[#allocation209_spill] sm:$0xff] %v8001_v46 }
 0x23c   :  { %2253 = vmatpush.bf16.msrb.mxu0 %v7983_v36  ;;  %2266 = vmatpush.bf16.msrb.mxu1 %v7985_v34  ;;  %10202 = vst [vmem:[#allocation210_spill] sm:$0xff] %v8003_v54  ;;  %v6344_v36 = vld [vmem:[#allocation13 + $0x14] sm:$0xf0]  ;;  %v6008_v34 = vld [vmem:[#allocation13 + $0x18] sm:$0xf0] }
 0x23d   :  { %2279 = vmatpush.bf16.msrb.mxu2 %v7989_v41  ;;  %2292 = vmatpush.bf16.msrb.mxu3 %v7991_v45  ;;  %10203 = vst [vmem:[#allocation211_spill] sm:$0xff] %v8007_v58  ;;  %v8013_v13 = vor.u32 %v6344_v36, %v6006_v3  ;;  %v8015_v5 = vor.u32 %v6342_v10, %v6008_v34  ;;  %v10210_v10 = vld [vmem:[#allocation50_spill] sm:$0xff]  ;;  %v10211_v3 = vld [vmem:[#allocation51_spill] sm:$0xff] }
 0x23e   :  { %10204 = vst [vmem:[#allocation212_spill] sm:$0xff] %v8009_v32 }
 0x23f   :  { %10205 = vst [vmem:[#allocation213_spill] sm:$0xff] %v8013_v13 }
 0x240   :  { %2254 = vmatpush.bf16.msrb.mxu0 %v7995_v28  ;;  %2267 = vmatpush.bf16.msrb.mxu1 %v7997_v26  ;;  %10206 = vst [vmem:[#allocation214_spill] sm:$0xff] %v8015_v5 }
 0x241   :  { %2280 = vmatpush.bf16.msrb.mxu2 %v8001_v46  ;;  %2293 = vmatpush.bf16.msrb.mxu3 %v8003_v54 }
 0x244   :  { %2255 = vmatpush.bf16.msrb.mxu0 %v8007_v58  ;;  %2268 = vmatpush.bf16.msrb.mxu1 %v8009_v32 }
 0x245   :  { %2281 = vmatpush.bf16.msrb.mxu2 %v8013_v13  ;;  %2294 = vmatpush.bf16.msrb.mxu3 %v8015_v5 }
 0x247   :  { %2256 = vmatmul.bf16.vlgmr.msrb.gmra.mxu0 %v7815_v52  ;;  %2269 = vmatmul.bf16.vlgmr.msrb.gmra.mxu1 %v7815_v52 }
 0x248   :  { %2368 = vmatpush.bf16.msra.mxu0 %v7200_v39  ;;  %2381 = vmatpush.bf16.msra.mxu1 %v7202_v43 }
 0x249   :  { %2282 = vmatmul.bf16.vlgmr.msrb.gmra.mxu2 %v7815_v52  ;;  %2295 = vmatmul.bf16.vlgmr.msrb.gmra.mxu3 %v7815_v52  ;;  %v10207_v52 = vld [vmem:[#allocation47_spill] sm:$0xff] }
 0x24a   :  { %2394 = vmatpush.bf16.msra.mxu2 %v7204_v49  ;;  %2407 = vmatpush.bf16.msra.mxu3 %v7207_v50 }
 0x24c   :  { %2369 = vmatpush.bf16.msra.mxu0 %v7209_v51  ;;  %2382 = vmatpush.bf16.msra.mxu1 %v7212_v53 }
 0x24e   :  { %2395 = vmatpush.bf16.msra.mxu2 %v7224_v2  ;;  %2408 = vmatpush.bf16.msra.mxu3 %v7217_v60 }
 0x250   :  { %2370 = vmatpush.bf16.msra.mxu0 %v7219_v61  ;;  %2383 = vmatpush.bf16.msra.mxu1 %v7222_v1 }
 0x252   :  { %2396 = vmatpush.bf16.msra.mxu2 %v7227_v9  ;;  %2409 = vmatpush.bf16.msra.mxu3 %v7231_v11  ;;  %v10250_v11 = vld [vmem:[#allocation118_spill] sm:$0xff] }
 0x254   :  { %2371 = vmatpush.bf16.msra.mxu0 %v7233_v12  ;;  %2384 = vmatpush.bf16.msra.mxu1 %v7236_v16 }
 0x256   :  { %2397 = vmatpush.bf16.msra.mxu2 %v7239_v23  ;;  %2410 = vmatpush.bf16.msra.mxu3 %v7243_v24 }
 0x258   :  { %2372 = vmatpush.bf16.msra.mxu0 %v7245_v25  ;;  %2385 = vmatpush.bf16.msra.mxu1 %v7248_v27  ;;  %v10244_v27 = vld [vmem:[#allocation112_spill] sm:$0xff]  ;;  %v10245_v25 = vld [vmem:[#allocation113_spill] sm:$0xff] }
 0x25a   :  { %2398 = vmatpush.bf16.msra.mxu2 %v7254_v31  ;;  %2411 = vmatpush.bf16.msra.mxu3 %v7256_v33  ;;  %v10242_v31 = vld [vmem:[#allocation110_spill] sm:$0xff] }
 0x25c   :  { %2373 = vmatpush.bf16.msra.mxu0 %v7259_v37  ;;  %2386 = vmatpush.bf16.msra.mxu1 %v7262_v42  ;;  %v10218_v42 = vld [vmem:[#allocation54_spill] sm:$0xff]  ;;  %v10221_v37 = vld [vmem:[#allocation85_spill] sm:$0xff] }
 0x25e   :  { %2399 = vmatpush.bf16.msra.mxu2 %v7264_v44  ;;  %2412 = vmatpush.bf16.msra.mxu3 %v10207_v52  ;;  %v10216_v44 = vld [vmem:[#allocation82_spill] sm:$0xff]  ;;  %v10217_v52 = vld [vmem:[#allocation83_spill] sm:$0xff] }
 0x260   :  { %2374 = vmatpush.bf16.msra.mxu0 %v10208_v6  ;;  %2387 = vmatpush.bf16.msra.mxu1 %v10209_v21 }
 0x261   :  { %v1594_v36 = vpop.f32.mrf.mxu0  ;;  %v1607_v34 = vpop.f32.mrf.mxu1 }
 0x262   :  { %2400 = vmatpush.bf16.msra.mxu2 %v10210_v10  ;;  %2413 = vmatpush.bf16.msra.mxu3 %v10211_v3  ;;  %v1637_v15 = vadd.f32 %v1594_v36, %v10214_v47  ;;  %v1638_v55 = vadd.f32 %v1607_v34, %v10215_v40  ;;  %v10219_v10 = vld [vmem:[#allocation55_spill] sm:$0xff]  ;;  %v10220_v3 = vld [vmem:[#allocation84_spill] sm:$0xff]  ;;  %v10223_v36 = vld [vmem:[#allocation89_spill] sm:$0xff] }
 0x263   :  { %v10224_v40 = vld [vmem:[#allocation68_spill] sm:$0xff] }
 0x264   :  { %2375 = vmatpush.bf16.msra.mxu0 %v10212_v62  ;;  %2388 = vmatpush.bf16.msra.mxu1 %v10213_v56  ;;  %v5862_v6 = vmul.f32 -1.442695, %v1637_v15  ;;  %v5863_v21 = vmul.f32 -1.442695, %v1638_v55  ;;  %v10222_v56 = vld [vmem:[#allocation86_spill] sm:$0xff] }
 0x266   :  { %2401 = vmatpush.bf16.msra.mxu2 %v10218_v42  ;;  %2414 = vmatpush.bf16.msra.mxu3 %v10219_v10  ;;  %6479 = vpow2.f32 %v5862_v6  ;;  %v10226_v42 = vld [vmem:[#allocation93_spill] sm:$0xff]  ;;  %v10227_v10 = vld [vmem:[#allocation94_spill] sm:$0xff] }
 0x267   :  { %6481 = vpow2.f32 %v5863_v21  ;;  %v10229_v21 = vld [vmem:[#allocation96_spill] sm:$0xff] }
 0x268   :  { %2488 = vmatpush.bf16.msrb.mxu0 %v10216_v44  ;;  %2501 = vmatpush.bf16.msrb.mxu1 %v10217_v52  ;;  %v1620_v34 = vpop.f32.mrf.mxu2  ;;  %v1633_v47 = vpop.f32.mrf.mxu3  ;;  %v10225_v44 = vld [vmem:[#allocation90_spill] sm:$0xff] }
 0x269   :  { %v1640_v52 = vadd.f32 %v1633_v47, %v10224_v40  ;;  %v1596_v15 = vpop.f32.mrf.mxu0  ;;  %v1609_v55 = vpop.f32.mrf.mxu1  ;;  %v10231_v40 = vld [vmem:[#allocation99_spill] sm:$0xff] }
 0x26a   :  { %2514 = vmatpush.bf16.msrb.mxu2 %v10220_v3  ;;  %2527 = vmatpush.bf16.msrb.mxu3 %v10221_v37  ;;  %v10228_v3 = vld [vmem:[#allocation95_spill] sm:$0xff]  ;;  %v10232_v15 = vld [vmem:[#allocation101_spill] sm:$0xff] }
 0x26b   :  { %v5864_v6 = vmul.f32 -1.442695, %v1640_v52  ;;  %v10234_v52 = vld [vmem:[#allocation103_spill] sm:$0xff] }
 0x26c   :  { %2489 = vmatpush.bf16.msrb.mxu0 %v10222_v56  ;;  %2502 = vmatpush.bf16.msrb.mxu1 %v10223_v36  ;;  %v6480_v37 = vpop.eup %6479  ;;  %v10230_v36 = vld [vmem:[#allocation97_spill] sm:$0xff] }
 0x26d   :  { %v6482_v56 = vpop.eup %6481  ;;  %v1644_v62 = vadd.f32 1.0, %v6480_v37  ;;  %6483 = vpow2.f32 %v5864_v6  ;;  %v10236_v37 = vld [vmem:[#allocation105_spill] sm:$0xff] }
 0x26e   :  { %2515 = vmatpush.bf16.msrb.mxu2 %v10225_v44  ;;  %2528 = vmatpush.bf16.msrb.mxu3 %v10226_v42  ;;  %v1663_v47 = vadd.f32 1.0, %v6482_v56  ;;  %v10233_v42 = vld [vmem:[#allocation102_spill] sm:$0xff] }
 0x26f   :  { %6485 = vrcp.f32 %v1644_v62  ;;  %v10238_v44 = vld [vmem:[#allocation106_spill] sm:$0xff]  ;;  %vm1650_vm6 = vweird.f32 %v1644_v62 }
 0x270   :  { %2490 = vmatpush.bf16.msrb.mxu0 %v10227_v10  ;;  %2503 = vmatpush.bf16.msrb.mxu1 %v10228_v3  ;;  %6487 = vrcp.f32 %v1663_v47  ;;  %v1622_v55 = vpop.f32.mrf.mxu2  ;;  %v1635_v10 = vpop.f32.mrf.mxu3  ;;  %v10235_v3 = vld [vmem:[#allocation104_spill] sm:$0xff]  ;;  %vm1669_vm7 = vweird.f32 %v1663_v47 }
 0x272   :  { %2516 = vmatpush.bf16.msrb.mxu2 %v10229_v21  ;;  %2529 = vmatpush.bf16.msrb.mxu3 %v10230_v36  ;;  %v10237_v36 = vld [vmem:[#allocation66_spill] sm:$0xff] }
 0x273   :  { %v6484_v6 = vpop.eup %6483 }
 0x274   :  { %2491 = vmatpush.bf16.msrb.mxu0 %v10231_v40  ;;  %2504 = vmatpush.bf16.msrb.mxu1 %v10232_v15  ;;  %v8078_v21 = vadd.f32 1.0, %v6484_v6  ;;  %v1639_v40 = vadd.f32 %v1620_v34, %v10237_v36  ;;  %v10239_v15 = vld [vmem:[#allocation107_spill] sm:$0xff]  ;;  %v1656_v6 = vand.u32 2147483648, %v1644_v62  ;;  %v1675_v34 = vand.u32 2147483648, %v1663_v47 }
 0x275   :  { %v6486_v56 = vpop.eup %6485  ;;  %v10243_v36 = vld [vmem:[#allocation111_spill] sm:$0xff] }
 0x276   :  { %2517 = vmatpush.bf16.msrb.mxu2 %v10233_v42  ;;  %2530 = vmatpush.bf16.msrb.mxu3 %v10234_v52  ;;  %v6488_v55 = vpop.eup %6487  ;;  %v1646_v10 = vmul.f32 %v6486_v56, %v1644_v62  ;;  %6489 = vrcp.f32 %v8078_v21  ;;  %v10240_v42 = vld [vmem:[#allocation108_spill] sm:$0xff]  ;;  %v10241_v52 = vld [vmem:[#allocation109_spill] sm:$0xff]  ;;  %vm1651_vm4 = vweird.f32 %v6486_v56  ;;  %vm1689_vm13 = vweird.f32 %v8078_v21 }
 0x277   :  { %6491 = vtanh.f32 %v1639_v40  ;;  %vm1670_vm5 = vweird.f32 %v6488_v55  ;;  %vm1652_vm8 = vmor %vm1650_vm6, %vm1651_vm4 }
 0x278   :  { %2492 = vmatpush.bf16.msrb.mxu0 %v10235_v3  ;;  %2505 = vmatpush.bf16.msrb.mxu1 %v10236_v37  ;;  %v1665_v3 = vmul.f32 %v6488_v55, %v1663_v47  ;;  %v1647_v37 = vsub.f32 1.0, %v1646_v10  ;;  %vm1671_vm9 = vmor %vm1669_vm7, %vm1670_vm5 }
 0x27a   :  { %2518 = vmatpush.bf16.msrb.mxu2 %v10238_v44  ;;  %2531 = vmatpush.bf16.msrb.mxu3 %v10239_v15  ;;  %v1666_v33 = vsub.f32 1.0, %v1665_v3  ;;  %v1648_v44 = vmul.f32 %v6486_v56, %v1647_v37  ;;  %v1654_v15 = vand.u32 2147483647, %v1644_v62  ;;  %v1657_v3 = vor.u32 1.1754944e-38, %v1656_v6  ;;  %v10247_v37 = vld [vmem:[#allocation115_spill] sm:$0xff] }
 0x27c   :  { %2493 = vmatpush.bf16.msrb.mxu0 %v10240_v42  ;;  %2506 = vmatpush.bf16.msrb.mxu1 %v10241_v52  ;;  %v1667_v42 = vmul.f32 %v6488_v55, %v1666_v33  ;;  %v1673_v52 = vand.u32 2147483647, %v1663_v47  ;;  %v6490_v24 = vpop.eup %6489  ;;  %v1649_v10 = vadd.f32 %v6486_v56, %v1648_v44  ;;  %vm1655_vm10 = vcmp.eq.f32.partialorder %v1654_v15, 8.507059e+37  ;;  %v10248_v33 = vld [vmem:[#allocation116_spill] sm:$0xff] }
 0x27d   :  { %v6492_v44 = vpop.eup %6491  ;;  %vm1690_vm12 = vweird.f32 %v6490_v24 }
 0x27e   :  { %2519 = vmatpush.bf16.msrb.mxu2 %v10242_v31  ;;  %2532 = vmatpush.bf16.msrb.mxu3 %v10243_v36  ;;  %v1668_v40 = vadd.f32 %v6488_v55, %v1667_v42  ;;  %v1685_v36 = vmul.f32 %v6490_v24, %v8078_v21  ;;  %v10246_v31 = vld [vmem:[#allocation114_spill] sm:$0xff]  ;;  %v1653_v23 = vsel %vm1652_vm8, %v6486_v56, %v1649_v10  ;;  %vm1674_vm11 = vcmp.eq.f32.partialorder %v1673_v52, 8.507059e+37  ;;  %vm1691_vm14 = vmor %vm1689_vm13, %vm1690_vm12 }
 0x27f   :  { %v1658_v62 = vsel %vm1655_vm10, %v1657_v3, %v1653_v23  ;;  %v1695_v23 = vand.u32 2147483648, %v8078_v21 }
 0x280   :  { %2494 = vmatpush.bf16.msrb.mxu0 %v10244_v27  ;;  %2507 = vmatpush.bf16.msrb.mxu1 %v10245_v25  ;;  %v1676_v27 = vor.u32 1.1754944e-38, %v1675_v34  ;;  %v10249_v25 = vld [vmem:[#allocation117_spill] sm:$0xff]  ;;  %v1672_v47 = vsel %vm1671_vm9, %v6488_v55, %v1668_v40  ;;  %v1686_v6 = vsub.f32 1.0, %v1685_v36  ;;  %v1700_v16 = vmul.f32 %v6492_v44, %v1658_v62 }
 0x281   :  { %v1696_v52 = vor.u32 1.1754944e-38, %v1695_v23 }
 0x282   :  { %2520 = vmatpush.bf16.msrb.mxu2 %v10246_v31  ;;  %2533 = vmatpush.bf16.msrb.mxu3 %v10247_v37  ;;  %v1677_v42 = vsel %vm1674_vm11, %v1676_v27, %v1672_v47  ;;  %v1687_v31 = vmul.f32 %v6490_v24, %v1686_v6  ;;  %v10251_v37 = vld [vmem:[#allocation119_spill] sm:$0xff]  ;;  %v1693_v27 = vand.u32 2147483647, %v8078_v21 }
 0x283   :  { %v1699_v12 = vmul.f32 %v1677_v42, %v7742_v48  ;;  %v1714_v34 = vpop.f32.mrf.mxu0  ;;  %v1727_v10 = vpop.f32.mrf.mxu1 }
 0x284   :  { %2495 = vmatpush.bf16.msrb.mxu0 %v10248_v33  ;;  %2508 = vmatpush.bf16.msrb.mxu1 %v10249_v25  ;;  %v1688_v15 = vadd.f32 %v6490_v24, %v1687_v31  ;;  %vm1694_vm15 = vcmp.eq.f32.partialorder %v1693_v27, 8.507059e+37  ;;  %v10253_v27 = vld [vmem:[#allocation57_spill] sm:$0xff] }
 0x285   :  { %v8098_v56 = vadd.f32 %v1700_v16, %v1699_v12 }
 0x286   :  { %2521 = vmatpush.bf16.msrb.mxu2 %v10250_v11  ;;  %2534 = vmatpush.bf16.msrb.mxu3 %v10251_v37  ;;  %v1692_v48 = vsel %vm1691_vm14, %v6490_v24, %v1688_v15  ;;  %v10252_v15 = vld [vmem:[#allocation56_spill] sm:$0xff] }
 0x287   :  { %6493 = vtanh.f32 %v8098_v56  ;;  %v1697_v36 = vsel %vm1694_vm15, %v1696_v52, %v1692_v48  ;;  %v10254_v52 = vld [vmem:[#allocation126_spill] sm:$0xff] }
 0x28a   :  { %v1740_v12 = vpop.f32.mrf.mxu2  ;;  %v1753_v16 = vpop.f32.mrf.mxu3 }
 0x28b   :  { %v1716_v3 = vpop.f32.mrf.mxu0  ;;  %v1729_v40 = vpop.f32.mrf.mxu1 }
 0x28c   :  { %v10256_v3 = vld [vmem:[#allocation128_spill] sm:$0xff]  ;;  %v10257_v40 = vld [vmem:[#allocation129_spill] sm:$0xff] }
 0x28d   :  { %v6494_v55 = vpop.eup %6493 }
 0x28e   :  { %v1703_v31 = vmul.f32 %v6494_v55, %v1697_v36  ;;  %v10255_v55 = vld [vmem:[#allocation127_spill] sm:$0xff] }
 0x290   :  { %v8104_v44 = vpack.c.bf16 %v1703_v31, %v1703_v31 }
 0x292   :  { %2376 = vmatmul.bf16.vlgmr.msra.gmra.mxu0 %v8104_v44  ;;  %2389 = vmatmul.bf16.vlgmr.msra.gmra.mxu1 %v8104_v44  ;;  %v1742_v24 = vpop.f32.mrf.mxu2  ;;  %v1755_v21 = vpop.f32.mrf.mxu3 }
 0x293   :  { %2402 = vmatmul.bf16.vlgmr.msra.gmra.mxu2 %v8104_v44  ;;  %2415 = vmatmul.bf16.vlgmr.msra.gmra.mxu3 %v8104_v44  ;;  %v1766_v62 = vpop.f32.mrf.mxu0  ;;  %v1779_v47 = vpop.f32.mrf.mxu1  ;;  %v10258_v24 = vld [vmem:[#allocation130_spill] sm:$0xff]  ;;  %v10259_v21 = vld [vmem:[#allocation131_spill] sm:$0xff] }
 0x294   :  { %2540 = vmatpush.bf16.msra.mxu0 %v7542_v38  ;;  %2553 = vmatpush.bf16.msra.mxu1 %v10121_v59  ;;  %v1767_v6 = vadd.f32 %v1766_v62, %v1714_v34  ;;  %v1780_v42 = vadd.f32 %v1779_v47, %v1727_v10 }
 0x295   :  { %2566 = vmatpush.bf16.msra.mxu2 %v10122_v8  ;;  %2579 = vmatpush.bf16.msra.mxu3 %v10123_v20 }
 0x296   :  { %v1809_v23 = vadd.f32 %v1767_v6, %v10252_v15  ;;  %v1810_v48 = vadd.f32 %v1780_v42, %v10253_v27  ;;  %v10260_v42 = vld [vmem:[#allocation61_spill] sm:$0xff]  ;;  %v10261_v15 = vld [vmem:[#allocation132_spill] sm:$0xff] }
 0x298   :  { %2541 = vmatpush.bf16.msra.mxu0 %v10125_v35  ;;  %2554 = vmatpush.bf16.msra.mxu1 %v10126_v4  ;;  %v5865_v36 = vmul.f32 -1.442695, %v1809_v23  ;;  %v5866_v31 = vmul.f32 -1.442695, %v1810_v48  ;;  %v10262_v23 = vld [vmem:[#allocation133_spill] sm:$0xff]  ;;  %v10263_v48 = vld [vmem:[#allocation134_spill] sm:$0xff] }
 0x299   :  { %2567 = vmatpush.bf16.msra.mxu2 %v10254_v52  ;;  %2580 = vmatpush.bf16.msra.mxu3 %v10255_v55 }
 0x29a   :  { %6495 = vpow2.f32 %v5865_v36  ;;  %v1792_v34 = vpop.f32.mrf.mxu2  ;;  %v1805_v10 = vpop.f32.mrf.mxu3 }
 0x29b   :  { %6497 = vpow2.f32 %v5866_v31  ;;  %v1806_v62 = vadd.f32 %v1805_v10, %v1753_v16  ;;  %v1768_v47 = vpop.f32.mrf.mxu0  ;;  %v1781_v6 = vpop.f32.mrf.mxu1 }
 0x29c   :  { %2542 = vmatpush.bf16.msra.mxu0 %v10256_v3  ;;  %2555 = vmatpush.bf16.msra.mxu1 %v10257_v40  ;;  %v10264_v40 = vld [vmem:[#allocation135_spill] sm:$0xff] }
 0x29d   :  { %2568 = vmatpush.bf16.msra.mxu2 %v10258_v24  ;;  %2581 = vmatpush.bf16.msra.mxu3 %v10259_v21  ;;  %v1812_v27 = vadd.f32 %v1806_v62, %v10260_v42  ;;  %v1793_v62 = vadd.f32 %v1792_v34, %v1740_v12  ;;  %v10269_v12 = vld [vmem:[#allocation145_spill] sm:$0xff] }
 0x29f   :  { %v5867_v36 = vmul.f32 -1.442695, %v1812_v27 }
 0x2a0   :  { %2543 = vmatpush.bf16.msra.mxu0 %v10261_v15  ;;  %2556 = vmatpush.bf16.msra.mxu1 %v10262_v23  ;;  %v6496_v3 = vpop.eup %6495 }
 0x2a1   :  { %2569 = vmatpush.bf16.msra.mxu2 %v10263_v48  ;;  %2582 = vmatpush.bf16.msra.mxu3 %v10264_v40  ;;  %v6498_v55 = vpop.eup %6497  ;;  %v1816_v24 = vadd.f32 1.0, %v6496_v3  ;;  %6499 = vpow2.f32 %v5867_v36  ;;  %v10265_v3 = vld [vmem:[#allocation142_spill] sm:$0xff]  ;;  %v10273_v40 = vld [vmem:[#allocation149_spill] sm:$0xff] }
 0x2a2   :  { %v1835_v16 = vadd.f32 1.0, %v6498_v55  ;;  %v1794_v31 = vpop.f32.mrf.mxu2  ;;  %v1807_v10 = vpop.f32.mrf.mxu3  ;;  %v10266_v55 = vld [vmem:[#allocation143_spill] sm:$0xff] }
 0x2a3   :  { %6501 = vrcp.f32 %v1816_v24  ;;  %v10267_v10 = vld [vmem:[#allocation59_spill] sm:$0xff]  ;;  %vm1822_vm2 = vweird.f32 %v1816_v24 }
 0x2a4   :  { %2544 = vmatpush.bf16.msra.mxu0 %v10137_v0  ;;  %2557 = vmatpush.bf16.msra.mxu1 %v10138_v7  ;;  %6503 = vrcp.f32 %v1835_v16  ;;  %v1811_v42 = vadd.f32 %v1793_v62, %v10267_v10  ;;  %v1828_v62 = vand.u32 2147483648, %v1816_v24  ;;  %v1847_v48 = vand.u32 2147483648, %v1835_v16 }
 0x2a5   :  { %2570 = vmatpush.bf16.msra.mxu2 %v10139_v18  ;;  %2583 = vmatpush.bf16.msra.mxu3 %v10140_v57  ;;  %v10268_v57 = vld [vmem:[#allocation144_spill] sm:$0xff]  ;;  %v1845_v21 = vand.u32 2147483647, %v1835_v16  ;;  %vm1841_vm3 = vweird.f32 %v1835_v16 }
 0x2a7   :  { %v8133_v47 = vpop.f32.mrf.mxu0  ;;  %v8135_v27 = vpop.f32.mrf.mxu1  ;;  %vm1846_vm7 = vcmp.eq.f32.partialorder %v1845_v21, 8.507059e+37 }
 0x2a8   :  { %2545 = vmatpush.bf16.msra.mxu0 %v10142_v22  ;;  %2558 = vmatpush.bf16.msra.mxu1 %v10143_v30  ;;  %v6500_v6 = vpop.eup %6499  ;;  %v10270_v22 = vld [vmem:[#allocation146_spill] sm:$0xff]  ;;  %v10271_v30 = vld [vmem:[#allocation147_spill] sm:$0xff] }
 0x2a9   :  { %2571 = vmatpush.bf16.msra.mxu2 %v10265_v3  ;;  %2584 = vmatpush.bf16.msra.mxu3 %v10266_v55  ;;  %v8141_v36 = vadd.f32 1.0, %v6500_v6  ;;  %v6502_v31 = vpop.eup %6501 }
 0x2aa   :  { %v6504_v34 = vpop.eup %6503  ;;  %v1818_v18 = vmul.f32 %v6502_v31, %v1816_v24  ;;  %vm1823_vm0 = vweird.f32 %v6502_v31 }
 0x2ab   :  { %6505 = vrcp.f32 %v8141_v36  ;;  %v1837_v3 = vmul.f32 %v6504_v34, %v1835_v16  ;;  %vm1842_vm1 = vweird.f32 %v6504_v34  ;;  %vm1824_vm4 = vmor %vm1822_vm2, %vm1823_vm0  ;;  %vm1861_vm9 = vweird.f32 %v8141_v36 }
 0x2ac   :  { %2546 = vmatpush.bf16.msra.mxu0 %v10268_v57  ;;  %2559 = vmatpush.bf16.msra.mxu1 %v10269_v12  ;;  %v1819_v55 = vsub.f32 1.0, %v1818_v18  ;;  %6507 = vtanh.f32 %v1811_v42  ;;  %v10272_v12 = vld [vmem:[#allocation148_spill] sm:$0xff]  ;;  %v10275_v18 = vld [vmem:[#allocation151_spill] sm:$0xff]  ;;  %vm1843_vm5 = vmor %vm1841_vm3, %vm1842_vm1 }
 0x2ad   :  { %2572 = vmatpush.bf16.msra.mxu2 %v10270_v22  ;;  %2585 = vmatpush.bf16.msra.mxu3 %v10271_v30  ;;  %v1838_v0 = vsub.f32 1.0, %v1837_v3  ;;  %v1826_v22 = vand.u32 2147483647, %v1816_v24  ;;  %v10274_v30 = vld [vmem:[#allocation150_spill] sm:$0xff]  ;;  %v10276_v24 = vld [vmem:[#allocation152_spill] sm:$0xff] }
 0x2ae   :  { %v8149_v7 = vpop.f32.mrf.mxu3  ;;  %v8151_v6 = vpop.f32.mrf.mxu2  ;;  %v1820_v23 = vmul.f32 %v6502_v31, %v1819_v55  ;;  %v1848_v55 = vor.u32 1.1754944e-38, %v1847_v48 }
 0x2af   :  { %v2047_v10 = vpop.f32.mrf.mxu0  ;;  %v2060_v57 = vpop.f32.mrf.mxu1  ;;  %v1839_v15 = vmul.f32 %v6504_v34, %v1838_v0  ;;  %vm1827_vm6 = vcmp.eq.f32.partialorder %v1826_v22, 8.507059e+37  ;;  %v1867_v22 = vand.u32 2147483648, %v8141_v36 }
 0x2b0   :  { %2547 = vmatpush.bf16.msra.mxu0 %v10272_v12  ;;  %2560 = vmatpush.bf16.msra.mxu1 %v10273_v40  ;;  %v1821_v52 = vadd.f32 %v6502_v31, %v1820_v23  ;;  %v1829_v57 = vor.u32 1.1754944e-38, %v1828_v62 }
 0x2b1   :  { %2573 = vmatpush.bf16.msra.mxu2 %v10274_v30  ;;  %2586 = vmatpush.bf16.msra.mxu3 %v10275_v18  ;;  %v6506_v3 = vpop.eup %6505  ;;  %v1840_v42 = vadd.f32 %v6504_v34, %v1839_v15 }
 0x2b2   :  { %v1857_v10 = vmul.f32 %v6506_v3, %v8141_v36  ;;  %v1825_v40 = vsel %vm1824_vm4, %v6502_v31, %v1821_v52  ;;  %v6508_v12 = vpop.eup %6507  ;;  %vm1862_vm8 = vweird.f32 %v6506_v3  ;;  %v1865_v52 = vand.u32 2147483647, %v8141_v36 }
 0x2b3   :  { %v1830_v30 = vsel %vm1827_vm6, %v1829_v57, %v1825_v40  ;;  %v1844_v4 = vsel %vm1843_vm5, %v6504_v34, %v1840_v42  ;;  %vm1863_vm10 = vmor %vm1861_vm9, %vm1862_vm8  ;;  %v10279_v42 = vld [vmem:[#allocation153_spill] sm:$0xff] }
 0x2b4   :  { %v1858_v0 = vsub.f32 1.0, %v1857_v10  ;;  %v1849_v18 = vsel %vm1846_vm7, %v1848_v55, %v1844_v4  ;;  %v1872_v35 = vmul.f32 %v6508_v12, %v1830_v30  ;;  %v1868_v30 = vor.u32 1.1754944e-38, %v1867_v22  ;;  %v10280_v10 = vld [vmem:[#allocation154_spill] sm:$0xff] }
 0x2b5   :  { %v1871_v16 = vmul.f32 %v1849_v18, %v10276_v24  ;;  %vm1866_vm11 = vcmp.eq.f32.partialorder %v1865_v52, 8.507059e+37 }
 0x2b6   :  { %v2086_v20 = vpop.f32.mrf.mxu3  ;;  %v2073_v23 = vpop.f32.mrf.mxu2  ;;  %v1859_v8 = vmul.f32 %v6506_v3, %v1858_v0  ;;  %v10281_v0 = vld [vmem:[#allocation155_spill] sm:$0xff] }
 0x2b7   :  { %v8159_v62 = vadd.f32 %v1872_v35, %v1871_v16  ;;  %v684_v20 = vld [vmem:[%s9561_s9] sm:$0xf] }
 0x2b8   :  { %v1860_v15 = vadd.f32 %v6506_v3, %v1859_v8  ;;  %v8168_v21 = vperm.slane %v684_v20, 0  ;;  %v8170_v48 = vperm.slane %v684_v20, 1  ;;  %v8186_v23 = vperm.slane %v684_v20, 3 }
 0x2b9   :  { %6509 = vtanh.f32 %v8159_v62 }
 0x2ba   :  { %v1864_v4 = vsel %vm1863_vm10, %v6506_v3, %v1860_v15  ;;  %10277 = vst [vmem:[#allocation62_spill] sm:$0xff] %v8168_v21 }
 0x2bb   :  { %v1869_v40 = vsel %vm1866_vm11, %v1868_v30, %v1864_v4  ;;  %10278 = vst [vmem:[#allocation63_spill] sm:$0xff] %v8170_v48  ;;  %v10284_v4 = vld [vmem:[#allocation157_spill] sm:$0xff]  ;;  %v10285_v30 = vld [vmem:[#allocation158_spill] sm:$0xff] }
 0x2bc   :  { %10283 = vst [vmem:[#allocation68_spill] sm:$0xff] %v8186_v23 }
 0x2bf   :  { %v6510_v35 = vpop.eup %6509 }
 0x2c0   :  { %v1875_v8 = vmul.f32 %v6510_v35, %v1869_v40  ;;  %v10286_v35 = vld [vmem:[#allocation159_spill] sm:$0xff]  ;;  %v10287_v40 = vld [vmem:[#allocation160_spill] sm:$0xff] }
 0x2c2   :  { %v8172_v31 = vpack.c.bf16 %v1875_v8, %v1875_v8 }
 0x2c4   :  { %v2257_v12 = vpop.f32.mrf.mxu0  ;;  %v2270_v34 = vpop.f32.mrf.mxu1  ;;  %2496 = vmatmul.bf16.vlgmr.msrb.gmra.mxu0 %v8172_v31  ;;  %2509 = vmatmul.bf16.vlgmr.msrb.gmra.mxu1 %v8172_v31 }
 0x2c5   :  { %v2258_v36 = vadd.f32 %v2257_v12, %v8133_v47  ;;  %v2271_v18 = vadd.f32 %v2270_v34, %v8135_v27  ;;  %2522 = vmatmul.bf16.vlgmr.msrb.gmra.mxu2 %v8172_v31  ;;  %2535 = vmatmul.bf16.vlgmr.msrb.gmra.mxu3 %v8172_v31  ;;  %v10282_v27 = vld [vmem:[#allocation156_spill] sm:$0xff]  ;;  %v10288_v34 = vld [vmem:[#allocation161_spill] sm:$0xff] }
 0x2c6   :  { %2660 = vmatpush.bf16.msrb.mxu0 %v10279_v42  ;;  %2673 = vmatpush.bf16.msrb.mxu1 %v10280_v10 }
 0x2c7   :  { %v2300_v3 = vadd.f32 %v2258_v36, %v8168_v21  ;;  %v2301_v57 = vadd.f32 %v2271_v18, %v8170_v48  ;;  %2686 = vmatpush.bf16.msrb.mxu2 %v10281_v0  ;;  %2699 = vmatpush.bf16.msrb.mxu3 %v10282_v27  ;;  %v10289_v36 = vld [vmem:[#allocation162_spill] sm:$0xff] }
 0x2c9   :  { %v6124_v55 = vmul.f32 -1.442695, %v2300_v3  ;;  %v6125_v47 = vmul.f32 -1.442695, %v2301_v57  ;;  %v10290_v3 = vld [vmem:[#allocation163_spill] sm:$0xff] }
 0x2ca   :  { %2661 = vmatpush.bf16.msrb.mxu0 %v10284_v4  ;;  %2674 = vmatpush.bf16.msrb.mxu1 %v10285_v30 }
 0x2cb   :  { %6511 = vpow2.f32 %v6124_v55  ;;  %2687 = vmatpush.bf16.msrb.mxu2 %v10286_v35  ;;  %2700 = vmatpush.bf16.msrb.mxu3 %v10287_v40  ;;  %v10305_v35 = vld [vmem:[#allocation177_spill] sm:$0xff] }
 0x2cc   :  { %v2283_v24 = vpop.f32.mrf.mxu2  ;;  %v2296_v16 = vpop.f32.mrf.mxu3  ;;  %6513 = vpow2.f32 %v6125_v47 }
 0x2cd   :  { %v2297_v15 = vadd.f32 %v2296_v16, %v8149_v7  ;;  %v2259_v22 = vpop.f32.mrf.mxu0  ;;  %v2272_v52 = vpop.f32.mrf.mxu1  ;;  %v10291_v7 = vld [vmem:[#allocation164_spill] sm:$0xff] }
 0x2ce   :  { %2662 = vmatpush.bf16.msrb.mxu0 %v10288_v34  ;;  %2675 = vmatpush.bf16.msrb.mxu1 %v10289_v36  ;;  %v10292_v52 = vld [vmem:[#allocation165_spill] sm:$0xff]  ;;  %v10295_v36 = vld [vmem:[#allocation168_spill] sm:$0xff]  ;;  %v8202_v34 = vperm.slane %v684_v20, 2 }
 0x2cf   :  { %v2303_v8 = vadd.f32 %v2297_v15, %v8186_v23  ;;  %2688 = vmatpush.bf16.msrb.mxu2 %v10290_v3  ;;  %2701 = vmatpush.bf16.msrb.mxu3 %v10291_v7  ;;  %v10293_v15 = vld [vmem:[#allocation166_spill] sm:$0xff]  ;;  %v2284_v7 = vadd.f32 %v2283_v24, %v8151_v6  ;;  %v10300_v20 = vld [vmem:[#allocation172_spill] sm:$0xff] }
 0x2d0   :  { %10296 = vst [vmem:[#allocation66_spill] sm:$0xff] %v8202_v34 }
 0x2d1   :  { %v6126_v12 = vmul.f32 -1.442695, %v2303_v8  ;;  %v6512_v18 = vpop.eup %6511  ;;  %v10294_v8 = vld [vmem:[#allocation167_spill] sm:$0xff]  ;;  %v2302_v24 = vadd.f32 %v2284_v7, %v8202_v34 }
 0x2d2   :  { %v6514_v57 = vpop.eup %6513  ;;  %v2307_v55 = vadd.f32 1.0, %v6512_v18  ;;  %2663 = vmatpush.bf16.msrb.mxu0 %v10292_v52  ;;  %2676 = vmatpush.bf16.msrb.mxu1 %v10293_v15  ;;  %v10297_v18 = vld [vmem:[#allocation169_spill] sm:$0xff]  ;;  %v10302_v52 = vld [vmem:[#allocation174_spill] sm:$0xff] }
 0x2d3   :  { %6515 = vpow2.f32 %v6126_v12  ;;  %v2326_v47 = vadd.f32 1.0, %v6514_v57  ;;  %2689 = vmatpush.bf16.msrb.mxu2 %v10294_v8  ;;  %2702 = vmatpush.bf16.msrb.mxu3 %v10295_v36  ;;  %v10298_v57 = vld [vmem:[#allocation170_spill] sm:$0xff] }
 0x2d4   :  { %v2285_v16 = vpop.f32.mrf.mxu2  ;;  %v2298_v22 = vpop.f32.mrf.mxu3  ;;  %6517 = vrcp.f32 %v2307_v55  ;;  %2548 = vmatmul.bf16.vlgmr.msra.gmra.mxu0 %v8104_v44  ;;  %2561 = vmatmul.bf16.vlgmr.msra.gmra.mxu1 %v8104_v44  ;;  %v2319_v3 = vand.u32 2147483648, %v2307_v55  ;;  %v2317_v7 = vand.u32 2147483647, %v2307_v55  ;;  %vm2313_vm14 = vweird.f32 %v2307_v55 }
 0x2d5   :  { %6519 = vrcp.f32 %v2326_v47  ;;  %2574 = vmatmul.bf16.vlgmr.msra.gmra.mxu2 %v8104_v44  ;;  %2587 = vmatmul.bf16.vlgmr.msra.gmra.mxu3 %v8104_v44  ;;  %v10299_v22 = vld [vmem:[#allocation171_spill] sm:$0xff]  ;;  %v10301_v44 = vld [vmem:[#allocation173_spill] sm:$0xff]  ;;  %v2336_v40 = vand.u32 2147483647, %v2326_v47  ;;  %vm2332_vm15 = vweird.f32 %v2326_v47 }
 0x2d6   :  { %2664 = vmatpush.bf16.msrb.mxu0 %v10297_v18  ;;  %2677 = vmatpush.bf16.msrb.mxu1 %v10298_v57  ;;  %v10303_v57 = vld [vmem:[#allocation175_spill] sm:$0xff]  ;;  %vm2318_vm1 = vcmp.eq.f32.partialorder %v2317_v7, 8.507059e+37  ;;  %v10309_v7 = vld [vmem:[#allocation184_spill] sm:$0xff] }
 0x2d7   :  { %2690 = vmatpush.bf16.msrb.mxu2 %v10299_v22  ;;  %2703 = vmatpush.bf16.msrb.mxu3 %v10300_v20  ;;  %v2338_v20 = vand.u32 2147483648, %v2326_v47  ;;  %vm2337_vm3 = vcmp.eq.f32.partialorder %v2336_v40, 8.507059e+37  ;;  %v10311_v40 = vld [vmem:[#allocation186_spill] sm:$0xff] }
 0x2d9   :  { %v6516_v12 = vpop.eup %6515 }
 0x2da   :  { %v8211_v16 = vadd.f32 1.0, %v6516_v12  ;;  %v6518_v6 = vpop.eup %6517  ;;  %2665 = vmatpush.bf16.msrb.mxu0 %v10301_v44  ;;  %2678 = vmatpush.bf16.msrb.mxu1 %v10302_v52  ;;  %v10304_v12 = vld [vmem:[#allocation176_spill] sm:$0xff]  ;;  %v10306_v44 = vld [vmem:[#allocation178_spill] sm:$0xff] }
 0x2db   :  { %v6520_v36 = vpop.eup %6519  ;;  %v2309_v8 = vmul.f32 %v6518_v6, %v2307_v55  ;;  %2691 = vmatpush.bf16.msrb.mxu2 %v10303_v57  ;;  %2704 = vmatpush.bf16.msrb.mxu3 %v10304_v12  ;;  %vm2314_vm12 = vweird.f32 %v6518_v6 }
 0x2dc   :  { %6521 = vrcp.f32 %v8211_v16  ;;  %v2328_v15 = vmul.f32 %v6520_v36, %v2326_v47  ;;  %vm2333_vm13 = vweird.f32 %v6520_v36  ;;  %vm2315_vm0 = vmor %vm2313_vm14, %vm2314_vm12  ;;  %vm2352_vm5 = vweird.f32 %v8211_v16 }
 0x2dd   :  { %v2310_v18 = vsub.f32 1.0, %v2309_v8  ;;  %6523 = vtanh.f32 %v2302_v24  ;;  %vm2334_vm2 = vmor %vm2332_vm15, %vm2333_vm13 }
 0x2de   :  { %v2329_v22 = vsub.f32 1.0, %v2328_v15  ;;  %2666 = vmatpush.bf16.msrb.mxu0 %v10305_v35  ;;  %2679 = vmatpush.bf16.msrb.mxu1 %v10306_v44  ;;  %v2320_v15 = vor.u32 1.1754944e-38, %v2319_v3 }
 0x2df   :  { %v2311_v23 = vmul.f32 %v6518_v6, %v2310_v18  ;;  %2692 = vmatpush.bf16.msrb.mxu2 %v7901_v29  ;;  %2705 = vmatpush.bf16.msrb.mxu3 %v7903_v14 }
 0x2e0   :  { %v2330_v34 = vmul.f32 %v6520_v36, %v2329_v22  ;;  %v2339_v22 = vor.u32 1.1754944e-38, %v2338_v20 }
 0x2e1   :  { %v2312_v8 = vadd.f32 %v6518_v6, %v2311_v23 }
 0x2e2   :  { %v6522_v52 = vpop.eup %6521  ;;  %v2331_v18 = vadd.f32 %v6520_v36, %v2330_v34  ;;  %2667 = vmatpush.bf16.msrb.mxu0 %v7907_v17  ;;  %2680 = vmatpush.bf16.msrb.mxu1 %v7909_v63  ;;  %v10307_v34 = vld [vmem:[#allocation182_spill] sm:$0xff] }
 0x2e3   :  { %v2348_v24 = vmul.f32 %v6522_v52, %v8211_v16  ;;  %v2316_v12 = vsel %vm2315_vm0, %v6518_v6, %v2312_v8  ;;  %v6524_v35 = vpop.eup %6523  ;;  %2693 = vmatpush.bf16.msrb.mxu2 %v7913_v19  ;;  %2706 = vmatpush.bf16.msrb.mxu3 %v10307_v34  ;;  %v10308_v6 = vld [vmem:[#allocation183_spill] sm:$0xff]  ;;  %vm2353_vm4 = vweird.f32 %v6522_v52 }
 0x2e4   :  { %v2321_v44 = vsel %vm2318_vm1, %v2320_v15, %v2316_v12  ;;  %v2335_v57 = vsel %vm2334_vm2, %v6520_v36, %v2331_v18  ;;  %v10310_v12 = vld [vmem:[#allocation185_spill] sm:$0xff]  ;;  %v10315_v18 = vld [vmem:[#allocation190_spill] sm:$0xff]  ;;  %vm2354_vm6 = vmor %vm2352_vm5, %vm2353_vm4 }
 0x2e5   :  { %v2349_v23 = vsub.f32 1.0, %v2348_v24  ;;  %v2340_v55 = vsel %vm2337_vm3, %v2339_v22, %v2335_v57  ;;  %v2363_v47 = vmul.f32 %v6524_v35, %v2321_v44  ;;  %v2358_v35 = vand.u32 2147483648, %v8211_v16  ;;  %v10312_v57 = vld [vmem:[#allocation187_spill] sm:$0xff]  ;;  %v10313_v44 = vld [vmem:[#allocation188_spill] sm:$0xff]  ;;  %v10314_v15 = vld [vmem:[#allocation189_spill] sm:$0xff] }
 0x2e6   :  { %v2362_v3 = vmul.f32 0.0, %v2340_v55  ;;  %2712 = vmatpush.bf16.msra.mxu0 %v10308_v6  ;;  %2725 = vmatpush.bf16.msra.mxu1 %v10309_v7  ;;  %v2356_v24 = vand.u32 2147483647, %v8211_v16  ;;  %v10317_v55 = vld [vmem:[#allocation192_spill] sm:$0xff]  ;;  %v10322_v16 = vld [vmem:[#allocation197_spill] sm:$0xff] }
 0x2e7   :  { %v2350_v20 = vmul.f32 %v6522_v52, %v2349_v23  ;;  %2738 = vmatpush.bf16.msra.mxu2 %v10310_v12  ;;  %2751 = vmatpush.bf16.msra.mxu3 %v10311_v40  ;;  %v10316_v23 = vld [vmem:[#allocation191_spill] sm:$0xff] }
 0x2e8   :  { %v8235_v36 = vadd.f32 %v2363_v47, %v2362_v3  ;;  %v2359_v47 = vor.u32 1.1754944e-38, %v2358_v35  ;;  %v10318_v3 = vld [vmem:[#allocation193_spill] sm:$0xff]  ;;  %vm2357_vm7 = vcmp.eq.f32.partialorder %v2356_v24, 8.507059e+37  ;;  %v10324_v35 = vld [vmem:[#allocation199_spill] sm:$0xff] }
 0x2e9   :  { %v2351_v8 = vadd.f32 %v6522_v52, %v2350_v20  ;;  %v10319_v20 = vld [vmem:[#allocation194_spill] sm:$0xff]  ;;  %v10326_v24 = vld [vmem:[#allocation201_spill] sm:$0xff] }
 0x2ea   :  { %6525 = vtanh.f32 %v8235_v36  ;;  %2713 = vmatpush.bf16.msra.mxu0 %v10312_v57  ;;  %2726 = vmatpush.bf16.msra.mxu1 %v10313_v44 }
 0x2eb   :  { %2739 = vmatpush.bf16.msra.mxu2 %v10314_v15  ;;  %2752 = vmatpush.bf16.msra.mxu3 %v10315_v18  ;;  %v2355_v22 = vsel %vm2354_vm6, %v6522_v52, %v2351_v8  ;;  %v10320_v15 = vld [vmem:[#allocation195_spill] sm:$0xff]  ;;  %v10321_v18 = vld [vmem:[#allocation196_spill] sm:$0xff]  ;;  %v10323_v52 = vld [vmem:[#allocation198_spill] sm:$0xff] }
 0x2ec   :  { %v2360_v57 = vsel %vm2357_vm7, %v2359_v47, %v2355_v22  ;;  %v10329_v22 = vld [vmem:[#allocation204_spill] sm:$0xff]  ;;  %v10331_v47 = vld [vmem:[#allocation67_spill] sm:$0xff] }
 0x2ee   :  { %2714 = vmatpush.bf16.msra.mxu0 %v10316_v23  ;;  %2727 = vmatpush.bf16.msra.mxu1 %v10317_v55 }
 0x2ef   :  { %2740 = vmatpush.bf16.msra.mxu2 %v10318_v3  ;;  %2753 = vmatpush.bf16.msra.mxu3 %v10319_v20  ;;  %v10325_v20 = vld [vmem:[#allocation200_spill] sm:$0xff] }
 0x2f0   :  { %v6526_v44 = vpop.eup %6525 }
 0x2f1   :  { %v2366_v40 = vmul.f32 %v6526_v44, %v2360_v57  ;;  %v10327_v57 = vld [vmem:[#allocation202_spill] sm:$0xff]  ;;  %v10328_v44 = vld [vmem:[#allocation203_spill] sm:$0xff] }
 0x2f2   :  { %2715 = vmatpush.bf16.msra.mxu0 %v10320_v15  ;;  %2728 = vmatpush.bf16.msra.mxu1 %v10321_v18 }
 0x2f3   :  { %2741 = vmatpush.bf16.msra.mxu2 %v10322_v16  ;;  %2754 = vmatpush.bf16.msra.mxu3 %v10323_v52  ;;  %v2659_v8 = vpack.c.bf16 %v2366_v40, %v2366_v40  ;;  %v10330_v40 = vld [vmem:[#allocation58_spill] sm:$0xff] }
 0x2f5   :  { %2668 = vmatmul.bf16.vlgmr.msrb.gmra.mxu0 %v2659_v8  ;;  %2681 = vmatmul.bf16.vlgmr.msrb.gmra.mxu1 %v2659_v8 }
 0x2f6   :  { %2694 = vmatmul.bf16.vlgmr.msrb.gmra.mxu2 %v2659_v8  ;;  %2707 = vmatmul.bf16.vlgmr.msrb.gmra.mxu3 %v2659_v8  ;;  %v415_v8 = vadd.f32 %v10331_v47, %v10330_v40  ;;  %v10336_v47 = vld [vmem:[#allocation37_spill] sm:$0xff] }
 0x2f7   :  { %2716 = vmatpush.bf16.msra.mxu0 %v10324_v35  ;;  %2729 = vmatpush.bf16.msra.mxu1 %v10325_v20 }
 0x2f8   :  { %2742 = vmatpush.bf16.msra.mxu2 %v10326_v24  ;;  %2755 = vmatpush.bf16.msra.mxu3 %v10327_v57 }
 0x2fb   :  { %2717 = vmatpush.bf16.msra.mxu0 %v10328_v44  ;;  %2730 = vmatpush.bf16.msra.mxu1 %v10329_v22 }
 0x2fc   :  { %2743 = vmatpush.bf16.msra.mxu2 %v7989_v41  ;;  %2756 = vmatpush.bf16.msra.mxu3 %v7991_v45  ;;  %v10369_v45 = vld [vmem:[#allocation96_spill] sm:$0xff]  ;;  %v10371_v41 = vld [vmem:[#allocation99_spill] sm:$0xff] }
 0x2ff   :  { %2718 = vmatpush.bf16.msra.mxu0 %v7995_v28  ;;  %2731 = vmatpush.bf16.msra.mxu1 %v7997_v26 }
 0x300   :  { %2744 = vmatpush.bf16.msra.mxu2 %v8001_v46  ;;  %2757 = vmatpush.bf16.msra.mxu3 %v8003_v54 }
 0x303   :  { %2719 = vmatpush.bf16.msra.mxu0 %v8007_v58  ;;  %2732 = vmatpush.bf16.msra.mxu1 %v8009_v32 }
 0x304   :  { %2745 = vmatpush.bf16.msra.mxu2 %v8013_v13  ;;  %2758 = vmatpush.bf16.msra.mxu3 %v8015_v5  ;;  %v10335_v13 = vld [vmem:[#allocation36_spill] sm:$0xff] }
 0x306   :  { %2720 = vmatmul.bf16.vlgmr.msra.gmra.mxu0 %v8172_v31  ;;  %2733 = vmatmul.bf16.vlgmr.msra.gmra.mxu1 %v8172_v31 }
 0x307   :  { %2832 = vmatpush.bf16.msrb.mxu0 %v7200_v39  ;;  %2845 = vmatpush.bf16.msrb.mxu1 %v7202_v43  ;;  %v10332_v43 = vld [vmem:[#allocation60_spill] sm:$0xff]  ;;  %v10333_v39 = vld [vmem:[#allocation69_spill] sm:$0xff] }
 0x308   :  { %2746 = vmatmul.bf16.vlgmr.msra.gmra.mxu2 %v8172_v31  ;;  %2759 = vmatmul.bf16.vlgmr.msra.gmra.mxu3 %v8172_v31  ;;  %v444_v5 = vadd.f32 %v10333_v39, %v10332_v43  ;;  %v10337_v39 = vld [vmem:[#allocation65_spill] sm:$0xff]  ;;  %v10338_v43 = vld [vmem:[#allocation71_spill] sm:$0xff] }
 0x309   :  { %2858 = vmatpush.bf16.msrb.mxu2 %v7204_v49  ;;  %2871 = vmatpush.bf16.msrb.mxu3 %v7207_v50  ;;  %v502_v40 = vadd.f32 %v10338_v43, %v10337_v39  ;;  %v10346_v39 = vld [vmem:[#allocation45_spill] sm:$0xff] }
 0x30b   :  { %2833 = vmatpush.bf16.msrb.mxu0 %v7209_v51  ;;  %2846 = vmatpush.bf16.msrb.mxu1 %v7212_v53  ;;  %v10334_v53 = vld [vmem:[#allocation35_spill] sm:$0xff] }
 0x30d   :  { %2859 = vmatpush.bf16.msrb.mxu2 %v7224_v2  ;;  %2872 = vmatpush.bf16.msrb.mxu3 %v7217_v60 }
 0x30f   :  { %2834 = vmatpush.bf16.msrb.mxu0 %v7219_v61  ;;  %2847 = vmatpush.bf16.msrb.mxu1 %v7222_v1  ;;  %v2377_v31 = vpop.f32.mrf.mxu0  ;;  %v2390_v50 = vpop.f32.mrf.mxu1  ;;  %v10339_v1 = vld [vmem:[#allocation38_spill] sm:$0xff]  ;;  %v10340_v61 = vld [vmem:[#allocation39_spill] sm:$0xff] }
 0x310   :  { %v2420_v49 = vadd.f32 %v2377_v31, %v415_v8  ;;  %v2421_v51 = vadd.f32 %v2390_v50, %v444_v5  ;;  %v10341_v8 = vld [vmem:[#allocation40_spill] sm:$0xff]  ;;  %v10342_v31 = vld [vmem:[#allocation41_spill] sm:$0xff] }
 0x311   :  { %2860 = vmatpush.bf16.msrb.mxu2 %v7227_v9  ;;  %2873 = vmatpush.bf16.msrb.mxu3 %v10334_v53 }
 0x312   :  { %v6127_v2 = vmul.f32 -1.442695, %v2420_v49  ;;  %v6128_v60 = vmul.f32 -1.442695, %v2421_v51 }
 0x313   :  { %2835 = vmatpush.bf16.msrb.mxu0 %v10335_v13  ;;  %2848 = vmatpush.bf16.msrb.mxu1 %v10336_v47  ;;  %v10343_v47 = vld [vmem:[#allocation42_spill] sm:$0xff] }
 0x314   :  { %6527 = vpow2.f32 %v6127_v2  ;;  %v10344_v2 = vld [vmem:[#allocation43_spill] sm:$0xff] }
 0x315   :  { %6529 = vpow2.f32 %v6128_v60  ;;  %2861 = vmatpush.bf16.msrb.mxu2 %v10339_v1  ;;  %2874 = vmatpush.bf16.msrb.mxu3 %v10340_v61  ;;  %v10345_v60 = vld [vmem:[#allocation44_spill] sm:$0xff] }
 0x316   :  { %v2403_v50 = vpop.f32.mrf.mxu2  ;;  %v2416_v5 = vpop.f32.mrf.mxu3 }
 0x317   :  { %2836 = vmatpush.bf16.msrb.mxu0 %v10341_v8  ;;  %2849 = vmatpush.bf16.msrb.mxu1 %v10342_v31  ;;  %v2423_v49 = vadd.f32 %v2416_v5, %v502_v40  ;;  %v2379_v51 = vpop.f32.mrf.mxu0  ;;  %v2392_v13 = vpop.f32.mrf.mxu1  ;;  %v10347_v8 = vld [vmem:[#allocation46_spill] sm:$0xff]  ;;  %v10348_v40 = vld [vmem:[#allocation47_spill] sm:$0xff] }
 0x318   :  { %v10350_v51 = vld [vmem:[#allocation49_spill] sm:$0xff]  ;;  %v10353_v31 = vld [vmem:[#allocation50_spill] sm:$0xff] }
 0x319   :  { %v6129_v53 = vmul.f32 -1.442695, %v2423_v49  ;;  %2862 = vmatpush.bf16.msrb.mxu2 %v10343_v47  ;;  %2875 = vmatpush.bf16.msrb.mxu3 %v10344_v2  ;;  %v10349_v49 = vld [vmem:[#allocation48_spill] sm:$0xff]  ;;  %v10352_v47 = vld [vmem:[#allocation70_spill] sm:$0xff] }
 0x31a   :  { %v6528_v43 = vpop.eup %6527 }
 0x31b   :  { %2837 = vmatpush.bf16.msrb.mxu0 %v10345_v60  ;;  %2850 = vmatpush.bf16.msrb.mxu1 %v10346_v39  ;;  %v6530_v61 = vpop.eup %6529  ;;  %v2427_v1 = vadd.f32 1.0, %v6528_v43  ;;  %6531 = vpow2.f32 %v6129_v53  ;;  %v10351_v60 = vld [vmem:[#allocation64_spill] sm:$0xff]  ;;  %v10354_v53 = vld [vmem:[#allocation51_spill] sm:$0xff] }
 0x31c   :  { %v2446_v9 = vadd.f32 1.0, %v6530_v61  ;;  %v473_v39 = vadd.f32 %v10352_v47, %v10351_v60  ;;  %v10355_v43 = vld [vmem:[#allocation52_spill] sm:$0xff]  ;;  %v10359_v60 = vld [vmem:[#allocation54_spill] sm:$0xff] }
 0x31d   :  { %6533 = vrcp.f32 %v2427_v1  ;;  %2863 = vmatpush.bf16.msrb.mxu2 %v10347_v8  ;;  %2876 = vmatpush.bf16.msrb.mxu3 %v10348_v40  ;;  %v10356_v40 = vld [vmem:[#allocation53_spill] sm:$0xff]  ;;  %v10357_v8 = vld [vmem:[#allocation82_spill] sm:$0xff]  ;;  %v2437_v54 = vand.u32 2147483647, %v2427_v1  ;;  %vm2433_vm10 = vweird.f32 %v2427_v1 }
 0x31e   :  { %6535 = vrcp.f32 %v2446_v9  ;;  %v2405_v13 = vpop.f32.mrf.mxu2  ;;  %v2418_v5 = vpop.f32.mrf.mxu3  ;;  %vm2452_vm11 = vweird.f32 %v2446_v9 }
 0x31f   :  { %2838 = vmatpush.bf16.msrb.mxu0 %v10349_v49  ;;  %2851 = vmatpush.bf16.msrb.mxu1 %v10350_v51  ;;  %v2422_v5 = vadd.f32 %v2403_v50, %v473_v39  ;;  %v10358_v49 = vld [vmem:[#allocation83_spill] sm:$0xff]  ;;  %v2439_v39 = vand.u32 2147483648, %v2427_v1  ;;  %v10363_v50 = vld [vmem:[#allocation86_spill] sm:$0xff]  ;;  %vm2438_vm14 = vcmp.eq.f32.partialorder %v2437_v54, 8.507059e+37 }
 0x321   :  { %v6532_v2 = vpop.eup %6531  ;;  %2864 = vmatpush.bf16.msrb.mxu2 %v10353_v31  ;;  %2877 = vmatpush.bf16.msrb.mxu3 %v10354_v53  ;;  %v10360_v53 = vld [vmem:[#allocation55_spill] sm:$0xff]  ;;  %v10361_v31 = vld [vmem:[#allocation84_spill] sm:$0xff] }
 0x322   :  { %v8309_v61 = vadd.f32 1.0, %v6532_v2 }
 0x323   :  { %2839 = vmatpush.bf16.msrb.mxu0 %v10355_v43  ;;  %2852 = vmatpush.bf16.msrb.mxu1 %v10356_v40  ;;  %v6534_v13 = vpop.eup %6533  ;;  %v10362_v43 = vld [vmem:[#allocation85_spill] sm:$0xff] }
 0x324   :  { %v6536_v51 = vpop.eup %6535  ;;  %v2429_v32 = vmul.f32 %v6534_v13, %v2427_v1  ;;  %6537 = vrcp.f32 %v8309_v61  ;;  %vm2434_vm8 = vweird.f32 %v6534_v13  ;;  %vm2472_vm1 = vweird.f32 %v8309_v61 }
 0x325   :  { %v2448_v47 = vmul.f32 %v6536_v51, %v2446_v9  ;;  %2865 = vmatpush.bf16.msrb.mxu2 %v10359_v60  ;;  %2878 = vmatpush.bf16.msrb.mxu3 %v10360_v53  ;;  %6539 = vtanh.f32 %v2422_v5  ;;  %vm2453_vm9 = vweird.f32 %v6536_v51  ;;  %v2456_v60 = vand.u32 2147483647, %v2446_v9  ;;  %vm2435_vm12 = vmor %vm2433_vm10, %vm2434_vm8 }
 0x326   :  { %v2430_v2 = vsub.f32 1.0, %v2429_v32  ;;  %v2440_v5 = vor.u32 1.1754944e-38, %v2439_v39  ;;  %vm2454_vm13 = vmor %vm2452_vm11, %vm2453_vm9 }
 0x327   :  { %2952 = vmatpush.bf16.msra.mxu0 %v10357_v8  ;;  %2965 = vmatpush.bf16.msra.mxu1 %v10358_v49  ;;  %v2449_v40 = vsub.f32 1.0, %v2448_v47  ;;  %v10364_v49 = vld [vmem:[#allocation89_spill] sm:$0xff]  ;;  %v2458_v8 = vand.u32 2147483648, %v2446_v9  ;;  %vm2457_vm15 = vcmp.eq.f32.partialorder %v2456_v60, 8.507059e+37  ;;  %v10374_v60 = vld [vmem:[#allocation103_spill] sm:$0xff] }
 0x328   :  { %v2431_v58 = vmul.f32 %v6534_v13, %v2430_v2  ;;  %v10368_v2 = vld [vmem:[#allocation95_spill] sm:$0xff] }
 0x329   :  { %2978 = vmatpush.bf16.msra.mxu2 %v10361_v31  ;;  %2991 = vmatpush.bf16.msra.mxu3 %v10362_v43  ;;  %v2450_v46 = vmul.f32 %v6536_v51, %v2449_v40  ;;  %v10365_v31 = vld [vmem:[#allocation90_spill] sm:$0xff]  ;;  %v10366_v43 = vld [vmem:[#allocation93_spill] sm:$0xff]  ;;  %v2459_v40 = vor.u32 1.1754944e-38, %v2458_v8 }
 0x32a   :  { %v6538_v53 = vpop.eup %6537  ;;  %v2432_v32 = vadd.f32 %v6534_v13, %v2431_v58 }
 0x32b   :  { %2953 = vmatpush.bf16.msra.mxu0 %v10363_v50  ;;  %2966 = vmatpush.bf16.msra.mxu1 %v10364_v49  ;;  %v2451_v47 = vadd.f32 %v6536_v51, %v2450_v46  ;;  %v2468_v49 = vmul.f32 %v6538_v53, %v8309_v61  ;;  %v10367_v50 = vld [vmem:[#allocation94_spill] sm:$0xff]  ;;  %v6540_v58 = vpop.eup %6539  ;;  %v10370_v46 = vld [vmem:[#allocation97_spill] sm:$0xff]  ;;  %vm2473_vm0 = vweird.f32 %v6538_v53 }
 0x32c   :  { %v2436_v26 = vsel %vm2435_vm12, %v6534_v13, %v2432_v32  ;;  %vm2474_vm2 = vmor %vm2472_vm1, %vm2473_vm0  ;;  %v10378_v13 = vld [vmem:[#allocation107_spill] sm:$0xff]  ;;  %v10379_v32 = vld [vmem:[#allocation108_spill] sm:$0xff] }
 0x32d   :  { %2979 = vmatpush.bf16.msra.mxu2 %v10365_v31  ;;  %2992 = vmatpush.bf16.msra.mxu3 %v10366_v43  ;;  %v2441_v1 = vsel %vm2438_vm14, %v2440_v5, %v2436_v26  ;;  %v2455_v28 = vsel %vm2454_vm13, %v6536_v51, %v2451_v47  ;;  %v2469_v31 = vsub.f32 1.0, %v2468_v49  ;;  %v10373_v26 = vld [vmem:[#allocation102_spill] sm:$0xff]  ;;  %v10375_v49 = vld [vmem:[#allocation104_spill] sm:$0xff]  ;;  %v10380_v5 = vld [vmem:[#allocation109_spill] sm:$0xff] }
 0x32e   :  { %v2460_v43 = vsel %vm2457_vm15, %v2459_v40, %v2455_v28  ;;  %v2483_v9 = vmul.f32 %v6540_v58, %v2441_v1  ;;  %v2478_v28 = vand.u32 2147483648, %v8309_v61  ;;  %v10381_v1 = vld [vmem:[#allocation110_spill] sm:$0xff] }
 0x32f   :  { %2954 = vmatpush.bf16.msra.mxu0 %v10367_v50  ;;  %2967 = vmatpush.bf16.msra.mxu1 %v10368_v2  ;;  %v2482_v39 = vmul.f32 %v2460_v43, %v8098_v56  ;;  %v2470_v50 = vmul.f32 %v6538_v53, %v2469_v31  ;;  %v10372_v2 = vld [vmem:[#allocation101_spill] sm:$0xff]  ;;  %v2476_v31 = vand.u32 2147483647, %v8309_v61  ;;  %v10377_v43 = vld [vmem:[#allocation106_spill] sm:$0xff]  ;;  %v10383_v61 = vld [vmem:[#allocation112_spill] sm:$0xff] }
 0x330   :  { %v10376_v56 = vld [vmem:[#allocation105_spill] sm:$0xff] }
 0x331   :  { %2980 = vmatpush.bf16.msra.mxu2 %v10369_v45  ;;  %2993 = vmatpush.bf16.msra.mxu3 %v10370_v46  ;;  %v8332_v8 = vadd.f32 %v2483_v9, %v2482_v39  ;;  %v2471_v54 = vadd.f32 %v6538_v53, %v2470_v50  ;;  %v2479_v50 = vor.u32 1.1754944e-38, %v2478_v28  ;;  %vm2477_vm3 = vcmp.eq.f32.partialorder %v2476_v31, 8.507059e+37  ;;  %v10382_v9 = vld [vmem:[#allocation111_spill] sm:$0xff] }
 0x332   :  { %v10386_v28 = vld [vmem:[#allocation115_spill] sm:$0xff] }
 0x333   :  { %2955 = vmatpush.bf16.msra.mxu0 %v10371_v41  ;;  %2968 = vmatpush.bf16.msra.mxu1 %v10372_v2  ;;  %6541 = vtanh.f32 %v8332_v8  ;;  %v2475_v51 = vsel %vm2474_vm2, %v6538_v53, %v2471_v54  ;;  %v10384_v53 = vld [vmem:[#allocation113_spill] sm:$0xff]  ;;  %v10385_v54 = vld [vmem:[#allocation114_spill] sm:$0xff] }
 0x334   :  { %v2480_v40 = vsel %vm2477_vm3, %v2479_v50, %v2475_v51  ;;  %v10387_v50 = vld [vmem:[#allocation122_spill] sm:$0xff] }
 0x335   :  { %2981 = vmatpush.bf16.msra.mxu2 %v10373_v26  ;;  %2994 = vmatpush.bf16.msra.mxu3 %v10374_v60 }
 0x337   :  { %2956 = vmatpush.bf16.msra.mxu0 %v10375_v49  ;;  %2969 = vmatpush.bf16.msra.mxu1 %v10376_v56 }
 0x339   :  { %2982 = vmatpush.bf16.msra.mxu2 %v10377_v43  ;;  %2995 = vmatpush.bf16.msra.mxu3 %v10378_v13  ;;  %v6542_v47 = vpop.eup %6541 }
 0x33a   :  { %v2486_v58 = vmul.f32 %v6542_v47, %v2480_v40  ;;  %v10388_v47 = vld [vmem:[#allocation123_spill] sm:$0xff]  ;;  %v10389_v40 = vld [vmem:[#allocation124_spill] sm:$0xff] }
 0x33b   :  { %2957 = vmatpush.bf16.msra.mxu0 %v10379_v32  ;;  %2970 = vmatpush.bf16.msra.mxu1 %v10380_v5  ;;  %v10408_v5 = vld [vmem:[#allocation57_spill] sm:$0xff] }
 0x33c   :  { %v8350_v39 = vpack.c.bf16 %v2486_v58, %v2486_v58  ;;  %v10390_v58 = vld [vmem:[#allocation125_spill] sm:$0xff] }
 0x33d   :  { %2983 = vmatpush.bf16.msra.mxu2 %v10381_v1  ;;  %2996 = vmatpush.bf16.msra.mxu3 %v10382_v9  ;;  %v10403_v1 = vld [vmem:[#allocation138_spill] sm:$0xff] }
 0x33e   :  { %2840 = vmatmul.bf16.vlgmr.msrb.gmra.mxu0 %v8350_v39  ;;  %2853 = vmatmul.bf16.vlgmr.msrb.gmra.mxu1 %v8350_v39 }
 0x33f   :  { %2958 = vmatpush.bf16.msra.mxu0 %v10383_v61  ;;  %2971 = vmatpush.bf16.msra.mxu1 %v10384_v53  ;;  %v10395_v53 = vld [vmem:[#allocation130_spill] sm:$0xff] }
 0x340   :  { %2866 = vmatmul.bf16.vlgmr.msrb.gmra.mxu2 %v8350_v39  ;;  %2879 = vmatmul.bf16.vlgmr.msrb.gmra.mxu3 %v8350_v39 }
 0x341   :  { %2984 = vmatpush.bf16.msra.mxu2 %v10385_v54  ;;  %2997 = vmatpush.bf16.msra.mxu3 %v10386_v28  ;;  %v2497_v31 = vpop.f32.mrf.mxu0  ;;  %v2510_v51 = vpop.f32.mrf.mxu1 }
 0x343   :  { %2959 = vmatpush.bf16.msra.mxu0 %v10248_v33  ;;  %2972 = vmatpush.bf16.msra.mxu1 %v10249_v25  ;;  %v10391_v33 = vld [vmem:[#allocation126_spill] sm:$0xff]  ;;  %v10392_v25 = vld [vmem:[#allocation127_spill] sm:$0xff] }
 0x345   :  { %2985 = vmatpush.bf16.msra.mxu2 %v10250_v11  ;;  %2998 = vmatpush.bf16.msra.mxu3 %v10251_v37 }
 0x347   :  { %3004 = vmatpush.bf16.msrb.mxu0 %v7542_v38  ;;  %3017 = vmatpush.bf16.msrb.mxu1 %v10121_v59  ;;  %v10393_v38 = vld [vmem:[#allocation128_spill] sm:$0xff]  ;;  %v10394_v59 = vld [vmem:[#allocation129_spill] sm:$0xff] }
 0x348   :  { %v2523_v28 = vpop.f32.mrf.mxu2  ;;  %v2536_v11 = vpop.f32.mrf.mxu3 }
 0x349   :  { %3030 = vmatpush.bf16.msrb.mxu2 %v10387_v50  ;;  %3043 = vmatpush.bf16.msrb.mxu3 %v10388_v47  ;;  %v2499_v54 = vpop.f32.mrf.mxu0  ;;  %v2512_v37 = vpop.f32.mrf.mxu1  ;;  %v10396_v50 = vld [vmem:[#allocation131_spill] sm:$0xff]  ;;  %v10397_v47 = vld [vmem:[#allocation132_spill] sm:$0xff] }
 0x34b   :  { %3005 = vmatpush.bf16.msrb.mxu0 %v10389_v40  ;;  %3018 = vmatpush.bf16.msrb.mxu1 %v10390_v58  ;;  %v10398_v40 = vld [vmem:[#allocation133_spill] sm:$0xff]  ;;  %v10399_v58 = vld [vmem:[#allocation134_spill] sm:$0xff] }
 0x34d   :  { %3031 = vmatpush.bf16.msrb.mxu2 %v10391_v33  ;;  %3044 = vmatpush.bf16.msrb.mxu3 %v10392_v25  ;;  %v10400_v33 = vld [vmem:[#allocation135_spill] sm:$0xff]  ;;  %v10401_v25 = vld [vmem:[#allocation136_spill] sm:$0xff] }
 0x34f   :  { %3006 = vmatpush.bf16.msrb.mxu0 %v10393_v38  ;;  %3019 = vmatpush.bf16.msrb.mxu1 %v10394_v59  ;;  %v10402_v38 = vld [vmem:[#allocation137_spill] sm:$0xff] }
 0x350   :  { %v2525_v59 = vpop.f32.mrf.mxu2  ;;  %v2538_v61 = vpop.f32.mrf.mxu3 }
 0x351   :  { %3032 = vmatpush.bf16.msrb.mxu2 %v10395_v53  ;;  %3045 = vmatpush.bf16.msrb.mxu3 %v10396_v50  ;;  %v2549_v54 = vpop.f32.mrf.mxu0  ;;  %v2562_v37 = vpop.f32.mrf.mxu1  ;;  %v10404_v50 = vld [vmem:[#allocation139_spill] sm:$0xff]  ;;  %v10409_v59 = vld [vmem:[#allocation142_spill] sm:$0xff] }
 0x352   :  { %v2550_v9 = vadd.f32 %v2549_v54, %v2497_v31  ;;  %v2563_v53 = vadd.f32 %v2562_v37, %v2510_v51  ;;  %v10410_v61 = vld [vmem:[#allocation143_spill] sm:$0xff]  ;;  %v10411_v31 = vld [vmem:[#allocation144_spill] sm:$0xff]  ;;  %v10412_v51 = vld [vmem:[#allocation145_spill] sm:$0xff] }
 0x353   :  { %3007 = vmatpush.bf16.msrb.mxu0 %v10397_v47  ;;  %3020 = vmatpush.bf16.msrb.mxu1 %v10398_v40  ;;  %v10405_v47 = vld [vmem:[#allocation140_spill] sm:$0xff]  ;;  %v10406_v40 = vld [vmem:[#allocation141_spill] sm:$0xff] }
 0x355   :  { %3033 = vmatpush.bf16.msrb.mxu2 %v10399_v58  ;;  %3046 = vmatpush.bf16.msrb.mxu3 %v10400_v33  ;;  %v10407_v58 = vld [vmem:[#allocation56_spill] sm:$0xff] }
 0x356   :  { %v2592_v33 = vadd.f32 %v2550_v9, %v10407_v58  ;;  %v10413_v9 = vld [vmem:[#allocation146_spill] sm:$0xff] }
 0x357   :  { %3008 = vmatpush.bf16.msrb.mxu0 %v10401_v25  ;;  %3021 = vmatpush.bf16.msrb.mxu1 %v10402_v38  ;;  %v2593_v25 = vadd.f32 %v2563_v53, %v10408_v5  ;;  %v10414_v53 = vld [vmem:[#allocation147_spill] sm:$0xff] }
 0x358   :  { %v6130_v32 = vmul.f32 -1.442695, %v2592_v33  ;;  %v2575_v54 = vpop.f32.mrf.mxu2  ;;  %v2588_v37 = vpop.f32.mrf.mxu3 }
 0x359   :  { %3034 = vmatpush.bf16.msrb.mxu2 %v10403_v1  ;;  %3047 = vmatpush.bf16.msrb.mxu3 %v10404_v50  ;;  %v6131_v38 = vmul.f32 -1.442695, %v2593_v25  ;;  %v2564_v50 = vpop.f32.mrf.mxu1  ;;  %v10415_v25 = vld [vmem:[#allocation61_spill] sm:$0xff] }
 0x35a   :  { %6543 = vpow2.f32 %v6130_v32  ;;  %v10419_v32 = vld [vmem:[#allocation151_spill] sm:$0xff] }
 0x35b   :  { %3009 = vmatpush.bf16.msrb.mxu0 %v10405_v47  ;;  %3022 = vmatpush.bf16.msrb.mxu1 %v10406_v40  ;;  %6545 = vpow2.f32 %v6131_v38  ;;  %v2589_v47 = vadd.f32 %v2588_v37, %v2536_v11  ;;  %v2551_v40 = vpop.f32.mrf.mxu0 }
 0x35d   :  { %3035 = vmatpush.bf16.msrb.mxu2 %v10409_v59  ;;  %3048 = vmatpush.bf16.msrb.mxu3 %v10410_v61  ;;  %v2595_v33 = vadd.f32 %v2589_v47, %v10415_v25  ;;  %v10416_v59 = vld [vmem:[#allocation148_spill] sm:$0xff]  ;;  %v10417_v61 = vld [vmem:[#allocation149_spill] sm:$0xff] }
 0x35f   :  { %3010 = vmatpush.bf16.msrb.mxu0 %v10411_v31  ;;  %3023 = vmatpush.bf16.msrb.mxu1 %v10412_v51  ;;  %v6132_v31 = vmul.f32 -1.442695, %v2595_v33  ;;  %v10418_v51 = vld [vmem:[#allocation150_spill] sm:$0xff] }
 0x360   :  { %v6544_v5 = vpop.eup %6543  ;;  %v2577_v40 = vpop.f32.mrf.mxu2 }
 0x361   :  { %3036 = vmatpush.bf16.msrb.mxu2 %v10413_v9  ;;  %3049 = vmatpush.bf16.msrb.mxu3 %v10414_v53  ;;  %v6546_v38 = vpop.eup %6545  ;;  %v2599_v11 = vadd.f32 1.0, %v6544_v5  ;;  %6547 = vpow2.f32 %v6132_v31  ;;  %v2590_v37 = vpop.f32.mrf.mxu3  ;;  %v2576_v53 = vadd.f32 %v2575_v54, %v2523_v28  ;;  %v10420_v9 = vld [vmem:[#allocation59_spill] sm:$0xff] }
 0x362   :  { %v2618_v50 = vadd.f32 1.0, %v6546_v38 }
 0x363   :  { %3011 = vmatpush.bf16.msrb.mxu0 %v10416_v59  ;;  %3024 = vmatpush.bf16.msrb.mxu1 %v10417_v61  ;;  %6549 = vrcp.f32 %v2599_v11  ;;  %v2594_v61 = vadd.f32 %v2576_v53, %v10420_v9  ;;  %v2611_v13 = vand.u32 2147483648, %v2599_v11  ;;  %v2609_v38 = vand.u32 2147483647, %v2599_v11 }
 0x364   :  { %6551 = vrcp.f32 %v2618_v50  ;;  %v2630_v5 = vand.u32 2147483648, %v2618_v50  ;;  %v2628_v28 = vand.u32 2147483647, %v2618_v50  ;;  %vm2605_vm6 = vweird.f32 %v2599_v11 }
 0x365   :  { %3037 = vmatpush.bf16.msrb.mxu2 %v10418_v51  ;;  %3050 = vmatpush.bf16.msrb.mxu3 %v10419_v32  ;;  %vm2624_vm7 = vweird.f32 %v2618_v50  ;;  %v2612_v53 = vor.u32 1.1754944e-38, %v2611_v13  ;;  %vm2610_vm10 = vcmp.eq.f32.partialorder %v2609_v38, 8.507059e+37 }
 0x366   :  { %vm2629_vm11 = vcmp.eq.f32.partialorder %v2628_v28, 8.507059e+37 }
 0x367   :  { %v6548_v47 = vpop.eup %6547 }
 0x368   :  { %v2638_v25 = vadd.f32 1.0, %v6548_v47 }
 0x369   :  { %v6550_v59 = vpop.eup %6549 }
 0x36a   :  { %v6552_v33 = vpop.eup %6551  ;;  %v2601_v58 = vmul.f32 %v6550_v59, %v2599_v11  ;;  %6553 = vrcp.f32 %v2638_v25  ;;  %vm2606_vm4 = vweird.f32 %v6550_v59  ;;  %vm2644_vm13 = vweird.f32 %v2638_v25 }
 0x36b   :  { %v2620_v51 = vmul.f32 %v6552_v33, %v2618_v50  ;;  %6555 = vtanh.f32 %v2594_v61  ;;  %vm2625_vm5 = vweird.f32 %v6552_v33  ;;  %vm2607_vm8 = vmor %vm2605_vm6, %vm2606_vm4 }
 0x36c   :  { %v2602_v1 = vsub.f32 1.0, %v2601_v58  ;;  %vm2626_vm9 = vmor %vm2624_vm7, %vm2625_vm5  ;;  %v2631_v58 = vor.u32 1.1754944e-38, %v2630_v5 }
 0x36d   :  { %v2621_v32 = vsub.f32 1.0, %v2620_v51 }
 0x36e   :  { %v2603_v31 = vmul.f32 %v6550_v59, %v2602_v1 }
 0x36f   :  { %v2622_v40 = vmul.f32 %v6552_v33, %v2621_v32 }
 0x370   :  { %v6554_v54 = vpop.eup %6553  ;;  %v2604_v37 = vadd.f32 %v6550_v59, %v2603_v31 }
 0x371   :  { %v2623_v47 = vadd.f32 %v6552_v33, %v2622_v40  ;;  %v2640_v9 = vmul.f32 %v6554_v54, %v2638_v25  ;;  %v6556_v1 = vpop.eup %6555  ;;  %vm2645_vm12 = vweird.f32 %v6554_v54  ;;  %v2648_v40 = vand.u32 2147483647, %v2638_v25 }
 0x372   :  { %v2608_v51 = vsel %vm2607_vm8, %v6550_v59, %v2604_v37  ;;  %v2669_v61 = vpop.f32.mrf.mxu0  ;;  %v2682_v43 = vpop.f32.mrf.mxu1  ;;  %v2650_v59 = vand.u32 2147483648, %v2638_v25  ;;  %vm2646_vm14 = vmor %vm2644_vm13, %vm2645_vm12 }
 0x373   :  { %v2613_v56 = vsel %vm2610_vm10, %v2612_v53, %v2608_v51  ;;  %v2627_v49 = vsel %vm2626_vm9, %v6552_v33, %v2623_v47  ;;  %v2641_v32 = vsub.f32 1.0, %v2640_v9  ;;  %vm2649_vm15 = vcmp.eq.f32.partialorder %v2648_v40, 8.507059e+37  ;;  %v10421_v40 = vld [vmem:[#allocation159_spill] sm:$0xff] }
 0x374   :  { %v2632_v60 = vsel %vm2629_vm11, %v2631_v58, %v2627_v49  ;;  %v2655_v26 = vmul.f32 %v6556_v1, %v2613_v56  ;;  %v2651_v56 = vor.u32 1.1754944e-38, %v2650_v59 }
 0x375   :  { %v2654_v11 = vmul.f32 %v2632_v60, %v8159_v62  ;;  %v2642_v50 = vmul.f32 %v6554_v54, %v2641_v32 }
 0x377   :  { %v8399_v31 = vadd.f32 %v2655_v26, %v2654_v11  ;;  %v2643_v13 = vadd.f32 %v6554_v54, %v2642_v50 }
 0x379   :  { %6557 = vtanh.f32 %v8399_v31  ;;  %v8402_v5 = vpop.f32.mrf.mxu2  ;;  %v2708_v38 = vpop.f32.mrf.mxu3  ;;  %v2647_v49 = vsel %vm2646_vm14, %v6554_v54, %v2643_v13 }
 0x37a   :  { %v2671_v33 = vpop.f32.mrf.mxu0  ;;  %v2684_v28 = vpop.f32.mrf.mxu1  ;;  %v2652_v60 = vsel %vm2649_vm15, %v2651_v56, %v2647_v49  ;;  %v10424_v56 = vld [vmem:[#allocation161_spill] sm:$0xff] }
 0x37b   :  { %v10422_v33 = vld [vmem:[#allocation160_spill] sm:$0xff] }
 0x37c   :  { %v10423_v28 = vld [vmem:[#allocation68_spill] sm:$0xff] }
 0x37f   :  { %v6558_v62 = vpop.eup %6557 }
 0x380   :  { %v2658_v26 = vmul.f32 %v6558_v62, %v2652_v60  ;;  %v10425_v62 = vld [vmem:[#allocation162_spill] sm:$0xff] }
 0x381   :  { %v2697_v9 = vpop.f32.mrf.mxu2  ;;  %v2710_v37 = vpop.f32.mrf.mxu3 }
 0x382   :  { %v8404_v53 = vpack.c.bf16 %v2658_v26, %v2658_v26  ;;  %v10426_v26 = vld [vmem:[#allocation163_spill] sm:$0xff]  ;;  %v10427_v9 = vld [vmem:[#allocation164_spill] sm:$0xff] }
 0x383   :  { %v2721_v47 = vpop.f32.mrf.mxu0  ;;  %v2734_v58 = vpop.f32.mrf.mxu1 }
 0x384   :  { %v2722_v51 = vadd.f32 %v2721_v47, %v2669_v61  ;;  %v2735_v1 = vadd.f32 %v2734_v58, %v2682_v43  ;;  %2960 = vmatmul.bf16.vlgmr.msra.gmra.mxu0 %v8404_v53  ;;  %2973 = vmatmul.bf16.vlgmr.msra.gmra.mxu1 %v8404_v53 }
 0x385   :  { %2986 = vmatmul.bf16.vlgmr.msra.gmra.mxu2 %v8404_v53  ;;  %2999 = vmatmul.bf16.vlgmr.msra.gmra.mxu3 %v8404_v53 }
 0x386   :  { %v2764_v25 = vadd.f32 %v2722_v51, %v8168_v21  ;;  %v2765_v54 = vadd.f32 %v2735_v1, %v8170_v48  ;;  %3124 = vmatpush.bf16.msra.mxu0 %v10279_v42  ;;  %3137 = vmatpush.bf16.msra.mxu1 %v10280_v10 }
 0x387   :  { %3150 = vmatpush.bf16.msra.mxu2 %v10281_v0  ;;  %3163 = vmatpush.bf16.msra.mxu3 %v10282_v27 }
 0x388   :  { %v6133_v43 = vmul.f32 -1.442695, %v2764_v25  ;;  %v6134_v61 = vmul.f32 -1.442695, %v2765_v54  ;;  %v10428_v25 = vld [vmem:[#allocation165_spill] sm:$0xff]  ;;  %v10429_v54 = vld [vmem:[#allocation166_spill] sm:$0xff] }
 0x38a   :  { %6559 = vpow2.f32 %v6133_v43  ;;  %3125 = vmatpush.bf16.msra.mxu0 %v10284_v4  ;;  %3138 = vmatpush.bf16.msra.mxu1 %v10285_v30  ;;  %v10430_v43 = vld [vmem:[#allocation167_spill] sm:$0xff] }
 0x38b   :  { %v2747_v32 = vpop.f32.mrf.mxu2  ;;  %v2760_v11 = vpop.f32.mrf.mxu3  ;;  %6561 = vpow2.f32 %v6134_v61  ;;  %3151 = vmatpush.bf16.msra.mxu2 %v10421_v40  ;;  %3164 = vmatpush.bf16.msra.mxu3 %v10422_v33  ;;  %v10431_v61 = vld [vmem:[#allocation168_spill] sm:$0xff] }
 0x38c   :  { %v2761_v50 = vadd.f32 %v2760_v11, %v2708_v38  ;;  %v2723_v13 = vpop.f32.mrf.mxu0  ;;  %v2736_v59 = vpop.f32.mrf.mxu1  ;;  %v2748_v11 = vadd.f32 %v2747_v32, %v8402_v5  ;;  %v10437_v32 = vld [vmem:[#allocation173_spill] sm:$0xff] }
 0x38d   :  { %v10433_v13 = vld [vmem:[#allocation170_spill] sm:$0xff] }
 0x38e   :  { %v2767_v49 = vadd.f32 %v2761_v50, %v10423_v28  ;;  %3126 = vmatpush.bf16.msra.mxu0 %v10424_v56  ;;  %3139 = vmatpush.bf16.msra.mxu1 %v10425_v62  ;;  %v10432_v50 = vld [vmem:[#allocation169_spill] sm:$0xff] }
 0x38f   :  { %3152 = vmatpush.bf16.msra.mxu2 %v10426_v26  ;;  %3165 = vmatpush.bf16.msra.mxu3 %v10427_v9 }
 0x390   :  { %v6135_v60 = vmul.f32 -1.442695, %v2767_v49  ;;  %v6560_v37 = vpop.eup %6559  ;;  %v10434_v49 = vld [vmem:[#allocation171_spill] sm:$0xff] }
 0x391   :  { %v6562_v47 = vpop.eup %6561  ;;  %v2771_v38 = vadd.f32 1.0, %v6560_v37 }
 0x392   :  { %6563 = vpow2.f32 %v6135_v60  ;;  %v8425_v58 = vadd.f32 1.0, %v6562_v47  ;;  %3127 = vmatpush.bf16.msra.mxu0 %v10428_v25  ;;  %3140 = vmatpush.bf16.msra.mxu1 %v10429_v54  ;;  %v10435_v60 = vld [vmem:[#allocation172_spill] sm:$0xff]  ;;  %v10441_v25 = vld [vmem:[#allocation177_spill] sm:$0xff] }
 0x393   :  { %v2749_v51 = vpop.f32.mrf.mxu2  ;;  %v2762_v1 = vpop.f32.mrf.mxu3  ;;  %6565 = vrcp.f32 %v2771_v38  ;;  %3153 = vmatpush.bf16.msra.mxu2 %v10430_v43  ;;  %3166 = vmatpush.bf16.msra.mxu3 %v10431_v61  ;;  %v2783_v43 = vand.u32 2147483648, %v2771_v38  ;;  %v2781_v54 = vand.u32 2147483647, %v2771_v38  ;;  %vm2777_vm2 = vweird.f32 %v2771_v38 }
 0x394   :  { %6567 = vrcp.f32 %v8425_v58  ;;  %3012 = vmatmul.bf16.vlgmr.msrb.gmra.mxu0 %v8350_v39  ;;  %3025 = vmatmul.bf16.vlgmr.msrb.gmra.mxu1 %v8350_v39  ;;  %v10436_v51 = vld [vmem:[#allocation66_spill] sm:$0xff]  ;;  %v2800_v9 = vand.u32 2147483647, %v8425_v58  ;;  %vm2796_vm3 = vweird.f32 %v8425_v58 }
 0x395   :  { %3038 = vmatmul.bf16.vlgmr.msrb.gmra.mxu2 %v8350_v39  ;;  %3051 = vmatmul.bf16.vlgmr.msrb.gmra.mxu3 %v8350_v39  ;;  %v2766_v1 = vadd.f32 %v2748_v11, %v10436_v51  ;;  %v10438_v39 = vld [vmem:[#allocation174_spill] sm:$0xff]  ;;  %v2802_v11 = vand.u32 2147483648, %v8425_v58  ;;  %vm2782_vm6 = vcmp.eq.f32.partialorder %v2781_v54, 8.507059e+37 }
 0x396   :  { %3128 = vmatpush.bf16.msra.mxu0 %v10432_v50  ;;  %3141 = vmatpush.bf16.msra.mxu1 %v10433_v13  ;;  %v10439_v50 = vld [vmem:[#allocation175_spill] sm:$0xff]  ;;  %vm2801_vm7 = vcmp.eq.f32.partialorder %v2800_v9, 8.507059e+37 }
 0x397   :  { %3154 = vmatpush.bf16.msra.mxu2 %v10434_v49  ;;  %3167 = vmatpush.bf16.msra.mxu3 %v10435_v60  ;;  %v10440_v49 = vld [vmem:[#allocation176_spill] sm:$0xff]  ;;  %v10444_v9 = vld [vmem:[#allocation187_spill] sm:$0xff] }
 0x398   :  { %v6564_v59 = vpop.eup %6563 }
 0x399   :  { %v8441_v37 = vadd.f32 1.0, %v6564_v59  ;;  %v6566_v47 = vpop.eup %6565 }
 0x39a   :  { %v6568_v61 = vpop.eup %6567  ;;  %v2773_v5 = vmul.f32 %v6566_v47, %v2771_v38  ;;  %3129 = vmatpush.bf16.msra.mxu0 %v10437_v32  ;;  %3142 = vmatpush.bf16.msra.mxu1 %v10438_v39  ;;  %vm2778_vm0 = vweird.f32 %v6566_v47  ;;  %v10442_v32 = vld [vmem:[#allocation178_spill] sm:$0xff] }
 0x39b   :  { %6569 = vrcp.f32 %v8441_v37  ;;  %v2792_v13 = vmul.f32 %v6568_v61, %v8425_v58  ;;  %3155 = vmatpush.bf16.msra.mxu2 %v10439_v50  ;;  %3168 = vmatpush.bf16.msra.mxu3 %v10440_v49  ;;  %vm2797_vm1 = vweird.f32 %v6568_v61  ;;  %vm2779_vm4 = vmor %vm2777_vm2, %vm2778_vm0  ;;  %vm2816_vm9 = vweird.f32 %v8441_v37 }
 0x39c   :  { %v2774_v60 = vsub.f32 1.0, %v2773_v5  ;;  %6571 = vtanh.f32 %v2766_v1  ;;  %vm2798_vm5 = vmor %vm2796_vm3, %vm2797_vm1 }
 0x39d   :  { %v2793_v59 = vsub.f32 1.0, %v2792_v13 }
 0x39e   :  { %v2775_v51 = vmul.f32 %v6566_v47, %v2774_v60  ;;  %3130 = vmatpush.bf16.msra.mxu0 %v10441_v25  ;;  %3143 = vmatpush.bf16.msra.mxu1 %v10442_v32  ;;  %v2784_v60 = vor.u32 1.1754944e-38, %v2783_v43  ;;  %v2803_v32 = vor.u32 1.1754944e-38, %v2802_v11  ;;  %v10448_v11 = vld [vmem:[#allocation194_spill] sm:$0xff] }
 0x39f   :  { %v2794_v39 = vmul.f32 %v6568_v61, %v2793_v59  ;;  %3156 = vmatpush.bf16.msra.mxu2 %v7901_v29  ;;  %3169 = vmatpush.bf16.msra.mxu3 %v7903_v14 }
 0x3a0   :  { %v2776_v5 = vadd.f32 %v6566_v47, %v2775_v51  ;;  %v10443_v51 = vld [vmem:[#allocation186_spill] sm:$0xff] }
 0x3a1   :  { %v6570_v13 = vpop.eup %6569  ;;  %v2795_v1 = vadd.f32 %v6568_v61, %v2794_v39 }
 0x3a2   :  { %v2812_v25 = vmul.f32 %v6570_v13, %v8441_v37  ;;  %v2780_v59 = vsel %vm2779_vm4, %v6566_v47, %v2776_v5  ;;  %3131 = vmatpush.bf16.msra.mxu0 %v7907_v17  ;;  %3144 = vmatpush.bf16.msra.mxu1 %v7909_v63  ;;  %v6572_v29 = vpop.eup %6571  ;;  %vm2817_vm8 = vweird.f32 %v6570_v13 }
 0x3a3   :  { %v2785_v14 = vsel %vm2782_vm6, %v2784_v60, %v2780_v59  ;;  %v2799_v49 = vsel %vm2798_vm5, %v6568_v61, %v2795_v1  ;;  %3157 = vmatpush.bf16.msra.mxu2 %v7913_v19  ;;  %3170 = vmatpush.bf16.msra.mxu3 %v10307_v34  ;;  %vm2818_vm10 = vmor %vm2816_vm9, %vm2817_vm8 }
 0x3a4   :  { %v2813_v38 = vsub.f32 1.0, %v2812_v25  ;;  %v2804_v58 = vsel %vm2801_vm7, %v2803_v32, %v2799_v49  ;;  %v2827_v43 = vmul.f32 %v6572_v29, %v2785_v14  ;;  %v10445_v25 = vld [vmem:[#allocation188_spill] sm:$0xff]  ;;  %v2822_v29 = vand.u32 2147483648, %v8441_v37  ;;  %v10446_v14 = vld [vmem:[#allocation189_spill] sm:$0xff] }
 0x3a5   :  { %v2826_v54 = vmul.f32 %v2804_v58, %v8235_v36  ;;  %v10447_v36 = vld [vmem:[#allocation190_spill] sm:$0xff]  ;;  %v2820_v49 = vand.u32 2147483647, %v8441_v37  ;;  %v10449_v58 = vld [vmem:[#allocation205_spill] sm:$0xff] }
 0x3a6   :  { %3176 = vmatpush.bf16.msrb.mxu0 %v10308_v6  ;;  %3189 = vmatpush.bf16.msrb.mxu1 %v10309_v7  ;;  %v2814_v47 = vmul.f32 %v6570_v13, %v2813_v38  ;;  %v2823_v5 = vor.u32 1.1754944e-38, %v2822_v29 }
 0x3a7   :  { %3202 = vmatpush.bf16.msrb.mxu2 %v10310_v12  ;;  %3215 = vmatpush.bf16.msrb.mxu3 %v10443_v51  ;;  %v8467_v61 = vadd.f32 %v2827_v43, %v2826_v54  ;;  %vm2821_vm11 = vcmp.eq.f32.partialorder %v2820_v49, 8.507059e+37  ;;  %v10450_v43 = vld [vmem:[#allocation206_spill] sm:$0xff]  ;;  %v10451_v54 = vld [vmem:[#allocation72_spill] sm:$0xff] }
 0x3a8   :  { %v2815_v39 = vadd.f32 %v6570_v13, %v2814_v47 }
 0x3a9   :  { %6573 = vtanh.f32 %v8467_v61 }
 0x3aa   :  { %3177 = vmatpush.bf16.msrb.mxu0 %v10444_v9  ;;  %3190 = vmatpush.bf16.msrb.mxu1 %v10445_v25  ;;  %v2819_v32 = vsel %vm2818_vm10, %v6570_v13, %v2815_v39  ;;  %v10452_v39 = vld [vmem:[#allocation73_spill] sm:$0xff] }
 0x3ab   :  { %3203 = vmatpush.bf16.msrb.mxu2 %v10446_v14  ;;  %3216 = vmatpush.bf16.msrb.mxu3 %v10447_v36  ;;  %v2824_v1 = vsel %vm2821_vm11, %v2823_v5, %v2819_v32  ;;  %v10453_v5 = vld [vmem:[#allocation207_spill] sm:$0xff] }
 0x3ae   :  { %3178 = vmatpush.bf16.msrb.mxu0 %v10316_v23  ;;  %3191 = vmatpush.bf16.msrb.mxu1 %v10317_v55 }
 0x3af   :  { %3204 = vmatpush.bf16.msrb.mxu2 %v10318_v3  ;;  %3217 = vmatpush.bf16.msrb.mxu3 %v10448_v11  ;;  %v6574_v60 = vpop.eup %6573 }
 0x3b0   :  { %v2830_v59 = vmul.f32 %v6574_v60, %v2824_v1  ;;  %v10454_v60 = vld [vmem:[#allocation208_spill] sm:$0xff]  ;;  %v10455_v1 = vld [vmem:[#allocation209_spill] sm:$0xff] }
 0x3b2   :  { %3179 = vmatpush.bf16.msrb.mxu0 %v10320_v15  ;;  %3192 = vmatpush.bf16.msrb.mxu1 %v10321_v18  ;;  %v3123_v37 = vpack.c.bf16 %v2830_v59, %v2830_v59  ;;  %v10456_v59 = vld [vmem:[#allocation210_spill] sm:$0xff] }
 0x3b3   :  { %3205 = vmatpush.bf16.msrb.mxu2 %v10322_v16  ;;  %3218 = vmatpush.bf16.msrb.mxu3 %v10323_v52 }
 0x3b4   :  { %3132 = vmatmul.bf16.vlgmr.msra.gmra.mxu0 %v3123_v37  ;;  %3145 = vmatmul.bf16.vlgmr.msra.gmra.mxu1 %v3123_v37 }
 0x3b5   :  { %3158 = vmatmul.bf16.vlgmr.msra.gmra.mxu2 %v3123_v37  ;;  %3171 = vmatmul.bf16.vlgmr.msra.gmra.mxu3 %v3123_v37 }
 0x3b6   :  { %3180 = vmatpush.bf16.msrb.mxu0 %v10324_v35  ;;  %3193 = vmatpush.bf16.msrb.mxu1 %v10325_v20  ;;  %v10479_v20 = vld [vmem:[#allocation40_spill] sm:$0xff] }
 0x3b7   :  { %3206 = vmatpush.bf16.msrb.mxu2 %v10326_v24  ;;  %3219 = vmatpush.bf16.msrb.mxu3 %v10327_v57  ;;  %v10478_v24 = vld [vmem:[#allocation39_spill] sm:$0xff] }
 0x3ba   :  { %3181 = vmatpush.bf16.msrb.mxu0 %v10328_v44  ;;  %3194 = vmatpush.bf16.msrb.mxu1 %v10329_v22  ;;  %v10457_v22 = vld [vmem:[#allocation211_spill] sm:$0xff] }
 0x3bb   :  { %v2841_v13 = vpop.f32.mrf.mxu0  ;;  %v2854_v38 = vpop.f32.mrf.mxu1  ;;  %3207 = vmatpush.bf16.msrb.mxu2 %v10449_v58  ;;  %3220 = vmatpush.bf16.msrb.mxu3 %v10450_v43  ;;  %v10458_v43 = vld [vmem:[#allocation212_spill] sm:$0xff] }
 0x3bc   :  { %v2884_v47 = vadd.f32 %v2841_v13, %v10451_v54  ;;  %v2885_v29 = vadd.f32 %v2854_v38, %v10452_v39  ;;  %v10459_v13 = vld [vmem:[#allocation76_spill] sm:$0xff]  ;;  %v10460_v39 = vld [vmem:[#allocation213_spill] sm:$0xff] }
 0x3be   :  { %v6136_v49 = vmul.f32 -1.442695, %v2884_v47  ;;  %v6137_v32 = vmul.f32 -1.442695, %v2885_v29  ;;  %3182 = vmatpush.bf16.msrb.mxu0 %v10453_v5  ;;  %3195 = vmatpush.bf16.msrb.mxu1 %v10454_v60  ;;  %v10461_v29 = vld [vmem:[#allocation214_spill] sm:$0xff] }
 0x3bf   :  { %3208 = vmatpush.bf16.msrb.mxu2 %v10455_v1  ;;  %3221 = vmatpush.bf16.msrb.mxu3 %v10456_v59  ;;  %v10462_v1 = vld [vmem:[#allocation24_spill] sm:$0xff]  ;;  %v10463_v59 = vld [vmem:[#allocation25_spill] sm:$0xff] }
 0x3c0   :  { %6575 = vpow2.f32 %v6136_v49 }
 0x3c1   :  { %6577 = vpow2.f32 %v6137_v32 }
 0x3c2   :  { %3183 = vmatpush.bf16.msrb.mxu0 %v10457_v22  ;;  %3196 = vmatpush.bf16.msrb.mxu1 %v10458_v43 }
 0x3c3   :  { %v2867_v37 = vpop.f32.mrf.mxu2  ;;  %v2880_v58 = vpop.f32.mrf.mxu3  ;;  %3209 = vmatpush.bf16.msrb.mxu2 %v10460_v39  ;;  %3222 = vmatpush.bf16.msrb.mxu3 %v10461_v29 }
 0x3c4   :  { %v2887_v38 = vadd.f32 %v2880_v58, %v10459_v13  ;;  %v2843_v54 = vpop.f32.mrf.mxu0  ;;  %v2856_v47 = vpop.f32.mrf.mxu1  ;;  %v10464_v13 = vld [vmem:[#allocation26_spill] sm:$0xff] }
 0x3c5   :  { %3184 = vmatmul.bf16.vlgmr.msrb.gmra.mxu0 %v8404_v53  ;;  %3197 = vmatmul.bf16.vlgmr.msrb.gmra.mxu1 %v8404_v53  ;;  %v10466_v54 = vld [vmem:[#allocation28_spill] sm:$0xff]  ;;  %v10467_v47 = vld [vmem:[#allocation29_spill] sm:$0xff] }
 0x3c6   :  { %v6138_v60 = vmul.f32 -1.442695, %v2887_v38  ;;  %3296 = vmatpush.bf16.msra.mxu0 %v10462_v1  ;;  %3309 = vmatpush.bf16.msra.mxu1 %v10463_v59  ;;  %v6576_v49 = vpop.eup %6575  ;;  %v10465_v38 = vld [vmem:[#allocation27_spill] sm:$0xff]  ;;  %v10468_v59 = vld [vmem:[#allocation33_spill] sm:$0xff] }
 0x3c7   :  { %v6578_v32 = vpop.eup %6577  ;;  %v2891_v43 = vadd.f32 1.0, %v6576_v49  ;;  %3210 = vmatmul.bf16.vlgmr.msrb.gmra.mxu2 %v8404_v53  ;;  %3223 = vmatmul.bf16.vlgmr.msrb.gmra.mxu3 %v8404_v53  ;;  %v10469_v49 = vld [vmem:[#allocation30_spill] sm:$0xff]  ;;  %v10470_v53 = vld [vmem:[#allocation31_spill] sm:$0xff] }
 0x3c8   :  { %6579 = vpow2.f32 %v6138_v60  ;;  %v2910_v58 = vadd.f32 1.0, %v6578_v32  ;;  %3322 = vmatpush.bf16.msra.mxu2 %v10464_v13  ;;  %3335 = vmatpush.bf16.msra.mxu3 %v10465_v38  ;;  %v10471_v60 = vld [vmem:[#allocation32_spill] sm:$0xff]  ;;  %v10472_v13 = vld [vmem:[#allocation74_spill] sm:$0xff] }
 0x3c9   :  { %6581 = vrcp.f32 %v2891_v43  ;;  %v2886_v22 = vadd.f32 %v2867_v37, %v10472_v13  ;;  %v2901_v37 = vand.u32 2147483647, %v2891_v43  ;;  %v10477_v13 = vld [vmem:[#allocation38_spill] sm:$0xff]  ;;  %vm2897_vm14 = vweird.f32 %v2891_v43 }
 0x3ca   :  { %3297 = vmatpush.bf16.msra.mxu0 %v10466_v54  ;;  %3310 = vmatpush.bf16.msra.mxu1 %v10467_v47  ;;  %6583 = vrcp.f32 %v2910_v58  ;;  %v10476_v47 = vld [vmem:[#allocation37_spill] sm:$0xff]  ;;  %v2922_v44 = vand.u32 2147483648, %v2910_v58  ;;  %vm2916_vm15 = vweird.f32 %v2910_v58 }
 0x3cb   :  { %v2869_v29 = vpop.f32.mrf.mxu2  ;;  %v2882_v39 = vpop.f32.mrf.mxu3  ;;  %vm2902_vm2 = vcmp.eq.f32.partialorder %v2901_v37, 8.507059e+37  ;;  %v10486_v37 = vld [vmem:[#allocation47_spill] sm:$0xff] }
 0x3cc   :  { %3323 = vmatpush.bf16.msra.mxu2 %v10468_v59  ;;  %3336 = vmatpush.bf16.msra.mxu3 %v10469_v49  ;;  %v10473_v29 = vld [vmem:[#allocation34_spill] sm:$0xff]  ;;  %v10474_v39 = vld [vmem:[#allocation35_spill] sm:$0xff]  ;;  %v10475_v49 = vld [vmem:[#allocation36_spill] sm:$0xff] }
 0x3ce   :  { %v6580_v1 = vpop.eup %6579  ;;  %3298 = vmatpush.bf16.msra.mxu0 %v10470_v53  ;;  %3311 = vmatpush.bf16.msra.mxu1 %v10471_v60 }
 0x3cf   :  { %v8518_v32 = vadd.f32 1.0, %v6580_v1  ;;  %v6582_v38 = vpop.eup %6581  ;;  %v2903_v1 = vand.u32 2147483648, %v2891_v43 }
 0x3d0   :  { %v6584_v54 = vpop.eup %6583  ;;  %v2893_v5 = vmul.f32 %v6582_v38, %v2891_v43  ;;  %3324 = vmatpush.bf16.msra.mxu2 %v10473_v29  ;;  %3337 = vmatpush.bf16.msra.mxu3 %v10474_v39  ;;  %vm2898_vm12 = vweird.f32 %v6582_v38  ;;  %v2920_v39 = vand.u32 2147483647, %v2910_v58  ;;  %v10483_v43 = vld [vmem:[#allocation44_spill] sm:$0xff] }
 0x3d1   :  { %6585 = vrcp.f32 %v8518_v32  ;;  %v2912_v59 = vmul.f32 %v6584_v54, %v2910_v58  ;;  %vm2917_vm13 = vweird.f32 %v6584_v54  ;;  %vm2899_vm0 = vmor %vm2897_vm14, %vm2898_vm12  ;;  %v10484_v58 = vld [vmem:[#allocation45_spill] sm:$0xff]  ;;  %vm2936_vm5 = vweird.f32 %v8518_v32 }
 0x3d2   :  { %3299 = vmatpush.bf16.msra.mxu0 %v10475_v49  ;;  %3312 = vmatpush.bf16.msra.mxu1 %v10476_v47  ;;  %v2894_v53 = vsub.f32 1.0, %v2893_v5  ;;  %6587 = vtanh.f32 %v2886_v22  ;;  %v10480_v49 = vld [vmem:[#allocation41_spill] sm:$0xff]  ;;  %v2904_v22 = vor.u32 1.1754944e-38, %v2903_v1  ;;  %vm2918_vm1 = vmor %vm2916_vm15, %vm2917_vm13  ;;  %vm2921_vm3 = vcmp.eq.f32.partialorder %v2920_v39, 8.507059e+37 }
 0x3d3   :  { %v2913_v60 = vsub.f32 1.0, %v2912_v59  ;;  %v10492_v39 = vld [vmem:[#allocation53_spill] sm:$0xff] }
 0x3d4   :  { %v2895_v57 = vmul.f32 %v6582_v38, %v2894_v53  ;;  %3325 = vmatpush.bf16.msra.mxu2 %v10477_v13  ;;  %3338 = vmatpush.bf16.msra.mxu3 %v10478_v24  ;;  %v2923_v13 = vor.u32 1.1754944e-38, %v2922_v44  ;;  %v10482_v24 = vld [vmem:[#allocation43_spill] sm:$0xff] }
 0x3d5   :  { %v2914_v29 = vmul.f32 %v6584_v54, %v2913_v60  ;;  %v10481_v60 = vld [vmem:[#allocation42_spill] sm:$0xff] }
 0x3d6   :  { %3300 = vmatpush.bf16.msra.mxu0 %v10479_v20  ;;  %3313 = vmatpush.bf16.msra.mxu1 %v10480_v49  ;;  %v2896_v5 = vadd.f32 %v6582_v38, %v2895_v57 }
 0x3d7   :  { %v6586_v47 = vpop.eup %6585  ;;  %v2915_v59 = vadd.f32 %v6584_v54, %v2914_v29 }
 0x3d8   :  { %v2932_v53 = vmul.f32 %v6586_v47, %v8518_v32  ;;  %v2900_v35 = vsel %vm2899_vm0, %v6582_v38, %v2896_v5  ;;  %3326 = vmatpush.bf16.msra.mxu2 %v10481_v60  ;;  %3339 = vmatpush.bf16.msra.mxu3 %v10482_v24  ;;  %v6588_v20 = vpop.eup %6587  ;;  %v10485_v38 = vld [vmem:[#allocation46_spill] sm:$0xff]  ;;  %v10487_v24 = vld [vmem:[#allocation48_spill] sm:$0xff]  ;;  %vm2937_vm4 = vweird.f32 %v6586_v47 }
 0x3d9   :  { %v2905_v52 = vsel %vm2902_vm2, %v2904_v22, %v2900_v35  ;;  %v2919_v49 = vsel %vm2918_vm1, %v6584_v54, %v2915_v59  ;;  %v10488_v35 = vld [vmem:[#allocation49_spill] sm:$0xff]  ;;  %vm2938_vm6 = vmor %vm2936_vm5, %vm2937_vm4  ;;  %v10493_v22 = vld [vmem:[#allocation82_spill] sm:$0xff] }
 0x3da   :  { %v2933_v57 = vsub.f32 1.0, %v2932_v53  ;;  %3301 = vmatpush.bf16.msra.mxu0 %v10483_v43  ;;  %3314 = vmatpush.bf16.msra.mxu1 %v10484_v58  ;;  %v2924_v29 = vsel %vm2921_vm3, %v2923_v13, %v2919_v49  ;;  %v2947_v1 = vmul.f32 %v6588_v20, %v2905_v52  ;;  %v2942_v49 = vand.u32 2147483648, %v8518_v32  ;;  %v10489_v52 = vld [vmem:[#allocation50_spill] sm:$0xff]  ;;  %v10494_v59 = vld [vmem:[#allocation83_spill] sm:$0xff] }
 0x3db   :  { %v2946_v16 = vmul.f32 %v2924_v29, %v8332_v8  ;;  %v2940_v20 = vand.u32 2147483647, %v8518_v32  ;;  %v10490_v8 = vld [vmem:[#allocation51_spill] sm:$0xff] }
 0x3dc   :  { %v2934_v44 = vmul.f32 %v6586_v47, %v2933_v57  ;;  %3327 = vmatpush.bf16.msra.mxu2 %v10485_v38  ;;  %3340 = vmatpush.bf16.msra.mxu3 %v10486_v37  ;;  %v2943_v53 = vor.u32 1.1754944e-38, %v2942_v49  ;;  %v10495_v57 = vld [vmem:[#allocation54_spill] sm:$0xff]  ;;  %v10496_v29 = vld [vmem:[#allocation55_spill] sm:$0xff]  ;;  %v10502_v49 = vld [vmem:[#allocation93_spill] sm:$0xff] }
 0x3dd   :  { %v8538_v5 = vadd.f32 %v2947_v1, %v2946_v16  ;;  %v10491_v16 = vld [vmem:[#allocation52_spill] sm:$0xff]  ;;  %vm2941_vm7 = vcmp.eq.f32.partialorder %v2940_v20, 8.507059e+37  ;;  %v10503_v20 = vld [vmem:[#allocation94_spill] sm:$0xff] }
 0x3de   :  { %3302 = vmatpush.bf16.msra.mxu0 %v10487_v24  ;;  %3315 = vmatpush.bf16.msra.mxu1 %v10488_v35  ;;  %v2935_v54 = vadd.f32 %v6586_v47, %v2934_v44  ;;  %v10497_v44 = vld [vmem:[#allocation84_spill] sm:$0xff]  ;;  %v10547_v35 = vld [vmem:[#allocation142_spill] sm:$0xff] }
 0x3df   :  { %6589 = vtanh.f32 %v8538_v5 }
 0x3e0   :  { %3328 = vmatpush.bf16.msra.mxu2 %v10489_v52  ;;  %3341 = vmatpush.bf16.msra.mxu3 %v10490_v8  ;;  %v2939_v13 = vsel %vm2938_vm6, %v6586_v47, %v2935_v54  ;;  %v10498_v8 = vld [vmem:[#allocation85_spill] sm:$0xff]  ;;  %v10499_v52 = vld [vmem:[#allocation86_spill] sm:$0xff] }
 0x3e1   :  { %v2944_v1 = vsel %vm2941_vm7, %v2943_v53, %v2939_v13  ;;  %v10500_v47 = vld [vmem:[#allocation89_spill] sm:$0xff]  ;;  %v10504_v13 = vld [vmem:[#allocation95_spill] sm:$0xff] }
 0x3e2   :  { %3303 = vmatpush.bf16.msra.mxu0 %v10491_v16  ;;  %3316 = vmatpush.bf16.msra.mxu1 %v10492_v39  ;;  %v10506_v53 = vld [vmem:[#allocation103_spill] sm:$0xff]  ;;  %v10545_v39 = vld [vmem:[#allocation140_spill] sm:$0xff] }
 0x3e4   :  { %3329 = vmatpush.bf16.msra.mxu2 %v10495_v57  ;;  %3342 = vmatpush.bf16.msra.mxu3 %v10496_v29  ;;  %v10541_v29 = vld [vmem:[#allocation138_spill] sm:$0xff]  ;;  %v10544_v57 = vld [vmem:[#allocation57_spill] sm:$0xff] }
 0x3e5   :  { %v6590_v32 = vpop.eup %6589 }
 0x3e6   :  { %3416 = vmatpush.bf16.msrb.mxu0 %v10493_v22  ;;  %3429 = vmatpush.bf16.msrb.mxu1 %v10494_v59  ;;  %v2950_v16 = vmul.f32 %v6590_v32, %v2944_v1  ;;  %v10501_v59 = vld [vmem:[#allocation90_spill] sm:$0xff]  ;;  %v10507_v32 = vld [vmem:[#allocation104_spill] sm:$0xff]  ;;  %v10508_v1 = vld [vmem:[#allocation105_spill] sm:$0xff] }
 0x3e7   :  { %v10539_v22 = vld [vmem:[#allocation136_spill] sm:$0xff] }
 0x3e8   :  { %3442 = vmatpush.bf16.msrb.mxu2 %v10497_v44  ;;  %3455 = vmatpush.bf16.msrb.mxu3 %v10498_v8  ;;  %v8558_v54 = vpack.c.bf16 %v2950_v16, %v2950_v16  ;;  %v10505_v16 = vld [vmem:[#allocation102_spill] sm:$0xff]  ;;  %v10531_v8 = vld [vmem:[#allocation128_spill] sm:$0xff] }
 0x3ea   :  { %3417 = vmatpush.bf16.msrb.mxu0 %v10499_v52  ;;  %3430 = vmatpush.bf16.msrb.mxu1 %v10500_v47 }
 0x3eb   :  { %3304 = vmatmul.bf16.vlgmr.msra.gmra.mxu0 %v8558_v54  ;;  %3317 = vmatmul.bf16.vlgmr.msra.gmra.mxu1 %v8558_v54 }
 0x3ec   :  { %3443 = vmatpush.bf16.msrb.mxu2 %v10501_v59  ;;  %3456 = vmatpush.bf16.msrb.mxu3 %v10502_v49  ;;  %v10509_v49 = vld [vmem:[#allocation106_spill] sm:$0xff]  ;;  %v10523_v59 = vld [vmem:[#allocation120_spill] sm:$0xff] }
 0x3ed   :  { %3330 = vmatmul.bf16.vlgmr.msra.gmra.mxu2 %v8558_v54  ;;  %3343 = vmatmul.bf16.vlgmr.msra.gmra.mxu3 %v8558_v54 }
 0x3ee   :  { %3418 = vmatpush.bf16.msrb.mxu0 %v10503_v20  ;;  %3431 = vmatpush.bf16.msrb.mxu1 %v10504_v13  ;;  %v10510_v20 = vld [vmem:[#allocation107_spill] sm:$0xff]  ;;  %v10511_v13 = vld [vmem:[#allocation108_spill] sm:$0xff] }
 0x3f0   :  { %3444 = vmatpush.bf16.msrb.mxu2 %v10369_v45  ;;  %3457 = vmatpush.bf16.msrb.mxu3 %v10370_v46  ;;  %v10512_v45 = vld [vmem:[#allocation109_spill] sm:$0xff]  ;;  %v10513_v46 = vld [vmem:[#allocation110_spill] sm:$0xff] }
 0x3f2   :  { %3419 = vmatpush.bf16.msrb.mxu0 %v10371_v41  ;;  %3432 = vmatpush.bf16.msrb.mxu1 %v10372_v2  ;;  %v10514_v41 = vld [vmem:[#allocation111_spill] sm:$0xff]  ;;  %v10515_v2 = vld [vmem:[#allocation112_spill] sm:$0xff] }
 0x3f4   :  { %3445 = vmatpush.bf16.msrb.mxu2 %v10505_v16  ;;  %3458 = vmatpush.bf16.msrb.mxu3 %v10506_v53  ;;  %v10516_v16 = vld [vmem:[#allocation113_spill] sm:$0xff]  ;;  %v10517_v53 = vld [vmem:[#allocation114_spill] sm:$0xff] }
 0x3f6   :  { %3420 = vmatpush.bf16.msrb.mxu0 %v10507_v32  ;;  %3433 = vmatpush.bf16.msrb.mxu1 %v10508_v1  ;;  %v10518_v32 = vld [vmem:[#allocation115_spill] sm:$0xff]  ;;  %v10519_v1 = vld [vmem:[#allocation116_spill] sm:$0xff] }
 0x3f8   :  { %3446 = vmatpush.bf16.msrb.mxu2 %v10509_v49  ;;  %3459 = vmatpush.bf16.msrb.mxu3 %v10510_v20  ;;  %v10520_v49 = vld [vmem:[#allocation117_spill] sm:$0xff]  ;;  %v10521_v20 = vld [vmem:[#allocation118_spill] sm:$0xff] }
 0x3fa   :  { %3421 = vmatpush.bf16.msrb.mxu0 %v10511_v13  ;;  %3434 = vmatpush.bf16.msrb.mxu1 %v10512_v45  ;;  %v10522_v13 = vld [vmem:[#allocation119_spill] sm:$0xff] }
 0x3fc   :  { %3447 = vmatpush.bf16.msrb.mxu2 %v10513_v46  ;;  %3460 = vmatpush.bf16.msrb.mxu3 %v10514_v41  ;;  %v10524_v41 = vld [vmem:[#allocation121_spill] sm:$0xff] }
 0x3fe   :  { %3422 = vmatpush.bf16.msrb.mxu0 %v10515_v2  ;;  %3435 = vmatpush.bf16.msrb.mxu1 %v10516_v16  ;;  %v10525_v2 = vld [vmem:[#allocation122_spill] sm:$0xff]  ;;  %v10526_v16 = vld [vmem:[#allocation123_spill] sm:$0xff] }
 0x400   :  { %3448 = vmatpush.bf16.msrb.mxu2 %v10517_v53  ;;  %3461 = vmatpush.bf16.msrb.mxu3 %v10518_v32  ;;  %v10527_v53 = vld [vmem:[#allocation124_spill] sm:$0xff]  ;;  %v10528_v32 = vld [vmem:[#allocation125_spill] sm:$0xff] }
 0x401   :  { %v2961_v45 = vpop.f32.mrf.mxu0  ;;  %v2974_v46 = vpop.f32.mrf.mxu1 }
 0x402   :  { %3423 = vmatpush.bf16.msrb.mxu0 %v10519_v1  ;;  %3436 = vmatpush.bf16.msrb.mxu1 %v10520_v49  ;;  %v10529_v1 = vld [vmem:[#allocation126_spill] sm:$0xff]  ;;  %v10530_v49 = vld [vmem:[#allocation127_spill] sm:$0xff] }
 0x404   :  { %3449 = vmatpush.bf16.msrb.mxu2 %v10521_v20  ;;  %3462 = vmatpush.bf16.msrb.mxu3 %v10522_v13 }
 0x406   :  { %3468 = vmatpush.bf16.msra.mxu0 %v10523_v59  ;;  %3481 = vmatpush.bf16.msra.mxu1 %v10524_v41  ;;  %v10532_v59 = vld [vmem:[#allocation129_spill] sm:$0xff]  ;;  %v10533_v41 = vld [vmem:[#allocation130_spill] sm:$0xff] }
 0x408   :  { %3494 = vmatpush.bf16.msra.mxu2 %v10525_v2  ;;  %3507 = vmatpush.bf16.msra.mxu3 %v10526_v16  ;;  %v2987_v20 = vpop.f32.mrf.mxu2  ;;  %v3000_v13 = vpop.f32.mrf.mxu3  ;;  %v10534_v2 = vld [vmem:[#allocation131_spill] sm:$0xff]  ;;  %v10535_v16 = vld [vmem:[#allocation132_spill] sm:$0xff] }
 0x409   :  { %v2963_v47 = vpop.f32.mrf.mxu0  ;;  %v2976_v52 = vpop.f32.mrf.mxu1 }
 0x40a   :  { %3469 = vmatpush.bf16.msra.mxu0 %v10527_v53  ;;  %3482 = vmatpush.bf16.msra.mxu1 %v10528_v32  ;;  %v10536_v53 = vld [vmem:[#allocation133_spill] sm:$0xff]  ;;  %v10537_v32 = vld [vmem:[#allocation134_spill] sm:$0xff] }
 0x40c   :  { %3495 = vmatpush.bf16.msra.mxu2 %v10529_v1  ;;  %3508 = vmatpush.bf16.msra.mxu3 %v10530_v49  ;;  %v10538_v1 = vld [vmem:[#allocation135_spill] sm:$0xff] }
 0x40e   :  { %3470 = vmatpush.bf16.msra.mxu0 %v10531_v8  ;;  %3483 = vmatpush.bf16.msra.mxu1 %v10532_v59  ;;  %v10540_v8 = vld [vmem:[#allocation137_spill] sm:$0xff] }
 0x410   :  { %3496 = vmatpush.bf16.msra.mxu2 %v10533_v41  ;;  %3509 = vmatpush.bf16.msra.mxu3 %v10534_v2  ;;  %v2989_v49 = vpop.f32.mrf.mxu2  ;;  %v3002_v44 = vpop.f32.mrf.mxu3  ;;  %v10542_v2 = vld [vmem:[#allocation139_spill] sm:$0xff] }
 0x411   :  { %v3013_v47 = vpop.f32.mrf.mxu0  ;;  %v3026_v52 = vpop.f32.mrf.mxu1  ;;  %v10546_v49 = vld [vmem:[#allocation141_spill] sm:$0xff] }
 0x412   :  { %3471 = vmatpush.bf16.msra.mxu0 %v10535_v16  ;;  %3484 = vmatpush.bf16.msra.mxu1 %v10536_v53  ;;  %v3014_v59 = vadd.f32 %v3013_v47, %v2961_v45  ;;  %v3027_v41 = vadd.f32 %v3026_v52, %v2974_v46  ;;  %v10543_v16 = vld [vmem:[#allocation56_spill] sm:$0xff] }
 0x414   :  { %3497 = vmatpush.bf16.msra.mxu2 %v10537_v32  ;;  %3510 = vmatpush.bf16.msra.mxu3 %v10538_v1  ;;  %v3056_v53 = vadd.f32 %v3014_v59, %v10543_v16  ;;  %v3057_v32 = vadd.f32 %v3027_v41, %v10544_v57  ;;  %v10549_v59 = vld [vmem:[#allocation144_spill] sm:$0xff]  ;;  %v10550_v41 = vld [vmem:[#allocation145_spill] sm:$0xff]  ;;  %v10551_v57 = vld [vmem:[#allocation146_spill] sm:$0xff] }
 0x415   :  { %v10552_v16 = vld [vmem:[#allocation147_spill] sm:$0xff] }
 0x416   :  { %3472 = vmatpush.bf16.msra.mxu0 %v10539_v22  ;;  %3485 = vmatpush.bf16.msra.mxu1 %v10540_v8  ;;  %v6139_v44 = vmul.f32 -1.442695, %v3056_v53  ;;  %v6140_v1 = vmul.f32 -1.442695, %v3057_v32  ;;  %v10548_v22 = vld [vmem:[#allocation143_spill] sm:$0xff]  ;;  %v10553_v53 = vld [vmem:[#allocation61_spill] sm:$0xff] }
 0x418   :  { %3498 = vmatpush.bf16.msra.mxu2 %v10541_v29  ;;  %3511 = vmatpush.bf16.msra.mxu3 %v10542_v2  ;;  %6591 = vpow2.f32 %v6139_v44  ;;  %v3039_v45 = vpop.f32.mrf.mxu2  ;;  %v3052_v46 = vpop.f32.mrf.mxu3  ;;  %v10555_v44 = vld [vmem:[#allocation149_spill] sm:$0xff] }
 0x419   :  { %6593 = vpow2.f32 %v6140_v1  ;;  %v3053_v47 = vadd.f32 %v3052_v46, %v3000_v13  ;;  %v3015_v52 = vpop.f32.mrf.mxu0  ;;  %v3028_v2 = vpop.f32.mrf.mxu1  ;;  %v10556_v1 = vld [vmem:[#allocation150_spill] sm:$0xff]  ;;  %v10557_v13 = vld [vmem:[#allocation151_spill] sm:$0xff] }
 0x41a   :  { %3473 = vmatpush.bf16.msra.mxu0 %v10545_v39  ;;  %3486 = vmatpush.bf16.msra.mxu1 %v10546_v49  ;;  %v10554_v49 = vld [vmem:[#allocation148_spill] sm:$0xff] }
 0x41b   :  { %v3059_v32 = vadd.f32 %v3053_v47, %v10553_v53 }
 0x41c   :  { %3499 = vmatpush.bf16.msra.mxu2 %v10547_v35  ;;  %3512 = vmatpush.bf16.msra.mxu3 %v10548_v22 }
 0x41d   :  { %v6141_v35 = vmul.f32 -1.442695, %v3059_v32 }
 0x41e   :  { %3474 = vmatpush.bf16.msra.mxu0 %v10549_v59  ;;  %3487 = vmatpush.bf16.msra.mxu1 %v10550_v41  ;;  %v6592_v22 = vpop.eup %6591 }
 0x41f   :  { %v6594_v2 = vpop.eup %6593  ;;  %v3063_v46 = vadd.f32 1.0, %v6592_v22  ;;  %6595 = vpow2.f32 %v6141_v35 }
 0x420   :  { %3500 = vmatpush.bf16.msra.mxu2 %v10551_v57  ;;  %3513 = vmatpush.bf16.msra.mxu3 %v10552_v16  ;;  %v3082_v52 = vadd.f32 1.0, %v6594_v2  ;;  %v3041_v41 = vpop.f32.mrf.mxu2  ;;  %v3054_v57 = vpop.f32.mrf.mxu3  ;;  %v3040_v16 = vadd.f32 %v3039_v45, %v2987_v20 }
 0x421   :  { %6597 = vrcp.f32 %v3063_v46  ;;  %v3075_v8 = vand.u32 2147483648, %v3063_v46  ;;  %v3073_v57 = vand.u32 2147483647, %v3063_v46  ;;  %vm3069_vm10 = vweird.f32 %v3063_v46 }
 0x422   :  { %3475 = vmatpush.bf16.msra.mxu0 %v10554_v49  ;;  %3488 = vmatpush.bf16.msra.mxu1 %v10555_v44  ;;  %6599 = vrcp.f32 %v3082_v52  ;;  %v10558_v49 = vld [vmem:[#allocation59_spill] sm:$0xff]  ;;  %v3094_v35 = vand.u32 2147483648, %v3082_v52  ;;  %v3092_v20 = vand.u32 2147483647, %v3082_v52  ;;  %vm3088_vm11 = vweird.f32 %v3082_v52 }
 0x423   :  { %v3058_v59 = vadd.f32 %v3040_v16, %v10558_v49  ;;  %v3076_v16 = vor.u32 1.1754944e-38, %v3075_v8  ;;  %vm3074_vm14 = vcmp.eq.f32.partialorder %v3073_v57, 8.507059e+37 }
 0x424   :  { %3501 = vmatpush.bf16.msra.mxu2 %v10556_v1  ;;  %3514 = vmatpush.bf16.msra.mxu3 %v10557_v13  ;;  %vm3093_vm15 = vcmp.eq.f32.partialorder %v3092_v20, 8.507059e+37 }
 0x425   :  { %v6596_v47 = vpop.eup %6595 }
 0x426   :  { %v3102_v32 = vadd.f32 1.0, %v6596_v47 }
 0x427   :  { %v6598_v53 = vpop.eup %6597 }
 0x428   :  { %v6600_v44 = vpop.eup %6599  ;;  %v3065_v39 = vmul.f32 %v6598_v53, %v3063_v46  ;;  %6601 = vrcp.f32 %v3102_v32  ;;  %vm3070_vm8 = vweird.f32 %v6598_v53  ;;  %vm3108_vm1 = vweird.f32 %v3102_v32 }
 0x429   :  { %v3084_v1 = vmul.f32 %v6600_v44, %v3082_v52  ;;  %6603 = vtanh.f32 %v3058_v59  ;;  %vm3089_vm9 = vweird.f32 %v6600_v44  ;;  %vm3071_vm12 = vmor %vm3069_vm10, %vm3070_vm8 }
 0x42a   :  { %v3066_v29 = vsub.f32 1.0, %v3065_v39  ;;  %vm3090_vm13 = vmor %vm3088_vm11, %vm3089_vm9  ;;  %v3095_v39 = vor.u32 1.1754944e-38, %v3094_v35  ;;  %v3112_v35 = vand.u32 2147483647, %v3102_v32 }
 0x42b   :  { %v3085_v13 = vsub.f32 1.0, %v3084_v1 }
 0x42c   :  { %v3067_v22 = vmul.f32 %v6598_v53, %v3066_v29  ;;  %vm3113_vm3 = vcmp.eq.f32.partialorder %v3112_v35, 8.507059e+37 }
 0x42d   :  { %v3086_v41 = vmul.f32 %v6600_v44, %v3085_v13 }
 0x42e   :  { %v6602_v45 = vpop.eup %6601  ;;  %v3068_v2 = vadd.f32 %v6598_v53, %v3067_v22 }
 0x42f   :  { %v3087_v47 = vadd.f32 %v6600_v44, %v3086_v41  ;;  %v3104_v49 = vmul.f32 %v6602_v45, %v3102_v32  ;;  %v6604_v59 = vpop.eup %6603  ;;  %vm3109_vm0 = vweird.f32 %v6602_v45 }
 0x430   :  { %v3072_v1 = vsel %vm3071_vm12, %v6598_v53, %v3068_v2  ;;  %v3114_v53 = vand.u32 2147483648, %v3102_v32  ;;  %vm3110_vm2 = vmor %vm3108_vm1, %vm3109_vm0 }
 0x431   :  { %v3077_v24 = vsel %vm3074_vm14, %v3076_v16, %v3072_v1  ;;  %v3091_v29 = vsel %vm3090_vm13, %v6600_v44, %v3087_v47  ;;  %v3105_v37 = vsub.f32 1.0, %v3104_v49  ;;  %v3133_v13 = vpop.f32.mrf.mxu0  ;;  %v3146_v38 = vpop.f32.mrf.mxu1 }
 0x432   :  { %v3096_v58 = vsel %vm3093_vm15, %v3095_v39, %v3091_v29  ;;  %v3119_v43 = vmul.f32 %v6604_v59, %v3077_v24  ;;  %v3115_v24 = vor.u32 1.1754944e-38, %v3114_v53 }
 0x433   :  { %v3118_v46 = vmul.f32 %v3096_v58, %v8399_v31  ;;  %v3106_v52 = vmul.f32 %v6602_v45, %v3105_v37 }
 0x435   :  { %v8627_v22 = vadd.f32 %v3119_v43, %v3118_v46  ;;  %v3107_v8 = vadd.f32 %v6602_v45, %v3106_v52 }
 0x437   :  { %6605 = vtanh.f32 %v8627_v22  ;;  %v3111_v20 = vsel %vm3110_vm2, %v6602_v45, %v3107_v8 }
 0x438   :  { %v8630_v57 = vpop.f32.mrf.mxu2  ;;  %v3172_v44 = vpop.f32.mrf.mxu3  ;;  %v3116_v58 = vsel %vm3113_vm3, %v3115_v24, %v3111_v20 }
 0x439   :  { %v3135_v49 = vpop.f32.mrf.mxu0  ;;  %v3148_v41 = vpop.f32.mrf.mxu1 }
 0x43a   :  { %v10559_v49 = vld [vmem:[#allocation164_spill] sm:$0xff] }
 0x43d   :  { %v6606_v31 = vpop.eup %6605 }
 0x43e   :  { %v3122_v43 = vmul.f32 %v6606_v31, %v3116_v58  ;;  %v10560_v58 = vld [vmem:[#allocation165_spill] sm:$0xff] }
 0x440   :  { %v8632_v37 = vpack.c.bf16 %v3122_v43, %v3122_v43  ;;  %v3161_v2 = vpop.f32.mrf.mxu2  ;;  %v3174_v16 = vpop.f32.mrf.mxu3 }
 0x442   :  { %v3185_v47 = vpop.f32.mrf.mxu0  ;;  %v3198_v39 = vpop.f32.mrf.mxu1  ;;  %3424 = vmatmul.bf16.vlgmr.msrb.gmra.mxu0 %v8632_v37  ;;  %3437 = vmatmul.bf16.vlgmr.msrb.gmra.mxu1 %v8632_v37 }
 0x443   :  { %v3186_v32 = vadd.f32 %v3185_v47, %v3133_v13  ;;  %v3199_v1 = vadd.f32 %v3198_v39, %v3146_v38  ;;  %3450 = vmatmul.bf16.vlgmr.msrb.gmra.mxu2 %v8632_v37  ;;  %3463 = vmatmul.bf16.vlgmr.msrb.gmra.mxu3 %v8632_v37  ;;  %v10562_v47 = vld [vmem:[#allocation167_spill] sm:$0xff]  ;;  %v10563_v39 = vld [vmem:[#allocation168_spill] sm:$0xff] }
 0x444   :  { %3588 = vmatpush.bf16.msrb.mxu0 %v10279_v42  ;;  %3601 = vmatpush.bf16.msrb.mxu1 %v10280_v10 }
 0x445   :  { %v3228_v45 = vadd.f32 %v3186_v32, %v8168_v21  ;;  %v3229_v59 = vadd.f32 %v3199_v1, %v8170_v48  ;;  %3614 = vmatpush.bf16.msrb.mxu2 %v10281_v0  ;;  %3627 = vmatpush.bf16.msrb.mxu3 %v10282_v27  ;;  %v10564_v1 = vld [vmem:[#allocation169_spill] sm:$0xff] }
 0x447   :  { %v6142_v29 = vmul.f32 -1.442695, %v3228_v45  ;;  %v6143_v46 = vmul.f32 -1.442695, %v3229_v59  ;;  %v10565_v45 = vld [vmem:[#allocation170_spill] sm:$0xff]  ;;  %v10566_v59 = vld [vmem:[#allocation171_spill] sm:$0xff] }
 0x448   :  { %3589 = vmatpush.bf16.msrb.mxu0 %v10284_v4  ;;  %3602 = vmatpush.bf16.msrb.mxu1 %v10285_v30 }
 0x449   :  { %6607 = vpow2.f32 %v6142_v29  ;;  %3615 = vmatpush.bf16.msrb.mxu2 %v10421_v40  ;;  %3628 = vmatpush.bf16.msrb.mxu3 %v10422_v33  ;;  %v10567_v29 = vld [vmem:[#allocation172_spill] sm:$0xff] }
 0x44a   :  { %v3211_v38 = vpop.f32.mrf.mxu2  ;;  %v3224_v13 = vpop.f32.mrf.mxu3  ;;  %6609 = vpow2.f32 %v6143_v46 }
 0x44b   :  { %v3225_v52 = vadd.f32 %v3224_v13, %v3172_v44  ;;  %v3187_v8 = vpop.f32.mrf.mxu0  ;;  %v3200_v53 = vpop.f32.mrf.mxu1  ;;  %v10561_v44 = vld [vmem:[#allocation166_spill] sm:$0xff]  ;;  %v3212_v32 = vadd.f32 %v3211_v38, %v8630_v57  ;;  %v10571_v38 = vld [vmem:[#allocation176_spill] sm:$0xff] }
 0x44c   :  { %3590 = vmatpush.bf16.msrb.mxu0 %v10424_v56  ;;  %3603 = vmatpush.bf16.msrb.mxu1 %v10425_v62  ;;  %v10568_v8 = vld [vmem:[#allocation66_spill] sm:$0xff] }
 0x44d   :  { %v3231_v35 = vadd.f32 %v3225_v52, %v10423_v28  ;;  %3616 = vmatpush.bf16.msrb.mxu2 %v10426_v26  ;;  %3629 = vmatpush.bf16.msrb.mxu3 %v10559_v49  ;;  %v3230_v53 = vadd.f32 %v3212_v32, %v10568_v8  ;;  %v10573_v32 = vld [vmem:[#allocation178_spill] sm:$0xff] }
 0x44f   :  { %v6144_v41 = vmul.f32 -1.442695, %v3231_v35  ;;  %v6608_v20 = vpop.eup %6607  ;;  %v10569_v35 = vld [vmem:[#allocation173_spill] sm:$0xff] }
 0x450   :  { %v6610_v24 = vpop.eup %6609  ;;  %v3235_v31 = vadd.f32 1.0, %v6608_v20  ;;  %3591 = vmatpush.bf16.msrb.mxu0 %v10560_v58  ;;  %3604 = vmatpush.bf16.msrb.mxu1 %v10561_v44 }
 0x451   :  { %6611 = vpow2.f32 %v6144_v41  ;;  %v8655_v43 = vadd.f32 1.0, %v6610_v24  ;;  %3617 = vmatpush.bf16.msrb.mxu2 %v10562_v47  ;;  %3630 = vmatpush.bf16.msrb.mxu3 %v10563_v39  ;;  %v10570_v41 = vld [vmem:[#allocation174_spill] sm:$0xff] }
 0x452   :  { %v3213_v2 = vpop.f32.mrf.mxu2  ;;  %v3226_v16 = vpop.f32.mrf.mxu3  ;;  %6613 = vrcp.f32 %v3235_v31  ;;  %3476 = vmatmul.bf16.vlgmr.msra.gmra.mxu0 %v8558_v54  ;;  %3489 = vmatmul.bf16.vlgmr.msra.gmra.mxu1 %v8558_v54  ;;  %v3245_v8 = vand.u32 2147483647, %v3235_v31  ;;  %vm3241_vm6 = vweird.f32 %v3235_v31 }
 0x453   :  { %6615 = vrcp.f32 %v8655_v43  ;;  %3502 = vmatmul.bf16.vlgmr.msra.gmra.mxu2 %v8558_v54  ;;  %3515 = vmatmul.bf16.vlgmr.msra.gmra.mxu3 %v8558_v54  ;;  %v3247_v16 = vand.u32 2147483648, %v3235_v31  ;;  %vm3260_vm7 = vweird.f32 %v8655_v43 }
 0x454   :  { %3592 = vmatpush.bf16.msrb.mxu0 %v10564_v1  ;;  %3605 = vmatpush.bf16.msrb.mxu1 %v10565_v45  ;;  %vm3246_vm10 = vcmp.eq.f32.partialorder %v3245_v8, 8.507059e+37 }
 0x455   :  { %3618 = vmatpush.bf16.msrb.mxu2 %v10566_v59  ;;  %3631 = vmatpush.bf16.msrb.mxu3 %v10567_v29  ;;  %v10574_v29 = vld [vmem:[#allocation179_spill] sm:$0xff] }
 0x457   :  { %v6612_v46 = vpop.eup %6611 }
 0x458   :  { %v8669_v13 = vadd.f32 1.0, %v6612_v46  ;;  %v6614_v52 = vpop.eup %6613  ;;  %3593 = vmatpush.bf16.msrb.mxu0 %v10569_v35  ;;  %3606 = vmatpush.bf16.msrb.mxu1 %v10570_v41  ;;  %v10572_v46 = vld [vmem:[#allocation177_spill] sm:$0xff]  ;;  %v3266_v41 = vand.u32 2147483648, %v8655_v43 }
 0x459   :  { %v6616_v54 = vpop.eup %6615  ;;  %v3237_v57 = vmul.f32 %v6614_v52, %v3235_v31  ;;  %3619 = vmatpush.bf16.msrb.mxu2 %v10439_v50  ;;  %3632 = vmatpush.bf16.msrb.mxu3 %v10571_v38  ;;  %vm3242_vm4 = vweird.f32 %v6614_v52  ;;  %v10575_v50 = vld [vmem:[#allocation180_spill] sm:$0xff] }
 0x45a   :  { %6617 = vrcp.f32 %v8669_v13  ;;  %v3256_v20 = vmul.f32 %v6616_v54, %v8655_v43  ;;  %vm3261_vm5 = vweird.f32 %v6616_v54  ;;  %vm3243_vm8 = vmor %vm3241_vm6, %vm3242_vm4  ;;  %vm3280_vm13 = vweird.f32 %v8669_v13 }
 0x45b   :  { %v3238_v24 = vsub.f32 1.0, %v3237_v57  ;;  %6619 = vtanh.f32 %v3230_v53  ;;  %v3264_v57 = vand.u32 2147483647, %v8655_v43  ;;  %vm3262_vm9 = vmor %vm3260_vm7, %vm3261_vm5 }
 0x45c   :  { %v3257_v2 = vsub.f32 1.0, %v3256_v20  ;;  %3594 = vmatpush.bf16.msrb.mxu0 %v10572_v46  ;;  %3607 = vmatpush.bf16.msrb.mxu1 %v10573_v32  ;;  %v3248_v32 = vor.u32 1.1754944e-38, %v3247_v16 }
 0x45d   :  { %v3239_v35 = vmul.f32 %v6614_v52, %v3238_v24  ;;  %3620 = vmatpush.bf16.msrb.mxu2 %v10574_v29  ;;  %3633 = vmatpush.bf16.msrb.mxu3 %v10575_v50  ;;  %vm3265_vm11 = vcmp.eq.f32.partialorder %v3264_v57, 8.507059e+37 }
 0x45e   :  { %v3258_v38 = vmul.f32 %v6616_v54, %v3257_v2  ;;  %v3267_v2 = vor.u32 1.1754944e-38, %v3266_v41  ;;  %v10576_v41 = vld [vmem:[#allocation58_spill] sm:$0xff] }
 0x45f   :  { %v3240_v53 = vadd.f32 %v6614_v52, %v3239_v35 }
 0x460   :  { %v8684_v20 = vpop.eup %6617  ;;  %v3259_v46 = vadd.f32 %v6616_v54, %v3258_v38  ;;  %3595 = vmatpush.bf16.msrb.mxu0 %v7907_v17  ;;  %3608 = vmatpush.bf16.msrb.mxu1 %v7909_v63 }
 0x461   :  { %v3276_v24 = vmul.f32 %v8684_v20, %v8669_v13  ;;  %v3244_v50 = vsel %vm3243_vm8, %v6614_v52, %v3240_v53  ;;  %3621 = vmatpush.bf16.msrb.mxu2 %v7913_v19  ;;  %3634 = vmatpush.bf16.msrb.mxu3 %v10307_v34  ;;  %v6620_v31 = vpop.eup %6619  ;;  %v10577_v53 = vld [vmem:[#allocation75_spill] sm:$0xff]  ;;  %vm3281_vm12 = vweird.f32 %v8684_v20 }
 0x462   :  { %v3249_v43 = vsel %vm3246_vm10, %v3248_v32, %v3244_v50  ;;  %v3263_v35 = vsel %vm3262_vm9, %v6616_v54, %v3259_v46  ;;  %v420_v50 = vadd.f32 %v10577_v53, %v10576_v41  ;;  %v10578_v54 = vld [vmem:[#allocation60_spill] sm:$0xff]  ;;  %v10579_v46 = vld [vmem:[#allocation77_spill] sm:$0xff]  ;;  %vm8717_vm14 = vmor %vm3280_vm13, %vm3281_vm12 }
 0x463   :  { %v3277_v38 = vsub.f32 1.0, %v3276_v24  ;;  %v3268_v16 = vsel %vm3265_vm11, %v3267_v2, %v3263_v35  ;;  %v3291_v17 = vmul.f32 %v6620_v31, %v3249_v43  ;;  %v449_v32 = vadd.f32 %v10579_v46, %v10578_v54  ;;  %v10582_v53 = vld [vmem:[#allocation65_spill] sm:$0xff] }
 0x464   :  { %3640 = vmatpush.bf16.msra.mxu0 %v10308_v6  ;;  %3653 = vmatpush.bf16.msra.mxu1 %v10309_v7  ;;  %v3290_v52 = vmul.f32 %v3268_v16, %v8467_v61  ;;  %v3284_v16 = vand.u32 2147483647, %v8669_v13  ;;  %v10584_v41 = vld [vmem:[#allocation197_spill] sm:$0xff] }
 0x465   :  { %3666 = vmatpush.bf16.msra.mxu2 %v10310_v12  ;;  %3679 = vmatpush.bf16.msra.mxu3 %v10443_v51  ;;  %v3278_v8 = vmul.f32 %v8684_v20, %v3277_v38 }
 0x466   :  { %v8703_v57 = vadd.f32 %v3291_v17, %v3290_v52  ;;  %v3286_v17 = vand.u32 2147483648, %v8669_v13  ;;  %vm3285_vm15 = vcmp.eq.f32.partialorder %v3284_v16, 8.507059e+37  ;;  %v10586_v16 = vld [vmem:[#allocation199_spill] sm:$0xff] }
 0x467   :  { %v3279_v43 = vadd.f32 %v8684_v20, %v3278_v8 }
 0x468   :  { %3641 = vmatpush.bf16.msra.mxu0 %v10444_v9  ;;  %3654 = vmatpush.bf16.msra.mxu1 %v10445_v25  ;;  %v3305_v24 = vpop.f32.mrf.mxu0  ;;  %v3318_v2 = vpop.f32.mrf.mxu1  ;;  %6621 = vtanh.f32 %v8703_v57  ;;  %v3287_v46 = vor.u32 1.1754944e-38, %v3286_v17 }
 0x469   :  { %3667 = vmatpush.bf16.msra.mxu2 %v10446_v14  ;;  %3680 = vmatpush.bf16.msra.mxu3 %v10447_v36  ;;  %v3348_v61 = vadd.f32 %v3305_v24, %v420_v50  ;;  %v3349_v31 = vadd.f32 %v3318_v2, %v449_v32  ;;  %v3283_v8 = vsel %vm8717_vm14, %v8684_v20, %v3279_v43  ;;  %v10583_v50 = vld [vmem:[#allocation79_spill] sm:$0xff]  ;;  %v10585_v20 = vld [vmem:[#allocation198_spill] sm:$0xff] }
 0x46a   :  { %v507_v13 = vadd.f32 %v10583_v50, %v10582_v53 }
 0x46b   :  { %v6145_v35 = vmul.f32 -1.442695, %v3348_v61  ;;  %v6146_v38 = vmul.f32 -1.442695, %v3349_v31  ;;  %v3288_v31 = vsel %vm3285_vm15, %v3287_v46, %v3283_v8  ;;  %v10589_v8 = vld [vmem:[#allocation202_spill] sm:$0xff] }
 0x46c   :  { %3642 = vmatpush.bf16.msra.mxu0 %v10316_v23  ;;  %3655 = vmatpush.bf16.msra.mxu1 %v10317_v55 }
 0x46d   :  { %6623 = vpow2.f32 %v6145_v35  ;;  %3668 = vmatpush.bf16.msra.mxu2 %v10318_v3  ;;  %3681 = vmatpush.bf16.msra.mxu3 %v10448_v11 }
 0x46e   :  { %6625 = vpow2.f32 %v6146_v38  ;;  %v6622_v2 = vpop.eup %6621 }
 0x46f   :  { %v3294_v43 = vmul.f32 %v6622_v2, %v3288_v31  ;;  %v10591_v2 = vld [vmem:[#allocation204_spill] sm:$0xff] }
 0x470   :  { %v3331_v32 = vpop.f32.mrf.mxu2  ;;  %v3344_v24 = vpop.f32.mrf.mxu3  ;;  %3643 = vmatpush.bf16.msra.mxu0 %v10320_v15  ;;  %3656 = vmatpush.bf16.msra.mxu1 %v10321_v18  ;;  %v10587_v15 = vld [vmem:[#allocation200_spill] sm:$0xff] }
 0x471   :  { %v3351_v61 = vadd.f32 %v3344_v24, %v507_v13  ;;  %v3307_v35 = vpop.f32.mrf.mxu0  ;;  %v3320_v54 = vpop.f32.mrf.mxu1  ;;  %3669 = vmatpush.bf16.msra.mxu2 %v10584_v41  ;;  %3682 = vmatpush.bf16.msra.mxu3 %v10585_v20  ;;  %v3587_v17 = vpack.c.bf16 %v3294_v43, %v3294_v43  ;;  %v10590_v24 = vld [vmem:[#allocation203_spill] sm:$0xff]  ;;  %v10592_v31 = vld [vmem:[#allocation64_spill] sm:$0xff] }
 0x472   :  { %v10588_v54 = vld [vmem:[#allocation201_spill] sm:$0xff]  ;;  %v10593_v35 = vld [vmem:[#allocation78_spill] sm:$0xff] }
 0x473   :  { %v6147_v52 = vmul.f32 -1.442695, %v3351_v61  ;;  %v6624_v38 = vpop.eup %6623  ;;  %3596 = vmatmul.bf16.vlgmr.msrb.gmra.mxu0 %v3587_v17  ;;  %3609 = vmatmul.bf16.vlgmr.msrb.gmra.mxu1 %v3587_v17  ;;  %v478_v43 = vadd.f32 %v10593_v35, %v10592_v31  ;;  %v10598_v35 = vld [vmem:[#allocation209_spill] sm:$0xff] }
 0x474   :  { %v6626_v50 = vpop.eup %6625  ;;  %v3355_v53 = vadd.f32 1.0, %v6624_v38  ;;  %3644 = vmatpush.bf16.msra.mxu0 %v10586_v16  ;;  %3657 = vmatpush.bf16.msra.mxu1 %v10587_v15  ;;  %v10594_v38 = vld [vmem:[#allocation205_spill] sm:$0xff]  ;;  %v10596_v15 = vld [vmem:[#allocation207_spill] sm:$0xff]  ;;  %v10602_v16 = vld [vmem:[#allocation24_spill] sm:$0xff] }
 0x475   :  { %6627 = vpow2.f32 %v6147_v52  ;;  %v8734_v18 = vadd.f32 1.0, %v6626_v50  ;;  %3622 = vmatmul.bf16.vlgmr.msrb.gmra.mxu2 %v3587_v17  ;;  %3635 = vmatmul.bf16.vlgmr.msrb.gmra.mxu3 %v3587_v17  ;;  %v10595_v17 = vld [vmem:[#allocation206_spill] sm:$0xff] }
 0x476   :  { %6629 = vrcp.f32 %v3355_v53  ;;  %3670 = vmatpush.bf16.msra.mxu2 %v10588_v54  ;;  %3683 = vmatpush.bf16.msra.mxu3 %v10589_v8  ;;  %v3350_v54 = vadd.f32 %v3331_v32, %v478_v43  ;;  %v10601_v32 = vld [vmem:[#allocation212_spill] sm:$0xff]  ;;  %vm3361_vm2 = vweird.f32 %v3355_v53 }
 0x477   :  { %6631 = vrcp.f32 %v8734_v18  ;;  %v3386_v43 = vand.u32 2147483648, %v8734_v18  ;;  %vm3380_vm3 = vweird.f32 %v8734_v18 }
 0x478   :  { %v3333_v13 = vpop.f32.mrf.mxu2  ;;  %v3346_v46 = vpop.f32.mrf.mxu3  ;;  %3645 = vmatpush.bf16.msra.mxu0 %v10590_v24  ;;  %3658 = vmatpush.bf16.msra.mxu1 %v10591_v2 }
 0x479   :  { %v10597_v13 = vld [vmem:[#allocation208_spill] sm:$0xff] }
 0x47a   :  { %3671 = vmatpush.bf16.msra.mxu2 %v10594_v38  ;;  %3684 = vmatpush.bf16.msra.mxu3 %v10595_v17  ;;  %v3367_v38 = vand.u32 2147483648, %v3355_v53  ;;  %v10600_v17 = vld [vmem:[#allocation211_spill] sm:$0xff] }
 0x47b   :  { %v6628_v61 = vpop.eup %6627 }
 0x47c   :  { %v8743_v52 = vadd.f32 1.0, %v6628_v61  ;;  %v6630_v50 = vpop.eup %6629  ;;  %3646 = vmatpush.bf16.msra.mxu0 %v10596_v15  ;;  %3659 = vmatpush.bf16.msra.mxu1 %v10597_v13  ;;  %v10599_v61 = vld [vmem:[#allocation210_spill] sm:$0xff]  ;;  %v3365_v15 = vand.u32 2147483647, %v3355_v53 }
 0x47d   :  { %v6632_v46 = vpop.eup %6631  ;;  %v3357_v24 = vmul.f32 %v6630_v50, %v3355_v53  ;;  %vm3362_vm0 = vweird.f32 %v6630_v50 }
 0x47e   :  { %v3376_v2 = vmul.f32 %v6632_v46, %v8734_v18  ;;  %6633 = vrcp.f32 %v8743_v52  ;;  %3672 = vmatpush.bf16.msra.mxu2 %v10598_v35  ;;  %3685 = vmatpush.bf16.msra.mxu3 %v10599_v61  ;;  %vm3381_vm1 = vweird.f32 %v6632_v46  ;;  %v3384_v61 = vand.u32 2147483647, %v8734_v18  ;;  %vm3363_vm4 = vmor %vm3361_vm2, %vm3362_vm0  ;;  %v10606_v35 = vld [vmem:[#allocation26_spill] sm:$0xff] }
 0x47f   :  { %v3358_v8 = vsub.f32 1.0, %v3357_v24  ;;  %6635 = vtanh.f32 %v3350_v54  ;;  %v10603_v24 = vld [vmem:[#allocation25_spill] sm:$0xff]  ;;  %vm3382_vm5 = vmor %vm3380_vm3, %vm3381_vm1  ;;  %vm3366_vm6 = vcmp.eq.f32.partialorder %v3365_v15, 8.507059e+37  ;;  %vm3400_vm9 = vweird.f32 %v8743_v52 }
 0x480   :  { %v3377_v31 = vsub.f32 1.0, %v3376_v2  ;;  %3647 = vmatpush.bf16.msra.mxu0 %v10600_v17  ;;  %3660 = vmatpush.bf16.msra.mxu1 %v10601_v32  ;;  %v10604_v54 = vld [vmem:[#allocation213_spill] sm:$0xff]  ;;  %v10605_v17 = vld [vmem:[#allocation214_spill] sm:$0xff]  ;;  %vm3385_vm7 = vcmp.eq.f32.partialorder %v3384_v61, 8.507059e+37  ;;  %v10614_v61 = vld [vmem:[#allocation32_spill] sm:$0xff] }
 0x481   :  { %v3359_v13 = vmul.f32 %v6630_v50, %v3358_v8  ;;  %v3368_v8 = vor.u32 1.1754944e-38, %v3367_v38  ;;  %v10608_v38 = vld [vmem:[#allocation28_spill] sm:$0xff] }
 0x482   :  { %v3378_v20 = vmul.f32 %v6632_v46, %v3377_v31  ;;  %3673 = vmatpush.bf16.msra.mxu2 %v10604_v54  ;;  %3686 = vmatpush.bf16.msra.mxu3 %v10605_v17  ;;  %v3387_v31 = vor.u32 1.1754944e-38, %v3386_v43  ;;  %v10610_v43 = vld [vmem:[#allocation33_spill] sm:$0xff] }
 0x483   :  { %v3360_v2 = vadd.f32 %v6630_v50, %v3359_v13  ;;  %3648 = vmatmul.bf16.vlgmr.msra.gmra.mxu0 %v8632_v37  ;;  %3661 = vmatmul.bf16.vlgmr.msra.gmra.mxu1 %v8632_v37 }
 0x484   :  { %3760 = vmatpush.bf16.msrb.mxu0 %v10602_v16  ;;  %3773 = vmatpush.bf16.msrb.mxu1 %v10603_v24  ;;  %v3379_v32 = vadd.f32 %v6632_v46, %v3378_v20  ;;  %v10607_v16 = vld [vmem:[#allocation27_spill] sm:$0xff]  ;;  %v6634_v24 = vpop.eup %6633 }
 0x485   :  { %v3364_v41 = vsel %vm3363_vm4, %v6630_v50, %v3360_v2  ;;  %v6636_v53 = vpop.eup %6635  ;;  %3674 = vmatmul.bf16.vlgmr.msra.gmra.mxu2 %v8632_v37  ;;  %3687 = vmatmul.bf16.vlgmr.msra.gmra.mxu3 %v8632_v37  ;;  %v3396_v50 = vmul.f32 %v6634_v24, %v8743_v52  ;;  %v10611_v2 = vld [vmem:[#allocation30_spill] sm:$0xff]  ;;  %vm3401_vm8 = vweird.f32 %v6634_v24 }
 0x486   :  { %3786 = vmatpush.bf16.msrb.mxu2 %v10606_v35  ;;  %3799 = vmatpush.bf16.msrb.mxu3 %v10607_v16  ;;  %v3369_v13 = vsel %vm3366_vm6, %v3368_v8, %v3364_v41  ;;  %v3383_v17 = vsel %vm3382_vm5, %v6632_v46, %v3379_v32  ;;  %v10609_v16 = vld [vmem:[#allocation29_spill] sm:$0xff]  ;;  %v10613_v46 = vld [vmem:[#allocation31_spill] sm:$0xff]  ;;  %v10617_v8 = vld [vmem:[#allocation36_spill] sm:$0xff] }
 0x487   :  { %v3388_v18 = vsel %vm3385_vm7, %v3387_v31, %v3383_v17  ;;  %v3411_v20 = vmul.f32 %v6636_v53, %v3369_v13  ;;  %v3397_v37 = vsub.f32 1.0, %v3396_v50  ;;  %v10615_v17 = vld [vmem:[#allocation34_spill] sm:$0xff]  ;;  %v10616_v32 = vld [vmem:[#allocation35_spill] sm:$0xff]  ;;  %vm3402_vm10 = vmor %vm3400_vm9, %vm3401_vm8 }
 0x488   :  { %3761 = vmatpush.bf16.msrb.mxu0 %v10608_v38  ;;  %3774 = vmatpush.bf16.msrb.mxu1 %v10609_v16  ;;  %v3410_v15 = vmul.f32 %v3388_v18, %v8538_v5  ;;  %v10618_v5 = vld [vmem:[#allocation37_spill] sm:$0xff]  ;;  %v10619_v53 = vld [vmem:[#allocation38_spill] sm:$0xff]  ;;  %v10620_v13 = vld [vmem:[#allocation39_spill] sm:$0xff] }
 0x489   :  { %v3398_v31 = vmul.f32 %v6634_v24, %v3397_v37  ;;  %v10621_v18 = vld [vmem:[#allocation40_spill] sm:$0xff]  ;;  %v10623_v50 = vld [vmem:[#allocation43_spill] sm:$0xff]  ;;  %v3404_v37 = vand.u32 2147483647, %v8743_v52  ;;  %v10691_v16 = vld [vmem:[#allocation57_spill] sm:$0xff] }
 0x48a   :  { %3787 = vmatpush.bf16.msrb.mxu2 %v10610_v43  ;;  %3800 = vmatpush.bf16.msrb.mxu3 %v10611_v2  ;;  %v8774_v41 = vadd.f32 %v3411_v20, %v3410_v15  ;;  %v10622_v20 = vld [vmem:[#allocation41_spill] sm:$0xff]  ;;  %v10686_v2 = vld [vmem:[#allocation138_spill] sm:$0xff]  ;;  %v10688_v43 = vld [vmem:[#allocation140_spill] sm:$0xff] }
 0x48b   :  { %v3399_v15 = vadd.f32 %v6634_v24, %v3398_v31  ;;  %v10627_v31 = vld [vmem:[#allocation47_spill] sm:$0xff]  ;;  %vm3405_vm11 = vcmp.eq.f32.partialorder %v3404_v37, 8.507059e+37  ;;  %v10641_v37 = vld [vmem:[#allocation89_spill] sm:$0xff]  ;;  %v10692_v38 = vld [vmem:[#allocation142_spill] sm:$0xff] }
 0x48c   :  { %10612 = vst [vmem:[#allocation152_spill] sm:$0xff] %v8774_v41  ;;  %3762 = vmatpush.bf16.msrb.mxu0 %v10613_v46  ;;  %3775 = vmatpush.bf16.msrb.mxu1 %v10614_v61  ;;  %6637 = vtanh.f32 %v8774_v41  ;;  %v10631_v46 = vld [vmem:[#allocation51_spill] sm:$0xff]  ;;  %v10694_v35 = vld [vmem:[#allocation144_spill] sm:$0xff] }
 0x48e   :  { %3788 = vmatpush.bf16.msrb.mxu2 %v10615_v17  ;;  %3801 = vmatpush.bf16.msrb.mxu3 %v10616_v32  ;;  %v10628_v32 = vld [vmem:[#allocation48_spill] sm:$0xff]  ;;  %v10629_v17 = vld [vmem:[#allocation49_spill] sm:$0xff] }
 0x490   :  { %3763 = vmatpush.bf16.msrb.mxu0 %v10617_v8  ;;  %3776 = vmatpush.bf16.msrb.mxu1 %v10618_v5  ;;  %v3406_v8 = vand.u32 2147483648, %v8743_v52  ;;  %v10626_v5 = vld [vmem:[#allocation46_spill] sm:$0xff] }
 0x491   :  { %v10630_v52 = vld [vmem:[#allocation50_spill] sm:$0xff] }
 0x492   :  { %3789 = vmatpush.bf16.msrb.mxu2 %v10619_v53  ;;  %3802 = vmatpush.bf16.msrb.mxu3 %v10620_v13  ;;  %v10624_v13 = vld [vmem:[#allocation44_spill] sm:$0xff]  ;;  %v10625_v53 = vld [vmem:[#allocation45_spill] sm:$0xff] }
 0x494   :  { %3764 = vmatpush.bf16.msrb.mxu0 %v10621_v18  ;;  %3777 = vmatpush.bf16.msrb.mxu1 %v10622_v20  ;;  %v3403_v18 = vsel %vm3402_vm10, %v6634_v24, %v3399_v15  ;;  %v6638_v20 = vpop.eup %6637  ;;  %v10633_v24 = vld [vmem:[#allocation53_spill] sm:$0xff] }
 0x496   :  { %3790 = vmatpush.bf16.msrb.mxu2 %v10481_v60  ;;  %3803 = vmatpush.bf16.msrb.mxu3 %v10623_v50  ;;  %v3407_v60 = vor.u32 1.1754944e-38, %v3406_v8  ;;  %v10635_v8 = vld [vmem:[#allocation55_spill] sm:$0xff] }
 0x498   :  { %3765 = vmatpush.bf16.msrb.mxu0 %v10624_v13  ;;  %3778 = vmatpush.bf16.msrb.mxu1 %v10625_v53  ;;  %v3408_v50 = vsel %vm3405_vm11, %v3407_v60, %v3403_v18  ;;  %v10632_v13 = vld [vmem:[#allocation52_spill] sm:$0xff]  ;;  %v10636_v60 = vld [vmem:[#allocation82_spill] sm:$0xff]  ;;  %v10637_v18 = vld [vmem:[#allocation83_spill] sm:$0xff] }
 0x499   :  { %v3414_v61 = vmul.f32 %v6638_v20, %v3408_v50  ;;  %v10638_v20 = vld [vmem:[#allocation84_spill] sm:$0xff]  ;;  %v10640_v50 = vld [vmem:[#allocation86_spill] sm:$0xff] }
 0x49a   :  { %3791 = vmatpush.bf16.msrb.mxu2 %v10626_v5  ;;  %3804 = vmatpush.bf16.msrb.mxu3 %v10627_v31  ;;  %v10634_v31 = vld [vmem:[#allocation54_spill] sm:$0xff] }
 0x49b   :  { %v8802_v15 = vpack.c.bf16 %v3414_v61, %v3414_v61  ;;  %v10639_v61 = vld [vmem:[#allocation85_spill] sm:$0xff]  ;;  %v10678_v5 = vld [vmem:[#allocation130_spill] sm:$0xff] }
 0x49c   :  { %3766 = vmatpush.bf16.msrb.mxu0 %v10628_v32  ;;  %3779 = vmatpush.bf16.msrb.mxu1 %v10629_v17 }
 0x49e   :  { %3792 = vmatpush.bf16.msrb.mxu2 %v10630_v52  ;;  %3805 = vmatpush.bf16.msrb.mxu3 %v10631_v46  ;;  %v10648_v46 = vld [vmem:[#allocation99_spill] sm:$0xff]  ;;  %v10670_v52 = vld [vmem:[#allocation122_spill] sm:$0xff] }
 0x4a0   :  { %3767 = vmatpush.bf16.msrb.mxu0 %v10632_v13  ;;  %3780 = vmatpush.bf16.msrb.mxu1 %v10633_v24  ;;  %v10646_v24 = vld [vmem:[#allocation96_spill] sm:$0xff]  ;;  %v10647_v13 = vld [vmem:[#allocation97_spill] sm:$0xff] }
 0x4a2   :  { %3793 = vmatpush.bf16.msrb.mxu2 %v10634_v31  ;;  %3806 = vmatpush.bf16.msrb.mxu3 %v10635_v8  ;;  %v10642_v8 = vld [vmem:[#allocation90_spill] sm:$0xff]  ;;  %v10645_v31 = vld [vmem:[#allocation95_spill] sm:$0xff] }
 0x4a3   :  { %3768 = vmatmul.bf16.vlgmr.msrb.gmra.mxu0 %v8802_v15  ;;  %3781 = vmatmul.bf16.vlgmr.msrb.gmra.mxu1 %v8802_v15 }
 0x4a4   :  { %3880 = vmatpush.bf16.msra.mxu0 %v10636_v60  ;;  %3893 = vmatpush.bf16.msra.mxu1 %v10637_v18  ;;  %v10643_v60 = vld [vmem:[#allocation93_spill] sm:$0xff]  ;;  %v10644_v18 = vld [vmem:[#allocation94_spill] sm:$0xff] }
 0x4a5   :  { %3794 = vmatmul.bf16.vlgmr.msrb.gmra.mxu2 %v8802_v15  ;;  %3807 = vmatmul.bf16.vlgmr.msrb.gmra.mxu3 %v8802_v15 }
 0x4a6   :  { %3906 = vmatpush.bf16.msra.mxu2 %v10638_v20  ;;  %3919 = vmatpush.bf16.msra.mxu3 %v10639_v61  ;;  %v10649_v20 = vld [vmem:[#allocation101_spill] sm:$0xff]  ;;  %v10650_v61 = vld [vmem:[#allocation102_spill] sm:$0xff] }
 0x4a8   :  { %3881 = vmatpush.bf16.msra.mxu0 %v10640_v50  ;;  %3894 = vmatpush.bf16.msra.mxu1 %v10641_v37  ;;  %v10651_v50 = vld [vmem:[#allocation103_spill] sm:$0xff]  ;;  %v10652_v37 = vld [vmem:[#allocation104_spill] sm:$0xff] }
 0x4aa   :  { %3907 = vmatpush.bf16.msra.mxu2 %v10642_v8  ;;  %3920 = vmatpush.bf16.msra.mxu3 %v10643_v60  ;;  %v10653_v8 = vld [vmem:[#allocation105_spill] sm:$0xff]  ;;  %v10654_v60 = vld [vmem:[#allocation106_spill] sm:$0xff] }
 0x4ac   :  { %3882 = vmatpush.bf16.msra.mxu0 %v10644_v18  ;;  %3895 = vmatpush.bf16.msra.mxu1 %v10645_v31  ;;  %v10655_v18 = vld [vmem:[#allocation107_spill] sm:$0xff]  ;;  %v10656_v31 = vld [vmem:[#allocation108_spill] sm:$0xff] }
 0x4ae   :  { %3908 = vmatpush.bf16.msra.mxu2 %v10646_v24  ;;  %3921 = vmatpush.bf16.msra.mxu3 %v10647_v13  ;;  %v10657_v24 = vld [vmem:[#allocation109_spill] sm:$0xff]  ;;  %v10658_v13 = vld [vmem:[#allocation110_spill] sm:$0xff] }
 0x4b0   :  { %3883 = vmatpush.bf16.msra.mxu0 %v10648_v46  ;;  %3896 = vmatpush.bf16.msra.mxu1 %v10649_v20  ;;  %v10659_v46 = vld [vmem:[#allocation111_spill] sm:$0xff]  ;;  %v10660_v20 = vld [vmem:[#allocation112_spill] sm:$0xff] }
 0x4b2   :  { %3909 = vmatpush.bf16.msra.mxu2 %v10650_v61  ;;  %3922 = vmatpush.bf16.msra.mxu3 %v10651_v50  ;;  %v10661_v61 = vld [vmem:[#allocation113_spill] sm:$0xff]  ;;  %v10662_v50 = vld [vmem:[#allocation114_spill] sm:$0xff] }
 0x4b4   :  { %3884 = vmatpush.bf16.msra.mxu0 %v10652_v37  ;;  %3897 = vmatpush.bf16.msra.mxu1 %v10653_v8  ;;  %v10663_v37 = vld [vmem:[#allocation115_spill] sm:$0xff]  ;;  %v10664_v8 = vld [vmem:[#allocation116_spill] sm:$0xff] }
 0x4b6   :  { %3910 = vmatpush.bf16.msra.mxu2 %v10654_v60  ;;  %3923 = vmatpush.bf16.msra.mxu3 %v10655_v18  ;;  %v10665_v60 = vld [vmem:[#allocation117_spill] sm:$0xff]  ;;  %v10666_v18 = vld [vmem:[#allocation120_spill] sm:$0xff] }
 0x4b8   :  { %3885 = vmatpush.bf16.msra.mxu0 %v10656_v31  ;;  %3898 = vmatpush.bf16.msra.mxu1 %v10657_v24  ;;  %v10667_v31 = vld [vmem:[#allocation121_spill] sm:$0xff]  ;;  %v10668_v24 = vld [vmem:[#allocation118_spill] sm:$0xff] }
 0x4ba   :  { %3911 = vmatpush.bf16.msra.mxu2 %v10658_v13  ;;  %3924 = vmatpush.bf16.msra.mxu3 %v10659_v46  ;;  %v10669_v13 = vld [vmem:[#allocation119_spill] sm:$0xff] }
 0x4bc   :  { %3886 = vmatpush.bf16.msra.mxu0 %v10660_v20  ;;  %3899 = vmatpush.bf16.msra.mxu1 %v10661_v61  ;;  %v10671_v61 = vld [vmem:[#allocation123_spill] sm:$0xff] }
 0x4be   :  { %3912 = vmatpush.bf16.msra.mxu2 %v10662_v50  ;;  %3925 = vmatpush.bf16.msra.mxu3 %v10663_v37  ;;  %v10672_v50 = vld [vmem:[#allocation124_spill] sm:$0xff]  ;;  %v10673_v37 = vld [vmem:[#allocation125_spill] sm:$0xff] }
 0x4bf   :  { %v3425_v46 = vpop.f32.mrf.mxu0  ;;  %v3438_v20 = vpop.f32.mrf.mxu1 }
 0x4c0   :  { %3887 = vmatpush.bf16.msra.mxu0 %v10664_v8  ;;  %3900 = vmatpush.bf16.msra.mxu1 %v10665_v60  ;;  %v10674_v8 = vld [vmem:[#allocation126_spill] sm:$0xff]  ;;  %v10675_v60 = vld [vmem:[#allocation127_spill] sm:$0xff] }
 0x4c2   :  { %3913 = vmatpush.bf16.msra.mxu2 %v10668_v24  ;;  %3926 = vmatpush.bf16.msra.mxu3 %v10669_v13 }
 0x4c4   :  { %3932 = vmatpush.bf16.msrb.mxu0 %v10666_v18  ;;  %3945 = vmatpush.bf16.msrb.mxu1 %v10667_v31  ;;  %v10676_v18 = vld [vmem:[#allocation128_spill] sm:$0xff]  ;;  %v10677_v31 = vld [vmem:[#allocation129_spill] sm:$0xff] }
 0x4c6   :  { %3958 = vmatpush.bf16.msrb.mxu2 %v10670_v52  ;;  %3971 = vmatpush.bf16.msrb.mxu3 %v10671_v61  ;;  %v3451_v24 = vpop.f32.mrf.mxu2  ;;  %v3464_v13 = vpop.f32.mrf.mxu3  ;;  %v10679_v52 = vld [vmem:[#allocation131_spill] sm:$0xff]  ;;  %v10680_v61 = vld [vmem:[#allocation132_spill] sm:$0xff] }
 0x4c7   :  { %v3427_v17 = vpop.f32.mrf.mxu0  ;;  %v3440_v32 = vpop.f32.mrf.mxu1 }
 0x4c8   :  { %3933 = vmatpush.bf16.msrb.mxu0 %v10672_v50  ;;  %3946 = vmatpush.bf16.msrb.mxu1 %v10673_v37  ;;  %v10681_v50 = vld [vmem:[#allocation133_spill] sm:$0xff]  ;;  %v10682_v37 = vld [vmem:[#allocation134_spill] sm:$0xff] }
 0x4ca   :  { %3959 = vmatpush.bf16.msrb.mxu2 %v10674_v8  ;;  %3972 = vmatpush.bf16.msrb.mxu3 %v10675_v60  ;;  %v10683_v8 = vld [vmem:[#allocation135_spill] sm:$0xff]  ;;  %v10684_v60 = vld [vmem:[#allocation136_spill] sm:$0xff] }
 0x4cc   :  { %3934 = vmatpush.bf16.msrb.mxu0 %v10676_v18  ;;  %3947 = vmatpush.bf16.msrb.mxu1 %v10677_v31  ;;  %v10685_v18 = vld [vmem:[#allocation137_spill] sm:$0xff] }
 0x4ce   :  { %3960 = vmatpush.bf16.msrb.mxu2 %v10678_v5  ;;  %3973 = vmatpush.bf16.msrb.mxu3 %v10679_v52  ;;  %v3453_v31 = vpop.f32.mrf.mxu2  ;;  %v3466_v53 = vpop.f32.mrf.mxu3  ;;  %v10687_v5 = vld [vmem:[#allocation139_spill] sm:$0xff] }
 0x4cf   :  { %v3477_v17 = vpop.f32.mrf.mxu0  ;;  %v3490_v32 = vpop.f32.mrf.mxu1  ;;  %v10693_v31 = vld [vmem:[#allocation143_spill] sm:$0xff] }
 0x4d0   :  { %3935 = vmatpush.bf16.msrb.mxu0 %v10680_v61  ;;  %3948 = vmatpush.bf16.msrb.mxu1 %v10681_v50  ;;  %v3478_v52 = vadd.f32 %v3477_v17, %v3425_v46  ;;  %v3491_v61 = vadd.f32 %v3490_v32, %v3438_v20  ;;  %v10689_v50 = vld [vmem:[#allocation141_spill] sm:$0xff] }
 0x4d2   :  { %3961 = vmatpush.bf16.msrb.mxu2 %v10682_v37  ;;  %3974 = vmatpush.bf16.msrb.mxu3 %v10683_v8  ;;  %v10690_v37 = vld [vmem:[#allocation56_spill] sm:$0xff] }
 0x4d3   :  { %v3520_v8 = vadd.f32 %v3478_v52, %v10690_v37  ;;  %v10696_v52 = vld [vmem:[#allocation146_spill] sm:$0xff]  ;;  %v10703_v37 = vld [vmem:[#allocation59_spill] sm:$0xff] }
 0x4d4   :  { %3936 = vmatpush.bf16.msrb.mxu0 %v10684_v60  ;;  %3949 = vmatpush.bf16.msrb.mxu1 %v10685_v18  ;;  %v3521_v60 = vadd.f32 %v3491_v61, %v10691_v16  ;;  %v10697_v61 = vld [vmem:[#allocation147_spill] sm:$0xff]  ;;  %v10701_v16 = vld [vmem:[#allocation150_spill] sm:$0xff] }
 0x4d5   :  { %v6148_v53 = vmul.f32 -1.442695, %v3520_v8  ;;  %v10700_v8 = vld [vmem:[#allocation61_spill] sm:$0xff] }
 0x4d6   :  { %3962 = vmatpush.bf16.msrb.mxu2 %v10686_v2  ;;  %3975 = vmatpush.bf16.msrb.mxu3 %v10687_v5  ;;  %v6149_v18 = vmul.f32 -1.442695, %v3521_v60  ;;  %v10695_v2 = vld [vmem:[#allocation145_spill] sm:$0xff]  ;;  %v3503_v46 = vpop.f32.mrf.mxu2  ;;  %v3516_v20 = vpop.f32.mrf.mxu3 }
 0x4d7   :  { %6639 = vpow2.f32 %v6148_v53  ;;  %v3517_v17 = vadd.f32 %v3516_v20, %v3464_v13  ;;  %v3479_v32 = vpop.f32.mrf.mxu0  ;;  %v10702_v53 = vld [vmem:[#allocation151_spill] sm:$0xff] }
 0x4d8   :  { %3937 = vmatpush.bf16.msrb.mxu0 %v10688_v43  ;;  %3950 = vmatpush.bf16.msrb.mxu1 %v10689_v50  ;;  %6641 = vpow2.f32 %v6149_v18  ;;  %v3492_v50 = vpop.f32.mrf.mxu1 }
 0x4d9   :  { %v3523_v60 = vadd.f32 %v3517_v17, %v10700_v8 }
 0x4da   :  { %3963 = vmatpush.bf16.msrb.mxu2 %v10692_v38  ;;  %3976 = vmatpush.bf16.msrb.mxu3 %v10693_v31  ;;  %v10698_v38 = vld [vmem:[#allocation148_spill] sm:$0xff]  ;;  %v10699_v31 = vld [vmem:[#allocation149_spill] sm:$0xff] }
 0x4dc   :  { %3938 = vmatpush.bf16.msrb.mxu0 %v10694_v35  ;;  %3951 = vmatpush.bf16.msrb.mxu1 %v10695_v2  ;;  %v6150_v35 = vmul.f32 -1.442695, %v3523_v60 }
 0x4dd   :  { %v6640_v2 = vpop.eup %6639 }
 0x4de   :  { %3964 = vmatpush.bf16.msrb.mxu2 %v10696_v52  ;;  %3977 = vmatpush.bf16.msrb.mxu3 %v10697_v61  ;;  %v6642_v18 = vpop.eup %6641  ;;  %v3527_v13 = vadd.f32 1.0, %v6640_v2  ;;  %6643 = vpow2.f32 %v6150_v35  ;;  %v3505_v20 = vpop.f32.mrf.mxu2  ;;  %v3504_v61 = vadd.f32 %v3503_v46, %v3451_v24 }
 0x4df   :  { %v3546_v50 = vadd.f32 1.0, %v6642_v18  ;;  %v3518_v32 = vpop.f32.mrf.mxu3 }
 0x4e0   :  { %3939 = vmatpush.bf16.msrb.mxu0 %v10698_v38  ;;  %3952 = vmatpush.bf16.msrb.mxu1 %v10699_v31  ;;  %6645 = vrcp.f32 %v3527_v13  ;;  %v3522_v17 = vadd.f32 %v3504_v61, %v10703_v37  ;;  %v3539_v5 = vand.u32 2147483648, %v3527_v13  ;;  %v3537_v18 = vand.u32 2147483647, %v3527_v13 }
 0x4e1   :  { %6647 = vrcp.f32 %v3546_v50  ;;  %v3558_v35 = vand.u32 2147483648, %v3546_v50  ;;  %v3556_v24 = vand.u32 2147483647, %v3546_v50  ;;  %vm3533_vm14 = vweird.f32 %v3527_v13 }
 0x4e2   :  { %3965 = vmatpush.bf16.msrb.mxu2 %v10701_v16  ;;  %3978 = vmatpush.bf16.msrb.mxu3 %v10702_v53  ;;  %vm3552_vm15 = vweird.f32 %v3546_v50  ;;  %v3540_v61 = vor.u32 1.1754944e-38, %v3539_v5  ;;  %vm3538_vm2 = vcmp.eq.f32.partialorder %v3537_v18, 8.507059e+37 }
 0x4e3   :  { %vm3557_vm3 = vcmp.eq.f32.partialorder %v3556_v24, 8.507059e+37 }
 0x4e4   :  { %v6644_v38 = vpop.eup %6643 }
 0x4e5   :  { %v3566_v52 = vadd.f32 1.0, %v6644_v38 }
 0x4e6   :  { %v6646_v31 = vpop.eup %6645 }
 0x4e7   :  { %v6648_v60 = vpop.eup %6647  ;;  %v3529_v8 = vmul.f32 %v6646_v31, %v3527_v13  ;;  %6649 = vrcp.f32 %v3566_v52  ;;  %vm3534_vm12 = vweird.f32 %v6646_v31  ;;  %vm3572_vm5 = vweird.f32 %v3566_v52 }
 0x4e8   :  { %v3548_v16 = vmul.f32 %v6648_v60, %v3546_v50  ;;  %6651 = vtanh.f32 %v3522_v17  ;;  %vm3553_vm13 = vweird.f32 %v6648_v60  ;;  %vm3535_vm0 = vmor %vm3533_vm14, %vm3534_vm12 }
 0x4e9   :  { %v3530_v53 = vsub.f32 1.0, %v3529_v8  ;;  %vm3554_vm1 = vmor %vm3552_vm15, %vm3553_vm13  ;;  %v3559_v8 = vor.u32 1.1754944e-38, %v3558_v35  ;;  %v3576_v35 = vand.u32 2147483647, %v3566_v52 }
 0x4ea   :  { %v3549_v43 = vsub.f32 1.0, %v3548_v16 }
 0x4eb   :  { %v3531_v2 = vmul.f32 %v6646_v31, %v3530_v53  ;;  %vm3577_vm7 = vcmp.eq.f32.partialorder %v3576_v35, 8.507059e+37 }
 0x4ec   :  { %v3550_v20 = vmul.f32 %v6648_v60, %v3549_v43 }
 0x4ed   :  { %v6650_v46 = vpop.eup %6649  ;;  %v3532_v38 = vadd.f32 %v6646_v31, %v3531_v2 }
 0x4ee   :  { %v3551_v32 = vadd.f32 %v6648_v60, %v3550_v20  ;;  %v3568_v37 = vmul.f32 %v6650_v46, %v3566_v52  ;;  %v6652_v17 = vpop.eup %6651  ;;  %vm3573_vm4 = vweird.f32 %v6650_v46 }
 0x4ef   :  { %v3536_v16 = vsel %vm3535_vm0, %v6646_v31, %v3532_v38  ;;  %v3578_v31 = vand.u32 2147483648, %v3566_v52  ;;  %vm3574_vm6 = vmor %vm3572_vm5, %vm3573_vm4 }
 0x4f0   :  { %v3541_v54 = vsel %vm3538_vm2, %v3540_v61, %v3536_v16  ;;  %v3555_v53 = vsel %vm3554_vm1, %v6648_v60, %v3551_v32  ;;  %v3569_v41 = vsub.f32 1.0, %v3568_v37  ;;  %v3597_v3 = vpop.f32.mrf.mxu0  ;;  %v3610_v55 = vpop.f32.mrf.mxu1 }
 0x4f1   :  { %v3560_v43 = vsel %vm3557_vm3, %v3559_v8, %v3555_v53  ;;  %v3583_v11 = vmul.f32 %v6652_v17, %v3541_v54  ;;  %v3579_v24 = vor.u32 1.1754944e-38, %v3578_v31 }
 0x4f2   :  { %v3582_v13 = vmul.f32 %v3560_v43, %v8627_v22  ;;  %v3570_v50 = vmul.f32 %v6650_v46, %v3569_v41 }
 0x4f4   :  { %v8879_v2 = vadd.f32 %v3583_v11, %v3582_v13  ;;  %v3571_v5 = vadd.f32 %v6650_v46, %v3570_v50 }
 0x4f6   :  { %6653 = vtanh.f32 %v8879_v2  ;;  %v3575_v18 = vsel %vm3574_vm6, %v6650_v46, %v3571_v5 }
 0x4f7   :  { %v3580_v41 = vsel %vm3577_vm7, %v3579_v24, %v3575_v18 }
 0x4f8   :  { %v8882_v60 = vpop.f32.mrf.mxu2  ;;  %v3636_v37 = vpop.f32.mrf.mxu3 }
 0x4f9   :  { %v3599_v54 = vpop.f32.mrf.mxu0  ;;  %v3612_v20 = vpop.f32.mrf.mxu1 }
 0x4fc   :  { %v6654_v22 = vpop.eup %6653 }
 0x4fd   :  { %v3586_v11 = vmul.f32 %v6654_v22, %v3580_v41 }
 0x4ff   :  { %v8884_v38 = vpack.c.bf16 %v3586_v11, %v3586_v11 }
 0x500   :  { %v3625_v61 = vpop.f32.mrf.mxu2  ;;  %v3638_v32 = vpop.f32.mrf.mxu3 }
 0x501   :  { %v3649_v8 = vpop.f32.mrf.mxu0  ;;  %v3662_v16 = vpop.f32.mrf.mxu1  ;;  %3888 = vmatmul.bf16.vlgmr.msra.gmra.mxu0 %v8884_v38  ;;  %3901 = vmatmul.bf16.vlgmr.msra.gmra.mxu1 %v8884_v38  ;;  %v10704_v61 = vld [vmem:[#allocation172_spill] sm:$0xff] }
 0x502   :  { %v3650_v52 = vadd.f32 %v3649_v8, %v3597_v3  ;;  %v3663_v17 = vadd.f32 %v3662_v16, %v3610_v55  ;;  %3914 = vmatmul.bf16.vlgmr.msra.gmra.mxu2 %v8884_v38  ;;  %3927 = vmatmul.bf16.vlgmr.msra.gmra.mxu3 %v8884_v38 }
 0x503   :  { %4052 = vmatpush.bf16.msra.mxu0 %v10279_v42  ;;  %4065 = vmatpush.bf16.msra.mxu1 %v10280_v10 }
 0x504   :  { %v3692_v46 = vadd.f32 %v3650_v52, %v8168_v21  ;;  %v3693_v53 = vadd.f32 %v3663_v17, %v8170_v48  ;;  %4078 = vmatpush.bf16.msra.mxu2 %v10281_v0  ;;  %4091 = vmatpush.bf16.msra.mxu3 %v10282_v27  ;;  %v10705_v52 = vld [vmem:[#allocation66_spill] sm:$0xff] }
 0x506   :  { %v6151_v43 = vmul.f32 -1.442695, %v3692_v46  ;;  %v6152_v13 = vmul.f32 -1.442695, %v3693_v53  ;;  %v10706_v46 = vld [vmem:[#allocation173_spill] sm:$0xff]  ;;  %v10707_v53 = vld [vmem:[#allocation174_spill] sm:$0xff] }
 0x507   :  { %4053 = vmatpush.bf16.msra.mxu0 %v10284_v4  ;;  %4066 = vmatpush.bf16.msra.mxu1 %v10285_v30 }
 0x508   :  { %6655 = vpow2.f32 %v6151_v43  ;;  %v3675_v55 = vpop.f32.mrf.mxu2  ;;  %v3688_v3 = vpop.f32.mrf.mxu3  ;;  %4079 = vmatpush.bf16.msra.mxu2 %v10421_v40  ;;  %4092 = vmatpush.bf16.msra.mxu3 %v10422_v33  ;;  %v10708_v43 = vld [vmem:[#allocation175_spill] sm:$0xff] }
 0x509   :  { %6657 = vpow2.f32 %v6152_v13  ;;  %v3689_v50 = vadd.f32 %v3688_v3, %v3636_v37  ;;  %v3651_v5 = vpop.f32.mrf.mxu0  ;;  %v3664_v31 = vpop.f32.mrf.mxu1  ;;  %v3676_v11 = vadd.f32 %v3675_v55, %v8882_v60  ;;  %v10709_v13 = vld [vmem:[#allocation176_spill] sm:$0xff] }
 0x50b   :  { %v3695_v35 = vadd.f32 %v3689_v50, %v10423_v28  ;;  %4054 = vmatpush.bf16.msra.mxu0 %v10424_v56  ;;  %4067 = vmatpush.bf16.msra.mxu1 %v10425_v62  ;;  %v3694_v17 = vadd.f32 %v3676_v11, %v10705_v52 }
 0x50c   :  { %4080 = vmatpush.bf16.msra.mxu2 %v10426_v26  ;;  %4093 = vmatpush.bf16.msra.mxu3 %v10559_v49 }
 0x50d   :  { %v6153_v18 = vmul.f32 -1.442695, %v3695_v35  ;;  %v10710_v35 = vld [vmem:[#allocation177_spill] sm:$0xff] }
 0x50e   :  { %v6656_v54 = vpop.eup %6655 }
 0x50f   :  { %v6658_v20 = vpop.eup %6657  ;;  %v8905_v24 = vadd.f32 1.0, %v6656_v54  ;;  %6659 = vpow2.f32 %v6153_v18  ;;  %4055 = vmatpush.bf16.msra.mxu0 %v10560_v58  ;;  %4068 = vmatpush.bf16.msra.mxu1 %v10561_v44  ;;  %v10711_v18 = vld [vmem:[#allocation178_spill] sm:$0xff] }
 0x510   :  { %v3718_v37 = vadd.f32 1.0, %v6658_v20  ;;  %v3677_v22 = vpop.f32.mrf.mxu2  ;;  %v3690_v41 = vpop.f32.mrf.mxu3  ;;  %4081 = vmatpush.bf16.msra.mxu2 %v10562_v47  ;;  %4094 = vmatpush.bf16.msra.mxu3 %v10563_v39 }
 0x511   :  { %6661 = vrcp.f32 %v8905_v24  ;;  %3940 = vmatmul.bf16.vlgmr.msrb.gmra.mxu0 %v8802_v15  ;;  %3953 = vmatmul.bf16.vlgmr.msrb.gmra.mxu1 %v8802_v15  ;;  %v3711_v50 = vand.u32 2147483648, %v8905_v24  ;;  %v3709_v31 = vand.u32 2147483647, %v8905_v24  ;;  %v10712_v41 = vld [vmem:[#allocation180_spill] sm:$0xff]  ;;  %vm3705_vm11 = vweird.f32 %v8905_v24 }
 0x512   :  { %6663 = vrcp.f32 %v3718_v37  ;;  %3966 = vmatmul.bf16.vlgmr.msrb.gmra.mxu2 %v8802_v15  ;;  %3979 = vmatmul.bf16.vlgmr.msrb.gmra.mxu3 %v8802_v15  ;;  %v3730_v54 = vand.u32 2147483648, %v3718_v37  ;;  %v3728_v22 = vand.u32 2147483647, %v3718_v37  ;;  %vm3724_vm10 = vweird.f32 %v3718_v37 }
 0x513   :  { %4056 = vmatpush.bf16.msra.mxu0 %v10564_v1  ;;  %4069 = vmatpush.bf16.msra.mxu1 %v10565_v45  ;;  %vm3710_vm14 = vcmp.eq.f32.partialorder %v3709_v31, 8.507059e+37 }
 0x514   :  { %4082 = vmatpush.bf16.msra.mxu2 %v10566_v59  ;;  %4095 = vmatpush.bf16.msra.mxu3 %v10704_v61  ;;  %v3731_v52 = vor.u32 1.1754944e-38, %v3730_v54  ;;  %vm3729_vm15 = vcmp.eq.f32.partialorder %v3728_v22, 8.507059e+37  ;;  %v10716_v22 = vld [vmem:[#allocation91_spill] sm:$0xff] }
 0x515   :  { %v6660_v32 = vpop.eup %6659 }
 0x516   :  { %v8921_v8 = vadd.f32 1.0, %v6660_v32 }
 0x517   :  { %v6662_v16 = vpop.eup %6661  ;;  %4057 = vmatpush.bf16.msra.mxu0 %v10706_v46  ;;  %4070 = vmatpush.bf16.msra.mxu1 %v10707_v53 }
 0x518   :  { %v6664_v15 = vpop.eup %6663  ;;  %v3701_v60 = vmul.f32 %v6662_v16, %v8905_v24  ;;  %6665 = vrcp.f32 %v8921_v8  ;;  %4083 = vmatpush.bf16.msra.mxu2 %v10708_v43  ;;  %4096 = vmatpush.bf16.msra.mxu3 %v10709_v13  ;;  %vm3706_vm8 = vweird.f32 %v6662_v16  ;;  %v10713_v13 = vld [vmem:[#allocation80_spill] sm:$0xff]  ;;  %v10714_v43 = vld [vmem:[#allocation81_spill] sm:$0xff]  ;;  %vm3744_vm1 = vweird.f32 %v8921_v8 }
 0x519   :  { %v3720_v55 = vmul.f32 %v6664_v15, %v3718_v37  ;;  %6667 = vtanh.f32 %v3694_v17  ;;  %vm3725_vm9 = vweird.f32 %v6664_v15  ;;  %v3712_v17 = vor.u32 1.1754944e-38, %v3711_v50  ;;  %vm3707_vm12 = vmor %vm3705_vm11, %vm3706_vm8 }
 0x51a   :  { %v3702_v3 = vsub.f32 1.0, %v3701_v60  ;;  %vm3726_vm13 = vmor %vm3724_vm10, %vm3725_vm9 }
 0x51b   :  { %v3721_v5 = vsub.f32 1.0, %v3720_v55  ;;  %4058 = vmatpush.bf16.msra.mxu0 %v10710_v35  ;;  %4071 = vmatpush.bf16.msra.mxu1 %v10711_v18 }
 0x51c   :  { %v3703_v20 = vmul.f32 %v6662_v16, %v3702_v3  ;;  %4084 = vmatpush.bf16.msra.mxu2 %v10574_v29  ;;  %4097 = vmatpush.bf16.msra.mxu3 %v10712_v41 }
 0x51d   :  { %v3722_v11 = vmul.f32 %v6664_v15, %v3721_v5  ;;  %v10715_v5 = vld [vmem:[#allocation181_spill] sm:$0xff] }
 0x51e   :  { %v8936_v32 = vpop.eup %6665  ;;  %v3704_v60 = vadd.f32 %v6662_v16, %v3703_v20 }
 0x51f   :  { %v3723_v18 = vadd.f32 %v6664_v15, %v3722_v11  ;;  %v3740_v3 = vmul.f32 %v8936_v32, %v8921_v8  ;;  %4059 = vmatpush.bf16.msra.mxu0 %v10715_v5  ;;  %4072 = vmatpush.bf16.msra.mxu1 %v7909_v63  ;;  %v6668_v24 = vpop.eup %6667  ;;  %vm3745_vm0 = vweird.f32 %v8936_v32 }
 0x520   :  { %v3769_v55 = vpop.f32.mrf.mxu0  ;;  %v3782_v35 = vpop.f32.mrf.mxu1  ;;  %v3708_v37 = vsel %vm3707_vm12, %v6662_v16, %v3704_v60  ;;  %4085 = vmatpush.bf16.msra.mxu2 %v7913_v19  ;;  %4098 = vmatpush.bf16.msra.mxu3 %v10307_v34  ;;  %v3748_v60 = vand.u32 2147483647, %v8921_v8  ;;  %vm8967_vm2 = vmor %vm3744_vm1, %vm3745_vm0 }
 0x521   :  { %v3812_v29 = vadd.f32 %v3769_v55, %v10713_v13  ;;  %v3813_v41 = vadd.f32 %v3782_v35, %v10714_v43  ;;  %v3713_v50 = vsel %vm3710_vm14, %v3712_v17, %v3708_v37  ;;  %v3727_v20 = vsel %vm3726_vm13, %v6664_v15, %v3723_v18 }
 0x522   :  { %v3741_v11 = vsub.f32 1.0, %v3740_v3  ;;  %v3732_v43 = vsel %vm3729_vm15, %v3731_v52, %v3727_v20  ;;  %v3755_v13 = vmul.f32 %v6668_v24, %v3713_v50  ;;  %v10719_v24 = vld [vmem:[#allocation192_spill] sm:$0xff]  ;;  %v10720_v50 = vld [vmem:[#allocation193_spill] sm:$0xff]  ;;  %vm3749_vm3 = vcmp.eq.f32.partialorder %v3748_v60, 8.507059e+37  ;;  %v10727_v60 = vld [vmem:[#allocation87_spill] sm:$0xff] }
 0x523   :  { %v6154_v53 = vmul.f32 -1.442695, %v3812_v29  ;;  %4104 = vmatpush.bf16.msrb.mxu0 %v10308_v6  ;;  %v6155_v35 = vmul.f32 -1.442695, %v3813_v41  ;;  %4117 = vmatpush.bf16.msrb.mxu1 %v10309_v7  ;;  %v3754_v16 = vmul.f32 %v3732_v43, %v8703_v57 }
 0x524   :  { %4130 = vmatpush.bf16.msrb.mxu2 %v10310_v12  ;;  %v3742_v31 = vmul.f32 %v8936_v32, %v3741_v11  ;;  %4143 = vmatpush.bf16.msrb.mxu3 %v10443_v51 }
 0x525   :  { %6669 = vpow2.f32 %v6154_v53  ;;  %v8953_v29 = vadd.f32 %v3755_v13, %v3754_v16  ;;  %v3750_v53 = vand.u32 2147483648, %v8921_v8  ;;  %v10721_v8 = vld [vmem:[#allocation194_spill] sm:$0xff] }
 0x526   :  { %6671 = vpow2.f32 %v6155_v35  ;;  %v3743_v57 = vadd.f32 %v8936_v32, %v3742_v31 }
 0x527   :  { %4105 = vmatpush.bf16.msrb.mxu0 %v10444_v9  ;;  %4118 = vmatpush.bf16.msrb.mxu1 %v10445_v25  ;;  %6673 = vtanh.f32 %v8953_v29  ;;  %v3751_v43 = vor.u32 1.1754944e-38, %v3750_v53 }
 0x528   :  { %v3795_v15 = vpop.f32.mrf.mxu2  ;;  %v3808_v18 = vpop.f32.mrf.mxu3  ;;  %4131 = vmatpush.bf16.msrb.mxu2 %v10446_v14  ;;  %4144 = vmatpush.bf16.msrb.mxu3 %v10447_v36  ;;  %v3747_v20 = vsel %vm8967_vm2, %v8936_v32, %v3743_v57  ;;  %v10724_v32 = vld [vmem:[#allocation197_spill] sm:$0xff] }
 0x529   :  { %v3771_v52 = vpop.f32.mrf.mxu0  ;;  %v3784_v54 = vpop.f32.mrf.mxu1  ;;  %v3815_v41 = vadd.f32 %v3808_v18, %v10716_v22  ;;  %v10722_v18 = vld [vmem:[#allocation195_spill] sm:$0xff]  ;;  %v10725_v22 = vld [vmem:[#allocation198_spill] sm:$0xff]  ;;  %v3814_v55 = vadd.f32 %v3795_v15, %v10727_v60 }
 0x52a   :  { %v3752_v52 = vsel %vm3749_vm3, %v3751_v43, %v3747_v20  ;;  %v10723_v54 = vld [vmem:[#allocation196_spill] sm:$0xff] }
 0x52b   :  { %v6670_v17 = vpop.eup %6669  ;;  %4106 = vmatpush.bf16.msrb.mxu0 %v10316_v23  ;;  %4119 = vmatpush.bf16.msrb.mxu1 %v10719_v24  ;;  %v6156_v13 = vmul.f32 -1.442695, %v3815_v41  ;;  %v10728_v43 = vld [vmem:[#allocation200_spill] sm:$0xff] }
 0x52c   :  { %v6672_v3 = vpop.eup %6671  ;;  %v8971_v37 = vadd.f32 1.0, %v6670_v17  ;;  %4132 = vmatpush.bf16.msrb.mxu2 %v10720_v50  ;;  %4145 = vmatpush.bf16.msrb.mxu3 %v10721_v8  ;;  %v10726_v17 = vld [vmem:[#allocation199_spill] sm:$0xff] }
 0x52d   :  { %v8978_v11 = vadd.f32 1.0, %v6672_v3  ;;  %v6674_v35 = vpop.eup %6673 }
 0x52e   :  { %6675 = vrcp.f32 %v8971_v37  ;;  %v3758_v57 = vmul.f32 %v6674_v35, %v3752_v52  ;;  %v10729_v35 = vld [vmem:[#allocation201_spill] sm:$0xff]  ;;  %v10731_v52 = vld [vmem:[#allocation203_spill] sm:$0xff]  ;;  %v3831_v60 = vand.u32 2147483648, %v8971_v37  ;;  %vm3825_vm6 = vweird.f32 %v8971_v37 }
 0x52f   :  { %6677 = vrcp.f32 %v8978_v11  ;;  %4107 = vmatpush.bf16.msrb.mxu0 %v10722_v18  ;;  %4120 = vmatpush.bf16.msrb.mxu1 %v10723_v54  ;;  %vm3844_vm7 = vweird.f32 %v8978_v11 }
 0x530   :  { %v3797_v16 = vpop.f32.mrf.mxu2  ;;  %v3810_v31 = vpop.f32.mrf.mxu3  ;;  %4133 = vmatpush.bf16.msrb.mxu2 %v10724_v32  ;;  %4146 = vmatpush.bf16.msrb.mxu3 %v10725_v22  ;;  %6679 = vpow2.f32 %v6156_v13  ;;  %v4051_v53 = vpack.c.bf16 %v3758_v57, %v3758_v57 }
 0x531   :  { %v10730_v31 = vld [vmem:[#allocation202_spill] sm:$0xff]  ;;  %6681 = vtanh.f32 %v3814_v55 }
 0x532   :  { %4060 = vmatmul.bf16.vlgmr.msra.gmra.mxu0 %v4051_v53  ;;  %4073 = vmatmul.bf16.vlgmr.msra.gmra.mxu1 %v4051_v53  ;;  %v10734_v55 = vld [vmem:[#allocation206_spill] sm:$0xff] }
 0x533   :  { %4108 = vmatpush.bf16.msrb.mxu0 %v10726_v17  ;;  %4086 = vmatmul.bf16.vlgmr.msra.gmra.mxu2 %v4051_v53  ;;  %v3850_v17 = vand.u32 2147483648, %v8978_v11 }
 0x534   :  { %v6676_v41 = vpop.eup %6675  ;;  %4099 = vmatmul.bf16.vlgmr.msra.gmra.mxu3 %v4051_v53  ;;  %4121 = vmatpush.bf16.msrb.mxu1 %v10728_v43  ;;  %v3829_v53 = vand.u32 2147483647, %v8971_v37  ;;  %v10735_v43 = vld [vmem:[#allocation207_spill] sm:$0xff] }
 0x535   :  { %v6678_v3 = vpop.eup %6677  ;;  %v3821_v16 = vmul.f32 %v6676_v41, %v8971_v37  ;;  %4134 = vmatpush.bf16.msrb.mxu2 %v10729_v35  ;;  %4147 = vmatpush.bf16.msrb.mxu3 %v10730_v31  ;;  %vm3826_vm4 = vweird.f32 %v6676_v41  ;;  %v3848_v35 = vand.u32 2147483647, %v8978_v11  ;;  %v10733_v31 = vld [vmem:[#allocation205_spill] sm:$0xff]  ;;  %v3851_v54 = vor.u32 1.1754944e-38, %v3850_v17  ;;  %v10736_v37 = vld [vmem:[#allocation208_spill] sm:$0xff] }
 0x536   :  { %v3840_v20 = vmul.f32 %v6678_v3, %v8978_v11  ;;  %v6680_v57 = vpop.eup %6679  ;;  %vm3845_vm5 = vweird.f32 %v6678_v3  ;;  %vm3827_vm8 = vmor %vm3825_vm6, %vm3826_vm4  ;;  %vm3830_vm10 = vcmp.eq.f32.partialorder %v3829_v53, 8.507059e+37  ;;  %v10738_v11 = vld [vmem:[#allocation210_spill] sm:$0xff]  ;;  %v10748_v53 = vld [vmem:[#allocation27_spill] sm:$0xff] }
 0x537   :  { %v3822_v13 = vsub.f32 1.0, %v3821_v16  ;;  %4109 = vmatpush.bf16.msrb.mxu0 %v10731_v52  ;;  %v10732_v16 = vld [vmem:[#allocation204_spill] sm:$0xff]  ;;  %vm3846_vm9 = vmor %vm3844_vm7, %vm3845_vm5  ;;  %vm3849_vm11 = vcmp.eq.f32.partialorder %v3848_v35, 8.507059e+37  ;;  %v10745_v35 = vld [vmem:[#allocation214_spill] sm:$0xff] }
 0x538   :  { %v3841_v15 = vsub.f32 1.0, %v3840_v20  ;;  %4122 = vmatpush.bf16.msrb.mxu1 %v10732_v16  ;;  %v9002_v20 = vadd.f32 1.0, %v6680_v57  ;;  %v6682_v16 = vpop.eup %6681  ;;  %v10737_v57 = vld [vmem:[#allocation209_spill] sm:$0xff] }
 0x539   :  { %v3823_v22 = vmul.f32 %v6676_v41, %v3822_v13  ;;  %4135 = vmatpush.bf16.msrb.mxu2 %v10733_v31  ;;  %4148 = vmatpush.bf16.msrb.mxu3 %v10734_v55  ;;  %v3832_v13 = vor.u32 1.1754944e-38, %v3831_v60  ;;  %v10739_v60 = vld [vmem:[#allocation211_spill] sm:$0xff] }
 0x53a   :  { %v3842_v32 = vmul.f32 %v6678_v3, %v3841_v15  ;;  %6683 = vrcp.f32 %v9002_v20  ;;  %vm3864_vm13 = vweird.f32 %v9002_v20 }
 0x53b   :  { %v3824_v52 = vadd.f32 %v6676_v41, %v3823_v22  ;;  %4110 = vmatpush.bf16.msrb.mxu0 %v10735_v43 }
 0x53c   :  { %v3843_v15 = vadd.f32 %v6678_v3, %v3842_v32  ;;  %4123 = vmatpush.bf16.msrb.mxu1 %v10736_v37  ;;  %v10740_v32 = vld [vmem:[#allocation152_spill] sm:$0xff] }
 0x53d   :  { %v3828_v18 = vsel %vm3827_vm8, %v6676_v41, %v3824_v52  ;;  %4136 = vmatpush.bf16.msrb.mxu2 %v10737_v57  ;;  %4149 = vmatpush.bf16.msrb.mxu3 %v10738_v11  ;;  %v10741_v41 = vld [vmem:[#allocation24_spill] sm:$0xff]  ;;  %v10832_v11 = vld [vmem:[#allocation57_spill] sm:$0xff] }
 0x53e   :  { %v3833_v31 = vsel %vm3830_vm10, %v3832_v13, %v3828_v18  ;;  %v3847_v22 = vsel %vm3846_vm9, %v6678_v3, %v3843_v15  ;;  %v10743_v18 = vld [vmem:[#allocation212_spill] sm:$0xff]  ;;  %v10744_v3 = vld [vmem:[#allocation213_spill] sm:$0xff] }
 0x53f   :  { %v3852_v55 = vsel %vm3849_vm11, %v3851_v54, %v3847_v22  ;;  %v3875_v8 = vmul.f32 %v6682_v16, %v3833_v31  ;;  %4111 = vmatpush.bf16.msrb.mxu0 %v10739_v60  ;;  %v10746_v54 = vld [vmem:[#allocation25_spill] sm:$0xff]  ;;  %v10747_v31 = vld [vmem:[#allocation26_spill] sm:$0xff] }
 0x540   :  { %v3874_v17 = vmul.f32 %v3852_v55, %v10740_v32  ;;  %4124 = vmatpush.bf16.msrb.mxu1 %v10743_v18  ;;  %v6684_v16 = vpop.eup %6683  ;;  %v10750_v55 = vld [vmem:[#allocation29_spill] sm:$0xff]  ;;  %v10752_v22 = vld [vmem:[#allocation30_spill] sm:$0xff]  ;;  %v10753_v32 = vld [vmem:[#allocation31_spill] sm:$0xff] }
 0x541   :  { %4137 = vmatpush.bf16.msrb.mxu2 %v10744_v3  ;;  %4150 = vmatpush.bf16.msrb.mxu3 %v10745_v35  ;;  %v3860_v13 = vmul.f32 %v6684_v16, %v9002_v20  ;;  %v10751_v15 = vld [vmem:[#allocation33_spill] sm:$0xff]  ;;  %v10760_v35 = vld [vmem:[#allocation39_spill] sm:$0xff]  ;;  %vm3865_vm12 = vweird.f32 %v6684_v16  ;;  %v10827_v60 = vld [vmem:[#allocation138_spill] sm:$0xff] }
 0x542   :  { %v9014_v52 = vadd.f32 %v3875_v8, %v3874_v17  ;;  %4112 = vmatmul.bf16.vlgmr.msrb.gmra.mxu0 %v8884_v38  ;;  %v10749_v8 = vld [vmem:[#allocation28_spill] sm:$0xff]  ;;  %vm3866_vm14 = vmor %vm3864_vm13, %vm3865_vm12  ;;  %v10772_v3 = vld [vmem:[#allocation51_spill] sm:$0xff] }
 0x543   :  { %4224 = vmatpush.bf16.msra.mxu0 %v10741_v41  ;;  %4125 = vmatmul.bf16.vlgmr.msrb.gmra.mxu1 %v8884_v38  ;;  %v10754_v17 = vld [vmem:[#allocation32_spill] sm:$0xff]  ;;  %v3861_v41 = vsub.f32 1.0, %v3860_v13 }
 0x544   :  { %10742 = vst [vmem:[#allocation153_spill] sm:$0xff] %v9014_v52  ;;  %4237 = vmatpush.bf16.msra.mxu1 %v10746_v54  ;;  %4138 = vmatmul.bf16.vlgmr.msrb.gmra.mxu2 %v8884_v38  ;;  %v10755_v54 = vld [vmem:[#allocation34_spill] sm:$0xff]  ;;  %6685 = vtanh.f32 %v9014_v52 }
 0x545   :  { %4250 = vmatpush.bf16.msra.mxu2 %v10747_v31  ;;  %4263 = vmatpush.bf16.msra.mxu3 %v10748_v53  ;;  %v10756_v31 = vld [vmem:[#allocation35_spill] sm:$0xff]  ;;  %v10758_v53 = vld [vmem:[#allocation37_spill] sm:$0xff] }
 0x546   :  { %4151 = vmatmul.bf16.vlgmr.msrb.gmra.mxu3 %v8884_v38  ;;  %v10757_v38 = vld [vmem:[#allocation36_spill] sm:$0xff] }
 0x547   :  { %4225 = vmatpush.bf16.msra.mxu0 %v10749_v8  ;;  %v3862_v8 = vmul.f32 %v6684_v16, %v3861_v41  ;;  %v3868_v41 = vand.u32 2147483647, %v9002_v20 }
 0x548   :  { %4238 = vmatpush.bf16.msra.mxu1 %v10750_v55  ;;  %v10759_v55 = vld [vmem:[#allocation38_spill] sm:$0xff] }
 0x549   :  { %4251 = vmatpush.bf16.msra.mxu2 %v10751_v15  ;;  %4264 = vmatpush.bf16.msra.mxu3 %v10752_v22  ;;  %v10761_v15 = vld [vmem:[#allocation40_spill] sm:$0xff]  ;;  %v10762_v22 = vld [vmem:[#allocation41_spill] sm:$0xff]  ;;  %v3863_v13 = vadd.f32 %v6684_v16, %v3862_v8  ;;  %v10768_v8 = vld [vmem:[#allocation47_spill] sm:$0xff]  ;;  %vm3869_vm15 = vcmp.eq.f32.partialorder %v3868_v41, 8.507059e+37 }
 0x54a   :  { %v10777_v41 = vld [vmem:[#allocation82_spill] sm:$0xff] }
 0x54b   :  { %4226 = vmatpush.bf16.msra.mxu0 %v10753_v32  ;;  %v10763_v32 = vld [vmem:[#allocation42_spill] sm:$0xff] }
 0x54c   :  { %4239 = vmatpush.bf16.msra.mxu1 %v10754_v17  ;;  %v10764_v17 = vld [vmem:[#allocation43_spill] sm:$0xff] }
 0x54d   :  { %4252 = vmatpush.bf16.msra.mxu2 %v10755_v54  ;;  %4265 = vmatpush.bf16.msra.mxu3 %v10756_v31  ;;  %v3870_v54 = vand.u32 2147483648, %v9002_v20  ;;  %v10766_v31 = vld [vmem:[#allocation45_spill] sm:$0xff]  ;;  %v10771_v20 = vld [vmem:[#allocation50_spill] sm:$0xff] }
 0x54f   :  { %4227 = vmatpush.bf16.msra.mxu0 %v10757_v38  ;;  %v3867_v38 = vsel %vm3866_vm14, %v6684_v16, %v3863_v13  ;;  %v10774_v16 = vld [vmem:[#allocation53_spill] sm:$0xff] }
 0x550   :  { %4240 = vmatpush.bf16.msra.mxu1 %v10758_v53  ;;  %v10767_v53 = vld [vmem:[#allocation46_spill] sm:$0xff] }
 0x551   :  { %4253 = vmatpush.bf16.msra.mxu2 %v10759_v55  ;;  %4266 = vmatpush.bf16.msra.mxu3 %v10760_v35  ;;  %v10765_v35 = vld [vmem:[#allocation44_spill] sm:$0xff]  ;;  %v6686_v55 = vpop.eup %6685 }
 0x553   :  { %4228 = vmatpush.bf16.msra.mxu0 %v10761_v15  ;;  %v3871_v15 = vor.u32 1.1754944e-38, %v3870_v54  ;;  %v10776_v54 = vld [vmem:[#allocation55_spill] sm:$0xff] }
 0x554   :  { %4241 = vmatpush.bf16.msra.mxu1 %v10762_v22 }
 0x555   :  { %4254 = vmatpush.bf16.msra.mxu2 %v10763_v32  ;;  %4267 = vmatpush.bf16.msra.mxu3 %v10764_v17  ;;  %v3872_v22 = vsel %vm3869_vm15, %v3871_v15, %v3867_v38  ;;  %v10769_v32 = vld [vmem:[#allocation48_spill] sm:$0xff]  ;;  %v10770_v17 = vld [vmem:[#allocation49_spill] sm:$0xff]  ;;  %v10778_v38 = vld [vmem:[#allocation83_spill] sm:$0xff] }
 0x556   :  { %v3878_v52 = vmul.f32 %v6686_v55, %v3872_v22  ;;  %v10783_v55 = vld [vmem:[#allocation90_spill] sm:$0xff]  ;;  %v10784_v15 = vld [vmem:[#allocation93_spill] sm:$0xff] }
 0x557   :  { %4229 = vmatpush.bf16.msra.mxu0 %v10765_v35  ;;  %v10773_v35 = vld [vmem:[#allocation52_spill] sm:$0xff]  ;;  %v10785_v22 = vld [vmem:[#allocation94_spill] sm:$0xff] }
 0x558   :  { %4242 = vmatpush.bf16.msra.mxu1 %v10766_v31  ;;  %v9057_v13 = vpack.c.bf16 %v3878_v52, %v3878_v52  ;;  %v10775_v31 = vld [vmem:[#allocation54_spill] sm:$0xff]  ;;  %v10780_v52 = vld [vmem:[#allocation85_spill] sm:$0xff] }
 0x559   :  { %4255 = vmatpush.bf16.msra.mxu2 %v10767_v53  ;;  %4268 = vmatpush.bf16.msra.mxu3 %v10768_v8  ;;  %v10781_v53 = vld [vmem:[#allocation86_spill] sm:$0xff]  ;;  %v10782_v8 = vld [vmem:[#allocation89_spill] sm:$0xff] }
 0x55b   :  { %4230 = vmatpush.bf16.msra.mxu0 %v10769_v32  ;;  %v10786_v32 = vld [vmem:[#allocation95_spill] sm:$0xff] }
 0x55c   :  { %4243 = vmatpush.bf16.msra.mxu1 %v10770_v17  ;;  %v10787_v17 = vld [vmem:[#allocation96_spill] sm:$0xff] }
 0x55d   :  { %4256 = vmatpush.bf16.msra.mxu2 %v10771_v20  ;;  %4269 = vmatpush.bf16.msra.mxu3 %v10772_v3  ;;  %v10779_v3 = vld [vmem:[#allocation84_spill] sm:$0xff]  ;;  %v10788_v20 = vld [vmem:[#allocation97_spill] sm:$0xff] }
 0x55f   :  { %4231 = vmatpush.bf16.msra.mxu0 %v10773_v35  ;;  %v10789_v35 = vld [vmem:[#allocation99_spill] sm:$0xff] }
 0x560   :  { %4244 = vmatpush.bf16.msra.mxu1 %v10774_v16  ;;  %v10790_v16 = vld [vmem:[#allocation101_spill] sm:$0xff] }
 0x561   :  { %4257 = vmatpush.bf16.msra.mxu2 %v10775_v31  ;;  %4270 = vmatpush.bf16.msra.mxu3 %v10776_v54  ;;  %v10791_v31 = vld [vmem:[#allocation102_spill] sm:$0xff]  ;;  %v10792_v54 = vld [vmem:[#allocation103_spill] sm:$0xff] }
 0x562   :  { %4232 = vmatmul.bf16.vlgmr.msra.gmra.mxu0 %v9057_v13 }
 0x563   :  { %4344 = vmatpush.bf16.msrb.mxu0 %v10777_v41  ;;  %4245 = vmatmul.bf16.vlgmr.msra.gmra.mxu1 %v9057_v13 }
 0x564   :  { %4357 = vmatpush.bf16.msrb.mxu1 %v10778_v38  ;;  %4258 = vmatmul.bf16.vlgmr.msra.gmra.mxu2 %v9057_v13  ;;  %v10819_v38 = vld [vmem:[#allocation130_spill] sm:$0xff] }
 0x565   :  { %4271 = vmatmul.bf16.vlgmr.msra.gmra.mxu3 %v9057_v13  ;;  %4370 = vmatpush.bf16.msrb.mxu2 %v10779_v3 }
 0x566   :  { %4383 = vmatpush.bf16.msrb.mxu3 %v10780_v52 }
 0x567   :  { %4345 = vmatpush.bf16.msrb.mxu0 %v10781_v53  ;;  %v10809_v53 = vld [vmem:[#allocation118_spill] sm:$0xff] }
 0x568   :  { %4358 = vmatpush.bf16.msrb.mxu1 %v10782_v8  ;;  %v10793_v8 = vld [vmem:[#allocation104_spill] sm:$0xff] }
 0x569   :  { %4371 = vmatpush.bf16.msrb.mxu2 %v10783_v55  ;;  %v10794_v55 = vld [vmem:[#allocation105_spill] sm:$0xff] }
 0x56a   :  { %4384 = vmatpush.bf16.msrb.mxu3 %v10784_v15  ;;  %v10795_v15 = vld [vmem:[#allocation106_spill] sm:$0xff] }
 0x56b   :  { %4346 = vmatpush.bf16.msrb.mxu0 %v10785_v22  ;;  %v10796_v22 = vld [vmem:[#allocation107_spill] sm:$0xff] }
 0x56c   :  { %4359 = vmatpush.bf16.msrb.mxu1 %v10786_v32  ;;  %v10797_v32 = vld [vmem:[#allocation108_spill] sm:$0xff] }
 0x56d   :  { %4372 = vmatpush.bf16.msrb.mxu2 %v10787_v17  ;;  %v10798_v17 = vld [vmem:[#allocation109_spill] sm:$0xff] }
 0x56e   :  { %4385 = vmatpush.bf16.msrb.mxu3 %v10788_v20  ;;  %v10799_v20 = vld [vmem:[#allocation110_spill] sm:$0xff] }
 0x56f   :  { %4347 = vmatpush.bf16.msrb.mxu0 %v10789_v35  ;;  %v10800_v35 = vld [vmem:[#allocation111_spill] sm:$0xff] }
 0x570   :  { %4360 = vmatpush.bf16.msrb.mxu1 %v10790_v16  ;;  %v10801_v16 = vld [vmem:[#allocation112_spill] sm:$0xff] }
 0x571   :  { %4373 = vmatpush.bf16.msrb.mxu2 %v10791_v31  ;;  %v10802_v31 = vld [vmem:[#allocation113_spill] sm:$0xff] }
 0x572   :  { %4386 = vmatpush.bf16.msrb.mxu3 %v10792_v54  ;;  %v10803_v54 = vld [vmem:[#allocation114_spill] sm:$0xff] }
 0x573   :  { %4348 = vmatpush.bf16.msrb.mxu0 %v10793_v8  ;;  %v10804_v8 = vld [vmem:[#allocation115_spill] sm:$0xff] }
 0x574   :  { %4361 = vmatpush.bf16.msrb.mxu1 %v10794_v55  ;;  %v10805_v55 = vld [vmem:[#allocation116_spill] sm:$0xff] }
 0x575   :  { %4374 = vmatpush.bf16.msrb.mxu2 %v10795_v15  ;;  %v10806_v15 = vld [vmem:[#allocation117_spill] sm:$0xff] }
 0x576   :  { %4387 = vmatpush.bf16.msrb.mxu3 %v10796_v22  ;;  %v10807_v22 = vld [vmem:[#allocation120_spill] sm:$0xff] }
 0x577   :  { %4349 = vmatpush.bf16.msrb.mxu0 %v10797_v32  ;;  %v10808_v32 = vld [vmem:[#allocation121_spill] sm:$0xff] }
 0x578   :  { %4362 = vmatpush.bf16.msrb.mxu1 %v10798_v17 }
 0x579   :  { %4375 = vmatpush.bf16.msrb.mxu2 %v10799_v20 }
 0x57a   :  { %4388 = vmatpush.bf16.msrb.mxu3 %v10800_v35  ;;  %v10810_v35 = vld [vmem:[#allocation119_spill] sm:$0xff] }
 0x57b   :  { %4350 = vmatpush.bf16.msrb.mxu0 %v10801_v16  ;;  %v10811_v16 = vld [vmem:[#allocation122_spill] sm:$0xff] }
 0x57c   :  { %4363 = vmatpush.bf16.msrb.mxu1 %v10802_v31  ;;  %v10812_v31 = vld [vmem:[#allocation123_spill] sm:$0xff] }
 0x57d   :  { %4376 = vmatpush.bf16.msrb.mxu2 %v10803_v54  ;;  %v10813_v54 = vld [vmem:[#allocation124_spill] sm:$0xff] }
 0x57e   :  { %4389 = vmatpush.bf16.msrb.mxu3 %v10804_v8  ;;  %v3889_v17 = vpop.f32.mrf.mxu0  ;;  %v3902_v20 = vpop.f32.mrf.mxu1  ;;  %v10814_v8 = vld [vmem:[#allocation125_spill] sm:$0xff] }
 0x57f   :  { %4351 = vmatpush.bf16.msrb.mxu0 %v10805_v55  ;;  %v10815_v55 = vld [vmem:[#allocation126_spill] sm:$0xff] }
 0x580   :  { %4364 = vmatpush.bf16.msrb.mxu1 %v10806_v15  ;;  %v10816_v15 = vld [vmem:[#allocation127_spill] sm:$0xff] }
 0x581   :  { %4377 = vmatpush.bf16.msrb.mxu2 %v10809_v53 }
 0x582   :  { %4390 = vmatpush.bf16.msrb.mxu3 %v10810_v35 }
 0x583   :  { %4396 = vmatpush.bf16.msra.mxu0 %v10807_v22  ;;  %v10817_v22 = vld [vmem:[#allocation128_spill] sm:$0xff] }
 0x584   :  { %4409 = vmatpush.bf16.msra.mxu1 %v10808_v32  ;;  %v10818_v32 = vld [vmem:[#allocation129_spill] sm:$0xff] }
 0x585   :  { %4422 = vmatpush.bf16.msra.mxu2 %v10811_v16  ;;  %v3915_v52 = vpop.f32.mrf.mxu2  ;;  %v3928_v53 = vpop.f32.mrf.mxu3  ;;  %v10820_v16 = vld [vmem:[#allocation131_spill] sm:$0xff] }
 0x586   :  { %4435 = vmatpush.bf16.msra.mxu3 %v10812_v31  ;;  %v3891_v3 = vpop.f32.mrf.mxu0  ;;  %v3904_v35 = vpop.f32.mrf.mxu1  ;;  %v10821_v31 = vld [vmem:[#allocation132_spill] sm:$0xff] }
 0x587   :  { %4397 = vmatpush.bf16.msra.mxu0 %v10813_v54  ;;  %v10822_v54 = vld [vmem:[#allocation133_spill] sm:$0xff] }
 0x588   :  { %4410 = vmatpush.bf16.msra.mxu1 %v10814_v8  ;;  %v10823_v8 = vld [vmem:[#allocation134_spill] sm:$0xff] }
 0x589   :  { %4423 = vmatpush.bf16.msra.mxu2 %v10815_v55  ;;  %v10824_v55 = vld [vmem:[#allocation135_spill] sm:$0xff] }
 0x58a   :  { %4436 = vmatpush.bf16.msra.mxu3 %v10816_v15  ;;  %v10825_v15 = vld [vmem:[#allocation136_spill] sm:$0xff] }
 0x58b   :  { %4398 = vmatpush.bf16.msra.mxu0 %v10817_v22  ;;  %v10826_v22 = vld [vmem:[#allocation137_spill] sm:$0xff] }
 0x58c   :  { %4411 = vmatpush.bf16.msra.mxu1 %v10818_v32 }
 0x58d   :  { %4424 = vmatpush.bf16.msra.mxu2 %v10819_v38  ;;  %v3917_v32 = vpop.f32.mrf.mxu2  ;;  %v3930_v41 = vpop.f32.mrf.mxu3 }
 0x58e   :  { %4437 = vmatpush.bf16.msra.mxu3 %v10820_v16  ;;  %v3941_v3 = vpop.f32.mrf.mxu0  ;;  %v3954_v35 = vpop.f32.mrf.mxu1  ;;  %v10828_v16 = vld [vmem:[#allocation139_spill] sm:$0xff]  ;;  %v10833_v32 = vld [vmem:[#allocation142_spill] sm:$0xff] }
 0x58f   :  { %4399 = vmatpush.bf16.msra.mxu0 %v10821_v31  ;;  %v3942_v18 = vadd.f32 %v3941_v3, %v3889_v17  ;;  %v3955_v38 = vadd.f32 %v3954_v35, %v3902_v20  ;;  %v10829_v31 = vld [vmem:[#allocation140_spill] sm:$0xff]  ;;  %v10834_v41 = vld [vmem:[#allocation143_spill] sm:$0xff]  ;;  %v10836_v20 = vld [vmem:[#allocation145_spill] sm:$0xff] }
 0x590   :  { %4412 = vmatpush.bf16.msra.mxu1 %v10822_v54  ;;  %v10830_v54 = vld [vmem:[#allocation141_spill] sm:$0xff]  ;;  %v10835_v17 = vld [vmem:[#allocation144_spill] sm:$0xff] }
 0x591   :  { %4425 = vmatpush.bf16.msra.mxu2 %v10823_v8  ;;  %v10831_v8 = vld [vmem:[#allocation56_spill] sm:$0xff] }
 0x592   :  { %4438 = vmatpush.bf16.msra.mxu3 %v10824_v55  ;;  %v3984_v55 = vadd.f32 %v3942_v18, %v10831_v8  ;;  %v10837_v18 = vld [vmem:[#allocation146_spill] sm:$0xff]  ;;  %v10841_v8 = vld [vmem:[#allocation149_spill] sm:$0xff] }
 0x593   :  { %4400 = vmatpush.bf16.msra.mxu0 %v10825_v15  ;;  %v3985_v15 = vadd.f32 %v3955_v38, %v10832_v11  ;;  %v10838_v38 = vld [vmem:[#allocation147_spill] sm:$0xff]  ;;  %v10840_v11 = vld [vmem:[#allocation148_spill] sm:$0xff] }
 0x594   :  { %4413 = vmatpush.bf16.msra.mxu1 %v10826_v22  ;;  %v6157_v57 = vmul.f32 -1.442695, %v3984_v55  ;;  %v10839_v55 = vld [vmem:[#allocation61_spill] sm:$0xff] }
 0x595   :  { %4426 = vmatpush.bf16.msra.mxu2 %v10827_v60  ;;  %v6158_v22 = vmul.f32 -1.442695, %v3985_v15  ;;  %v3967_v3 = vpop.f32.mrf.mxu2  ;;  %v3980_v35 = vpop.f32.mrf.mxu3 }
 0x596   :  { %4439 = vmatpush.bf16.msra.mxu3 %v10828_v16  ;;  %6687 = vpow2.f32 %v6157_v57  ;;  %v3956_v16 = vpop.f32.mrf.mxu1  ;;  %v10843_v57 = vld [vmem:[#allocation151_spill] sm:$0xff] }
 0x597   :  { %4401 = vmatpush.bf16.msra.mxu0 %v10829_v31  ;;  %6689 = vpow2.f32 %v6158_v22  ;;  %v3981_v31 = vadd.f32 %v3980_v35, %v3928_v53 }
 0x598   :  { %4414 = vmatpush.bf16.msra.mxu1 %v10830_v54  ;;  %v3943_v54 = vpop.f32.mrf.mxu0 }
 0x599   :  { %4427 = vmatpush.bf16.msra.mxu2 %v10833_v32  ;;  %v3987_v15 = vadd.f32 %v3981_v31, %v10839_v55 }
 0x59a   :  { %4440 = vmatpush.bf16.msra.mxu3 %v10834_v41 }
 0x59b   :  { %4402 = vmatpush.bf16.msra.mxu0 %v10835_v17  ;;  %v6159_v17 = vmul.f32 -1.442695, %v3987_v15 }
 0x59c   :  { %4415 = vmatpush.bf16.msra.mxu1 %v10836_v20  ;;  %v6688_v41 = vpop.eup %6687  ;;  %v10842_v20 = vld [vmem:[#allocation150_spill] sm:$0xff] }
 0x59d   :  { %4428 = vmatpush.bf16.msra.mxu2 %v10837_v18  ;;  %v6690_v22 = vpop.eup %6689  ;;  %v3991_v53 = vadd.f32 1.0, %v6688_v41  ;;  %6691 = vpow2.f32 %v6159_v17  ;;  %v3969_v54 = vpop.f32.mrf.mxu2  ;;  %v10844_v18 = vld [vmem:[#allocation59_spill] sm:$0xff] }
 0x59e   :  { %4441 = vmatpush.bf16.msra.mxu3 %v10838_v38  ;;  %v4010_v16 = vadd.f32 1.0, %v6690_v22  ;;  %v3982_v35 = vpop.f32.mrf.mxu3  ;;  %v3968_v38 = vadd.f32 %v3967_v3, %v3915_v52 }
 0x59f   :  { %4403 = vmatpush.bf16.msra.mxu0 %v10840_v11  ;;  %6693 = vrcp.f32 %v3991_v53  ;;  %v4003_v37 = vand.u32 2147483648, %v3991_v53  ;;  %v4001_v22 = vand.u32 2147483647, %v3991_v53  ;;  %vm3997_vm2 = vweird.f32 %v3991_v53 }
 0x5a0   :  { %4416 = vmatpush.bf16.msra.mxu1 %v10841_v8  ;;  %6695 = vrcp.f32 %v4010_v16  ;;  %v3986_v8 = vadd.f32 %v3968_v38, %v10844_v18  ;;  %v4022_v41 = vand.u32 2147483648, %v4010_v16  ;;  %v4020_v52 = vand.u32 2147483647, %v4010_v16 }
 0x5a1   :  { %4429 = vmatpush.bf16.msra.mxu2 %v10842_v20  ;;  %vm4016_vm3 = vweird.f32 %v4010_v16  ;;  %v4004_v38 = vor.u32 1.1754944e-38, %v4003_v37  ;;  %vm4002_vm6 = vcmp.eq.f32.partialorder %v4001_v22, 8.507059e+37 }
 0x5a2   :  { %4442 = vmatpush.bf16.msra.mxu3 %v10843_v57  ;;  %vm4021_vm7 = vcmp.eq.f32.partialorder %v4020_v52, 8.507059e+37 }
 0x5a3   :  { %v6692_v31 = vpop.eup %6691 }
 0x5a4   :  { %v4030_v55 = vadd.f32 1.0, %v6692_v31 }
 0x5a5   :  { %v6694_v11 = vpop.eup %6693 }
 0x5a6   :  { %v6696_v15 = vpop.eup %6695  ;;  %v3993_v32 = vmul.f32 %v6694_v11, %v3991_v53  ;;  %6697 = vrcp.f32 %v4030_v55  ;;  %vm3998_vm0 = vweird.f32 %v6694_v11  ;;  %vm4036_vm9 = vweird.f32 %v4030_v55 }
 0x5a7   :  { %v4012_v20 = vmul.f32 %v6696_v15, %v4010_v16  ;;  %6699 = vtanh.f32 %v3986_v8  ;;  %vm4017_vm1 = vweird.f32 %v6696_v15  ;;  %vm3999_vm4 = vmor %vm3997_vm2, %vm3998_vm0 }
 0x5a8   :  { %v3994_v60 = vsub.f32 1.0, %v3993_v32  ;;  %vm4018_vm5 = vmor %vm4016_vm3, %vm4017_vm1  ;;  %v4023_v32 = vor.u32 1.1754944e-38, %v4022_v41  ;;  %v4040_v41 = vand.u32 2147483647, %v4030_v55 }
 0x5a9   :  { %v4013_v57 = vsub.f32 1.0, %v4012_v20 }
 0x5aa   :  { %v3995_v17 = vmul.f32 %v6694_v11, %v3994_v60  ;;  %vm4041_vm11 = vcmp.eq.f32.partialorder %v4040_v41, 8.507059e+37 }
 0x5ab   :  { %v4014_v54 = vmul.f32 %v6696_v15, %v4013_v57 }
 0x5ac   :  { %v6698_v3 = vpop.eup %6697  ;;  %v3996_v35 = vadd.f32 %v6694_v11, %v3995_v17 }
 0x5ad   :  { %v4015_v31 = vadd.f32 %v6696_v15, %v4014_v54  ;;  %v4032_v18 = vmul.f32 %v6698_v3, %v4030_v55  ;;  %v6700_v8 = vpop.eup %6699  ;;  %vm4037_vm8 = vweird.f32 %v6698_v3 }
 0x5ae   :  { %v4000_v20 = vsel %vm3999_vm4, %v6694_v11, %v3996_v35  ;;  %v4042_v11 = vand.u32 2147483648, %v4030_v55  ;;  %vm4038_vm10 = vmor %vm4036_vm9, %vm4037_vm8 }
 0x5af   :  { %v4005_v43 = vsel %vm4002_vm6, %v4004_v38, %v4000_v20  ;;  %v4019_v60 = vsel %vm4018_vm5, %v6696_v15, %v4015_v31  ;;  %v4033_v50 = vsub.f32 1.0, %v4032_v18  ;;  %v4061_v23 = vpop.f32.mrf.mxu0  ;;  %v4074_v36 = vpop.f32.mrf.mxu1 }
 0x5b0   :  { %v4024_v57 = vsel %vm4021_vm7, %v4023_v32, %v4019_v60  ;;  %v4047_v24 = vmul.f32 %v6700_v8, %v4005_v43  ;;  %v4043_v52 = vor.u32 1.1754944e-38, %v4042_v11 }
 0x5b1   :  { %v4046_v53 = vmul.f32 %v4024_v57, %v8879_v2  ;;  %v4034_v16 = vmul.f32 %v6698_v3, %v4033_v50 }
 0x5b3   :  { %v9134_v17 = vadd.f32 %v4047_v24, %v4046_v53  ;;  %v4035_v37 = vadd.f32 %v6698_v3, %v4034_v16 }
 0x5b5   :  { %6701 = vtanh.f32 %v9134_v17  ;;  %v4039_v22 = vsel %vm4038_vm10, %v6698_v3, %v4035_v37 }
 0x5b6   :  { %v9137_v15 = vpop.f32.mrf.mxu2  ;;  %v4044_v50 = vsel %vm4041_vm11, %v4043_v52, %v4039_v22 }
 0x5b7   :  { %v4100_v18 = vpop.f32.mrf.mxu3  ;;  %v4063_v43 = vpop.f32.mrf.mxu0 }
 0x5b8   :  { %v4076_v54 = vpop.f32.mrf.mxu1 }
 0x5bb   :  { %v6702_v2 = vpop.eup %6701 }
 0x5bc   :  { %v4050_v24 = vmul.f32 %v6702_v2, %v4044_v50 }
 0x5be   :  { %v9139_v35 = vpack.c.bf16 %v4050_v24, %v4050_v24  ;;  %v4089_v38 = vpop.f32.mrf.mxu2 }
 0x5bf   :  { %v4102_v31 = vpop.f32.mrf.mxu3  ;;  %v4113_v55 = vpop.f32.mrf.mxu0 }
 0x5c0   :  { %4352 = vmatmul.bf16.vlgmr.msrb.gmra.mxu0 %v9139_v35  ;;  %4365 = vmatmul.bf16.vlgmr.msrb.gmra.mxu1 %v9139_v35  ;;  %v4126_v32 = vpop.f32.mrf.mxu1  ;;  %v4114_v3 = vadd.f32 %v4113_v55, %v4061_v23  ;;  %v10845_v55 = vld [vmem:[#allocation174_spill] sm:$0xff] }
 0x5c1   :  { %4378 = vmatmul.bf16.vlgmr.msrb.gmra.mxu2 %v9139_v35  ;;  %4391 = vmatmul.bf16.vlgmr.msrb.gmra.mxu3 %v9139_v35  ;;  %v4127_v20 = vadd.f32 %v4126_v32, %v4074_v36 }
 0x5c2   :  { %4516 = vmatpush.bf16.msrb.mxu0 %v10279_v42  ;;  %4529 = vmatpush.bf16.msrb.mxu1 %v10280_v10  ;;  %v4156_v8 = vadd.f32 %v4114_v3, %v8168_v21 }
 0x5c3   :  { %4542 = vmatpush.bf16.msrb.mxu2 %v10281_v0  ;;  %4555 = vmatpush.bf16.msrb.mxu3 %v10282_v27  ;;  %v4157_v60 = vadd.f32 %v4127_v20, %v8170_v48  ;;  %v10847_v20 = vld [vmem:[#allocation175_spill] sm:$0xff] }
 0x5c4   :  { %v6160_v57 = vmul.f32 -1.442695, %v4156_v8  ;;  %v10848_v8 = vld [vmem:[#allocation176_spill] sm:$0xff] }
 0x5c5   :  { %v6161_v53 = vmul.f32 -1.442695, %v4157_v60 }
 0x5c6   :  { %4517 = vmatpush.bf16.msrb.mxu0 %v10284_v4  ;;  %4530 = vmatpush.bf16.msrb.mxu1 %v10285_v30  ;;  %6703 = vpow2.f32 %v6160_v57 }
 0x5c7   :  { %4543 = vmatpush.bf16.msrb.mxu2 %v10421_v40  ;;  %4556 = vmatpush.bf16.msrb.mxu3 %v10422_v33  ;;  %v4139_v23 = vpop.f32.mrf.mxu2  ;;  %6705 = vpow2.f32 %v6161_v53  ;;  %v4115_v37 = vpop.f32.mrf.mxu0 }
 0x5c8   :  { %v4128_v11 = vpop.f32.mrf.mxu1  ;;  %v4140_v24 = vadd.f32 %v4139_v23, %v9137_v15 }
 0x5c9   :  { %v4152_v36 = vpop.f32.mrf.mxu3 }
 0x5ca   :  { %v4153_v16 = vadd.f32 %v4152_v36, %v4100_v18  ;;  %4518 = vmatpush.bf16.msrb.mxu0 %v10424_v56  ;;  %4531 = vmatpush.bf16.msrb.mxu1 %v10425_v62  ;;  %v10849_v36 = vld [vmem:[#allocation177_spill] sm:$0xff] }
 0x5cb   :  { %4544 = vmatpush.bf16.msrb.mxu2 %v10426_v26  ;;  %4557 = vmatpush.bf16.msrb.mxu3 %v10559_v49 }
 0x5cc   :  { %v4159_v41 = vadd.f32 %v4153_v16, %v10423_v28  ;;  %v6704_v43 = vpop.eup %6703  ;;  %v10850_v16 = vld [vmem:[#allocation178_spill] sm:$0xff] }
 0x5cd   :  { %v6706_v54 = vpop.eup %6705  ;;  %v9162_v18 = vadd.f32 1.0, %v6704_v43 }
 0x5ce   :  { %v6162_v22 = vmul.f32 -1.442695, %v4159_v41  ;;  %4519 = vmatpush.bf16.msrb.mxu0 %v10560_v58  ;;  %4532 = vmatpush.bf16.msrb.mxu1 %v10561_v44  ;;  %v4182_v52 = vadd.f32 1.0, %v6706_v54  ;;  %v10851_v41 = vld [vmem:[#allocation179_spill] sm:$0xff] }
 0x5cf   :  { %4545 = vmatpush.bf16.msrb.mxu2 %v10562_v47  ;;  %4558 = vmatpush.bf16.msrb.mxu3 %v10563_v39  ;;  %v4141_v2 = vpop.f32.mrf.mxu2  ;;  %v4175_v23 = vand.u32 2147483648, %v9162_v18  ;;  %v4173_v11 = vand.u32 2147483647, %v9162_v18  ;;  %vm4169_vm15 = vweird.f32 %v9162_v18 }
 0x5d0   :  { %6707 = vpow2.f32 %v6162_v22  ;;  %4404 = vmatmul.bf16.vlgmr.msra.gmra.mxu0 %v9057_v13  ;;  %4417 = vmatmul.bf16.vlgmr.msra.gmra.mxu1 %v9057_v13  ;;  %v10852_v22 = vld [vmem:[#allocation180_spill] sm:$0xff]  ;;  %v4194_v43 = vand.u32 2147483648, %v4182_v52  ;;  %v4192_v2 = vand.u32 2147483647, %v4182_v52  ;;  %vm4188_vm14 = vweird.f32 %v4182_v52 }
 0x5d1   :  { %v4154_v50 = vpop.f32.mrf.mxu3  ;;  %6709 = vrcp.f32 %v9162_v18  ;;  %4430 = vmatmul.bf16.vlgmr.msra.gmra.mxu2 %v9057_v13  ;;  %4443 = vmatmul.bf16.vlgmr.msra.gmra.mxu3 %v9057_v13  ;;  %v10846_v13 = vld [vmem:[#allocation66_spill] sm:$0xff]  ;;  %vm4174_vm2 = vcmp.eq.f32.partialorder %v4173_v11, 8.507059e+37 }
 0x5d2   :  { %6711 = vrcp.f32 %v4182_v52  ;;  %4520 = vmatpush.bf16.msrb.mxu0 %v10564_v1  ;;  %4533 = vmatpush.bf16.msrb.mxu1 %v10565_v45  ;;  %v4158_v3 = vadd.f32 %v4140_v24, %v10846_v13  ;;  %v10853_v50 = vld [vmem:[#allocation58_spill] sm:$0xff]  ;;  %v10854_v24 = vld [vmem:[#allocation88_spill] sm:$0xff]  ;;  %vm4193_vm3 = vcmp.eq.f32.partialorder %v4192_v2, 8.507059e+37 }
 0x5d3   :  { %4546 = vmatpush.bf16.msrb.mxu2 %v10566_v59  ;;  %4559 = vmatpush.bf16.msrb.mxu3 %v10704_v61  ;;  %v10858_v2 = vld [vmem:[#allocation98_spill] sm:$0xff] }
 0x5d6   :  { %v6708_v38 = vpop.eup %6707  ;;  %4521 = vmatpush.bf16.msrb.mxu0 %v10706_v46  ;;  %4534 = vmatpush.bf16.msrb.mxu1 %v10845_v55 }
 0x5d7   :  { %v9176_v31 = vadd.f32 1.0, %v6708_v38  ;;  %v6710_v32 = vpop.eup %6709  ;;  %4547 = vmatpush.bf16.msrb.mxu2 %v10847_v20  ;;  %4560 = vmatpush.bf16.msrb.mxu3 %v10848_v8  ;;  %v425_v38 = vadd.f32 %v10854_v24, %v10853_v50  ;;  %v10856_v8 = vld [vmem:[#allocation92_spill] sm:$0xff] }
 0x5d8   :  { %v6712_v60 = vpop.eup %6711  ;;  %v4165_v15 = vmul.f32 %v6710_v32, %v9162_v18  ;;  %vm4170_vm12 = vweird.f32 %v6710_v32  ;;  %v4195_v18 = vor.u32 1.1754944e-38, %v4194_v43  ;;  %v10857_v43 = vld [vmem:[#allocation64_spill] sm:$0xff] }
 0x5d9   :  { %6713 = vrcp.f32 %v9176_v31  ;;  %v4184_v57 = vmul.f32 %v6712_v60, %v4182_v52  ;;  %vm4189_vm13 = vweird.f32 %v6712_v60  ;;  %vm4171_vm0 = vmor %vm4169_vm15, %vm4170_vm12  ;;  %vm4208_vm5 = vweird.f32 %v9176_v31 }
 0x5da   :  { %v4166_v53 = vsub.f32 1.0, %v4165_v15  ;;  %4522 = vmatpush.bf16.msrb.mxu0 %v10849_v36  ;;  %4535 = vmatpush.bf16.msrb.mxu1 %v10850_v16  ;;  %6715 = vtanh.f32 %v4158_v3  ;;  %v10855_v15 = vld [vmem:[#allocation60_spill] sm:$0xff]  ;;  %vm4190_vm1 = vmor %vm4188_vm14, %vm4189_vm13 }
 0x5db   :  { %v4185_v37 = vsub.f32 1.0, %v4184_v57  ;;  %4548 = vmatpush.bf16.msrb.mxu2 %v10851_v41  ;;  %4561 = vmatpush.bf16.msrb.mxu3 %v10852_v22  ;;  %v454_v36 = vadd.f32 %v10856_v8, %v10855_v15  ;;  %v4176_v41 = vor.u32 1.1754944e-38, %v4175_v23 }
 0x5dc   :  { %v4167_v54 = vmul.f32 %v6710_v32, %v4166_v53 }
 0x5dd   :  { %v4186_v20 = vmul.f32 %v6712_v60, %v4185_v37 }
 0x5de   :  { %v4168_v3 = vadd.f32 %v6710_v32, %v4167_v54  ;;  %4523 = vmatpush.bf16.msrb.mxu0 %v10715_v5  ;;  %4536 = vmatpush.bf16.msrb.mxu1 %v7909_v63 }
 0x5df   :  { %v9195_v57 = vpop.eup %6713  ;;  %v4233_v22 = vpop.f32.mrf.mxu0  ;;  %v4187_v53 = vadd.f32 %v6712_v60, %v4186_v20  ;;  %4549 = vmatpush.bf16.msrb.mxu2 %v7913_v19  ;;  %4562 = vmatpush.bf16.msrb.mxu3 %v10307_v34 }
 0x5e0   :  { %v4246_v16 = vpop.f32.mrf.mxu1  ;;  %v4204_v8 = vmul.f32 %v9195_v57, %v9176_v31  ;;  %v4276_v37 = vadd.f32 %v4233_v22, %v425_v38  ;;  %v4172_v52 = vsel %vm4171_vm0, %v6710_v32, %v4168_v3  ;;  %v6716_v23 = vpop.eup %6715  ;;  %v10860_v38 = vld [vmem:[#allocation100_spill] sm:$0xff]  ;;  %vm4209_vm4 = vweird.f32 %v9195_v57 }
 0x5e1   :  { %v4277_v50 = vadd.f32 %v4246_v16, %v454_v36  ;;  %v4177_v54 = vsel %vm4174_vm2, %v4176_v41, %v4172_v52  ;;  %v4191_v20 = vsel %vm4190_vm1, %v6712_v60, %v4187_v53  ;;  %v483_v41 = vadd.f32 %v10858_v2, %v10857_v43  ;;  %v10859_v60 = vld [vmem:[#allocation65_spill] sm:$0xff]  ;;  %vm9231_vm6 = vmor %vm4208_vm5, %vm4209_vm4 }
 0x5e2   :  { %4568 = vmatpush.bf16.msra.mxu0 %v10308_v6  ;;  %v4205_v24 = vsub.f32 1.0, %v4204_v8  ;;  %v6163_v15 = vmul.f32 -1.442695, %v4276_v37  ;;  %4581 = vmatpush.bf16.msra.mxu1 %v10309_v7  ;;  %v4196_v36 = vsel %vm4193_vm3, %v4195_v18, %v4191_v20  ;;  %v4219_v16 = vmul.f32 %v6716_v23, %v4177_v54  ;;  %v10861_v23 = vld [vmem:[#allocation190_spill] sm:$0xff] }
 0x5e3   :  { %4594 = vmatpush.bf16.msra.mxu2 %v10310_v12  ;;  %v6164_v22 = vmul.f32 -1.442695, %v4277_v50  ;;  %4607 = vmatpush.bf16.msra.mxu3 %v10443_v51  ;;  %v4218_v32 = vmul.f32 %v4196_v36, %v8953_v29  ;;  %v512_v3 = vadd.f32 %v10860_v38, %v10859_v60  ;;  %v4214_v20 = vand.u32 2147483648, %v9176_v31 }
 0x5e4   :  { %v4206_v11 = vmul.f32 %v9195_v57, %v4205_v24  ;;  %6717 = vpow2.f32 %v6163_v15  ;;  %v10862_v15 = vld [vmem:[#allocation191_spill] sm:$0xff]  ;;  %v4212_v36 = vand.u32 2147483647, %v9176_v31 }
 0x5e5   :  { %6719 = vpow2.f32 %v6164_v22  ;;  %v9217_v53 = vadd.f32 %v4219_v16, %v4218_v32  ;;  %v10863_v22 = vld [vmem:[#allocation192_spill] sm:$0xff]  ;;  %v10864_v32 = vld [vmem:[#allocation193_spill] sm:$0xff]  ;;  %v4215_v38 = vor.u32 1.1754944e-38, %v4214_v20 }
 0x5e6   :  { %4569 = vmatpush.bf16.msra.mxu0 %v10444_v9  ;;  %4582 = vmatpush.bf16.msra.mxu1 %v10445_v25  ;;  %v4207_v54 = vadd.f32 %v9195_v57, %v4206_v11  ;;  %vm4213_vm7 = vcmp.eq.f32.partialorder %v4212_v36, 8.507059e+37  ;;  %v10872_v11 = vld [vmem:[#allocation199_spill] sm:$0xff]  ;;  %v10873_v36 = vld [vmem:[#allocation200_spill] sm:$0xff] }
 0x5e7   :  { %v4259_v8 = vpop.f32.mrf.mxu2  ;;  %4595 = vmatpush.bf16.msra.mxu2 %v10446_v14  ;;  %v4235_v18 = vpop.f32.mrf.mxu0  ;;  %4608 = vmatpush.bf16.msra.mxu3 %v10861_v23  ;;  %6721 = vtanh.f32 %v9217_v53  ;;  %v10885_v23 = vld [vmem:[#allocation212_spill] sm:$0xff] }
 0x5e8   :  { %v4272_v37 = vpop.f32.mrf.mxu3  ;;  %v4278_v29 = vadd.f32 %v4259_v8, %v483_v41  ;;  %v4248_v52 = vpop.f32.mrf.mxu1  ;;  %v10867_v41 = vld [vmem:[#allocation194_spill] sm:$0xff]  ;;  %v4211_v60 = vsel %vm9231_vm6, %v9195_v57, %v4207_v54  ;;  %v10869_v18 = vld [vmem:[#allocation196_spill] sm:$0xff] }
 0x5e9   :  { %v4279_v50 = vadd.f32 %v4272_v37, %v512_v3  ;;  %v10868_v3 = vld [vmem:[#allocation195_spill] sm:$0xff]  ;;  %v10870_v52 = vld [vmem:[#allocation197_spill] sm:$0xff] }
 0x5ea   :  { %4570 = vmatpush.bf16.msra.mxu0 %v10862_v15  ;;  %v6718_v16 = vpop.eup %6717  ;;  %4583 = vmatpush.bf16.msra.mxu1 %v10863_v22  ;;  %v10883_v15 = vld [vmem:[#allocation210_spill] sm:$0xff] }
 0x5eb   :  { %v6165_v24 = vmul.f32 -1.442695, %v4279_v50  ;;  %4596 = vmatpush.bf16.msra.mxu2 %v10864_v32  ;;  %v6720_v43 = vpop.eup %6719  ;;  %v9235_v2 = vadd.f32 1.0, %v6718_v16  ;;  %4609 = vmatpush.bf16.msra.mxu3 %v10867_v41  ;;  %v10871_v16 = vld [vmem:[#allocation198_spill] sm:$0xff] }
 0x5ec   :  { %v9241_v31 = vadd.f32 1.0, %v6720_v43 }
 0x5ed   :  { %6723 = vpow2.f32 %v6165_v24  ;;  %v6722_v8 = vpop.eup %6721  ;;  %v4216_v24 = vsel %vm4213_vm7, %v4215_v38, %v4211_v60  ;;  %v10875_v38 = vld [vmem:[#allocation202_spill] sm:$0xff]  ;;  %vm4289_vm10 = vweird.f32 %v9235_v2 }
 0x5ee   :  { %6725 = vrcp.f32 %v9235_v2  ;;  %4571 = vmatpush.bf16.msra.mxu0 %v10868_v3  ;;  %4584 = vmatpush.bf16.msra.mxu1 %v10869_v18  ;;  %v4222_v57 = vmul.f32 %v6722_v8, %v4216_v24  ;;  %v10874_v3 = vld [vmem:[#allocation201_spill] sm:$0xff]  ;;  %v10876_v8 = vld [vmem:[#allocation203_spill] sm:$0xff]  ;;  %vm4308_vm11 = vweird.f32 %v9241_v31 }
 0x5ef   :  { %6727 = vrcp.f32 %v9241_v31  ;;  %v4261_v37 = vpop.f32.mrf.mxu2  ;;  %4597 = vmatpush.bf16.msra.mxu2 %v10870_v52  ;;  %4610 = vmatpush.bf16.msra.mxu3 %v10871_v16 }
 0x5f0   :  { %v4274_v50 = vpop.f32.mrf.mxu3  ;;  %v4515_v20 = vpack.c.bf16 %v4222_v57, %v4222_v57  ;;  %v10877_v57 = vld [vmem:[#allocation204_spill] sm:$0xff] }
 0x5f2   :  { %4572 = vmatpush.bf16.msra.mxu0 %v10872_v11  ;;  %4585 = vmatpush.bf16.msra.mxu1 %v10873_v36  ;;  %v4295_v36 = vand.u32 2147483648, %v9235_v2  ;;  %v4314_v11 = vand.u32 2147483648, %v9241_v31 }
 0x5f3   :  { %v6724_v54 = vpop.eup %6723  ;;  %4598 = vmatpush.bf16.msra.mxu2 %v10874_v3  ;;  %4524 = vmatmul.bf16.vlgmr.msrb.gmra.mxu0 %v4515_v20 }
 0x5f4   :  { %v9250_v43 = vadd.f32 1.0, %v6724_v54  ;;  %v6726_v37 = vpop.eup %6725  ;;  %4537 = vmatmul.bf16.vlgmr.msrb.gmra.mxu1 %v4515_v20  ;;  %4550 = vmatmul.bf16.vlgmr.msrb.gmra.mxu2 %v4515_v20  ;;  %v10878_v54 = vld [vmem:[#allocation205_spill] sm:$0xff]  ;;  %v4315_v32 = vor.u32 1.1754944e-38, %v4314_v11 }
 0x5f5   :  { %v6728_v50 = vpop.eup %6727  ;;  %v4285_v52 = vmul.f32 %v6726_v37, %v9235_v2  ;;  %4563 = vmatmul.bf16.vlgmr.msrb.gmra.mxu3 %v4515_v20  ;;  %vm4290_vm8 = vweird.f32 %v6726_v37  ;;  %v4293_v20 = vand.u32 2147483647, %v9235_v2 }
 0x5f6   :  { %6729 = vrcp.f32 %v9250_v43  ;;  %v4304_v60 = vmul.f32 %v6728_v50, %v9241_v31  ;;  %4611 = vmatpush.bf16.msra.mxu3 %v10875_v38  ;;  %4573 = vmatpush.bf16.msra.mxu0 %v10876_v8  ;;  %vm4309_vm9 = vweird.f32 %v6728_v50  ;;  %v4312_v38 = vand.u32 2147483647, %v9241_v31  ;;  %v10879_v8 = vld [vmem:[#allocation206_spill] sm:$0xff]  ;;  %vm4291_vm12 = vmor %vm4289_vm10, %vm4290_vm8 }
 0x5f7   :  { %v4286_v24 = vsub.f32 1.0, %v4285_v52  ;;  %4586 = vmatpush.bf16.msra.mxu1 %v10877_v57  ;;  %4599 = vmatpush.bf16.msra.mxu2 %v10878_v54  ;;  %6731 = vtanh.f32 %v4278_v29  ;;  %v10880_v52 = vld [vmem:[#allocation207_spill] sm:$0xff]  ;;  %v10882_v29 = vld [vmem:[#allocation209_spill] sm:$0xff]  ;;  %vm4310_vm13 = vmor %vm4308_vm11, %vm4309_vm9  ;;  %vm4294_vm14 = vcmp.eq.f32.partialorder %v4293_v20, 8.507059e+37  ;;  %vm4328_vm1 = vweird.f32 %v9250_v43 }
 0x5f8   :  { %v4305_v3 = vsub.f32 1.0, %v4304_v60  ;;  %v10881_v60 = vld [vmem:[#allocation208_spill] sm:$0xff]  ;;  %vm4313_vm15 = vcmp.eq.f32.partialorder %v4312_v38, 8.507059e+37  ;;  %v10891_v38 = vld [vmem:[#allocation214_spill] sm:$0xff]  ;;  %v4332_v20 = vand.u32 2147483647, %v9250_v43 }
 0x5f9   :  { %v4287_v16 = vmul.f32 %v6726_v37, %v4286_v24  ;;  %v4296_v24 = vor.u32 1.1754944e-38, %v4295_v36  ;;  %v10887_v36 = vld [vmem:[#allocation153_spill] sm:$0xff] }
 0x5fa   :  { %v4306_v18 = vmul.f32 %v6728_v50, %v4305_v3  ;;  %4612 = vmatpush.bf16.msra.mxu3 %v10879_v8  ;;  %4574 = vmatpush.bf16.msra.mxu0 %v10880_v52  ;;  %vm4333_vm3 = vcmp.eq.f32.partialorder %v4332_v20, 8.507059e+37  ;;  %v10908_v20 = vld [vmem:[#allocation107_spill] sm:$0xff] }
 0x5fb   :  { %v4288_v54 = vadd.f32 %v6726_v37, %v4287_v16  ;;  %4587 = vmatpush.bf16.msra.mxu1 %v10881_v60  ;;  %4600 = vmatpush.bf16.msra.mxu2 %v10882_v29  ;;  %v10884_v60 = vld [vmem:[#allocation211_spill] sm:$0xff] }
 0x5fc   :  { %v6730_v57 = vpop.eup %6729  ;;  %v4307_v3 = vadd.f32 %v6728_v50, %v4306_v18  ;;  %v10886_v18 = vld [vmem:[#allocation213_spill] sm:$0xff] }
 0x5fd   :  { %v4324_v41 = vmul.f32 %v6730_v57, %v9250_v43  ;;  %v4292_v8 = vsel %vm4291_vm12, %v6726_v37, %v4288_v54  ;;  %v6732_v52 = vpop.eup %6731  ;;  %v10888_v37 = vld [vmem:[#allocation82_spill] sm:$0xff]  ;;  %v10889_v54 = vld [vmem:[#allocation83_spill] sm:$0xff]  ;;  %vm4329_vm0 = vweird.f32 %v6730_v57 }
 0x5fe   :  { %v4297_v22 = vsel %vm4294_vm14, %v4296_v24, %v4292_v8  ;;  %v4311_v16 = vsel %vm4310_vm13, %v6728_v50, %v4307_v3  ;;  %4613 = vmatpush.bf16.msra.mxu3 %v10883_v15  ;;  %4575 = vmatpush.bf16.msra.mxu0 %v10884_v60  ;;  %v10890_v50 = vld [vmem:[#allocation84_spill] sm:$0xff]  ;;  %v10892_v8 = vld [vmem:[#allocation85_spill] sm:$0xff]  ;;  %vm4330_vm2 = vmor %vm4328_vm1, %vm4329_vm0 }
 0x5ff   :  { %v4325_v2 = vsub.f32 1.0, %v4324_v41  ;;  %v4316_v29 = vsel %vm4313_vm15, %v4315_v32, %v4311_v16  ;;  %v4339_v31 = vmul.f32 %v6732_v52, %v4297_v22  ;;  %4588 = vmatpush.bf16.msra.mxu1 %v10885_v23  ;;  %4601 = vmatpush.bf16.msra.mxu2 %v10886_v18  ;;  %v4334_v32 = vand.u32 2147483648, %v9250_v43  ;;  %v10894_v52 = vld [vmem:[#allocation89_spill] sm:$0xff]  ;;  %v10898_v43 = vld [vmem:[#allocation95_spill] sm:$0xff] }
 0x600   :  { %v4338_v14 = vmul.f32 %v4316_v29, %v10887_v36  ;;  %v10895_v29 = vld [vmem:[#allocation90_spill] sm:$0xff]  ;;  %v10896_v24 = vld [vmem:[#allocation93_spill] sm:$0xff] }
 0x601   :  { %v4326_v11 = vmul.f32 %v6730_v57, %v4325_v2  ;;  %v4335_v16 = vor.u32 1.1754944e-38, %v4334_v32  ;;  %v10907_v32 = vld [vmem:[#allocation106_spill] sm:$0xff] }
 0x602   :  { %4689 = vmatpush.bf16.msrb.mxu0 %v10888_v37  ;;  %v4340_v41 = vadd.f32 %v4339_v31, %v4338_v14  ;;  %4614 = vmatpush.bf16.msra.mxu3 %v10891_v38  ;;  %v10893_v14 = vld [vmem:[#allocation86_spill] sm:$0xff] }
 0x603   :  { %4702 = vmatpush.bf16.msrb.mxu1 %v10889_v54  ;;  %4715 = vmatpush.bf16.msrb.mxu2 %v10890_v50  ;;  %v4327_v22 = vadd.f32 %v6730_v57, %v4326_v11  ;;  %v10897_v31 = vld [vmem:[#allocation94_spill] sm:$0xff]  ;;  %v10899_v11 = vld [vmem:[#allocation96_spill] sm:$0xff]  ;;  %v10901_v54 = vld [vmem:[#allocation99_spill] sm:$0xff] }
 0x604   :  { %6733 = vtanh.f32 %v4340_v41  ;;  %4576 = vmatmul.bf16.vlgmr.msra.gmra.mxu0 %v9139_v35  ;;  %4589 = vmatmul.bf16.vlgmr.msra.gmra.mxu1 %v9139_v35  ;;  %v10902_v50 = vld [vmem:[#allocation101_spill] sm:$0xff]  ;;  %v10903_v41 = vld [vmem:[#allocation102_spill] sm:$0xff] }
 0x605   :  { %4602 = vmatmul.bf16.vlgmr.msra.gmra.mxu2 %v9139_v35  ;;  %4615 = vmatmul.bf16.vlgmr.msra.gmra.mxu3 %v9139_v35  ;;  %v4331_v3 = vsel %vm4330_vm2, %v6730_v57, %v4327_v22  ;;  %v10900_v35 = vld [vmem:[#allocation97_spill] sm:$0xff]  ;;  %v10904_v57 = vld [vmem:[#allocation103_spill] sm:$0xff] }
 0x606   :  { %4728 = vmatpush.bf16.msrb.mxu3 %v10892_v8  ;;  %4690 = vmatpush.bf16.msrb.mxu0 %v10893_v14  ;;  %v4336_v36 = vsel %vm4333_vm3, %v4335_v16, %v4331_v3  ;;  %v10905_v8 = vld [vmem:[#allocation104_spill] sm:$0xff]  ;;  %v10906_v22 = vld [vmem:[#allocation105_spill] sm:$0xff] }
 0x607   :  { %4703 = vmatpush.bf16.msrb.mxu1 %v10894_v52  ;;  %4716 = vmatpush.bf16.msrb.mxu2 %v10895_v29  ;;  %v10909_v14 = vld [vmem:[#allocation108_spill] sm:$0xff]  ;;  %v10910_v52 = vld [vmem:[#allocation109_spill] sm:$0xff]  ;;  %v10911_v29 = vld [vmem:[#allocation110_spill] sm:$0xff] }
 0x608   :  { %v10913_v3 = vld [vmem:[#allocation112_spill] sm:$0xff]  ;;  %v10914_v16 = vld [vmem:[#allocation113_spill] sm:$0xff] }
 0x60a   :  { %4729 = vmatpush.bf16.msrb.mxu3 %v10896_v24  ;;  %v6734_v2 = vpop.eup %6733  ;;  %4691 = vmatpush.bf16.msrb.mxu0 %v10897_v31  ;;  %v10912_v24 = vld [vmem:[#allocation111_spill] sm:$0xff] }
 0x60b   :  { %4704 = vmatpush.bf16.msrb.mxu1 %v10898_v43  ;;  %4717 = vmatpush.bf16.msrb.mxu2 %v10899_v11  ;;  %v9297_v37 = vmul.f32 %v6734_v2, %v4336_v36  ;;  %v10915_v2 = vld [vmem:[#allocation114_spill] sm:$0xff]  ;;  %v10916_v31 = vld [vmem:[#allocation115_spill] sm:$0xff]  ;;  %v10917_v43 = vld [vmem:[#allocation116_spill] sm:$0xff] }
 0x60c   :  { %v10918_v36 = vld [vmem:[#allocation117_spill] sm:$0xff]  ;;  %v10919_v11 = vld [vmem:[#allocation118_spill] sm:$0xff] }
 0x60e   :  { %4730 = vmatpush.bf16.msrb.mxu3 %v10900_v35  ;;  %4692 = vmatpush.bf16.msrb.mxu0 %v10901_v54  ;;  %v10920_v35 = vld [vmem:[#allocation119_spill] sm:$0xff]  ;;  %v10921_v54 = vld [vmem:[#allocation120_spill] sm:$0xff] }
 0x60f   :  { %4705 = vmatpush.bf16.msrb.mxu1 %v10902_v50  ;;  %4718 = vmatpush.bf16.msrb.mxu2 %v10903_v41  ;;  %v10922_v50 = vld [vmem:[#allocation121_spill] sm:$0xff]  ;;  %v10923_v41 = vld [vmem:[#allocation122_spill] sm:$0xff] }
 0x612   :  { %4731 = vmatpush.bf16.msrb.mxu3 %v10904_v57  ;;  %4693 = vmatpush.bf16.msrb.mxu0 %v10905_v8  ;;  %v10924_v57 = vld [vmem:[#allocation123_spill] sm:$0xff]  ;;  %v10925_v8 = vld [vmem:[#allocation124_spill] sm:$0xff] }
 0x613   :  { %4706 = vmatpush.bf16.msrb.mxu1 %v10906_v22  ;;  %4719 = vmatpush.bf16.msrb.mxu2 %v10907_v32  ;;  %v10926_v22 = vld [vmem:[#allocation125_spill] sm:$0xff]  ;;  %v10927_v32 = vld [vmem:[#allocation126_spill] sm:$0xff] }
 0x616   :  { %4732 = vmatpush.bf16.msrb.mxu3 %v10908_v20  ;;  %4694 = vmatpush.bf16.msrb.mxu0 %v10909_v14  ;;  %v10928_v20 = vld [vmem:[#allocation127_spill] sm:$0xff]  ;;  %v10929_v14 = vld [vmem:[#allocation128_spill] sm:$0xff] }
 0x617   :  { %4707 = vmatpush.bf16.msrb.mxu1 %v10910_v52  ;;  %4720 = vmatpush.bf16.msrb.mxu2 %v10911_v29  ;;  %v10930_v52 = vld [vmem:[#allocation129_spill] sm:$0xff]  ;;  %v10931_v29 = vld [vmem:[#allocation130_spill] sm:$0xff] }
 0x61a   :  { %4733 = vmatpush.bf16.msrb.mxu3 %v10912_v24  ;;  %4695 = vmatpush.bf16.msrb.mxu0 %v10913_v3  ;;  %v10932_v24 = vld [vmem:[#allocation131_spill] sm:$0xff]  ;;  %v10933_v3 = vld [vmem:[#allocation132_spill] sm:$0xff] }
 0x61b   :  { %4708 = vmatpush.bf16.msrb.mxu1 %v10914_v16  ;;  %4721 = vmatpush.bf16.msrb.mxu2 %v10915_v2  ;;  %v10934_v16 = vld [vmem:[#allocation133_spill] sm:$0xff]  ;;  %v10935_v2 = vld [vmem:[#allocation134_spill] sm:$0xff] }
 0x61e   :  { %4734 = vmatpush.bf16.msrb.mxu3 %v10916_v31  ;;  %4696 = vmatpush.bf16.msrb.mxu0 %v10917_v43  ;;  %v10936_v31 = vld [vmem:[#allocation135_spill] sm:$0xff]  ;;  %v10937_v43 = vld [vmem:[#allocation136_spill] sm:$0xff] }
 0x61f   :  { %4709 = vmatpush.bf16.msrb.mxu1 %v10918_v36  ;;  %4722 = vmatpush.bf16.msrb.mxu2 %v10919_v11  ;;  %v10938_v36 = vld [vmem:[#allocation137_spill] sm:$0xff]  ;;  %v10939_v11 = vld [vmem:[#allocation138_spill] sm:$0xff] }
 0x622   :  { %4735 = vmatpush.bf16.msrb.mxu3 %v10920_v35  ;;  %4741 = vmatpush.bf16.msra.mxu0 %v10921_v54  ;;  %v10940_v35 = vld [vmem:[#allocation139_spill] sm:$0xff]  ;;  %v10941_v54 = vld [vmem:[#allocation140_spill] sm:$0xff] }
 0x623   :  { %4754 = vmatpush.bf16.msra.mxu1 %v10922_v50  ;;  %4767 = vmatpush.bf16.msra.mxu2 %v10923_v41  ;;  %v10942_v50 = vld [vmem:[#allocation141_spill] sm:$0xff]  ;;  %v10943_v41 = vld [vmem:[#allocation142_spill] sm:$0xff] }
 0x626   :  { %4780 = vmatpush.bf16.msra.mxu3 %v10924_v57  ;;  %4742 = vmatpush.bf16.msra.mxu0 %v10925_v8  ;;  %v10944_v57 = vld [vmem:[#allocation143_spill] sm:$0xff]  ;;  %v10945_v8 = vld [vmem:[#allocation144_spill] sm:$0xff] }
 0x627   :  { %4755 = vmatpush.bf16.msra.mxu1 %v10926_v22  ;;  %4768 = vmatpush.bf16.msra.mxu2 %v10927_v32  ;;  %v10946_v22 = vld [vmem:[#allocation145_spill] sm:$0xff]  ;;  %v10947_v32 = vld [vmem:[#allocation146_spill] sm:$0xff] }
 0x62a   :  { %4781 = vmatpush.bf16.msra.mxu3 %v10928_v20  ;;  %4743 = vmatpush.bf16.msra.mxu0 %v10929_v14  ;;  %v10948_v20 = vld [vmem:[#allocation147_spill] sm:$0xff]  ;;  %v10949_v14 = vld [vmem:[#allocation148_spill] sm:$0xff] }
 0x62b   :  { %4756 = vmatpush.bf16.msra.mxu1 %v10930_v52  ;;  %4769 = vmatpush.bf16.msra.mxu2 %v10931_v29  ;;  %v10950_v52 = vld [vmem:[#allocation149_spill] sm:$0xff]  ;;  %v10951_v29 = vld [vmem:[#allocation150_spill] sm:$0xff] }
 0x62e   :  { %4782 = vmatpush.bf16.msra.mxu3 %v10932_v24  ;;  %4744 = vmatpush.bf16.msra.mxu0 %v10933_v3  ;;  %v10952_v24 = vld [vmem:[#allocation151_spill] sm:$0xff] }
 0x62f   :  { %4757 = vmatpush.bf16.msra.mxu1 %v10934_v16  ;;  %4770 = vmatpush.bf16.msra.mxu2 %v10935_v2 }
 0x632   :  { %4783 = vmatpush.bf16.msra.mxu3 %v10936_v31  ;;  %4745 = vmatpush.bf16.msra.mxu0 %v10937_v43 }
 0x633   :  { %4758 = vmatpush.bf16.msra.mxu1 %v10938_v36  ;;  %4771 = vmatpush.bf16.msra.mxu2 %v10939_v11 }
 0x636   :  { %4784 = vmatpush.bf16.msra.mxu3 %v10940_v35  ;;  %4746 = vmatpush.bf16.msra.mxu0 %v10941_v54 }
 0x637   :  { %4759 = vmatpush.bf16.msra.mxu1 %v10942_v50  ;;  %4772 = vmatpush.bf16.msra.mxu2 %v10943_v41 }
 0x63a   :  { %4785 = vmatpush.bf16.msra.mxu3 %v10944_v57  ;;  %4747 = vmatpush.bf16.msra.mxu0 %v10945_v8  ;;  %v10953_v8 = vld [vmem:[#allocation56_spill] sm:$0xff] }
 0x63b   :  { %4760 = vmatpush.bf16.msra.mxu1 %v10946_v22  ;;  %4773 = vmatpush.bf16.msra.mxu2 %v10947_v32  ;;  %v10954_v32 = vld [vmem:[#allocation57_spill] sm:$0xff] }
 0x63d   :  { %v4353_v3 = vpop.f32.mrf.mxu0  ;;  %v4366_v16 = vpop.f32.mrf.mxu1 }
 0x63e   :  { %4786 = vmatpush.bf16.msra.mxu3 %v10948_v20  ;;  %4748 = vmatpush.bf16.msra.mxu0 %v10949_v14 }
 0x63f   :  { %4761 = vmatpush.bf16.msra.mxu1 %v10950_v52  ;;  %4774 = vmatpush.bf16.msra.mxu2 %v10951_v29 }
 0x642   :  { %4787 = vmatpush.bf16.msra.mxu3 %v10952_v24 }
 0x644   :  { %v4379_v2 = vpop.f32.mrf.mxu2  ;;  %v4392_v31 = vpop.f32.mrf.mxu3 }
 0x645   :  { %v4355_v43 = vpop.f32.mrf.mxu0  ;;  %v4368_v36 = vpop.f32.mrf.mxu1 }
 0x646   :  { %v10955_v36 = vld [vmem:[#allocation61_spill] sm:$0xff] }
 0x64c   :  { %v4381_v11 = vpop.f32.mrf.mxu2  ;;  %v4394_v35 = vpop.f32.mrf.mxu3 }
 0x64d   :  { %v4405_v54 = vpop.f32.mrf.mxu0  ;;  %v4418_v50 = vpop.f32.mrf.mxu1 }
 0x64e   :  { %v4406_v41 = vadd.f32 %v4405_v54, %v4353_v3  ;;  %v4419_v57 = vadd.f32 %v4418_v50, %v4366_v16 }
 0x650   :  { %v4448_v22 = vadd.f32 %v4406_v41, %v10953_v8  ;;  %v4449_v20 = vadd.f32 %v4419_v57, %v10954_v32 }
 0x652   :  { %v6166_v14 = vmul.f32 -1.442695, %v4448_v22  ;;  %v6167_v52 = vmul.f32 -1.442695, %v4449_v20 }
 0x654   :  { %6735 = vpow2.f32 %v6166_v14  ;;  %v4431_v29 = vpop.f32.mrf.mxu2  ;;  %v4444_v24 = vpop.f32.mrf.mxu3  ;;  %v10956_v14 = vld [vmem:[#allocation59_spill] sm:$0xff] }
 0x655   :  { %6737 = vpow2.f32 %v6167_v52  ;;  %v4445_v38 = vadd.f32 %v4444_v24, %v4392_v31  ;;  %v4407_v18 = vpop.f32.mrf.mxu0  ;;  %v4420_v43 = vpop.f32.mrf.mxu1  ;;  %v4432_v41 = vadd.f32 %v4431_v29, %v4379_v2 }
 0x657   :  { %v4451_v11 = vadd.f32 %v4445_v38, %v10955_v36  ;;  %v4450_v31 = vadd.f32 %v4432_v41, %v10956_v14 }
 0x659   :  { %v6168_v35 = vmul.f32 -1.442695, %v4451_v11 }
 0x65a   :  { %v6736_v23 = vpop.eup %6735 }
 0x65b   :  { %v6738_v60 = vpop.eup %6737  ;;  %v4455_v3 = vadd.f32 1.0, %v6736_v23  ;;  %6739 = vpow2.f32 %v6168_v35 }
 0x65c   :  { %v4474_v16 = vadd.f32 1.0, %v6738_v60  ;;  %v4433_v54 = vpop.f32.mrf.mxu2  ;;  %v4446_v50 = vpop.f32.mrf.mxu3 }
 0x65d   :  { %6741 = vrcp.f32 %v4455_v3  ;;  %v4467_v11 = vand.u32 2147483648, %v4455_v3  ;;  %v4465_v35 = vand.u32 2147483647, %v4455_v3  ;;  %vm4461_vm6 = vweird.f32 %v4455_v3 }
 0x65e   :  { %6743 = vrcp.f32 %v4474_v16  ;;  %v4486_v23 = vand.u32 2147483648, %v4474_v16  ;;  %v4484_v2 = vand.u32 2147483647, %v4474_v16  ;;  %vm4480_vm7 = vweird.f32 %v4474_v16 }
 0x65f   :  { %v4468_v41 = vor.u32 1.1754944e-38, %v4467_v11  ;;  %vm4466_vm10 = vcmp.eq.f32.partialorder %v4465_v35, 8.507059e+37 }
 0x660   :  { %vm4485_vm11 = vcmp.eq.f32.partialorder %v4484_v2, 8.507059e+37 }
 0x661   :  { %v6740_v57 = vpop.eup %6739 }
 0x662   :  { %v4494_v22 = vadd.f32 1.0, %v6740_v57 }
 0x663   :  { %v6742_v20 = vpop.eup %6741 }
 0x664   :  { %v6744_v18 = vpop.eup %6743  ;;  %v4457_v52 = vmul.f32 %v6742_v20, %v4455_v3  ;;  %6745 = vrcp.f32 %v4494_v22  ;;  %vm4462_vm4 = vweird.f32 %v6742_v20  ;;  %vm4500_vm13 = vweird.f32 %v4494_v22 }
 0x665   :  { %v4476_v38 = vmul.f32 %v6744_v18, %v4474_v16  ;;  %6747 = vtanh.f32 %v4450_v31  ;;  %vm4481_vm5 = vweird.f32 %v6744_v18  ;;  %vm4463_vm8 = vmor %vm4461_vm6, %vm4462_vm4 }
 0x666   :  { %v4458_v24 = vsub.f32 1.0, %v4457_v52  ;;  %vm4482_vm9 = vmor %vm4480_vm7, %vm4481_vm5  ;;  %v4487_v52 = vor.u32 1.1754944e-38, %v4486_v23  ;;  %v4504_v23 = vand.u32 2147483647, %v4494_v22 }
 0x667   :  { %v4477_v43 = vsub.f32 1.0, %v4476_v38 }
 0x668   :  { %v4459_v60 = vmul.f32 %v6742_v20, %v4458_v24  ;;  %vm4505_vm15 = vcmp.eq.f32.partialorder %v4504_v23, 8.507059e+37 }
 0x669   :  { %v4478_v54 = vmul.f32 %v6744_v18, %v4477_v43 }
 0x66a   :  { %v6746_v29 = vpop.eup %6745  ;;  %v4460_v50 = vadd.f32 %v6742_v20, %v4459_v60 }
 0x66b   :  { %v4479_v57 = vadd.f32 %v6744_v18, %v4478_v54  ;;  %v4496_v14 = vmul.f32 %v6746_v29, %v4494_v22  ;;  %v6748_v31 = vpop.eup %6747  ;;  %vm4501_vm12 = vweird.f32 %v6746_v29 }
 0x66c   :  { %v4464_v38 = vsel %vm4463_vm8, %v6742_v20, %v4460_v50  ;;  %v4506_v20 = vand.u32 2147483648, %v4494_v22  ;;  %vm4502_vm14 = vmor %vm4500_vm13, %vm4501_vm12 }
 0x66d   :  { %v4469_v36 = vsel %vm4466_vm10, %v4468_v41, %v4464_v38  ;;  %v4483_v24 = vsel %vm4482_vm9, %v6744_v18, %v4479_v57  ;;  %v4497_v32 = vsub.f32 1.0, %v4496_v14 }
 0x66e   :  { %v4488_v43 = vsel %vm4485_vm11, %v4487_v52, %v4483_v24  ;;  %v4511_v8 = vmul.f32 %v6748_v31, %v4469_v36  ;;  %v4507_v36 = vor.u32 1.1754944e-38, %v4506_v20 }
 0x66f   :  { %v4510_v15 = vmul.f32 %v4488_v43, %v9134_v17  ;;  %v4498_v60 = vmul.f32 %v6746_v29, %v4497_v32 }
 0x670   :  { %v4525_v3 = vpop.f32.mrf.mxu0 }
 0x671   :  { %v4538_v16 = vpop.f32.mrf.mxu1  ;;  %v9356_v25 = vadd.f32 %v4511_v8, %v4510_v15  ;;  %v4499_v11 = vadd.f32 %v6746_v29, %v4498_v60 }
 0x673   :  { %10957 = vst [vmem:[#allocation154_spill] sm:$0xff] %v9356_v25  ;;  %6749 = vtanh.f32 %v9356_v25  ;;  %v4503_v18 = vsel %vm4502_vm14, %v6746_v29, %v4499_v11  ;;  %v10989_v25 = vld [vmem:[#allocation212_spill] sm:$0xff] }
 0x674   :  { %v4508_v2 = vsel %vm4505_vm15, %v4507_v36, %v4503_v18 }
 0x677   :  { %v9359_v35 = vpop.f32.mrf.mxu2 }
 0x678   :  { %v4564_v14 = vpop.f32.mrf.mxu3  ;;  %v4527_v54 = vpop.f32.mrf.mxu0 }
 0x679   :  { %v4540_v17 = vpop.f32.mrf.mxu1  ;;  %v6750_v32 = vpop.eup %6749 }
 0x67a   :  { %v4514_v15 = vmul.f32 %v6750_v32, %v4508_v2 }
 0x67c   :  { %v9361_v8 = vpack.c.bf16 %v4514_v15, %v4514_v15 }
 0x67e   :  { %4697 = vmatmul.bf16.vlgmr.msrb.gmra.mxu0 %v9361_v8  ;;  %4710 = vmatmul.bf16.vlgmr.msrb.gmra.mxu1 %v9361_v8 }
 0x67f   :  { %v4553_v50 = vpop.f32.mrf.mxu2  ;;  %4723 = vmatmul.bf16.vlgmr.msrb.gmra.mxu2 %v9361_v8  ;;  %4736 = vmatmul.bf16.vlgmr.msrb.gmra.mxu3 %v9361_v8 }
 0x680   :  { %v4566_v41 = vpop.f32.mrf.mxu3  ;;  %4861 = vmatpush.bf16.msrb.mxu0 %v10279_v42  ;;  %4874 = vmatpush.bf16.msrb.mxu1 %v10280_v10 }
 0x681   :  { %v4577_v22 = vpop.f32.mrf.mxu0  ;;  %v4590_v29 = vpop.f32.mrf.mxu1  ;;  %4887 = vmatpush.bf16.msrb.mxu2 %v10281_v0  ;;  %4900 = vmatpush.bf16.msrb.mxu3 %v10282_v27 }
 0x682   :  { %v4578_v57 = vadd.f32 %v4577_v22, %v4525_v3  ;;  %v4591_v52 = vadd.f32 %v4590_v29, %v4538_v16 }
 0x684   :  { %v4620_v38 = vadd.f32 %v4578_v57, %v8168_v21  ;;  %v4621_v31 = vadd.f32 %v4591_v52, %v8170_v48  ;;  %4862 = vmatpush.bf16.msrb.mxu0 %v10284_v4  ;;  %4875 = vmatpush.bf16.msrb.mxu1 %v10285_v30  ;;  %v10958_v57 = vld [vmem:[#allocation175_spill] sm:$0xff]  ;;  %v10959_v52 = vld [vmem:[#allocation176_spill] sm:$0xff]  ;;  %v10978_v48 = vld [vmem:[#allocation201_spill] sm:$0xff] }
 0x685   :  { %4888 = vmatpush.bf16.msrb.mxu2 %v10421_v40  ;;  %4901 = vmatpush.bf16.msrb.mxu3 %v10422_v33  ;;  %v10988_v21 = vld [vmem:[#allocation211_spill] sm:$0xff] }
 0x686   :  { %v6169_v24 = vmul.f32 -1.442695, %v4620_v38  ;;  %v6170_v43 = vmul.f32 -1.442695, %v4621_v31 }
 0x688   :  { %6751 = vpow2.f32 %v6169_v24  ;;  %v4603_v60 = vpop.f32.mrf.mxu2  ;;  %v4616_v3 = vpop.f32.mrf.mxu3  ;;  %4863 = vmatpush.bf16.msrb.mxu0 %v10424_v56  ;;  %4876 = vmatpush.bf16.msrb.mxu1 %v10425_v62 }
 0x689   :  { %6753 = vpow2.f32 %v6170_v43  ;;  %v4617_v16 = vadd.f32 %v4616_v3, %v4564_v14  ;;  %v4579_v11 = vpop.f32.mrf.mxu0  ;;  %v4592_v20 = vpop.f32.mrf.mxu1  ;;  %4889 = vmatpush.bf16.msrb.mxu2 %v10426_v26  ;;  %4902 = vmatpush.bf16.msrb.mxu3 %v10559_v49  ;;  %v4687_v14 = vpack.c.bf16 %v9297_v37, %v9297_v37  ;;  %v4604_v37 = vadd.f32 %v4603_v60, %v9359_v35  ;;  %v10960_v43 = vld [vmem:[#allocation177_spill] sm:$0xff]  ;;  %v10961_v60 = vld [vmem:[#allocation178_spill] sm:$0xff] }
 0x68a   :  { %v10962_v11 = vld [vmem:[#allocation179_spill] sm:$0xff]  ;;  %v10963_v20 = vld [vmem:[#allocation180_spill] sm:$0xff] }
 0x68b   :  { %v4623_v23 = vadd.f32 %v4617_v16, %v10423_v28  ;;  %v4622_v29 = vadd.f32 %v4604_v37, %v10846_v13  ;;  %v10976_v13 = vld [vmem:[#allocation199_spill] sm:$0xff]  ;;  %v10977_v28 = vld [vmem:[#allocation200_spill] sm:$0xff] }
 0x68c   :  { %4864 = vmatpush.bf16.msrb.mxu0 %v10560_v58  ;;  %4877 = vmatpush.bf16.msrb.mxu1 %v10561_v44 }
 0x68d   :  { %v6171_v18 = vmul.f32 -1.442695, %v4623_v23  ;;  %4890 = vmatpush.bf16.msrb.mxu2 %v10562_v47  ;;  %4903 = vmatpush.bf16.msrb.mxu3 %v10563_v39 }
 0x68e   :  { %v6752_v36 = vpop.eup %6751  ;;  %4749 = vmatmul.bf16.vlgmr.msra.gmra.mxu0 %v4687_v14  ;;  %4762 = vmatmul.bf16.vlgmr.msra.gmra.mxu1 %v4687_v14 }
 0x68f   :  { %v6754_v54 = vpop.eup %6753  ;;  %v4627_v17 = vadd.f32 1.0, %v6752_v36  ;;  %6755 = vpow2.f32 %v6171_v18  ;;  %4775 = vmatmul.bf16.vlgmr.msra.gmra.mxu2 %v4687_v14  ;;  %4788 = vmatmul.bf16.vlgmr.msra.gmra.mxu3 %v4687_v14 }
 0x690   :  { %v9388_v32 = vadd.f32 1.0, %v6754_v54  ;;  %v4605_v2 = vpop.f32.mrf.mxu2  ;;  %v4618_v15 = vpop.f32.mrf.mxu3  ;;  %4865 = vmatpush.bf16.msrb.mxu0 %v10564_v1  ;;  %4878 = vmatpush.bf16.msrb.mxu1 %v10565_v45 }
 0x691   :  { %6757 = vrcp.f32 %v4627_v17  ;;  %4891 = vmatpush.bf16.msrb.mxu2 %v10566_v59  ;;  %4904 = vmatpush.bf16.msrb.mxu3 %v10704_v61  ;;  %v4639_v16 = vand.u32 2147483648, %v4627_v17  ;;  %v4637_v36 = vand.u32 2147483647, %v4627_v17  ;;  %vm4633_vm2 = vweird.f32 %v4627_v17 }
 0x692   :  { %6759 = vrcp.f32 %v9388_v32  ;;  %v4658_v23 = vand.u32 2147483648, %v9388_v32  ;;  %v4656_v54 = vand.u32 2147483647, %v9388_v32  ;;  %vm4652_vm3 = vweird.f32 %v9388_v32 }
 0x693   :  { %v4640_v37 = vor.u32 1.1754944e-38, %v4639_v16  ;;  %vm4638_vm6 = vcmp.eq.f32.partialorder %v4637_v36, 8.507059e+37 }
 0x694   :  { %4866 = vmatpush.bf16.msrb.mxu0 %v10706_v46  ;;  %4879 = vmatpush.bf16.msrb.mxu1 %v10845_v55  ;;  %vm4657_vm7 = vcmp.eq.f32.partialorder %v4656_v54, 8.507059e+37 }
 0x695   :  { %v6756_v50 = vpop.eup %6755  ;;  %4892 = vmatpush.bf16.msrb.mxu2 %v10958_v57  ;;  %4905 = vmatpush.bf16.msrb.mxu3 %v10959_v52 }
 0x696   :  { %v9396_v41 = vadd.f32 1.0, %v6756_v50 }
 0x697   :  { %v6758_v22 = vpop.eup %6757 }
 0x698   :  { %v6760_v38 = vpop.eup %6759  ;;  %v4629_v35 = vmul.f32 %v6758_v22, %v4627_v17  ;;  %6761 = vrcp.f32 %v9396_v41  ;;  %4867 = vmatpush.bf16.msrb.mxu0 %v10960_v43  ;;  %4880 = vmatpush.bf16.msrb.mxu1 %v10961_v60  ;;  %vm4634_vm0 = vweird.f32 %v6758_v22  ;;  %vm4672_vm9 = vweird.f32 %v9396_v41 }
 0x699   :  { %v4648_v31 = vmul.f32 %v6760_v38, %v9388_v32  ;;  %6763 = vtanh.f32 %v4622_v29  ;;  %4893 = vmatpush.bf16.msrb.mxu2 %v10962_v11  ;;  %4906 = vmatpush.bf16.msrb.mxu3 %v10963_v20  ;;  %vm4653_vm1 = vweird.f32 %v6760_v38  ;;  %vm4635_vm4 = vmor %vm4633_vm2, %vm4634_vm0 }
 0x69a   :  { %v4630_v24 = vsub.f32 1.0, %v4629_v35  ;;  %vm4654_vm5 = vmor %vm4652_vm3, %vm4653_vm1  ;;  %v4659_v35 = vor.u32 1.1754944e-38, %v4658_v23 }
 0x69b   :  { %v4649_v3 = vsub.f32 1.0, %v4648_v31 }
 0x69c   :  { %v4631_v18 = vmul.f32 %v6758_v22, %v4630_v24  ;;  %4868 = vmatpush.bf16.msrb.mxu0 %v10715_v5  ;;  %4881 = vmatpush.bf16.msrb.mxu1 %v7909_v63 }
 0x69d   :  { %v4650_v14 = vmul.f32 %v6760_v38, %v4649_v3  ;;  %4894 = vmatpush.bf16.msrb.mxu2 %v7913_v19  ;;  %4907 = vmatpush.bf16.msrb.mxu3 %v10307_v34 }
 0x69e   :  { %v6762_v2 = vpop.eup %6761  ;;  %v4632_v15 = vadd.f32 %v6758_v22, %v4631_v18 }
 0x69f   :  { %v4651_v50 = vadd.f32 %v6760_v38, %v4650_v14  ;;  %v4668_v29 = vmul.f32 %v6762_v2, %v9396_v41  ;;  %v6764_v17 = vpop.eup %6763  ;;  %vm4673_vm8 = vweird.f32 %v6762_v2 }
 0x6a0   :  { %v4636_v31 = vsel %vm4635_vm4, %v6758_v22, %v4632_v15  ;;  %4913 = vmatpush.bf16.msra.mxu0 %v10308_v6  ;;  %4926 = vmatpush.bf16.msra.mxu1 %v10309_v7  ;;  %v10964_v22 = vld [vmem:[#allocation188_spill] sm:$0xff]  ;;  %v10966_v15 = vld [vmem:[#allocation189_spill] sm:$0xff]  ;;  %vm4674_vm10 = vmor %vm4672_vm9, %vm4673_vm8 }
 0x6a1   :  { %v4641_v24 = vsel %vm4638_vm6, %v4640_v37, %v4636_v31  ;;  %v4655_v32 = vsel %vm4654_vm5, %v6760_v38, %v4651_v50  ;;  %v4669_v3 = vsub.f32 1.0, %v4668_v29  ;;  %4939 = vmatpush.bf16.msra.mxu2 %v10310_v12  ;;  %4952 = vmatpush.bf16.msra.mxu3 %v10443_v51  ;;  %v10967_v38 = vld [vmem:[#allocation190_spill] sm:$0xff]  ;;  %v4678_v37 = vand.u32 2147483648, %v9396_v41  ;;  %v10969_v50 = vld [vmem:[#allocation192_spill] sm:$0xff] }
 0x6a2   :  { %v4660_v16 = vsel %vm4657_vm7, %v4659_v35, %v4655_v32  ;;  %v4683_v18 = vmul.f32 %v6764_v17, %v4641_v24  ;;  %v4676_v29 = vand.u32 2147483647, %v9396_v41  ;;  %v10970_v35 = vld [vmem:[#allocation193_spill] sm:$0xff]  ;;  %v10971_v31 = vld [vmem:[#allocation194_spill] sm:$0xff]  ;;  %v10972_v32 = vld [vmem:[#allocation195_spill] sm:$0xff] }
 0x6a3   :  { %v4682_v14 = vmul.f32 %v4660_v16, %v9217_v53  ;;  %v4670_v23 = vmul.f32 %v6762_v2, %v4669_v3  ;;  %v10968_v53 = vld [vmem:[#allocation191_spill] sm:$0xff]  ;;  %v4679_v24 = vor.u32 1.1754944e-38, %v4678_v37  ;;  %v10973_v3 = vld [vmem:[#allocation196_spill] sm:$0xff] }
 0x6a4   :  { %4914 = vmatpush.bf16.msra.mxu0 %v10444_v9  ;;  %4927 = vmatpush.bf16.msra.mxu1 %v10964_v22  ;;  %vm4677_vm11 = vcmp.eq.f32.partialorder %v4676_v29, 8.507059e+37  ;;  %v10981_v37 = vld [vmem:[#allocation204_spill] sm:$0xff]  ;;  %v10982_v29 = vld [vmem:[#allocation205_spill] sm:$0xff] }
 0x6a5   :  { %v9424_v36 = vadd.f32 %v4683_v18, %v4682_v14  ;;  %4940 = vmatpush.bf16.msra.mxu2 %v10966_v15  ;;  %4953 = vmatpush.bf16.msra.mxu3 %v10967_v38  ;;  %v4671_v54 = vadd.f32 %v6762_v2, %v4670_v23  ;;  %v10974_v18 = vld [vmem:[#allocation197_spill] sm:$0xff]  ;;  %v10975_v14 = vld [vmem:[#allocation198_spill] sm:$0xff] }
 0x6a7   :  { %10965 = vst [vmem:[#allocation155_spill] sm:$0xff] %v9424_v36  ;;  %6765 = vtanh.f32 %v9424_v36  ;;  %v4675_v17 = vsel %vm4674_vm10, %v6762_v2, %v4671_v54  ;;  %v10979_v2 = vld [vmem:[#allocation202_spill] sm:$0xff]  ;;  %v10980_v54 = vld [vmem:[#allocation203_spill] sm:$0xff] }
 0x6a8   :  { %4915 = vmatpush.bf16.msra.mxu0 %v10968_v53  ;;  %4928 = vmatpush.bf16.msra.mxu1 %v10969_v50  ;;  %v4680_v23 = vsel %vm4677_vm11, %v4679_v24, %v4675_v17  ;;  %v10983_v17 = vld [vmem:[#allocation206_spill] sm:$0xff]  ;;  %v10985_v24 = vld [vmem:[#allocation208_spill] sm:$0xff] }
 0x6a9   :  { %4941 = vmatpush.bf16.msra.mxu2 %v10970_v35  ;;  %4954 = vmatpush.bf16.msra.mxu3 %v10971_v31 }
 0x6ac   :  { %4916 = vmatpush.bf16.msra.mxu0 %v10972_v32  ;;  %4929 = vmatpush.bf16.msra.mxu1 %v10973_v3 }
 0x6ad   :  { %v6766_v16 = vpop.eup %6765  ;;  %4942 = vmatpush.bf16.msra.mxu2 %v10974_v18  ;;  %4955 = vmatpush.bf16.msra.mxu3 %v10975_v14 }
 0x6ae   :  { %v4686_v36 = vmul.f32 %v6766_v16, %v4680_v23  ;;  %v10986_v16 = vld [vmem:[#allocation209_spill] sm:$0xff]  ;;  %v10987_v23 = vld [vmem:[#allocation210_spill] sm:$0xff] }
 0x6b0   :  { %v4860_v41 = vpack.c.bf16 %v4686_v36, %v4686_v36  ;;  %4917 = vmatpush.bf16.msra.mxu0 %v10976_v13  ;;  %4930 = vmatpush.bf16.msra.mxu1 %v10977_v28  ;;  %v10984_v36 = vld [vmem:[#allocation207_spill] sm:$0xff] }
 0x6b1   :  { %4943 = vmatpush.bf16.msra.mxu2 %v10978_v48  ;;  %4956 = vmatpush.bf16.msra.mxu3 %v10979_v2 }
 0x6b2   :  { %4869 = vmatmul.bf16.vlgmr.msrb.gmra.mxu0 %v4860_v41  ;;  %4882 = vmatmul.bf16.vlgmr.msrb.gmra.mxu1 %v4860_v41 }
 0x6b3   :  { %4895 = vmatmul.bf16.vlgmr.msrb.gmra.mxu2 %v4860_v41  ;;  %4908 = vmatmul.bf16.vlgmr.msrb.gmra.mxu3 %v4860_v41  ;;  %v10990_v41 = vld [vmem:[#allocation213_spill] sm:$0xff] }
 0x6b4   :  { %4918 = vmatpush.bf16.msra.mxu0 %v10980_v54  ;;  %4931 = vmatpush.bf16.msra.mxu1 %v10981_v37  ;;  %v10991_v54 = vld [vmem:[#allocation214_spill] sm:$0xff] }
 0x6b5   :  { %4944 = vmatpush.bf16.msra.mxu2 %v10982_v29  ;;  %4957 = vmatpush.bf16.msra.mxu3 %v10983_v17 }
 0x6b8   :  { %4919 = vmatpush.bf16.msra.mxu0 %v10984_v36  ;;  %4932 = vmatpush.bf16.msra.mxu1 %v10985_v24 }
 0x6b9   :  { %4945 = vmatpush.bf16.msra.mxu2 %v10986_v16  ;;  %4958 = vmatpush.bf16.msra.mxu3 %v10987_v23 }
 0x6bc   :  { %4920 = vmatpush.bf16.msra.mxu0 %v10988_v21  ;;  %4933 = vmatpush.bf16.msra.mxu1 %v10989_v25 }
 0x6bd   :  { %4946 = vmatpush.bf16.msra.mxu2 %v10990_v41  ;;  %4959 = vmatpush.bf16.msra.mxu3 %v10991_v54 }
 0x6c0   :  { %5034 = vmatpush.bf16.msrb.mxu0 %v10279_v42  ;;  %5047 = vmatpush.bf16.msrb.mxu1 %v10280_v10 }
 0x6c1   :  { %5060 = vmatpush.bf16.msrb.mxu2 %v10281_v0  ;;  %5073 = vmatpush.bf16.msrb.mxu3 %v10282_v27 }
 0x6c2   :  { %4921 = vmatmul.bf16.vlgmr.msra.gmra.mxu0 %v9361_v8  ;;  %4934 = vmatmul.bf16.vlgmr.msra.gmra.mxu1 %v9361_v8 }
 0x6c3   :  { %4947 = vmatmul.bf16.vlgmr.msra.gmra.mxu2 %v9361_v8  ;;  %4960 = vmatmul.bf16.vlgmr.msra.gmra.mxu3 %v9361_v8 }
 0x6c4   :  { %5035 = vmatpush.bf16.msrb.mxu0 %v10284_v4  ;;  %5048 = vmatpush.bf16.msrb.mxu1 %v10285_v30 }
 0x6c5   :  { %5061 = vmatpush.bf16.msrb.mxu2 %v10421_v40  ;;  %5074 = vmatpush.bf16.msrb.mxu3 %v10422_v33  ;;  %v10993_v40 = vld [vmem:[#allocation56_spill] sm:$0xff]  ;;  %v10994_v33 = vld [vmem:[#allocation57_spill] sm:$0xff] }
 0x6c8   :  { %5036 = vmatpush.bf16.msrb.mxu0 %v10424_v56  ;;  %5049 = vmatpush.bf16.msrb.mxu1 %v10425_v62 }
 0x6c9   :  { %5062 = vmatpush.bf16.msrb.mxu2 %v10426_v26  ;;  %5075 = vmatpush.bf16.msrb.mxu3 %v10559_v49 }
 0x6cc   :  { %5037 = vmatpush.bf16.msrb.mxu0 %v10560_v58  ;;  %5050 = vmatpush.bf16.msrb.mxu1 %v10561_v44  ;;  %v10995_v44 = vld [vmem:[#allocation61_spill] sm:$0xff] }
 0x6cd   :  { %5063 = vmatpush.bf16.msrb.mxu2 %v10562_v47  ;;  %5076 = vmatpush.bf16.msrb.mxu3 %v10563_v39 }
 0x6d0   :  { %5038 = vmatpush.bf16.msrb.mxu0 %v10564_v1  ;;  %5051 = vmatpush.bf16.msrb.mxu1 %v10565_v45 }
 0x6d1   :  { %5064 = vmatpush.bf16.msrb.mxu2 %v10566_v59  ;;  %5077 = vmatpush.bf16.msrb.mxu3 %v10704_v61 }
 0x6d4   :  { %5039 = vmatpush.bf16.msrb.mxu0 %v10706_v46  ;;  %5052 = vmatpush.bf16.msrb.mxu1 %v10845_v55 }
 0x6d5   :  { %5065 = vmatpush.bf16.msrb.mxu2 %v10958_v57  ;;  %5078 = vmatpush.bf16.msrb.mxu3 %v10959_v52  ;;  %v10996_v57 = vld [vmem:[#allocation59_spill] sm:$0xff] }
 0x6d8   :  { %5040 = vmatpush.bf16.msrb.mxu0 %v10960_v43  ;;  %5053 = vmatpush.bf16.msrb.mxu1 %v10961_v60 }
 0x6d9   :  { %5066 = vmatpush.bf16.msrb.mxu2 %v10962_v11  ;;  %5079 = vmatpush.bf16.msrb.mxu3 %v10963_v20 }
 0x6dc   :  { %5041 = vmatpush.bf16.msrb.mxu0 %v10715_v5  ;;  %5054 = vmatpush.bf16.msrb.mxu1 %v7909_v63  ;;  %v10992_v63 = vld [vmem:[#allocation203_spill] sm:$0xff] }
 0x6dd   :  { %5067 = vmatpush.bf16.msrb.mxu2 %v7913_v19  ;;  %5080 = vmatpush.bf16.msrb.mxu3 %v10307_v34 }
 0x6e0   :  { %5086 = vmatpush.bf16.msra.mxu0 %v10308_v6  ;;  %5099 = vmatpush.bf16.msra.mxu1 %v10309_v7 }
 0x6e1   :  { %5112 = vmatpush.bf16.msra.mxu2 %v10310_v12  ;;  %5125 = vmatpush.bf16.msra.mxu3 %v10443_v51 }
 0x6e4   :  { %5087 = vmatpush.bf16.msra.mxu0 %v10444_v9  ;;  %5100 = vmatpush.bf16.msra.mxu1 %v10964_v22 }
 0x6e5   :  { %5113 = vmatpush.bf16.msra.mxu2 %v10966_v15  ;;  %5126 = vmatpush.bf16.msra.mxu3 %v10967_v38 }
 0x6e8   :  { %5088 = vmatpush.bf16.msra.mxu0 %v10968_v53  ;;  %5101 = vmatpush.bf16.msra.mxu1 %v10969_v50 }
 0x6e9   :  { %5114 = vmatpush.bf16.msra.mxu2 %v10970_v35  ;;  %5127 = vmatpush.bf16.msra.mxu3 %v10971_v31 }
 0x6ec   :  { %5089 = vmatpush.bf16.msra.mxu0 %v10972_v32  ;;  %5102 = vmatpush.bf16.msra.mxu1 %v10973_v3 }
 0x6ed   :  { %5115 = vmatpush.bf16.msra.mxu2 %v10974_v18  ;;  %5128 = vmatpush.bf16.msra.mxu3 %v10975_v14 }
 0x6f0   :  { %5090 = vmatpush.bf16.msra.mxu0 %v10976_v13  ;;  %5103 = vmatpush.bf16.msra.mxu1 %v10977_v28 }
 0x6f1   :  { %5116 = vmatpush.bf16.msra.mxu2 %v10978_v48  ;;  %5129 = vmatpush.bf16.msra.mxu3 %v10979_v2 }
 0x6f4   :  { %5091 = vmatpush.bf16.msra.mxu0 %v10992_v63  ;;  %5104 = vmatpush.bf16.msra.mxu1 %v10981_v37 }
 0x6f5   :  { %5117 = vmatpush.bf16.msra.mxu2 %v10982_v29  ;;  %5130 = vmatpush.bf16.msra.mxu3 %v10983_v17 }
 0x6f8   :  { %5092 = vmatpush.bf16.msra.mxu0 %v10984_v36  ;;  %5105 = vmatpush.bf16.msra.mxu1 %v10985_v24 }
 0x6f9   :  { %5118 = vmatpush.bf16.msra.mxu2 %v10986_v16  ;;  %5131 = vmatpush.bf16.msra.mxu3 %v10987_v23 }
 0x6fb   :  { %v4698_v19 = vpop.f32.mrf.mxu0  ;;  %v4711_v48 = vpop.f32.mrf.mxu1 }
 0x6fc   :  { %5093 = vmatpush.bf16.msra.mxu0 %v10988_v21  ;;  %5106 = vmatpush.bf16.msra.mxu1 %v10989_v25 }
 0x6fd   :  { %5119 = vmatpush.bf16.msra.mxu2 %v10990_v41  ;;  %5132 = vmatpush.bf16.msra.mxu3 %v10991_v54  ;;  %v10997_v41 = vld [vmem:[#allocation154_spill] sm:$0xff] }
 0x702   :  { %v4724_v42 = vpop.f32.mrf.mxu2  ;;  %v4737_v10 = vpop.f32.mrf.mxu3 }
 0x703   :  { %v4700_v0 = vpop.f32.mrf.mxu0  ;;  %v4713_v27 = vpop.f32.mrf.mxu1 }
 0x70a   :  { %v4726_v4 = vpop.f32.mrf.mxu2  ;;  %v4739_v30 = vpop.f32.mrf.mxu3 }
 0x70b   :  { %v4750_v34 = vpop.f32.mrf.mxu0  ;;  %v4763_v6 = vpop.f32.mrf.mxu1 }
 0x70c   :  { %v4751_v7 = vadd.f32 %v4750_v34, %v4698_v19  ;;  %v4764_v12 = vadd.f32 %v4763_v6, %v4711_v48 }
 0x70e   :  { %v4793_v21 = vadd.f32 %v4751_v7, %v10993_v40  ;;  %v4794_v28 = vadd.f32 %v4764_v12, %v10994_v33 }
 0x710   :  { %v6172_v56 = vmul.f32 -1.442695, %v4793_v21  ;;  %v6173_v62 = vmul.f32 -1.442695, %v4794_v28 }
 0x712   :  { %6767 = vpow2.f32 %v6172_v56  ;;  %v4776_v26 = vpop.f32.mrf.mxu2  ;;  %v4789_v51 = vpop.f32.mrf.mxu3 }
 0x713   :  { %6769 = vpow2.f32 %v6173_v62  ;;  %v4777_v9 = vadd.f32 %v4776_v26, %v4724_v42  ;;  %v4790_v25 = vadd.f32 %v4789_v51, %v4737_v10  ;;  %v4752_v49 = vpop.f32.mrf.mxu0  ;;  %v4765_v58 = vpop.f32.mrf.mxu1 }
 0x714   :  { %v10998_v49 = vld [vmem:[#allocation62_spill] sm:$0xff] }
 0x715   :  { %v4796_v47 = vadd.f32 %v4790_v25, %v10995_v44  ;;  %v4795_v52 = vadd.f32 %v4777_v9, %v10996_v57  ;;  %v10999_v44 = vld [vmem:[#allocation63_spill] sm:$0xff] }
 0x717   :  { %v6174_v39 = vmul.f32 -1.442695, %v4796_v47 }
 0x718   :  { %v6768_v1 = vpop.eup %6767 }
 0x719   :  { %v6770_v45 = vpop.eup %6769  ;;  %v4800_v59 = vadd.f32 1.0, %v6768_v1  ;;  %6771 = vpow2.f32 %v6174_v39 }
 0x71a   :  { %v4819_v61 = vadd.f32 1.0, %v6770_v45  ;;  %v4778_v46 = vpop.f32.mrf.mxu2  ;;  %v4791_v5 = vpop.f32.mrf.mxu3 }
 0x71b   :  { %6773 = vrcp.f32 %v4800_v59  ;;  %v4812_v15 = vand.u32 2147483648, %v4800_v59  ;;  %v4810_v50 = vand.u32 2147483647, %v4800_v59  ;;  %vm4806_vm14 = vweird.f32 %v4800_v59 }
 0x71c   :  { %6775 = vrcp.f32 %v4819_v61  ;;  %v4831_v38 = vand.u32 2147483648, %v4819_v61  ;;  %v4829_v31 = vand.u32 2147483647, %v4819_v61  ;;  %vm4825_vm15 = vweird.f32 %v4819_v61 }
 0x71d   :  { %v4813_v18 = vor.u32 1.1754944e-38, %v4812_v15  ;;  %vm4811_vm2 = vcmp.eq.f32.partialorder %v4810_v50, 8.507059e+37  ;;  %v11001_v50 = vld [vmem:[#allocation66_spill] sm:$0xff] }
 0x71e   :  { %v4832_v54 = vor.u32 1.1754944e-38, %v4831_v38  ;;  %vm4830_vm3 = vcmp.eq.f32.partialorder %v4829_v31, 8.507059e+37 }
 0x71f   :  { %v6772_v55 = vpop.eup %6771 }
 0x720   :  { %v4839_v13 = vadd.f32 1.0, %v6772_v55  ;;  %v11000_v55 = vld [vmem:[#allocation68_spill] sm:$0xff] }
 0x721   :  { %v6774_v8 = vpop.eup %6773 }
 0x722   :  { %v6776_v43 = vpop.eup %6775  ;;  %v4802_v60 = vmul.f32 %v6774_v8, %v4800_v59  ;;  %6777 = vrcp.f32 %v4839_v13  ;;  %vm4807_vm12 = vweird.f32 %v6774_v8  ;;  %v4851_v27 = vand.u32 2147483648, %v4839_v13 }
 0x723   :  { %v4821_v11 = vmul.f32 %v6776_v43, %v4819_v61  ;;  %6779 = vtanh.f32 %v4795_v52  ;;  %vm4826_vm13 = vweird.f32 %v6776_v43  ;;  %vm4808_vm0 = vmor %vm4806_vm14, %vm4807_vm12  ;;  %vm4845_vm5 = vweird.f32 %v4839_v13 }
 0x724   :  { %v4803_v20 = vsub.f32 1.0, %v4802_v60  ;;  %vm4827_vm1 = vmor %vm4825_vm15, %vm4826_vm13  ;;  %v4849_v4 = vand.u32 2147483647, %v4839_v13  ;;  %v4852_v40 = vor.u32 1.1754944e-38, %v4851_v27 }
 0x725   :  { %v4822_v22 = vsub.f32 1.0, %v4821_v11 }
 0x726   :  { %v4804_v53 = vmul.f32 %v6774_v8, %v4803_v20  ;;  %vm4850_vm7 = vcmp.eq.f32.partialorder %v4849_v4, 8.507059e+37 }
 0x727   :  { %v4823_v35 = vmul.f32 %v6776_v43, %v4822_v22 }
 0x728   :  { %v6778_v32 = vpop.eup %6777  ;;  %v4805_v3 = vadd.f32 %v6774_v8, %v4804_v53 }
 0x729   :  { %v4824_v14 = vadd.f32 %v6776_v43, %v4823_v35  ;;  %v4841_v2 = vmul.f32 %v6778_v32, %v4839_v13  ;;  %v6780_v29 = vpop.eup %6779  ;;  %vm4846_vm4 = vweird.f32 %v6778_v32 }
 0x72a   :  { %v4809_v37 = vsel %vm4808_vm0, %v6774_v8, %v4805_v3  ;;  %vm4847_vm6 = vmor %vm4845_vm5, %vm4846_vm4 }
 0x72b   :  { %v4814_v17 = vsel %vm4811_vm2, %v4813_v18, %v4809_v37  ;;  %v4828_v36 = vsel %vm4827_vm1, %v6776_v43, %v4824_v14  ;;  %v4842_v24 = vsub.f32 1.0, %v4841_v2 }
 0x72c   :  { %v4833_v16 = vsel %vm4830_vm3, %v4832_v54, %v4828_v36  ;;  %v4856_v23 = vmul.f32 %v6780_v29, %v4814_v17 }
 0x72d   :  { %v4855_v63 = vmul.f32 %v4833_v16, %v10997_v41  ;;  %v4843_v19 = vmul.f32 %v6778_v32, %v4842_v24 }
 0x72f   :  { %v4870_v48 = vpop.f32.mrf.mxu0  ;;  %v4883_v42 = vpop.f32.mrf.mxu1  ;;  %v4857_v10 = vadd.f32 %v4856_v23, %v4855_v63  ;;  %v4844_v0 = vadd.f32 %v6778_v32, %v4843_v19 }
 0x731   :  { %6781 = vtanh.f32 %v4857_v10  ;;  %v4848_v6 = vsel %vm4847_vm6, %v6778_v32, %v4844_v0 }
 0x732   :  { %v4853_v33 = vsel %vm4850_vm7, %v4852_v40, %v4848_v6 }
 0x736   :  { %v4896_v30 = vpop.f32.mrf.mxu2  ;;  %v4909_v34 = vpop.f32.mrf.mxu3 }
 0x737   :  { %v4872_v7 = vpop.f32.mrf.mxu0  ;;  %v4885_v12 = vpop.f32.mrf.mxu1 }
 0x738   :  { %v6782_v21 = vpop.eup %6781 }
 0x739   :  { %v9529_v28 = vmul.f32 %v6782_v21, %v4853_v33 }
 0x73e   :  { %v4898_v56 = vpop.f32.mrf.mxu2  ;;  %v4911_v62 = vpop.f32.mrf.mxu3 }
 0x73f   :  { %v4922_v26 = vpop.f32.mrf.mxu0  ;;  %v4935_v51 = vpop.f32.mrf.mxu1 }
 0x740   :  { %v4923_v9 = vadd.f32 %v4922_v26, %v4870_v48  ;;  %v4936_v25 = vadd.f32 %v4935_v51, %v4883_v42 }
 0x742   :  { %v4965_v58 = vadd.f32 %v4923_v9, %v10998_v49  ;;  %v4966_v47 = vadd.f32 %v4936_v25, %v10999_v44 }
 0x744   :  { %v6175_v39 = vmul.f32 -1.442695, %v4965_v58  ;;  %v6176_v1 = vmul.f32 -1.442695, %v4966_v47  ;;  %v5032_v58 = vpack.c.bf16 %v9529_v28, %v9529_v28 }
 0x746   :  { %6783 = vpow2.f32 %v6175_v39  ;;  %v4948_v45 = vpop.f32.mrf.mxu2  ;;  %v4961_v59 = vpop.f32.mrf.mxu3 }
 0x747   :  { %6785 = vpow2.f32 %v6176_v1  ;;  %v4962_v61 = vadd.f32 %v4961_v59, %v4909_v34  ;;  %v4924_v46 = vpop.f32.mrf.mxu0  ;;  %v4937_v5 = vpop.f32.mrf.mxu1  ;;  %v4949_v22 = vadd.f32 %v4948_v45, %v4896_v30  ;;  %v11002_v34 = vld [vmem:[#allocation155_spill] sm:$0xff]  ;;  %v6412_v1 = vld [vmem:[#allocation16 + $0x38] sm:$0xff]  ;;  %v6411_v45 = vld [vmem:[#allocation16 + $0x30] sm:$0xff] }
 0x749   :  { %v4968_v13 = vadd.f32 %v4962_v61, %v11000_v55  ;;  %v4967_v35 = vadd.f32 %v4949_v22, %v11001_v50 }
 0x74b   :  { %v6177_v8 = vmul.f32 -1.442695, %v4968_v13  ;;  %v6410_v13 = vld [vmem:[#allocation16 + $0x28] sm:$0xff] }
 0x74c   :  { %v6784_v57 = vpop.eup %6783 }
 0x74d   :  { %v6786_v52 = vpop.eup %6785  ;;  %v4972_v43 = vadd.f32 1.0, %v6784_v57  ;;  %6787 = vpow2.f32 %v6177_v8  ;;  %v6409_v8 = vld [vmem:[#allocation16 + $0x20] sm:$0xff] }
 0x74e   :  { %v4991_v60 = vadd.f32 1.0, %v6786_v52  ;;  %v4950_v11 = vpop.f32.mrf.mxu2  ;;  %v4963_v20 = vpop.f32.mrf.mxu3 }
 0x74f   :  { %6789 = vrcp.f32 %v4972_v43  ;;  %v4984_v2 = vand.u32 2147483648, %v4972_v43  ;;  %v4982_v29 = vand.u32 2147483647, %v4972_v43  ;;  %vm4978_vm10 = vweird.f32 %v4972_v43  ;;  %v6408_v20 = vld [vmem:[#allocation16 + $0x18] sm:$0xff] }
 0x750   :  { %6791 = vrcp.f32 %v4991_v60  ;;  %v5003_v54 = vand.u32 2147483648, %v4991_v60  ;;  %v5001_v36 = vand.u32 2147483647, %v4991_v60  ;;  %vm4997_vm11 = vweird.f32 %v4991_v60 }
 0x751   :  { %v4985_v23 = vor.u32 1.1754944e-38, %v4984_v2  ;;  %vm4983_vm14 = vcmp.eq.f32.partialorder %v4982_v29, 8.507059e+37 }
 0x752   :  { %v5004_v19 = vor.u32 1.1754944e-38, %v5003_v54  ;;  %vm5002_vm15 = vcmp.eq.f32.partialorder %v5001_v36, 8.507059e+37 }
 0x753   :  { %v6788_v15 = vpop.eup %6787 }
 0x754   :  { %v5011_v38 = vadd.f32 1.0, %v6788_v15 }
 0x755   :  { %v6790_v53 = vpop.eup %6789 }
 0x756   :  { %v6792_v31 = vpop.eup %6791  ;;  %v4974_v32 = vmul.f32 %v6790_v53, %v4972_v43  ;;  %6793 = vrcp.f32 %v5011_v38  ;;  %vm4979_vm8 = vweird.f32 %v6790_v53  ;;  %v5023_v21 = vand.u32 2147483648, %v5011_v38 }
 0x757   :  { %v4993_v3 = vmul.f32 %v6792_v31, %v4991_v60  ;;  %6795 = vtanh.f32 %v4967_v35  ;;  %vm4998_vm9 = vweird.f32 %v6792_v31  ;;  %vm4980_vm12 = vmor %vm4978_vm10, %vm4979_vm8  ;;  %vm5017_vm1 = vweird.f32 %v5011_v38  ;;  %v6407_v35 = vld [vmem:[#allocation16 + $0x10] sm:$0xff] }
 0x758   :  { %v4975_v18 = vsub.f32 1.0, %v4974_v32  ;;  %vm4999_vm13 = vmor %vm4997_vm11, %vm4998_vm9  ;;  %v5021_v33 = vand.u32 2147483647, %v5011_v38  ;;  %v5024_v62 = vor.u32 1.1754944e-38, %v5023_v21 }
 0x759   :  { %v4994_v14 = vsub.f32 1.0, %v4993_v3  ;;  %v6406_v3 = vld [vmem:[#allocation16 + $0x8] sm:$0xff] }
 0x75a   :  { %v4976_v37 = vmul.f32 %v6790_v53, %v4975_v18  ;;  %vm5022_vm3 = vcmp.eq.f32.partialorder %v5021_v33, 8.507059e+37 }
 0x75b   :  { %v4995_v17 = vmul.f32 %v6792_v31, %v4994_v14 }
 0x75c   :  { %v6794_v24 = vpop.eup %6793  ;;  %v4977_v16 = vadd.f32 %v6790_v53, %v4976_v37  ;;  %v6405_v37 = vld [vmem:[#allocation16] sm:$0xff] }
 0x75d   :  { %v4996_v41 = vadd.f32 %v6792_v31, %v4995_v17  ;;  %v5013_v63 = vmul.f32 %v6794_v24, %v5011_v38  ;;  %v6796_v42 = vpop.eup %6795  ;;  %vm5018_vm0 = vweird.f32 %v6794_v24 }
 0x75e   :  { %v4981_v48 = vsel %vm4980_vm12, %v6790_v53, %v4977_v16  ;;  %vm5019_vm2 = vmor %vm5017_vm1, %vm5018_vm0 }
 0x75f   :  { %v4986_v10 = vsel %vm4983_vm14, %v4985_v23, %v4981_v48  ;;  %v5000_v0 = vsel %vm4999_vm13, %v6792_v31, %v4996_v41  ;;  %v5014_v27 = vsub.f32 1.0, %v5013_v63 }
 0x760   :  { %v5005_v4 = vsel %vm5002_vm15, %v5004_v19, %v5000_v0  ;;  %v5028_v30 = vmul.f32 %v6796_v42, %v4986_v10 }
 0x761   :  { %v5027_v6 = vmul.f32 %v5005_v4, %v11002_v34  ;;  %v5015_v7 = vmul.f32 %v6794_v24, %v5014_v27 }
 0x763   :  { %v9536_v12 = vadd.f32 %v5028_v30, %v5027_v6  ;;  %v5016_v40 = vadd.f32 %v6794_v24, %v5015_v7 }
 0x765   :  { %6797 = vtanh.f32 %v9536_v12  ;;  %v5020_v56 = vsel %vm5019_vm2, %v6794_v24, %v5016_v40 }
 0x766   :  { %v5025_v51 = vsel %vm5022_vm3, %v5024_v62, %v5020_v56 }
 0x76b   :  { %v6798_v26 = vpop.eup %6797 }
 0x76c   :  { %v5031_v9 = vmul.f32 %v6798_v26, %v5025_v51 }
 0x76e   :  { %v5033_v25 = vpack.c.bf16 %v5031_v9, %v5031_v9 }
 0x770   :  { %5042 = vmatmul.bf16.vlgmr.msrb.gmra.mxu0 %v5033_v25  ;;  %5055 = vmatmul.bf16.vlgmr.msrb.gmra.mxu1 %v5033_v25 }
 0x771   :  { %5068 = vmatmul.bf16.vlgmr.msrb.gmra.mxu2 %v5033_v25  ;;  %5081 = vmatmul.bf16.vlgmr.msrb.gmra.mxu3 %v5033_v25 }
 0x772   :  { %5274 = vmatpush.bf16.msrb.mxu0 %v6412_v1 }
 0x776   :  { %5275 = vmatpush.bf16.msrb.mxu0 %v6411_v45 }
 0x77a   :  { %5276 = vmatpush.bf16.msrb.mxu0 %v6410_v13 }
 0x77e   :  { %5277 = vmatpush.bf16.msrb.mxu0 %v6409_v8 }
 0x780   :  { %5094 = vmatmul.bf16.vlgmr.msra.gmra.mxu0 %v5032_v58  ;;  %5107 = vmatmul.bf16.vlgmr.msra.gmra.mxu1 %v5032_v58 }
 0x781   :  { %5120 = vmatmul.bf16.vlgmr.msra.gmra.mxu2 %v5032_v58  ;;  %5133 = vmatmul.bf16.vlgmr.msra.gmra.mxu3 %v5032_v58 }
 0x782   :  { %5278 = vmatpush.bf16.msrb.mxu0 %v6408_v20  ;;  %v6818_v20 = vld [vmem:[#allocation2 + $0x30] sm:$0xff] }
 0x786   :  { %5279 = vmatpush.bf16.msrb.mxu0 %v6407_v35  ;;  %v6430_v35 = vld [vmem:[%s9563_s11] ss:$0 sm:$0xff]  ;;  %s7089_s11 = smov [#allocation17]  }
 0x787   :  { %s5325_s27 = sshll.u32 %s7089_s11, 4  ;;  %s5326_s27 = int_to_ptr.vmem [resolvable:$true] %s5325_s27 }
 0x78a   :  { %5280 = vmatpush.bf16.msrb.mxu0 %v6406_v3 }
 0x78e   :  { %5281 = vmatpush.bf16.msrb.mxu0 %v6405_v37  ;;  %v6820_v37 = vld [vmem:[#allocation2] sm:$0xff] }
 0x7ed   :  { %v5043_v47 = vpop.f32.mrf.mxu0  ;;  %v5056_v39 = vpop.f32.mrf.mxu1 }
 0x7f4   :  { %v5069_v59 = vpop.f32.mrf.mxu2  ;;  %v5082_v61 = vpop.f32.mrf.mxu3 }
 0x7f5   :  { %v5045_v46 = vpop.f32.mrf.mxu0  ;;  %v5058_v5 = vpop.f32.mrf.mxu1 }
 0x7fc   :  { %v5071_v57 = vpop.f32.mrf.mxu2  ;;  %v5084_v52 = vpop.f32.mrf.mxu3 }
 0x7fd   :  { %v5095_v28 = vpop.f32.mrf.mxu0  ;;  %v5108_v43 = vpop.f32.mrf.mxu1 }
 0x7fe   :  { %v5096_v60 = vadd.f32 %v5095_v28, %v5043_v47  ;;  %v5109_v11 = vadd.f32 %v5108_v43, %v5056_v39 }
 0x800   :  { %v5138_v22 = vadd.f32 %v5096_v60, %v10998_v49  ;;  %v5139_v15 = vadd.f32 %v5109_v11, %v10999_v44  ;;  %v6817_v11 = vld [vmem:[#allocation2 + $0x28] sm:$0xff] }
 0x802   :  { %v6178_v38 = vmul.f32 -1.442695, %v5138_v22  ;;  %v6179_v53 = vmul.f32 -1.442695, %v5139_v15  ;;  %v6819_v22 = vld [vmem:[#allocation2 + $0x38] sm:$0xff] }
 0x804   :  { %6799 = vpow2.f32 %v6178_v38  ;;  %v5121_v31 = vpop.f32.mrf.mxu2  ;;  %v5134_v32 = vpop.f32.mrf.mxu3 }
 0x805   :  { %6801 = vpow2.f32 %v6179_v53  ;;  %v5135_v18 = vadd.f32 %v5134_v32, %v5082_v61  ;;  %v5097_v14 = vpop.f32.mrf.mxu0  ;;  %v5110_v2 = vpop.f32.mrf.mxu1  ;;  %v5122_v23 = vadd.f32 %v5121_v31, %v5069_v59  ;;  %v5290_v53 = vsub.f32 %v6819_v22, %v6817_v11 }
 0x807   :  { %v5141_v54 = vadd.f32 %v5135_v18, %v11000_v55  ;;  %v5140_v48 = vadd.f32 %v5122_v23, %v11001_v50 }
 0x809   :  { %v6180_v49 = vmul.f32 -1.442695, %v5141_v54 }
 0x80a   :  { %v6800_v29 = vpop.eup %6799 }
 0x80b   :  { %v6802_v44 = vpop.eup %6801  ;;  %v5145_v17 = vadd.f32 1.0, %v6800_v29  ;;  %6803 = vpow2.f32 %v6180_v49 }
 0x80c   :  { %v5164_v36 = vadd.f32 1.0, %v6802_v44  ;;  %v5123_v24 = vpop.f32.mrf.mxu2  ;;  %v5136_v16 = vpop.f32.mrf.mxu3 }
 0x80d   :  { %6805 = vrcp.f32 %v5145_v17  ;;  %v5157_v4 = vand.u32 2147483648, %v5145_v17  ;;  %v5155_v6 = vand.u32 2147483647, %v5145_v17  ;;  %vm5151_vm6 = vweird.f32 %v5145_v17 }
 0x80e   :  { %6807 = vrcp.f32 %v5164_v36  ;;  %v5176_v30 = vand.u32 2147483648, %v5164_v36  ;;  %v5174_v40 = vand.u32 2147483647, %v5164_v36  ;;  %vm5170_vm7 = vweird.f32 %v5164_v36 }
 0x80f   :  { %v5158_v50 = vor.u32 1.1754944e-38, %v5157_v4  ;;  %vm5156_vm10 = vcmp.eq.f32.partialorder %v5155_v6, 8.507059e+37 }
 0x810   :  { %v5177_v26 = vor.u32 1.1754944e-38, %v5176_v30  ;;  %vm5175_vm11 = vcmp.eq.f32.partialorder %v5174_v40, 8.507059e+37 }
 0x811   :  { %v6804_v41 = vpop.eup %6803 }
 0x812   :  { %v5184_v63 = vadd.f32 1.0, %v6804_v41 }
 0x813   :  { %v6806_v19 = vpop.eup %6805 }
 0x814   :  { %v6808_v55 = vpop.eup %6807  ;;  %v5147_v42 = vmul.f32 %v6806_v19, %v5145_v17  ;;  %6809 = vrcp.f32 %v5184_v63  ;;  %vm5152_vm4 = vweird.f32 %v6806_v19  ;;  %v5196_v5 = vand.u32 2147483648, %v5184_v63 }
 0x815   :  { %v5166_v10 = vmul.f32 %v6808_v55, %v5164_v36  ;;  %6811 = vtanh.f32 %v5140_v48  ;;  %vm5171_vm5 = vweird.f32 %v6808_v55  ;;  %vm5153_vm8 = vmor %vm5151_vm6, %vm5152_vm4  ;;  %vm5190_vm13 = vweird.f32 %v5184_v63 }
 0x816   :  { %v5148_v0 = vsub.f32 1.0, %v5147_v42  ;;  %vm5172_vm9 = vmor %vm5170_vm7, %vm5171_vm5  ;;  %v5194_v13 = vand.u32 2147483647, %v5184_v63  ;;  %v5197_v57 = vor.u32 1.1754944e-38, %v5196_v5 }
 0x817   :  { %v5167_v27 = vsub.f32 1.0, %v5166_v10 }
 0x818   :  { %v5149_v34 = vmul.f32 %v6806_v19, %v5148_v0  ;;  %vm5195_vm15 = vcmp.eq.f32.partialorder %v5194_v13, 8.507059e+37 }
 0x819   :  { %v5168_v7 = vmul.f32 %v6808_v55, %v5167_v27 }
 0x81a   :  { %v6810_v21 = vpop.eup %6809  ;;  %v5150_v33 = vadd.f32 %v6806_v19, %v5149_v34 }
 0x81b   :  { %v5169_v56 = vadd.f32 %v6808_v55, %v5168_v7  ;;  %v5186_v62 = vmul.f32 %v6810_v21, %v5184_v63  ;;  %v6812_v9 = vpop.eup %6811  ;;  %vm5191_vm12 = vweird.f32 %v6810_v21 }
 0x81c   :  { %v5154_v51 = vsel %vm5153_vm8, %v6806_v19, %v5150_v33  ;;  %vm5192_vm14 = vmor %vm5190_vm13, %vm5191_vm12 }
 0x81d   :  { %v5159_v25 = vsel %vm5156_vm10, %v5158_v50, %v5154_v51  ;;  %v5173_v58 = vsel %vm5172_vm9, %v6808_v55, %v5169_v56  ;;  %v5187_v47 = vsub.f32 1.0, %v5186_v62 }
 0x81e   :  { %v5178_v39 = vsel %vm5175_vm11, %v5177_v26, %v5173_v58  ;;  %v5201_v1 = vmul.f32 %v6812_v9, %v5159_v25 }
 0x81f   :  { %v5200_v45 = vmul.f32 %v5178_v39, %v9536_v12  ;;  %v5188_v59 = vmul.f32 %v6810_v21, %v5187_v47  ;;  %v5287_v12 = vadd.f32 %v6818_v20, %v6817_v11 }
 0x821   :  { %v5202_v61 = vadd.f32 %v5201_v1, %v5200_v45  ;;  %v5189_v46 = vadd.f32 %v6810_v21, %v5188_v59  ;;  %v5288_v15 = vadd.f32 %v6819_v22, %v5287_v12 }
 0x823   :  { %6813 = vtanh.f32 %v5202_v61  ;;  %v5193_v8 = vsel %vm5192_vm14, %v6810_v21, %v5189_v46  ;;  %v5289_v38 = vmul.f32 0.33333334, %v5288_v15 }
 0x824   :  { %v5198_v28 = vsel %vm5195_vm15, %v5197_v57, %v5193_v8 }
 0x825   :  { %v5291_v31 = vadd.f32 %v5290_v53, %v5289_v38 }
 0x829   :  { %v6814_v52 = vpop.eup %6813 }
 0x82a   :  { %v5204_v43 = vmul.f32 %v6814_v52, %v5198_v28 }
 0x82c   :  { %v5205_v60 = vpack.c.bf16 %v5204_v43, %v5204_v43 }
 0x82e   :  { %5282 = vmatmul.bf16.vlgmr.msrb.gmra.mxu0 %v5205_v60 }
 0x8ab   :  { %v5283_v32 = vpop.f32.mrf.mxu0 }
 0x8ac   :  { %v5284_v3 = vadd.f32 %v6430_v35, %v5283_v32 }
 0x8ae   :  { %v5292_v18 = vadd.f32 %v5291_v31, %v5284_v3 }
 0x8b0   :  { %5298 = vadd.xlane.f32.xlu1 %v5292_v18  ;;  %v5293_v14 = vmul.f32 %v5292_v18, %v5292_v18 }
 0x8b2   :  { %v5294_v2 = vsub.f32 1.0, %v5293_v14 }
 0x8b3   :  { %v5285_v54 = vpop.f32.mrf.mxu0 }
 0x8b4   :  { %5295 = vadd.xlane.f32.xlu0 %v5294_v2 }
 0x8bc   :  { %189 = vadd.xlane.f32.xlu0 %v6820_v37 }
 0x923   :  { %v5299_v16 = vpop.xlane.xlu1 %5298 }
 0x924   :  { %v5300_v48 = vmul.f32 0.01, %v5299_v16 }
 0x927   :  { %v5296_v49 = vpop.xlane.xlu0 %5295 }
 0x928   :  { %v5297_v29 = vmul.f32 0.01, %v5296_v49 }
 0x92a   :  { %6815 = vrcp.f32 %v5297_v29  ;;  %v5313_v23 = vand.u32 2147483648, %v5297_v29  ;;  %v5311_v63 = vand.u32 2147483647, %v5297_v29  ;;  %vm5307_vm1 = vweird.f32 %v5297_v29 }
 0x92c   :  { %v5314_v42 = vor.u32 1.1754944e-38, %v5313_v23  ;;  %vm5312_vm3 = vcmp.eq.f32.partialorder %v5311_v63, 8.507059e+37 }
 0x92f   :  { %v190_v36 = vpop.xlane.xlu0 %189 }
 0x930   :  { %v6816_v44 = vpop.eup %6815  ;;  %v191_v19 = vmul.f32 0.01, %v190_v36 }
 0x931   :  { %v5303_v17 = vmul.f32 %v6816_v44, %v5297_v29  ;;  %vm5308_vm0 = vweird.f32 %v6816_v44 }
 0x932   :  { %vm5309_vm2 = vmor %vm5307_vm1, %vm5308_vm0  ;;  %v5301_v0 = vsub.f32 %v191_v19, %v5300_v48 }
 0x933   :  { %v5304_v24 = vsub.f32 1.0, %v5303_v17 }
 0x935   :  { %v5305_v41 = vmul.f32 %v6816_v44, %v5304_v24 }
 0x937   :  { %v5306_v55 = vadd.f32 %v6816_v44, %v5305_v41 }
 0x939   :  { %v5310_v10 = vsel %vm5309_vm2, %v6816_v44, %v5306_v55 }
 0x93a   :  { %v5315_v27 = vsel %vm5312_vm3, %v5314_v42, %v5310_v10 }
 0x93b   :  { %v5316_v4 = vmul.f32 %v5315_v27, %v5301_v0 }
 0x93d   :  { %v5317_v30 = vmul.f32 %v5316_v4, %v5294_v2 }
 0x93f   :  { %v5318_v34 = vadd.f32 %v5317_v30, %v5292_v18 }
 0x941   :  { %5319 = vst [vmem:[#allocation17] sm:$0xff] %v5318_v34 }
 0x942   :  { %5330 = dma.vmem_to_hbm [thread:$0]  %s5326_s27, 128, %s5328_s14, [#allocation4]  }
 0x943   :  { %7071 = dma.done.wait [#allocation4], 128  }
 0x944   :  { %7072 = vsyncadd [#allocation4], 4294967168 }
 0x945   :  { %5335 = vsyncpa [#allocation3], 1 }
 0x946   :  { %5336 = vsyncpa [#allocation6], 1 }
 0x947   :  { %5337 = vsyncpa [#allocation9], 1 }
 0x948   :  { %5338 = vsyncpa [#allocation12], 1 }
 0x949   :  { %5339 = vsyncpa [#allocation15], 1 }
 0x94a   :  { %5340 = vsyncpa [#allocation4], 1 }

</bundles_post_ra>
